<compile_context>
chip_gen: v7x
topology: tpu7x:2x2x1
jax: 0.10.0
libtpu: 0.0.40
codegen_flags: <defaults>
</compile_context>

<pallas_src>
import functools

import jax
import jax.numpy as jnp
from jax.experimental import pallas as pl
from jax.experimental.pallas import tpu as pltpu

EPS = 1e-5  # nn.InstanceNorm2d default


# ----------------------------------------------------------------------------
# in-kernel helpers (fp32, VMEM values)
# ----------------------------------------------------------------------------
def _instance_norm(y, inv_npix, eps):
    """InstanceNorm (affine=False) over flattened spatial axis 0.  y: (hw, C)."""
    s1 = jnp.sum(y, axis=0, keepdims=True)
    s2 = jnp.sum(y * y, axis=0, keepdims=True)
    mean = s1 * inv_npix
    var = s2 * inv_npix - mean * mean          # biased variance, one pass
    return (y - mean) * jax.lax.rsqrt(var + eps)


def _im2col_dot(xp, w_mat, h_out, w_out, stride, cin):
    """3x3 conv as a single MXU matmul.

    xp    : (Hp, Wp, cin) zero-padded input (VMEM value)
    w_mat : (9*cin, cout) weights, rows ordered (dy, dx, cin) row-major
    returns (h_out*w_out, cout) fp32
    """
    cols = []
    for dy in range(3):
        for dx in range(3):
            patch = jax.lax.slice(
                xp,
                (dy, dx, 0),
                (dy + (h_out - 1) * stride + 1,
                 dx + (w_out - 1) * stride + 1,
                 cin),
                (stride, stride, 1),
            )                                   # (h_out, w_out, cin)
            cols.append(patch.reshape(h_out * w_out, cin))
    pm = jnp.concatenate(cols, axis=-1)         # (hw, 9*cin)
    return jnp.dot(pm, w_mat, preferred_element_type=jnp.float32)


# ----------------------------------------------------------------------------
# fused BasicBlock kernel (one batch element per grid step)
# ----------------------------------------------------------------------------
def _basic_block_kernel(*refs, stride, h, w, cin, cout, h_out, w_out,
                        has_downsample, eps):
    if has_downsample:
        x_ref, w1_ref, w2_ref, wd_ref, o_ref, xp_ref, mp_ref = refs
    else:
        x_ref, w1_ref, w2_ref, o_ref, xp_ref, mp_ref = refs
        wd_ref = None

    hw = h_out * w_out
    inv_hw = 1.0 / float(hw)

    x = x_ref[0].astype(jnp.float32)                       # (h, w, cin)

    # ---- conv1 (3x3, stride): pad into VMEM scratch, single im2col matmul --
    xp_ref[...] = jnp.zeros_like(xp_ref)
    xp_ref[pl.ds(1, h), pl.ds(1, w), :] = x
    y = _im2col_dot(xp_ref[...], w1_ref[...].astype(jnp.float32),
                    h_out, w_out, stride, cin)             # (hw, cout)

    # ---- bn1 + ReLU fused on the fp32 accumulator ---------------------------
    y = jnp.maximum(_instance_norm(y, inv_hw, eps), 0.0)

    # ---- conv2 (3x3, stride 1), intermediate never leaves VMEM --------------
    mp_ref[...] = jnp.zeros_like(mp_ref)
    mp_ref[pl.ds(1, h_out), pl.ds(1, w_out), :] = y.reshape(h_out, w_out, cout)
    y2 = _im2col_dot(mp_ref[...], w2_ref[...].astype(jnp.float32),
                     h_out, w_out, 1, cout)                # (hw, cout)

    # ---- bn2 -----------------------------------------------------------------
    y2 = _instance_norm(y2, inv_hw, eps)

    # ---- skip path -----------------------------------------------------------
    if has_downsample:
        xs = jax.lax.slice(
            x, (0, 0, 0),
            ((h_out - 1) * stride + 1, (w_out - 1) * stride + 1, cin),
            (stride, stride, 1),
        ).reshape(hw, cin)
        ds = jnp.dot(xs, wd_ref[...].astype(jnp.float32),
                     preferred_element_type=jnp.float32)   # 1x1 conv
        ds = _instance_norm(ds, inv_hw, eps)
    else:
        ds = x.reshape(hw, cin)                            # identity (cin==cout)

    out = jnp.maximum(y2 + ds, 0.0)
    o_ref[0] = out.reshape(h_out, w_out, cout).astype(o_ref.dtype)


# ----------------------------------------------------------------------------
# parameter preparation (runs ONCE, outside the forward pass)
# ----------------------------------------------------------------------------
def prepare_params(params):
    """OIHW -> im2col (9*Cin, Cout) layout; 1x1 down conv -> (Cin, Cout)."""
    cout = params["conv1"].shape[0]
    prepped = {
        "w1": jnp.transpose(params["conv1"], (2, 3, 1, 0)).reshape(-1, cout),
        "w2": jnp.transpose(params["conv2"], (2, 3, 1, 0)).reshape(-1, cout),
    }
    if "down_conv" in params:
        prepped["wd"] = jnp.transpose(params["down_conv"][:, :, 0, 0], (1, 0))
    return prepped


# ----------------------------------------------------------------------------
# public forward (NCHW in / NCHW out, PyTorch semantics)
# ----------------------------------------------------------------------------
@functools.partial(jax.jit, static_argnums=2)
def basic_block_forward(x_nchw, prepped, stride):
    n, cin, h, w = x_nchw.shape
    cout = prepped["w1"].shape[-1]
    h_out = (h + 2 - 3) // stride + 1
    w_out = (w + 2 - 3) // stride + 1
    has_ds = "wd" in prepped

    x = jnp.transpose(x_nchw, (0, 2, 3, 1))                # NCHW -> NHWC

    kernel = functools.partial(
        _basic_block_kernel, stride=stride, h=h, w=w, cin=cin, cout=cout,
        h_out=h_out, w_out=w_out, has_downsample=has_ds, eps=EPS)

    in_specs = [
        pl.BlockSpec((1, h, w, cin), lambda i: (i, 0, 0, 0)),
        pl.BlockSpec((9 * cin, cout), lambda i: (0, 0)),
        pl.BlockSpec((9 * cout, cout), lambda i: (0, 0)),
    ]
    args = [x, prepped["w1"], prepped["w2"]]
    if has_ds:
        in_specs.append(pl.BlockSpec((cin, cout), lambda i: (0, 0)))
        args.append(prepped["wd"])

    out = pl.pallas_call(
        kernel,
        out_shape=jax.ShapeDtypeStruct((n, h_out, w_out, cout), x.dtype),
        grid=(n,),                                          # >=2 iters: both v7x TCs busy
        in_specs=in_specs,
        out_specs=pl.BlockSpec((1, h_out, w_out, cout), lambda i: (i, 0, 0, 0)),
        scratch_shapes=[
            pltpu.VMEM((h + 2, w + 2, cin), jnp.float32),       # padded conv1 input
            pltpu.VMEM((h_out + 2, w_out + 2, cout), jnp.float32),  # padded conv2 input
        ],
        compiler_params=pltpu.CompilerParams(
            dimension_semantics=("parallel",),
            vmem_limit_bytes=32 * 1024 * 1024,
        ),
    )(*args)

    return jnp.transpose(out, (0, 3, 1, 2))                 # NHWC -> NCHW


# ----------------------------------------------------------------------------
# pure-JAX reference (correctness check)
# ----------------------------------------------------------------------------
def _ref_instnorm(x_nchw):
    mean = x_nchw.mean(axis=(2, 3), keepdims=True)
    var = ((x_nchw - mean) ** 2).mean(axis=(2, 3), keepdims=True)
    return (x_nchw - mean) / jnp.sqrt(var + EPS)


def ref_forward(x_nchw, params, stride):
    def conv(x, w, s, pad):
        return jax.lax.conv_general_dilated(
            x, w, (s, s), [(pad, pad), (pad, pad)],
            dimension_numbers=("NCHW", "OIHW", "NCHW"))

    out = jax.nn.relu(_ref_instnorm(conv(x_nchw, params["conv1"], stride, 1)))
    out = _ref_instnorm(conv(out, params["conv2"], 1, 1))
    if "down_conv" in params:
        ds = _ref_instnorm(conv(x_nchw, params["down_conv"], stride, 0))
    else:
        ds = x_nchw
    return jax.nn.relu(out + ds)


# ----------------------------------------------------------------------------
# main
# ----------------------------------------------------------------------------
if __name__ == "__main__":
    in_planes, planes, stride = 4, 8, 1       # Cin != planes -> downsample path
    N, H, W = 2, 16, 16

    key = jax.random.PRNGKey(0)
    k_x, k1, k2, k3 = jax.random.split(key, 4)

    x = jax.random.normal(k_x, (N, in_planes, H, W), dtype=jnp.float32)

    def kaiming(k, shape):
        fan_in = shape[1] * shape[2] * shape[3]
        return jax.random.normal(k, shape, jnp.float32) * jnp.sqrt(2.0 / fan_in)

    params = {
        "conv1": kaiming(k1, (planes, in_planes, 3, 3)),
        "conv2": kaiming(k2, (planes, planes, 3, 3)),
        "down_conv": kaiming(k3, (planes, in_planes, 1, 1)),
    }

    prepped = prepare_params(params)          # one-time weight re-layout

    out = basic_block_forward(x, prepped, stride)
    out = jax.block_until_ready(out)

    ref = jax.block_until_ready(ref_forward(x, params, stride))
    assert out.shape == ref.shape, (out.shape, ref.shape)
    assert jnp.allclose(out, ref, rtol=1e-4, atol=2e-4), float(
        jnp.max(jnp.abs(out - ref)))

    print("KERNEL_OK")
</pallas_src>

<mosaic_0001>
module attributes {stable_mosaic.version = 11 : i64} {
  func.func @_basic_block_kernel(%arg0: i32, %arg1: memref<1x16x16x4xf32, #tpu.memory_space<vmem>>, %arg2: memref<36x8xf32, #tpu.memory_space<vmem>>, %arg3: memref<72x8xf32, #tpu.memory_space<vmem>>, %arg4: memref<4x8xf32, #tpu.memory_space<vmem>>, %arg5: memref<1x16x16x8xf32, #tpu.memory_space<vmem>>, %arg6: memref<18x18x4xf32, #tpu.memory_space<vmem>>, %arg7: memref<18x18x8xf32, #tpu.memory_space<vmem>>) attributes {dimension_semantics = [#tpu.dimension_semantics<parallel>], iteration_bounds = array<i64: 2>, scalar_prefetch = 0 : i64, scratch_operands = 2 : i64, tpu.core_type = #tpu.core_type<tc>, window_params = [{transform_indices = @transform_0, window_bounds = array<i64: 1, 16, 16, 4>}, {pipeline_mode = #tpu.pipeline_mode<synchronous>, transform_indices = @transform_1, window_bounds = array<i64: 36, 8>}, {pipeline_mode = #tpu.pipeline_mode<synchronous>, transform_indices = @transform_2, window_bounds = array<i64: 72, 8>}, {pipeline_mode = #tpu.pipeline_mode<synchronous>, transform_indices = @transform_3, window_bounds = array<i64: 4, 8>}, {transform_indices = @transform_4, window_bounds = array<i64: 1, 16, 16, 8>}]} {
    %c0 = arith.constant 0 : index
    %c0_0 = arith.constant 0 : index
    %c0_1 = arith.constant 0 : index
    %c0_2 = arith.constant 0 : index
    %0 = vector.load %arg1[%c0, %c0_0, %c0_1, %c0_2] : memref<1x16x16x4xf32, #tpu.memory_space<vmem>>, vector<1x16x16x4xf32>
    %1 = vector.shape_cast %0 : vector<1x16x16x4xf32> to vector<16x16x4xf32>
    %cst = arith.constant 0.000000e+00 : f32
    %2 = vector.broadcast %cst : f32 to vector<18x18x4xf32>
    %c0_3 = arith.constant 0 : index
    %c0_4 = arith.constant 0 : index
    %c0_5 = arith.constant 0 : index
    %3 = vector.load %arg6[%c0_3, %c0_4, %c0_5] : memref<18x18x4xf32, #tpu.memory_space<vmem>>, vector<18x18x4xf32>
    tpu.vector_store %arg6[%c0_3, %c0_4, %c0_5], %2 {strides = array<i32>} : memref<18x18x4xf32, #tpu.memory_space<vmem>>, vector<18x18x4xf32>,
    %c1 = arith.constant 1 : index
    %c1_6 = arith.constant 1 : index
    %c0_7 = arith.constant 0 : index
    %4 = vector.load %arg6[%c1, %c1_6, %c0_7] : memref<18x18x4xf32, #tpu.memory_space<vmem>>, vector<16x16x4xf32>
    tpu.vector_store %arg6[%c1, %c1_6, %c0_7], %1 {strides = array<i32>} : memref<18x18x4xf32, #tpu.memory_space<vmem>>, vector<16x16x4xf32>,
    %c0_8 = arith.constant 0 : index
    %c0_9 = arith.constant 0 : index
    %c0_10 = arith.constant 0 : index
    %5 = vector.load %arg6[%c0_8, %c0_9, %c0_10] : memref<18x18x4xf32, #tpu.memory_space<vmem>>, vector<18x18x4xf32>
    %c0_11 = arith.constant 0 : index
    %c0_12 = arith.constant 0 : index
    %6 = vector.load %arg2[%c0_11, %c0_12] : memref<36x8xf32, #tpu.memory_space<vmem>>, vector<36x8xf32>
    %7 = vector.extract_strided_slice %5 {offsets = [0, 0, 0], sizes = [16, 16, 4], strides = [1, 1, 1]} : vector<18x18x4xf32> to vector<16x16x4xf32>
    %8 = vector.shape_cast %7 : vector<16x16x4xf32> to vector<256x4xf32>
    %9 = vector.extract_strided_slice %5 {offsets = [0, 1, 0], sizes = [16, 16, 4], strides = [1, 1, 1]} : vector<18x18x4xf32> to vector<16x16x4xf32>
    %10 = vector.shape_cast %9 : vector<16x16x4xf32> to vector<256x4xf32>
    %11 = vector.extract_strided_slice %5 {offsets = [0, 2, 0], sizes = [16, 16, 4], strides = [1, 1, 1]} : vector<18x18x4xf32> to vector<16x16x4xf32>
    %12 = vector.shape_cast %11 : vector<16x16x4xf32> to vector<256x4xf32>
    %13 = vector.extract_strided_slice %5 {offsets = [1, 0, 0], sizes = [16, 16, 4], strides = [1, 1, 1]} : vector<18x18x4xf32> to vector<16x16x4xf32>
    %14 = vector.shape_cast %13 : vector<16x16x4xf32> to vector<256x4xf32>
    %15 = vector.extract_strided_slice %5 {offsets = [1, 1, 0], sizes = [16, 16, 4], strides = [1, 1, 1]} : vector<18x18x4xf32> to vector<16x16x4xf32>
    %16 = vector.shape_cast %15 : vector<16x16x4xf32> to vector<256x4xf32>
    %17 = vector.extract_strided_slice %5 {offsets = [1, 2, 0], sizes = [16, 16, 4], strides = [1, 1, 1]} : vector<18x18x4xf32> to vector<16x16x4xf32>
    %18 = vector.shape_cast %17 : vector<16x16x4xf32> to vector<256x4xf32>
    %19 = vector.extract_strided_slice %5 {offsets = [2, 0, 0], sizes = [16, 16, 4], strides = [1, 1, 1]} : vector<18x18x4xf32> to vector<16x16x4xf32>
    %20 = vector.shape_cast %19 : vector<16x16x4xf32> to vector<256x4xf32>
    %21 = vector.extract_strided_slice %5 {offsets = [2, 1, 0], sizes = [16, 16, 4], strides = [1, 1, 1]} : vector<18x18x4xf32> to vector<16x16x4xf32>
    %22 = vector.shape_cast %21 : vector<16x16x4xf32> to vector<256x4xf32>
    %23 = vector.extract_strided_slice %5 {offsets = [2, 2, 0], sizes = [16, 16, 4], strides = [1, 1, 1]} : vector<18x18x4xf32> to vector<16x16x4xf32>
    %24 = vector.shape_cast %23 : vector<16x16x4xf32> to vector<256x4xf32>
    %25 = tpu.concatenate %8, %10, %12, %14, %16, %18, %20, %22, %24 in 1 : vector<256x4xf32>, vector<256x4xf32>, vector<256x4xf32>, vector<256x4xf32>, vector<256x4xf32>, vector<256x4xf32>, vector<256x4xf32>, vector<256x4xf32>, vector<256x4xf32> -> vector<256x36xf32>
    %cst_13 = arith.constant dense<0.000000e+00> : vector<256x8xf32>
    %26 = tpu.matmul %25, %6, %cst_13 {dimension_numbers = #tpu.dot_dimension_numbers<[1], [0], [0], [1], [0, 0, 1, 1], [], []>} : vector<256x36xf32>, vector<36x8xf32>, vector<256x8xf32> -> vector<256x8xf32>
    %cst_14 = arith.constant dense<0.000000e+00> : vector<8xf32>
    %27 = vector.multi_reduction <add>, %26, %cst_14 [0] : vector<256x8xf32> to vector<8xf32>
    %28 = vector.shape_cast %27 : vector<8xf32> to vector<1x8xf32>
    %29 = arith.mulf %26, %26 : vector<256x8xf32>
    %cst_15 = arith.constant dense<0.000000e+00> : vector<8xf32>
    %30 = vector.multi_reduction <add>, %29, %cst_15 [0] : vector<256x8xf32> to vector<8xf32>
    %31 = vector.shape_cast %30 : vector<8xf32> to vector<1x8xf32>
    %cst_16 = arith.constant 3.906250e-03 : f32
    %32 = vector.broadcast %cst_16 : f32 to vector<1x8xf32>
    %33 = arith.mulf %28, %32 : vector<1x8xf32>
    %cst_17 = arith.constant 3.906250e-03 : f32
    %34 = vector.broadcast %cst_17 : f32 to vector<1x8xf32>
    %35 = arith.mulf %31, %34 : vector<1x8xf32>
    %36 = arith.mulf %33, %33 : vector<1x8xf32>
    %37 = arith.subf %35, %36 : vector<1x8xf32>
    %38 = vector.broadcast %33 : vector<1x8xf32> to vector<256x8xf32>
    %39 = arith.subf %26, %38 : vector<256x8xf32>
    %cst_18 = arith.constant 9.99999974E-6 : f32
    %40 = vector.broadcast %cst_18 : f32 to vector<1x8xf32>
    %41 = arith.addf %37, %40 : vector<1x8xf32>
    %42 = math.rsqrt %41 : vector<1x8xf32>
    %43 = vector.broadcast %42 : vector<1x8xf32> to vector<256x8xf32>
    %44 = arith.mulf %39, %43 : vector<256x8xf32>
    %cst_19 = arith.constant 0.000000e+00 : f32
    %45 = vector.broadcast %cst_19 : f32 to vector<256x8xf32>
    %46 = arith.maximumf %44, %45 : vector<256x8xf32>
    %cst_20 = arith.constant 0.000000e+00 : f32
    %47 = vector.broadcast %cst_20 : f32 to vector<18x18x8xf32>
    %c0_21 = arith.constant 0 : index
    %c0_22 = arith.constant 0 : index
    %c0_23 = arith.constant 0 : index
    %48 = vector.load %arg7[%c0_21, %c0_22, %c0_23] : memref<18x18x8xf32, #tpu.memory_space<vmem>>, vector<18x18x8xf32>
    tpu.vector_store %arg7[%c0_21, %c0_22, %c0_23], %47 {strides = array<i32>} : memref<18x18x8xf32, #tpu.memory_space<vmem>>, vector<18x18x8xf32>,
    %49 = vector.shape_cast %46 : vector<256x8xf32> to vector<16x16x8xf32>
    %c1_24 = arith.constant 1 : index
    %c1_25 = arith.constant 1 : index
    %c0_26 = arith.constant 0 : index
    %50 = vector.load %arg7[%c1_24, %c1_25, %c0_26] : memref<18x18x8xf32, #tpu.memory_space<vmem>>, vector<16x16x8xf32>
    tpu.vector_store %arg7[%c1_24, %c1_25, %c0_26], %49 {strides = array<i32>} : memref<18x18x8xf32, #tpu.memory_space<vmem>>, vector<16x16x8xf32>,
    %c0_27 = arith.constant 0 : index
    %c0_28 = arith.constant 0 : index
    %c0_29 = arith.constant 0 : index
    %51 = vector.load %arg7[%c0_27, %c0_28, %c0_29] : memref<18x18x8xf32, #tpu.memory_space<vmem>>, vector<18x18x8xf32>
    %c0_30 = arith.constant 0 : index
    %c0_31 = arith.constant 0 : index
    %52 = vector.load %arg3[%c0_30, %c0_31] : memref<72x8xf32, #tpu.memory_space<vmem>>, vector<72x8xf32>
    %53 = vector.extract_strided_slice %51 {offsets = [0, 0, 0], sizes = [16, 16, 8], strides = [1, 1, 1]} : vector<18x18x8xf32> to vector<16x16x8xf32>
    %54 = vector.shape_cast %53 : vector<16x16x8xf32> to vector<256x8xf32>
    %55 = vector.extract_strided_slice %51 {offsets = [0, 1, 0], sizes = [16, 16, 8], strides = [1, 1, 1]} : vector<18x18x8xf32> to vector<16x16x8xf32>
    %56 = vector.shape_cast %55 : vector<16x16x8xf32> to vector<256x8xf32>
    %57 = vector.extract_strided_slice %51 {offsets = [0, 2, 0], sizes = [16, 16, 8], strides = [1, 1, 1]} : vector<18x18x8xf32> to vector<16x16x8xf32>
    %58 = vector.shape_cast %57 : vector<16x16x8xf32> to vector<256x8xf32>
    %59 = vector.extract_strided_slice %51 {offsets = [1, 0, 0], sizes = [16, 16, 8], strides = [1, 1, 1]} : vector<18x18x8xf32> to vector<16x16x8xf32>
    %60 = vector.shape_cast %59 : vector<16x16x8xf32> to vector<256x8xf32>
    %61 = vector.extract_strided_slice %51 {offsets = [1, 1, 0], sizes = [16, 16, 8], strides = [1, 1, 1]} : vector<18x18x8xf32> to vector<16x16x8xf32>
    %62 = vector.shape_cast %61 : vector<16x16x8xf32> to vector<256x8xf32>
    %63 = vector.extract_strided_slice %51 {offsets = [1, 2, 0], sizes = [16, 16, 8], strides = [1, 1, 1]} : vector<18x18x8xf32> to vector<16x16x8xf32>
    %64 = vector.shape_cast %63 : vector<16x16x8xf32> to vector<256x8xf32>
    %65 = vector.extract_strided_slice %51 {offsets = [2, 0, 0], sizes = [16, 16, 8], strides = [1, 1, 1]} : vector<18x18x8xf32> to vector<16x16x8xf32>
    %66 = vector.shape_cast %65 : vector<16x16x8xf32> to vector<256x8xf32>
    %67 = vector.extract_strided_slice %51 {offsets = [2, 1, 0], sizes = [16, 16, 8], strides = [1, 1, 1]} : vector<18x18x8xf32> to vector<16x16x8xf32>
    %68 = vector.shape_cast %67 : vector<16x16x8xf32> to vector<256x8xf32>
    %69 = vector.extract_strided_slice %51 {offsets = [2, 2, 0], sizes = [16, 16, 8], strides = [1, 1, 1]} : vector<18x18x8xf32> to vector<16x16x8xf32>
    %70 = vector.shape_cast %69 : vector<16x16x8xf32> to vector<256x8xf32>
    %71 = tpu.concatenate %54, %56, %58, %60, %62, %64, %66, %68, %70 in 1 : vector<256x8xf32>, vector<256x8xf32>, vector<256x8xf32>, vector<256x8xf32>, vector<256x8xf32>, vector<256x8xf32>, vector<256x8xf32>, vector<256x8xf32>, vector<256x8xf32> -> vector<256x72xf32>
    %cst_32 = arith.constant dense<0.000000e+00> : vector<256x8xf32>
    %72 = tpu.matmul %71, %52, %cst_32 {dimension_numbers = #tpu.dot_dimension_numbers<[1], [0], [0], [1], [0, 0, 1, 1], [], []>} : vector<256x72xf32>, vector<72x8xf32>, vector<256x8xf32> -> vector<256x8xf32>
    %cst_33 = arith.constant dense<0.000000e+00> : vector<8xf32>
    %73 = vector.multi_reduction <add>, %72, %cst_33 [0] : vector<256x8xf32> to vector<8xf32>
    %74 = vector.shape_cast %73 : vector<8xf32> to vector<1x8xf32>
    %75 = arith.mulf %72, %72 : vector<256x8xf32>
    %cst_34 = arith.constant dense<0.000000e+00> : vector<8xf32>
    %76 = vector.multi_reduction <add>, %75, %cst_34 [0] : vector<256x8xf32> to vector<8xf32>
    %77 = vector.shape_cast %76 : vector<8xf32> to vector<1x8xf32>
    %cst_35 = arith.constant 3.906250e-03 : f32
    %78 = vector.broadcast %cst_35 : f32 to vector<1x8xf32>
    %79 = arith.mulf %74, %78 : vector<1x8xf32>
    %cst_36 = arith.constant 3.906250e-03 : f32
    %80 = vector.broadcast %cst_36 : f32 to vector<1x8xf32>
    %81 = arith.mulf %77, %80 : vector<1x8xf32>
    %82 = arith.mulf %79, %79 : vector<1x8xf32>
    %83 = arith.subf %81, %82 : vector<1x8xf32>
    %84 = vector.broadcast %79 : vector<1x8xf32> to vector<256x8xf32>
    %85 = arith.subf %72, %84 : vector<256x8xf32>
    %cst_37 = arith.constant 9.99999974E-6 : f32
    %86 = vector.broadcast %cst_37 : f32 to vector<1x8xf32>
    %87 = arith.addf %83, %86 : vector<1x8xf32>
    %88 = math.rsqrt %87 : vector<1x8xf32>
    %89 = vector.broadcast %88 : vector<1x8xf32> to vector<256x8xf32>
    %90 = arith.mulf %85, %89 : vector<256x8xf32>
    %91 = vector.extract_strided_slice %1 {offsets = [0, 0, 0], sizes = [16, 16, 4], strides = [1, 1, 1]} : vector<16x16x4xf32> to vector<16x16x4xf32>
    %92 = vector.shape_cast %91 : vector<16x16x4xf32> to vector<256x4xf32>
    %c0_38 = arith.constant 0 : index
    %c0_39 = arith.constant 0 : index
    %93 = vector.load %arg4[%c0_38, %c0_39] : memref<4x8xf32, #tpu.memory_space<vmem>>, vector<4x8xf32>
    %cst_40 = arith.constant dense<0.000000e+00> : vector<256x8xf32>
    %94 = tpu.matmul %92, %93, %cst_40 {dimension_numbers = #tpu.dot_dimension_numbers<[1], [0], [0], [1], [0, 0, 1, 1], [], []>} : vector<256x4xf32>, vector<4x8xf32>, vector<256x8xf32> -> vector<256x8xf32>
    %cst_41 = arith.constant dense<0.000000e+00> : vector<8xf32>
    %95 = vector.multi_reduction <add>, %94, %cst_41 [0] : vector<256x8xf32> to vector<8xf32>
    %96 = vector.shape_cast %95 : vector<8xf32> to vector<1x8xf32>
    %97 = arith.mulf %94, %94 : vector<256x8xf32>
    %cst_42 = arith.constant dense<0.000000e+00> : vector<8xf32>
    %98 = vector.multi_reduction <add>, %97, %cst_42 [0] : vector<256x8xf32> to vector<8xf32>
    %99 = vector.shape_cast %98 : vector<8xf32> to vector<1x8xf32>
    %cst_43 = arith.constant 3.906250e-03 : f32
    %100 = vector.broadcast %cst_43 : f32 to vector<1x8xf32>
    %101 = arith.mulf %96, %100 : vector<1x8xf32>
    %cst_44 = arith.constant 3.906250e-03 : f32
    %102 = vector.broadcast %cst_44 : f32 to vector<1x8xf32>
    %103 = arith.mulf %99, %102 : vector<1x8xf32>
    %104 = arith.mulf %101, %101 : vector<1x8xf32>
    %105 = arith.subf %103, %104 : vector<1x8xf32>
    %106 = vector.broadcast %101 : vector<1x8xf32> to vector<256x8xf32>
    %107 = arith.subf %94, %106 : vector<256x8xf32>
    %cst_45 = arith.constant 9.99999974E-6 : f32
    %108 = vector.broadcast %cst_45 : f32 to vector<1x8xf32>
    %109 = arith.addf %105, %108 : vector<1x8xf32>
    %110 = math.rsqrt %109 : vector<1x8xf32>
    %111 = vector.broadcast %110 : vector<1x8xf32> to vector<256x8xf32>
    %112 = arith.mulf %107, %111 : vector<256x8xf32>
    %113 = arith.addf %90, %112 : vector<256x8xf32>
    %cst_46 = arith.constant 0.000000e+00 : f32
    %114 = vector.broadcast %cst_46 : f32 to vector<256x8xf32>
    %115 = arith.maximumf %113, %114 : vector<256x8xf32>
    %116 = vector.shape_cast %115 : vector<256x8xf32> to vector<16x16x8xf32>
    %c0_47 = arith.constant 0 : index
    %c0_48 = arith.constant 0 : index
    %c0_49 = arith.constant 0 : index
    %c0_50 = arith.constant 0 : index
    %117 = vector.load %arg5[%c0_47, %c0_48, %c0_49, %c0_50] : memref<1x16x16x8xf32, #tpu.memory_space<vmem>>, vector<1x16x16x8xf32>
    %118 = vector.shape_cast %117 : vector<1x16x16x8xf32> to vector<16x16x8xf32>
    %119 = vector.shape_cast %116 : vector<16x16x8xf32> to vector<1x16x16x8xf32>
    tpu.vector_store %arg5[%c0_47, %c0_48, %c0_49, %c0_50], %119 {strides = array<i32>} : memref<1x16x16x8xf32, #tpu.memory_space<vmem>>, vector<1x16x16x8xf32>,
    return
  }
  func.func @transform_0(%arg0: i32) -> (i32, i32, i32, i32) {
    %c0_i32 = arith.constant 0 : i32
    %c0_i32_0 = arith.constant 0 : i32
    %c0_i32_1 = arith.constant 0 : i32
    %c0_i32_2 = arith.constant 0 : i32
    return %arg0, %c0_i32, %c0_i32_0, %c0_i32_1 : i32, i32, i32, i32
  }
  func.func @transform_1(%arg0: i32) -> (i32, i32) {
    %c0_i32 = arith.constant 0 : i32
    %c0_i32_0 = arith.constant 0 : i32
    %c0_i32_1 = arith.constant 0 : i32
    return %c0_i32, %c0_i32_0 : i32, i32
  }
  func.func @transform_2(%arg0: i32) -> (i32, i32) {
    %c0_i32 = arith.constant 0 : i32
    %c0_i32_0 = arith.constant 0 : i32
    %c0_i32_1 = arith.constant 0 : i32
    return %c0_i32, %c0_i32_0 : i32, i32
  }
  func.func @transform_3(%arg0: i32) -> (i32, i32) {
    %c0_i32 = arith.constant 0 : i32
    %c0_i32_0 = arith.constant 0 : i32
    %c0_i32_1 = arith.constant 0 : i32
    return %c0_i32, %c0_i32_0 : i32, i32
  }
  func.func @transform_4(%arg0: i32) -> (i32, i32, i32, i32) {
    %c0_i32 = arith.constant 0 : i32
    %c0_i32_0 = arith.constant 0 : i32
    %c0_i32_1 = arith.constant 0 : i32
    %c0_i32_2 = arith.constant 0 : i32
    return %arg0, %c0_i32, %c0_i32_0, %c0_i32_1 : i32, i32, i32, i32
  }
}

</mosaic_0001>

<bundles_post_ra>
// kernel: basic_block_forward.1
= control target key start
LH: loop header
LB: loop body
LE: loop exit
PB: predicated region body
PF: predicated region fallthrough
CT: control target
= control target key end

     0   :  { %s5494_s15 = smov 0   ;;  %s10359_s0 = inlined_call_operand.vmem [shape: f32[2,16,16,4], index: 0, kind: input, shape index: {}]   ;;  %s10360_s1 = inlined_call_operand.vmem [shape: f32[36,8], index: 1, kind: input, shape index: {}]   ;;  %s10361_s2 = inlined_call_operand.vmem [shape: f32[72,8], index: 2, kind: input, shape index: {}]   ;;  %s10362_s3 = inlined_call_operand.vmem [shape: f32[4,8], index: 3, kind: input, shape index: {}]   ;;  %s10363_s4 = inlined_call_operand.vmem [shape: f32[2,16,16,8], index: 4, kind: output, shape index: {}]  }
   0x1 LB: > { %s4934_s16 = sadd.s32 4294967295, %s5454_s15   ;;  %p4938_p0 = scmp.ge.s32.totalorder %s5454_s15, 1  ;;  %s5454_s15 = sphi %s5494_s15, %s14_s15  }
   0x2   : > { %p162_p1 = scmp.lt.s32.totalorder %s5454_s15, 3 }
   0x4   : > { %p163_p2 = pnand %p4938_p0, %p162_p1 }
   0x6   : > { %166 = sbr.rel (%p163_p2) target bundleno = 1857 (0x741), region = 36 }
   0xd   : > { %vm230_vm0 = vcmask 31744   ;;  %vm233_vm1 = vcmask 25600   ;;  %p5504_p3 = scmp.lt.s32.totalorder %s4934_s16, 1  ;;  %v10364_v0 = vmov 0.0   ;;  %vm426_vm2 = vcmask 1046528   ;;  %s5457_s22 = smov 4  }
   0xe   : > { %231 = vst.msk [vmem:[#allocation2] sm:$0xff] %vm230_vm0, %v10364_v0  ;;  %232 = vst.msk [vmem:[#allocation2 + $0x8] sm:$0xff] %vm230_vm0, %v10364_v0  ;;  %vm1414_vm3 = vcmask 64512   ;;  %vm507_vm4 = vcmask 1045504   ;;  %s5458_s23 = smov 8   ;;  %s5459_s24 = smov 12  }
   0xf   : > { %235 = vst.msk [vmem:[#allocation2 + $0x18] sm:$0xff] %vm230_vm0, %v10364_v0  ;;  %236 = vst.msk [vmem:[#allocation2 + $0x20] sm:$0xff] %vm230_vm0, %v10364_v0  ;;  %s11137_s16 = smov (!%p5504_p3, %s4934_s16), 1  ;;  %s5460_s25 = smov 16   ;;  %vm1742_vm5 = vcmask 1043456   ;;  %vm1447_vm6 = vcmask 97280  }
  0x10   : > { %238 = vst.msk [vmem:[#allocation2 + $0x30] sm:$0xff] %vm230_vm0, %v10364_v0  ;;  %239 = vst.msk [vmem:[#allocation2 + $0x38] sm:$0xff] %vm230_vm0, %v10364_v0  ;;  %s5043_s18 = sshll.u32 %s11137_s16, 8  ;;  %s5461_s8 = smov 20   ;;  %vm1480_vm7 = vcmask 130048   ;;  %vm1513_vm8 = vcmask 162816  }
  0x11   : > { %241 = vst.msk [vmem:[#allocation2 + $0x48] sm:$0xff] %vm230_vm0, %v10364_v0  ;;  %242 = vst.msk [vmem:[#allocation2 + $0x50] sm:$0xff] %vm230_vm0, %v10364_v0  ;;  %s5628_s21 = scalar_lea.vmem %s10359_s0, %s5043_s18  ;;  %s5462_s11 = smov 24   ;;  %vm1546_vm9 = vcmask 195584   ;;  %vm1579_vm10 = vcmask 228352   ;;  %vm1612_vm11 = vcmask 261120  }
  0x12   : > { %244 = vst.msk [vmem:[#allocation2 + $0x60] sm:$0xff] %vm230_vm0, %v10364_v0  ;;  %245 = vst.msk [vmem:[#allocation2 + $0x68] sm:$0xff] %vm230_vm0, %v10364_v0  ;;  %v5631_v1 = vld [vmem:[%s5628_s21] sm:$0xff]  ;;  %v5634_v2 = vld [vmem:[%s5628_s21 + $0x8] sm:$0xff]  ;;  %s5463_s12 = smov 28   ;;  %s5464_s13 = smov 32  }
  0x13   : > { %247 = vst.msk [vmem:[#allocation2 + $0x78] sm:$0xff] %vm230_vm0, %v10364_v0  ;;  %248 = vst.msk [vmem:[#allocation2 + $0x80] sm:$0xff] %vm230_vm0, %v10364_v0  ;;  %v5637_v3 = vld [vmem:[%s5628_s21 + $0x10] sm:$0xff]  ;;  %v5644_v4 = vld [vmem:[%s5628_s21 + $0x18] sm:$0xff]  ;;  %vm1645_vm12 = vcmask 293888   ;;  %vm2245_vm13 = vcmask 58368   ;;  %s10266_s20 = scalar_lea.vmem %s10363_s4, %s5043_s18 }
  0x14   : > { %250 = vst.msk [vmem:[#allocation2 + $0x90] sm:$0xff] %vm230_vm0, %v10364_v0  ;;  %251 = vst.msk [vmem:[#allocation2 + $0x98] sm:$0xff] %vm230_vm0, %v10364_v0  ;;  %v5649_v5 = vld [vmem:[%s5628_s21 + $0x20] sm:$0xff]  ;;  %v5652_v6 = vld [vmem:[%s5628_s21 + $0x28] sm:$0xff]  ;;  %s5466_s30 = smov 48   ;;  %s5467_s9 = smov 56  }
  0x15   : > { %253 = vst.msk [vmem:[#allocation2 + $0xa8] sm:$0xff] %vm230_vm0, %v10364_v0  ;;  %254 = vst.msk [vmem:[#allocation2 + $0xb0] sm:$0xff] %vm230_vm0, %v10364_v0  ;;  %v5654_v7 = vld [vmem:[#allocation2] sm:$0xff]  ;;  %v5656_v8 = vld [vmem:[#allocation2 + $0x8] sm:$0xff]  ;;  %s5468_s14 = smov 64   ;;  %vm3524_vm14 = vcmask 326656  }
  0x16   : > { %256 = vst.msk [vmem:[#allocation2 + $0xc0] sm:$0xff] %vm230_vm0, %v10364_v0  ;;  %257 = vst.msk [vmem:[#allocation2 + $0xc8] sm:$0xff] %vm230_vm0, %v10364_v0  ;;  %v427_v10 = vrot.slane %v5654_v7, 1  ;;  %v428_v11 = vrot.slane %v5656_v8, 1  ;;  %v5670_v13 = vld [vmem:[%s5628_s21 + $0x30] sm:$0xff]  ;;  %v5673_v14 = vld [vmem:[%s5628_s21 + $0x38] sm:$0xff] }
  0x17   : > { %259 = vst.msk [vmem:[#allocation2 + $0xd8] sm:$0xff] %vm230_vm0, %v10364_v0  ;;  %260 = vst.msk [vmem:[#allocation2 + $0xe0] sm:$0xff] %vm230_vm0, %v10364_v0  ;;  %v5676_v15 = vld [vmem:[%s5628_s21 + $0x40] sm:$0xff]  ;;  %v5683_v16 = vld [vmem:[%s5628_s21 + $0x48] sm:$0xff]  ;;  %vm3557_vm15 = vcmask 392192  }
  0x18   : > { %262 = vst.msk [vmem:[#allocation2 + $0xf0] sm:$0xff] %vm230_vm0, %v10364_v0  ;;  %263 = vst.msk [vmem:[#allocation2 + $0xf8] sm:$0xff] %vm230_vm0, %v10364_v0  ;;  %v5688_v17 = vld [vmem:[%s5628_s21 + $0x50] sm:$0xff]  ;;  %v5691_v18 = vld [vmem:[%s5628_s21 + $0x58] sm:$0xff]  ;;  %v429_v19 = vsel %vm426_vm2, %v427_v10, %v428_v11 }
  0x19   : > { %265 = vst.msk [vmem:[#allocation2 + $0x108] sm:$0xff] %vm230_vm0, %v10364_v0  ;;  %266 = vst.msk [vmem:[#allocation2 + $0x110] sm:$0xff] %vm230_vm0, %v10364_v0  ;;  %v5701_v20 = vld [vmem:[%s5628_s21 + $0x60] sm:$0xff]  ;;  %v5704_v21 = vld [vmem:[%s5628_s21 + $0x68] sm:$0xff]  ;;  %614 = vrot.lane.b32.xlu0 %v429_v19, %s5457_s22 }
  0x1a   : > { %268 = vst.msk [vmem:[#allocation2 + $0x120] sm:$0xff] %vm230_vm0, %v10364_v0  ;;  %269 = vst.msk [vmem:[#allocation2 + $0x128] sm:$0xff] %vm230_vm0, %v10364_v0  ;;  %v5707_v22 = vld [vmem:[%s5628_s21 + $0x70] sm:$0xff]  ;;  %v5715_v23 = vld [vmem:[%s5628_s21 + $0x78] sm:$0xff] }
  0x1b   : > { %271 = vst.msk [vmem:[#allocation2 + $0x138] sm:$0xff] %vm230_vm0, %v10364_v0  ;;  %272 = vst.msk [vmem:[#allocation2 + $0x140] sm:$0xff] %vm230_vm0, %v10364_v0  ;;  %v5720_v24 = vld [vmem:[%s5628_s21 + $0x80] sm:$0xff]  ;;  %v5723_v25 = vld [vmem:[%s5628_s21 + $0x88] sm:$0xff] }
  0x1c   : > { %274 = vst.msk [vmem:[#allocation2 + $0x150] sm:$0xff] %vm230_vm0, %v10364_v0  ;;  %275 = vst.msk [vmem:[#allocation2 + $0x158] sm:$0xff] %vm230_vm0, %v10364_v0  ;;  %v5733_v27 = vld [vmem:[%s5628_s21 + $0x90] sm:$0xff]  ;;  %v5736_v28 = vld [vmem:[%s5628_s21 + $0x98] sm:$0xff] }
  0x1d   : > { %277 = vst.msk [vmem:[#allocation2 + $0x168] sm:$0xff] %vm230_vm0, %v10364_v0  ;;  %278 = vst.msk [vmem:[#allocation2 + $0x170] sm:$0xff] %vm230_vm0, %v10364_v0  ;;  %v5739_v29 = vld [vmem:[%s5628_s21 + $0xa0] sm:$0xff]  ;;  %v5811_v60 = vld [vmem:[%s5628_s21 + $0xa8] sm:$0xff] }
  0x1e   : > { %280 = vst.msk [vmem:[#allocation2 + $0x180] sm:$0xff] %vm230_vm0, %v10364_v0  ;;  %281 = vst.msk [vmem:[#allocation2 + $0x188] sm:$0xff] %vm230_vm0, %v10364_v0  ;;  %v5830_v19 = vld [vmem:[%s5628_s21 + $0xb8] sm:$0xff] }
  0x1f   : > { %283 = vst.msk [vmem:[#allocation2 + $0x198] sm:$0xff] %vm230_vm0, %v10364_v0  ;;  %284 = vst.msk [vmem:[#allocation2 + $0x1a0] sm:$0xff] %vm230_vm0, %v10364_v0 }
  0x20   : > { %234 = vst.msk [vmem:[#allocation2 + $0x10] sm:$0x3] %vm233_vm1, %v10364_v0  ;;  %237 = vst.msk [vmem:[#allocation2 + $0x28] sm:$0x3] %vm233_vm1, %v10364_v0 }
  0x21   : > { %240 = vst.msk [vmem:[#allocation2 + $0x40] sm:$0x3] %vm233_vm1, %v10364_v0  ;;  %243 = vst.msk [vmem:[#allocation2 + $0x58] sm:$0x3] %vm233_vm1, %v10364_v0 }
  0x22   : > { %246 = vst.msk [vmem:[#allocation2 + $0x70] sm:$0x3] %vm233_vm1, %v10364_v0  ;;  %249 = vst.msk [vmem:[#allocation2 + $0x88] sm:$0x3] %vm233_vm1, %v10364_v0 }
  0x23   : > { %252 = vst.msk [vmem:[#allocation2 + $0xa0] sm:$0x3] %vm233_vm1, %v10364_v0  ;;  %255 = vst.msk [vmem:[#allocation2 + $0xb8] sm:$0x3] %vm233_vm1, %v10364_v0 }
  0x24   : > { %258 = vst.msk [vmem:[#allocation2 + $0xd0] sm:$0x3] %vm233_vm1, %v10364_v0  ;;  %261 = vst.msk [vmem:[#allocation2 + $0xe8] sm:$0x3] %vm233_vm1, %v10364_v0 }
  0x25   : > { %264 = vst.msk [vmem:[#allocation2 + $0x100] sm:$0x3] %vm233_vm1, %v10364_v0  ;;  %267 = vst.msk [vmem:[#allocation2 + $0x118] sm:$0x3] %vm233_vm1, %v10364_v0 }
  0x26   : > { %270 = vst.msk [vmem:[#allocation2 + $0x130] sm:$0x3] %vm233_vm1, %v10364_v0  ;;  %273 = vst.msk [vmem:[#allocation2 + $0x148] sm:$0x3] %vm233_vm1, %v10364_v0 }
  0x27   : > { %276 = vst.msk [vmem:[#allocation2 + $0x160] sm:$0x3] %vm233_vm1, %v10364_v0  ;;  %279 = vst.msk [vmem:[#allocation2 + $0x178] sm:$0x3] %vm233_vm1, %v10364_v0  ;;  %v5658_v9 = vld [vmem:[#allocation2 + $0x10] sm:$0x3] }
  0x28   : > { %282 = vst.msk [vmem:[#allocation2 + $0x190] sm:$0x3] %vm233_vm1, %v10364_v0  ;;  %285 = vst.msk [vmem:[#allocation2 + $0x1a8] sm:$0x3] %vm233_vm1, %v10364_v0  ;;  %v430_v12 = vrot.slane %v5658_v9, 1  ;;  %vm3590_vm1 = vcmask 457728  }
  0x29   : > { %10576 = vst [vmem:[#allocation4_spill] sm:$0xff] %v5631_v1  ;;  %10577 = vst [vmem:[#allocation5_spill] sm:$0xff] %v5634_v2 }
  0x2a   : > { %10578 = vst [vmem:[#allocation6_spill] sm:$0xff] %v5637_v3  ;;  %287 = vst.msk [vmem:[#allocation2 + $0x19] sm:$0xff] %vm230_vm0, %v5631_v1  ;;  %v431_v26 = vsel %vm426_vm2, %v428_v11, %v430_v12  ;;  %v5827_v12 = vld [vmem:[%s5628_s21 + $0xb0] sm:$0xff] }
  0x2b   : > { %288 = vst.msk [vmem:[#allocation2 + $0x21] sm:$0xff] %vm230_vm0, %v5634_v2  ;;  %10579 = vst [vmem:[#allocation7_spill] sm:$0xff] %v5644_v4  ;;  %616 = vrot.lane.b32.xlu0 %v431_v26, %s5457_s22  ;;  %v5833_v26 = vld [vmem:[%s5628_s21 + $0xc0] sm:$0xff] }
  0x2c   : > { %289 = vst.msk [vmem:[#allocation2 + $0x31] sm:$0xff] %vm230_vm0, %v5637_v3  ;;  %10580 = vst [vmem:[#allocation8_spill] sm:$0xff] %v5649_v5 }
  0x2d   : > { %10581 = vst [vmem:[#allocation9_spill] sm:$0xff] %v5652_v6  ;;  %290 = vst.msk [vmem:[#allocation2 + $0x39] sm:$0xff] %vm230_vm0, %v5644_v4 }
  0x2e   : > { %291 = vst.msk [vmem:[#allocation2 + $0x49] sm:$0xff] %vm230_vm0, %v5649_v5  ;;  %292 = vst.msk [vmem:[#allocation2 + $0x51] sm:$0xff] %vm230_vm0, %v5652_v6 }
  0x2f   : > { %10582 = vst [vmem:[#allocation10_spill] sm:$0xff] %v5670_v13  ;;  %10583 = vst [vmem:[#allocation11_spill] sm:$0xff] %v5673_v14 }
  0x30   : > { %10584 = vst [vmem:[#allocation12_spill] sm:$0xff] %v5676_v15  ;;  %293 = vst.msk [vmem:[#allocation2 + $0x61] sm:$0xff] %vm230_vm0, %v5670_v13 }
  0x31   : > { %294 = vst.msk [vmem:[#allocation2 + $0x69] sm:$0xff] %vm230_vm0, %v5673_v14  ;;  %10585 = vst [vmem:[#allocation13_spill] sm:$0xff] %v5683_v16  ;;  %v5741_v30 = vld [vmem:[#allocation2 + $0x18] sm:$0xff] }
  0x32   : > { %295 = vst.msk [vmem:[#allocation2 + $0x79] sm:$0xff] %vm230_vm0, %v5676_v15  ;;  %10586 = vst [vmem:[#allocation14_spill] sm:$0xff] %v5688_v17  ;;  %v5743_v31 = vld [vmem:[#allocation2 + $0x20] sm:$0xff]  ;;  %v432_v33 = vrot.slane %v5741_v30, 1  ;;  %v5758_v37 = vld [vmem:[#allocation2 + $0x28] sm:$0x3] }
  0x33   : > { %10587 = vst [vmem:[#allocation15_spill] sm:$0xff] %v5691_v18  ;;  %296 = vst.msk [vmem:[#allocation2 + $0x81] sm:$0xff] %vm230_vm0, %v5683_v16  ;;  %v5745_v32 = vld [vmem:[#allocation2 + $0x30] sm:$0xff]  ;;  %v433_v34 = vrot.slane %v5743_v31, 1  ;;  %v435_v39 = vrot.slane %v5758_v37, 1 }
  0x34   : > { %297 = vst.msk [vmem:[#allocation2 + $0x91] sm:$0xff] %vm230_vm0, %v5688_v17  ;;  %298 = vst.msk [vmem:[#allocation2 + $0x99] sm:$0xff] %vm230_vm0, %v5691_v18  ;;  %v5755_v35 = vld [vmem:[#allocation2 + $0x38] sm:$0xff]  ;;  %v437_v36 = vrot.slane %v5745_v32, 1  ;;  %v5767_v42 = vld [vmem:[#allocation2 + $0x40] sm:$0x3] }
  0x35   : > { %10588 = vst [vmem:[#allocation16_spill] sm:$0xff] %v5701_v20  ;;  %10589 = vst [vmem:[#allocation17_spill] sm:$0xff] %v5704_v21  ;;  %v438_v38 = vrot.slane %v5755_v35, 1  ;;  %v5763_v40 = vld [vmem:[#allocation2 + $0x48] sm:$0xff]  ;;  %v5765_v41 = vld [vmem:[#allocation2 + $0x50] sm:$0xff]  ;;  %v5770_v43 = vsel %vm426_vm2, %v432_v33, %v433_v34  ;;  %v5784_v49 = vsel %vm426_vm2, %v433_v34, %v435_v39  ;;  %v440_v50 = vrot.slane %v5767_v42, 1 }
  0x36   : > { %10590 = vst [vmem:[#allocation18_spill] sm:$0xff] %v5707_v22  ;;  %299 = vst.msk [vmem:[#allocation2 + $0xa9] sm:$0xff] %vm230_vm0, %v5701_v20  ;;  %v442_v44 = vrot.slane %v5763_v40, 1  ;;  %v443_v45 = vrot.slane %v5765_v41, 1  ;;  %618 = vrot.lane.b32.xlu1 %v5770_v43, %s5457_s22  ;;  %v5789_v51 = vld [vmem:[#allocation2 + $0x58] sm:$0x3] }
  0x37   : > { %300 = vst.msk [vmem:[#allocation2 + $0xb1] sm:$0xff] %vm230_vm0, %v5704_v21  ;;  %10591 = vst [vmem:[#allocation19_spill] sm:$0xff] %v5715_v23  ;;  %v5777_v46 = vsel %vm426_vm2, %v437_v36, %v438_v38  ;;  %v5779_v47 = vld [vmem:[#allocation2 + $0x60] sm:$0xff]  ;;  %v5803_v57 = vsel %vm426_vm2, %v438_v38, %v440_v50  ;;  %v445_v58 = vrot.slane %v5789_v51, 1  ;;  %v5844_v36 = vld [vmem:[%s5628_s21 + $0xc8] sm:$0xff] }
  0x38   : > { %301 = vst.msk [vmem:[#allocation2 + $0xc1] sm:$0xff] %vm230_vm0, %v5707_v22  ;;  %10592 = vst [vmem:[#allocation20_spill] sm:$0xff] %v5720_v24  ;;  %v5781_v48 = vld [vmem:[#allocation2 + $0x68] sm:$0xff]  ;;  %622 = vrot.lane.b32.xlu0 %v5777_v46, %s5457_s22  ;;  %v5792_v52 = vsel %vm426_vm2, %v442_v44, %v443_v45  ;;  %v447_v53 = vrot.slane %v5779_v47, 1  ;;  %v5808_v59 = vld [vmem:[#allocation2 + $0x70] sm:$0x3] }
  0x39   : > { %10593 = vst [vmem:[#allocation21_spill] sm:$0xff] %v5723_v25  ;;  %302 = vst.msk [vmem:[#allocation2 + $0xc9] sm:$0xff] %vm230_vm0, %v5715_v23  ;;  %v448_v54 = vrot.slane %v5781_v48, 1  ;;  %v5798_v55 = vld [vmem:[#allocation2 + $0x78] sm:$0xff]  ;;  %v5836_v33 = vsel %vm426_vm2, %v443_v45, %v445_v58  ;;  %v450_v34 = vrot.slane %v5808_v59, 1  ;;  %v5849_v38 = vld [vmem:[%s5628_s21 + $0xd0] sm:$0xff] }
  0x3a   : > { %303 = vst.msk [vmem:[#allocation2 + $0xd9] sm:$0xff] %vm230_vm0, %v5720_v24  ;;  %304 = vst.msk [vmem:[#allocation2 + $0xe1] sm:$0xff] %vm230_vm0, %v5723_v25  ;;  %620 = vrot.lane.b32.xlu1 %v5784_v49, %s5457_s22  ;;  %v5800_v56 = vld [vmem:[#allocation2 + $0x80] sm:$0xff]  ;;  %v452_v62 = vrot.slane %v5798_v55, 1  ;;  %v5852_v39 = vld [vmem:[%s5628_s21 + $0xd8] sm:$0xff] }
  0x3b   : > { %10594 = vst [vmem:[#allocation22_spill] sm:$0xff] %v5733_v27  ;;  %10595 = vst [vmem:[#allocation23_spill] sm:$0xff] %v5736_v28  ;;  %v5814_v61 = vsel %vm426_vm2, %v447_v53, %v448_v54  ;;  %v453_v63 = vrot.slane %v5800_v56, 1  ;;  %v5818_v10 = vld [vmem:[#allocation2 + $0x90] sm:$0xff]  ;;  %v5820_v11 = vld [vmem:[#allocation2 + $0x98] sm:$0xff] }
  0x3c   : > { %10596 = vst [vmem:[#allocation24_spill] sm:$0xff] %v5739_v29  ;;  %305 = vst.msk [vmem:[#allocation2 + $0xf1] sm:$0xff] %vm230_vm0, %v5733_v27  ;;  %626 = vrot.lane.b32.xlu0 %v5792_v52, %s5457_s22  ;;  %v5856_v44 = vld [vmem:[#allocation2 + $0x88] sm:$0x3]  ;;  %v5865_v45 = vld [vmem:[%s5628_s21 + $0xe0] sm:$0xff]  ;;  %v457_v58 = vrot.slane %v5818_v10, 1 }
  0x3d   : > { %306 = vst.msk [vmem:[#allocation2 + $0xf9] sm:$0xff] %vm230_vm0, %v5736_v28  ;;  %307 = vst.msk [vmem:[#allocation2 + $0x109] sm:$0xff] %vm230_vm0, %v5739_v29  ;;  %v5868_v50 = vld [vmem:[%s5628_s21 + $0xe8] sm:$0xff]  ;;  %v5871_v53 = vsel %vm426_vm2, %v452_v62, %v453_v63  ;;  %v458_v0 = vrot.slane %v5820_v11, 1  ;;  %v5886_v62 = vsel %vm426_vm2, %v448_v54, %v450_v34 }
  0x3e   : > { %10597 = vst [vmem:[#allocation25_spill] sm:$0xff] %v5803_v57  ;;  %10598 = vst [vmem:[#allocation26_spill] sm:$0xff] %v5811_v60  ;;  %624 = vrot.lane.b32.xlu1 %v5803_v57, %s5457_s22  ;;  %v6145_v57 = vld [vmem:[%s5628_s21 + $0xf8] sm:$0xff] }
  0x3f   : > { %10599 = vst [vmem:[#allocation27_spill] sm:$0xff] %v5814_v61  ;;  %308 = vst.msk [vmem:[#allocation2 + $0x111] sm:$0xff] %vm230_vm0, %v5811_v60 }
  0x40   : > { %10600 = vst [vmem:[#allocation28_spill] sm:$0xff] %v5827_v12  ;;  %10601 = vst [vmem:[#allocation29_spill] sm:$0xff] %v5830_v19  ;;  %630 = vrot.lane.b32.xlu0 %v5814_v61, %s5457_s22  ;;  %v5902_v54 = vld [vmem:[#allocation2 + $0xc8] sm:$0xff]  ;;  %v509_v61 = vrot.slane %v5656_v8, 2  ;;  %v513_v8 = vrot.slane %v5741_v30, 2 }
  0x41   : > { %10602 = vst [vmem:[#allocation30_spill] sm:$0xff] %v5833_v26  ;;  %10603 = vst [vmem:[#allocation31_spill] sm:$0xff] %v5836_v33  ;;  %v468_v27 = vrot.slane %v5902_v54, 1  ;;  %v5919_v25 = vld [vmem:[#allocation2 + $0xd8] sm:$0xff] }
  0x42   : > { %309 = vst.msk [vmem:[#allocation2 + $0x121] sm:$0xff] %vm230_vm0, %v5827_v12  ;;  %310 = vst.msk [vmem:[#allocation2 + $0x129] sm:$0xff] %vm230_vm0, %v5830_v19  ;;  %628 = vrot.lane.b32.xlu1 %v5836_v33, %s5457_s22  ;;  %v5900_v12 = vld [vmem:[#allocation2 + $0xc0] sm:$0xff]  ;;  %v472_v22 = vrot.slane %v5919_v25, 1 }
  0x43   : > { %10604 = vst [vmem:[#allocation32_spill] sm:$0xff] %v5844_v36  ;;  %311 = vst.msk [vmem:[#allocation2 + $0x139] sm:$0xff] %vm230_vm0, %v5833_v26  ;;  %v5891_v26 = vld [vmem:[#allocation2 + $0xa0] sm:$0x3]  ;;  %v467_v28 = vrot.slane %v5900_v12, 1  ;;  %v5938_v20 = vld [vmem:[#allocation2 + $0xf0] sm:$0xff] }
  0x44   : > { %10605 = vst [vmem:[#allocation33_spill] sm:$0xff] %v5849_v38  ;;  %10606 = vst [vmem:[#allocation34_spill] sm:$0xff] %v5852_v39  ;;  %634 = vrot.lane.b32.xlu0 %v5871_v53, %s5457_s22  ;;  %v460_v60 = vrot.slane %v5891_v26, 1  ;;  %v477_v16 = vrot.slane %v5938_v20, 1  ;;  %v5957_v14 = vld [vmem:[#allocation2 + $0x108] sm:$0xff] }
  0x45   : > { %312 = vst.msk [vmem:[#allocation2 + $0x141] sm:$0xff] %vm230_vm0, %v5844_v36  ;;  %313 = vst.msk [vmem:[#allocation2 + $0x151] sm:$0xff] %vm230_vm0, %v5849_v38  ;;  %v5883_v38 = vld [vmem:[#allocation2 + $0xb0] sm:$0xff]  ;;  %v455_v36 = vrot.slane %v5856_v44, 1  ;;  %v5932_v23 = vsel %vm426_vm2, %v467_v28, %v468_v27  ;;  %v5948_v28 = vld [vmem:[#allocation2 + $0xe8] sm:$0x3] }
  0x46   : > { %314 = vst.msk [vmem:[#allocation2 + $0x159] sm:$0xff] %vm230_vm0, %v5852_v39  ;;  %10607 = vst [vmem:[#allocation35_spill] sm:$0xff] %v5865_v45  ;;  %v5881_v39 = vld [vmem:[#allocation2 + $0xa8] sm:$0xff]  ;;  %v463_v19 = vrot.slane %v5883_v38, 1  ;;  %632 = vrot.lane.b32.xlu1 %v5886_v62, %s5457_s22  ;;  %v475_v13 = vrot.slane %v5948_v28, 1  ;;  %v482_v5 = vrot.slane %v5957_v14, 1 }
  0x47   : > { %10608 = vst [vmem:[#allocation36_spill] sm:$0xff] %v5868_v50  ;;  %10609 = vst [vmem:[#allocation37_spill] sm:$0xff] %v5871_v53  ;;  %v5905_v34 = vsel %vm426_vm2, %v453_v63, %v455_v36  ;;  %v5921_v63 = vld [vmem:[#allocation2 + $0xe0] sm:$0xff]  ;;  %v5924_v36 = vsel %vm426_vm2, %v458_v0, %v460_v60 }
  0x48   : > { %315 = vst.msk [vmem:[#allocation2 + $0x169] sm:$0xff] %vm230_vm0, %v5865_v45  ;;  %316 = vst.msk [vmem:[#allocation2 + $0x171] sm:$0xff] %vm230_vm0, %v5868_v50  ;;  %v5894_v45 = vsel %vm426_vm2, %v457_v58, %v458_v0  ;;  %v462_v50 = vrot.slane %v5881_v39, 1  ;;  %v5910_v58 = vld [vmem:[#allocation2 + $0xb8] sm:$0x3]  ;;  %v473_v21 = vrot.slane %v5921_v63, 1 }
  0x49   : > { %10610 = vst [vmem:[#allocation38_spill] sm:$0xff] %v5886_v62  ;;  %10611 = vst [vmem:[#allocation39_spill] sm:$0xff] %v5894_v45  ;;  %638 = vrot.lane.b32.xlu0 %v5894_v45, %s5457_s22  ;;  %v465_v24 = vrot.slane %v5910_v58, 1  ;;  %v5940_v0 = vld [vmem:[#allocation2 + $0xf8] sm:$0xff]  ;;  %v5976_v3 = vld [vmem:[#allocation2 + $0x120] sm:$0xff]  ;;  %v10626_v62 = vmov 0.0  }
  0x4a   : > { %10612 = vst [vmem:[#allocation40_spill] sm:$0xff] %v5905_v34  ;;  %v5913_v29 = vsel %vm426_vm2, %v462_v50, %v463_v19  ;;  %636 = vrot.lane.b32.xlu1 %v5905_v34, %s5457_s22  ;;  %10614 = vst [vmem:[#allocation42_spill] sm:$0xff] %v5924_v36  ;;  %v5929_v50 = vld [vmem:[#allocation2 + $0xd0] sm:$0x3]  ;;  %v5951_v17 = vsel %vm426_vm2, %v472_v22, %v473_v21  ;;  %v478_v15 = vrot.slane %v5940_v0, 1 }
  0x4b   : > { %10613 = vst [vmem:[#allocation41_spill] sm:$0xff] %v5913_v29  ;;  %10615 = vst [vmem:[#allocation43_spill] sm:$0xff] %v5932_v23  ;;  %v5943_v60 = vsel %vm426_vm2, %v463_v19, %v465_v24  ;;  %v470_v18 = vrot.slane %v5929_v50, 1  ;;  %v5959_v24 = vld [vmem:[#allocation2 + $0x110] sm:$0xff]  ;;  %v5967_v22 = vld [vmem:[#allocation2 + $0x100] sm:$0x3] }
  0x4c   : > { %10616 = vst [vmem:[#allocation44_spill] sm:$0xff] %v5943_v60  ;;  %10617 = vst [vmem:[#allocation45_spill] sm:$0xff] %v5951_v17  ;;  %v5970_v6 = vsel %vm426_vm2, %v477_v16, %v478_v15  ;;  %v483_v4 = vrot.slane %v5959_v24, 1  ;;  %v480_v2 = vrot.slane %v5967_v22, 1  ;;  %v5986_v16 = vld [vmem:[#allocation2 + $0x118] sm:$0x3] }
  0x4d   : > { %642 = vrot.lane.b32.xlu0 %v5913_v29, %s5457_s22  ;;  %v5962_v19 = vsel %vm426_vm2, %v468_v27, %v470_v18  ;;  %10619 = vst [vmem:[#allocation47_spill] sm:$0xff] %v5970_v6  ;;  %v5978_v18 = vld [vmem:[#allocation2 + $0x128] sm:$0xff]  ;;  %v5981_v27 = vsel %vm426_vm2, %v473_v21, %v475_v13  ;;  %v5997_v13 = vld [vmem:[#allocation2 + $0x140] sm:$0xff]  ;;  %v6014_v29 = vld [vmem:[#allocation2 + $0x150] sm:$0xff] }
  0x4e   : > { %640 = vrot.lane.b32.xlu1 %v5924_v36, %s5457_s22  ;;  %10618 = vst [vmem:[#allocation46_spill] sm:$0xff] %v5962_v19  ;;  %10620 = vst [vmem:[#allocation48_spill] sm:$0xff] %v5981_v27  ;;  %v5989_v1 = vsel %vm426_vm2, %v482_v5, %v483_v4  ;;  %v6000_v21 = vsel %vm426_vm2, %v478_v15, %v480_v2  ;;  %v6005_v5 = vld [vmem:[#allocation2 + $0x130] sm:$0x3]  ;;  %v6016_v2 = vld [vmem:[#allocation2 + $0x158] sm:$0xff]  ;;  %v497_v45 = vrot.slane %v6014_v29, 1 }
  0x4f   : > { %10621 = vst [vmem:[#allocation49_spill] sm:$0xff] %v5989_v1  ;;  %10622 = vst [vmem:[#allocation50_spill] sm:$0xff] %v6000_v21  ;;  %v10629_v53 = vrot.slane %v6016_v2, 1 }
  0x50   : > { %2243 = vst.msk [vmem:[#allocation3] sm:$0xff] %vm1414_vm3, %v10626_v62  ;;  %2244 = vst.msk [vmem:[#allocation3 + $0x8] sm:$0xff] %vm1414_vm3, %v10626_v62 }
  0x51   : > { %646 = vrot.lane.b32.xlu0 %v5932_v23, %s5457_s22  ;;  %2247 = vst.msk [vmem:[#allocation3 + $0x18] sm:$0xff] %vm1414_vm3, %v10626_v62  ;;  %2248 = vst.msk [vmem:[#allocation3 + $0x20] sm:$0xff] %vm1414_vm3, %v10626_v62 }
  0x52   : > { %644 = vrot.lane.b32.xlu1 %v5943_v60, %s5457_s22  ;;  %v5995_v60 = vld [vmem:[#allocation2 + $0x138] sm:$0xff]  ;;  %2250 = vst.msk [vmem:[#allocation3 + $0x30] sm:$0xff] %vm1414_vm3, %v10626_v62  ;;  %2251 = vst.msk [vmem:[#allocation3 + $0x38] sm:$0xff] %vm1414_vm3, %v10626_v62 }
  0x53   : > { %v492_v36 = vrot.slane %v5995_v60, 1  ;;  %2253 = vst.msk [vmem:[#allocation3 + $0x48] sm:$0xff] %vm1414_vm3, %v10626_v62  ;;  %2254 = vst.msk [vmem:[#allocation3 + $0x50] sm:$0xff] %vm1414_vm3, %v10626_v62 }
  0x54   : > { %2256 = vst.msk [vmem:[#allocation3 + $0x60] sm:$0xff] %vm1414_vm3, %v10626_v62  ;;  %2257 = vst.msk [vmem:[#allocation3 + $0x68] sm:$0xff] %vm1414_vm3, %v10626_v62 }
  0x55   : > { %650 = vrot.lane.b32.xlu0 %v5951_v17, %s5457_s22  ;;  %v487_v17 = vrot.slane %v5976_v3, 1  ;;  %2259 = vst.msk [vmem:[#allocation3 + $0x78] sm:$0xff] %vm1414_vm3, %v10626_v62  ;;  %2260 = vst.msk [vmem:[#allocation3 + $0x80] sm:$0xff] %vm1414_vm3, %v10626_v62 }
  0x56   : > { %648 = vrot.lane.b32.xlu1 %v5962_v19, %s5457_s22  ;;  %v488_v19 = vrot.slane %v5978_v18, 1  ;;  %2262 = vst.msk [vmem:[#allocation3 + $0x90] sm:$0xff] %vm1414_vm3, %v10626_v62  ;;  %2263 = vst.msk [vmem:[#allocation3 + $0x98] sm:$0xff] %vm1414_vm3, %v10626_v62 }
  0x57   : > { %2265 = vst.msk [vmem:[#allocation3 + $0xa8] sm:$0xff] %vm1414_vm3, %v10626_v62  ;;  %2266 = vst.msk [vmem:[#allocation3 + $0xb0] sm:$0xff] %vm1414_vm3, %v10626_v62 }
  0x58   : > { %v6008_v23 = vsel %vm426_vm2, %v487_v17, %v488_v19  ;;  %v6024_v17 = vld [vmem:[#allocation2 + $0x148] sm:$0x3]  ;;  %2268 = vst.msk [vmem:[#allocation3 + $0xc0] sm:$0xff] %vm1414_vm3, %v10626_v62  ;;  %2269 = vst.msk [vmem:[#allocation3 + $0xc8] sm:$0xff] %vm1414_vm3, %v10626_v62 }
  0x59   : > { %654 = vrot.lane.b32.xlu0 %v5970_v6, %s5457_s22  ;;  %v485_v6 = vrot.slane %v5986_v16, 1  ;;  %10623 = vst [vmem:[#allocation51_spill] sm:$0xff] %v6008_v23  ;;  %2271 = vst.msk [vmem:[#allocation3 + $0xd8] sm:$0xff] %vm1414_vm3, %v10626_v62 }
  0x5a   : > { %652 = vrot.lane.b32.xlu1 %v5981_v27, %s5457_s22  ;;  %v493_v27 = vrot.slane %v5997_v13, 1  ;;  %2272 = vst.msk [vmem:[#allocation3 + $0xe0] sm:$0xff] %vm1414_vm3, %v10626_v62  ;;  %2274 = vst.msk [vmem:[#allocation3 + $0xf0] sm:$0xff] %vm1414_vm3, %v10626_v62 }
  0x5b   : > { %v6019_v15 = vsel %vm426_vm2, %v483_v4, %v485_v6  ;;  %v6033_v4 = vld [vmem:[#allocation2 + $0x168] sm:$0xff]  ;;  %v6035_v6 = vld [vmem:[#allocation2 + $0x170] sm:$0xff]  ;;  %2275 = vst.msk [vmem:[#allocation3 + $0xf8] sm:$0xff] %vm1414_vm3, %v10626_v62  ;;  %2277 = vst.msk [vmem:[#allocation3 + $0x108] sm:$0xff] %vm1414_vm3, %v10626_v62 }
  0x5c   : > { %10624 = vst [vmem:[#allocation52_spill] sm:$0xff] %v6019_v15  ;;  %v6027_v34 = vsel %vm426_vm2, %v492_v36, %v493_v27  ;;  %2278 = vst.msk [vmem:[#allocation3 + $0x110] sm:$0xff] %vm1414_vm3, %v10626_v62 }
  0x5d   : > { %658 = vrot.lane.b32.xlu0 %v5989_v1, %s5457_s22  ;;  %v490_v1 = vrot.slane %v6005_v5, 1  ;;  %10625 = vst [vmem:[#allocation53_spill] sm:$0xff] %v6027_v34  ;;  %2280 = vst.msk [vmem:[#allocation3 + $0x120] sm:$0xff] %vm1414_vm3, %v10626_v62 }
  0x5e   : > { %656 = vrot.lane.b32.xlu1 %v6000_v21, %s5457_s22  ;;  %2281 = vst.msk [vmem:[#allocation3 + $0x128] sm:$0xff] %vm1414_vm3, %v10626_v62  ;;  %2283 = vst.msk [vmem:[#allocation3 + $0x138] sm:$0xff] %vm1414_vm3, %v10626_v62  ;;  %v495_v21 = vrot.slane %v6024_v17, 1 }
  0x5f   : > { %2284 = vst.msk [vmem:[#allocation3 + $0x140] sm:$0xff] %vm1414_vm3, %v10626_v62  ;;  %2286 = vst.msk [vmem:[#allocation3 + $0x150] sm:$0xff] %vm1414_vm3, %v10626_v62  ;;  %v6110_v36 = vsel %vm426_vm2, %v488_v19, %v490_v1  ;;  %v502_v1 = vrot.slane %v6033_v4, 1  ;;  %v503_v19 = vrot.slane %v6035_v6, 1 }
  0x60   : > { %2287 = vst.msk [vmem:[#allocation3 + $0x158] sm:$0xff] %vm1414_vm3, %v10626_v62  ;;  %2289 = vst.msk [vmem:[#allocation3 + $0x168] sm:$0xff] %vm1414_vm3, %v10626_v62  ;;  %v6132_v33 = vsel %vm426_vm2, %v493_v27, %v495_v21  ;;  %v10634_v27 = vrot.slane %v6016_v2, 1 }
  0x61   : > { %662 = vrot.lane.b32.xlu0 %v6008_v23, %s5457_s22  ;;  %2290 = vst.msk [vmem:[#allocation3 + $0x170] sm:$0xff] %vm1414_vm3, %v10626_v62  ;;  %2292 = vst.msk [vmem:[#allocation3 + $0x180] sm:$0xff] %vm1414_vm3, %v10626_v62  ;;  %v6118_v23 = vld [vmem:[#allocation2 + $0x160] sm:$0x3] }
  0x62   : > { %660 = vrot.lane.b32.xlu1 %v6019_v15, %s5457_s22  ;;  %2293 = vst.msk [vmem:[#allocation3 + $0x188] sm:$0xff] %vm1414_vm3, %v10626_v62  ;;  %2295 = vst.msk [vmem:[#allocation3 + $0x198] sm:$0xff] %vm1414_vm3, %v10626_v62  ;;  %v6114_v15 = vld [vmem:[%s5628_s21 + $0xf0] sm:$0xff] }
  0x63   : > { %2296 = vst.msk [vmem:[#allocation3 + $0x1a0] sm:$0xff] %vm1414_vm3, %v10626_v62  ;;  %10627 = vst [vmem:[#allocation54_spill] sm:$0xff] %v6110_v36  ;;  %v6125_v62 = vsel %vm426_vm2, %v497_v45, %v10629_v53  ;;  %v6140_v45 = vsel %vm426_vm2, %v502_v1, %v503_v19  ;;  %v508_v53 = vrot.slane %v5654_v7, 2 }
  0x64   : > { %10628 = vst [vmem:[#allocation55_spill] sm:$0xff] %v6114_v15  ;;  %317 = vst.msk [vmem:[#allocation2 + $0x181] sm:$0xff] %vm230_vm0, %v6114_v15  ;;  %v6137_v15 = vld [vmem:[#allocation2 + $0x178] sm:$0x3] }
  0x65   : > { %666 = vrot.lane.b32.xlu0 %v6027_v34, %s5457_s22  ;;  %10630 = vst [vmem:[#allocation56_spill] sm:$0xff] %v6125_v62  ;;  %10631 = vst [vmem:[#allocation57_spill] sm:$0xff] %v6132_v33  ;;  %v500_v34 = vrot.slane %v6118_v23, 1  ;;  %v505_v1 = vrot.slane %v6137_v15, 1  ;;  %v510_v7 = vsel %vm507_vm4, %v508_v53, %v509_v61  ;;  %v518_v53 = vrot.slane %v5745_v32, 2 }
  0x66   : > { %664 = vrot.lane.b32.xlu1 %v6110_v36, %s5457_s22  ;;  %10632 = vst [vmem:[#allocation58_spill] sm:$0xff] %v6140_v45  ;;  %10633 = vst [vmem:[#allocation59_spill] sm:$0xff] %v6145_v57 }
  0x67   : > { %318 = vst.msk [vmem:[#allocation2 + $0x189] sm:$0xff] %vm230_vm0, %v6145_v57  ;;  %v6154_v21 = vsel %vm426_vm2, %v10634_v27, %v500_v34  ;;  %v6165_v57 = vsel %vm426_vm2, %v503_v19, %v505_v1  ;;  %v511_v34 = vrot.slane %v5658_v9, 2  ;;  %v516_v19 = vrot.slane %v5758_v37, 2 }
  0x68   : > { %10635 = vst [vmem:[#allocation60_spill] sm:$0xff] %v6154_v21  ;;  %10636 = vst [vmem:[#allocation61_spill] sm:$0xff] %v6165_v57  ;;  %v523_v1 = vrot.slane %v5763_v40, 2 }
  0x69   : > { %670 = vrot.lane.b32.xlu0 %v6125_v62, %s5457_s22 }
  0x6a   : > { %668 = vrot.lane.b32.xlu1 %v6132_v33, %s5457_s22  ;;  %v514_v33 = vrot.slane %v5743_v31, 2 }
  0x6c   : > { %v6170_v27 = vsel %vm507_vm4, %v513_v8, %v514_v33  ;;  %v6187_v8 = vsel %vm507_vm4, %v514_v33, %v516_v19  ;;  %v526_v33 = vrot.slane %v5789_v51, 2  ;;  %v534_v19 = vrot.slane %v5800_v56, 2 }
  0x6d   : > { %674 = vrot.lane.b32.xlu0 %v6140_v45, %s5457_s22  ;;  %v519_v45 = vrot.slane %v5755_v35, 2 }
  0x6e   : > { %672 = vrot.lane.b32.xlu1 %v6154_v21, %s5457_s22  ;;  %v512_v21 = vsel %vm507_vm4, %v509_v61, %v511_v34  ;;  %v528_v61 = vrot.slane %v5779_v47, 2  ;;  %v529_v34 = vrot.slane %v5781_v48, 2 }
  0x6f   : > { %v6181_v9 = vsel %vm507_vm4, %v518_v53, %v519_v45  ;;  %v533_v53 = vrot.slane %v5798_v55, 2 }
  0x71   : > { %710 = vrot.lane.b32.xlu0 %v510_v7, %s5458_s23  ;;  %v524_v7 = vrot.slane %v5765_v41, 2  ;;  %v6219_v51 = vsel %vm507_vm4, %v533_v53, %v534_v19  ;;  %v544_v53 = vrot.slane %v5883_v38, 2 }
  0x72   : > { %676 = vrot.lane.b32.xlu1 %v6165_v57, %s5457_s22  ;;  %v521_v57 = vrot.slane %v5767_v42, 2  ;;  %v6206_v42 = vsel %vm507_vm4, %v528_v61, %v529_v34  ;;  %10639 = vst [vmem:[#allocation64_spill] sm:$0xff] %v6219_v51  ;;  %v539_v61 = vrot.slane %v5820_v11, 2 }
  0x73   : > { %v6193_v37 = vsel %vm507_vm4, %v523_v1, %v524_v7  ;;  %10638 = vst [vmem:[#allocation63_spill] sm:$0xff] %v6206_v42  ;;  %v6213_v1 = vsel %vm507_vm4, %v524_v7, %v526_v33  ;;  %v536_v7 = vrot.slane %v5856_v44, 2  ;;  %v543_v33 = vrot.slane %v5881_v39, 2 }
  0x74   : > { %10637 = vst [vmem:[#allocation62_spill] sm:$0xff] %v6193_v37 }
  0x75   : > { %714 = vrot.lane.b32.xlu0 %v6170_v27, %s5458_s23  ;;  %v6245_v44 = vsel %vm507_vm4, %v543_v33, %v544_v53  ;;  %v554_v33 = vrot.slane %v5921_v63, 2 }
  0x76   : > { %712 = vrot.lane.b32.xlu1 %v512_v21, %s5458_s23  ;;  %v6200_v21 = vsel %vm507_vm4, %v519_v45, %v521_v57  ;;  %v531_v57 = vrot.slane %v5808_v59, 2  ;;  %v538_v45 = vrot.slane %v5818_v10, 2  ;;  %10641 = vst [vmem:[#allocation66_spill] sm:$0xff] %v6245_v44 }
  0x78   : > { %v6232_v59 = vsel %vm507_vm4, %v538_v45, %v539_v61  ;;  %v549_v45 = vrot.slane %v5902_v54, 2 }
  0x79   : > { %718 = vrot.lane.b32.xlu0 %v6181_v9, %s5458_s23  ;;  %10640 = vst [vmem:[#allocation65_spill] sm:$0xff] %v6232_v59 }
  0x7a   : > { %716 = vrot.lane.b32.xlu1 %v6187_v8, %s5458_s23 }
  0x7d   : > { %722 = vrot.lane.b32.xlu0 %v6193_v37, %s5458_s23  ;;  %v6226_v37 = vsel %vm507_vm4, %v529_v34, %v531_v57  ;;  %v541_v34 = vrot.slane %v5891_v26, 2  ;;  %v548_v57 = vrot.slane %v5900_v12, 2 }
  0x7e   : > { %720 = vrot.lane.b32.xlu1 %v6200_v21, %s5458_s23 }
  0x7f   : > { %v6258_v26 = vsel %vm507_vm4, %v548_v57, %v549_v45  ;;  %v559_v57 = vrot.slane %v5940_v0, 2 }
  0x80   : > { %10642 = vst [vmem:[#allocation67_spill] sm:$0xff] %v6258_v26 }
  0x81   : > { %726 = vrot.lane.b32.xlu0 %v6206_v42, %s5458_s23  ;;  %v6239_v42 = vsel %vm507_vm4, %v534_v19, %v536_v7  ;;  %v546_v19 = vrot.slane %v5910_v58, 2  ;;  %v553_v7 = vrot.slane %v5919_v25, 2 }
  0x82   : > { %724 = vrot.lane.b32.xlu1 %v6213_v1, %s5458_s23 }
  0x83   : > { %v6271_v58 = vsel %vm507_vm4, %v553_v7, %v554_v33  ;;  %v564_v7 = vrot.slane %v5959_v24, 2 }
  0x84   : > { %10643 = vst [vmem:[#allocation68_spill] sm:$0xff] %v6271_v58 }
  0x85   : > { %730 = vrot.lane.b32.xlu0 %v6219_v51, %s5458_s23  ;;  %v6252_v51 = vsel %vm507_vm4, %v539_v61, %v541_v34  ;;  %v551_v61 = vrot.slane %v5929_v50, 2  ;;  %v558_v34 = vrot.slane %v5938_v20, 2 }
  0x86   : > { %728 = vrot.lane.b32.xlu1 %v6226_v37, %s5458_s23 }
  0x87   : > { %v6284_v50 = vsel %vm507_vm4, %v558_v34, %v559_v57  ;;  %v569_v34 = vrot.slane %v5978_v18, 2 }
  0x88   : > { %10644 = vst [vmem:[#allocation69_spill] sm:$0xff] %v6284_v50 }
  0x89   : > { %734 = vrot.lane.b32.xlu0 %v6232_v59, %s5458_s23  ;;  %v6265_v59 = vsel %vm507_vm4, %v544_v53, %v546_v19  ;;  %v556_v53 = vrot.slane %v5948_v28, 2  ;;  %v563_v19 = vrot.slane %v5957_v14, 2 }
  0x8a   : > { %732 = vrot.lane.b32.xlu1 %v6239_v42, %s5458_s23 }
  0x8b   : > { %v6297_v28 = vsel %vm507_vm4, %v563_v19, %v564_v7  ;;  %v574_v19 = vrot.slane %v5997_v13, 2 }
  0x8c   : > { %10645 = vst [vmem:[#allocation70_spill] sm:$0xff] %v6297_v28 }
  0x8d   : > { %738 = vrot.lane.b32.xlu0 %v6245_v44, %s5458_s23  ;;  %v6278_v44 = vsel %vm507_vm4, %v549_v45, %v551_v61  ;;  %v561_v45 = vrot.slane %v5967_v22, 2  ;;  %v568_v61 = vrot.slane %v5976_v3, 2 }
  0x8e   : > { %736 = vrot.lane.b32.xlu1 %v6252_v51, %s5458_s23 }
  0x8f   : > { %v6310_v22 = vsel %vm507_vm4, %v568_v61, %v569_v34  ;;  %v579_v61 = vrot.slane %v6016_v2, 2 }
  0x90   : > { %10647 = vst [vmem:[#allocation72_spill] sm:$0xff] %v6310_v22 }
  0x91   : > { %742 = vrot.lane.b32.xlu0 %v6258_v26, %s5458_s23  ;;  %v6291_v26 = vsel %vm507_vm4, %v554_v33, %v556_v53  ;;  %v566_v33 = vrot.slane %v5986_v16, 2  ;;  %v573_v53 = vrot.slane %v5995_v60, 2 }
  0x92   : > { %740 = vrot.lane.b32.xlu1 %v6265_v59, %s5458_s23 }
  0x93   : > { %v6323_v16 = vsel %vm507_vm4, %v573_v53, %v574_v19  ;;  %v583_v53 = vrot.slane %v6033_v4, 2 }
  0x94   : > { %10649 = vst [vmem:[#allocation74_spill] sm:$0xff] %v6323_v16 }
  0x95   : > { %746 = vrot.lane.b32.xlu0 %v6271_v58, %s5458_s23  ;;  %v6304_v58 = vsel %vm507_vm4, %v559_v57, %v561_v45  ;;  %v571_v57 = vrot.slane %v6005_v5, 2  ;;  %v578_v45 = vrot.slane %v6014_v29, 2  ;;  %v576_v5 = vrot.slane %v6024_v17, 2 }
  0x96   : > { %744 = vrot.lane.b32.xlu1 %v6278_v44, %s5458_s23  ;;  %10646 = vst [vmem:[#allocation71_spill] sm:$0xff] %v6304_v58  ;;  %v581_v17 = vrot.slane %v6118_v23, 2 }
  0x99   : > { %750 = vrot.lane.b32.xlu0 %v6284_v50, %s5458_s23  ;;  %v6317_v50 = vsel %vm507_vm4, %v564_v7, %v566_v33  ;;  %v6332_v7 = vsel %vm507_vm4, %v569_v34, %v571_v57  ;;  %v6338_v33 = vsel %vm507_vm4, %v578_v45, %v579_v61  ;;  %v6347_v34 = vsel %vm507_vm4, %v574_v19, %v576_v5 }
  0x9a   : > { %748 = vrot.lane.b32.xlu1 %v6291_v26, %s5458_s23  ;;  %10648 = vst [vmem:[#allocation73_spill] sm:$0xff] %v6317_v50  ;;  %10650 = vst [vmem:[#allocation75_spill] sm:$0xff] %v6332_v7  ;;  %v586_v19 = vrot.slane %v6137_v15, 2 }
  0x9b   : > { %10651 = vst [vmem:[#allocation76_spill] sm:$0xff] %v6338_v33  ;;  %10652 = vst [vmem:[#allocation77_spill] sm:$0xff] %v6347_v34 }
  0x9d   : > { %754 = vrot.lane.b32.xlu0 %v6297_v28, %s5458_s23  ;;  %v6327_v28 = vpop.permute.xlu0 %614 }
  0x9e   : > { %752 = vrot.lane.b32.xlu1 %v6304_v58, %s5458_s23 }
  0xa1   : > { %758 = vrot.lane.b32.xlu0 %v6310_v22, %s5458_s23  ;;  %v584_v22 = vrot.slane %v6035_v6, 2  ;;  %v6342_v58 = vpop.permute.xlu0 %616 }
  0xa2   : > { %756 = vrot.lane.b32.xlu1 %v6317_v50, %s5458_s23 }
  0xa3   : > { %v6355_v45 = vsel %vm507_vm4, %v583_v53, %v584_v22  ;;  %v6374_v53 = vsel %vm507_vm4, %v584_v22, %v586_v19 }
  0xa4   : > { %10653 = vst [vmem:[#allocation78_spill] sm:$0xff] %v6355_v45  ;;  %10656 = vst [vmem:[#allocation81_spill] sm:$0xff] %v6374_v53 }
  0xa5   : > { %762 = vrot.lane.b32.xlu0 %v6323_v16, %s5458_s23 }
  0xa6   : > { %760 = vrot.lane.b32.xlu1 %v6332_v7, %s5458_s23  ;;  %v6362_v7 = vsel %vm507_vm4, %v579_v61, %v581_v17 }
  0xa7   : > { %10654 = vst [vmem:[#allocation79_spill] sm:$0xff] %v6362_v7 }
  0xa8   : > { %v6352_v57 = vpop.permute.xlu1 %618 }
  0xa9   : > { %766 = vrot.lane.b32.xlu0 %v6338_v33, %s5458_s23 }
  0xaa   : > { %v6357_v16 = vpop.permute.xlu0 %622  ;;  %764 = vrot.lane.b32.xlu1 %v6347_v34, %s5458_s23  ;;  %v10719_v34 = vld [vmem:[#allocation49_spill] sm:$0xff] }
  0xac   : > { %v6367_v23 = vpop.permute.xlu1 %620 }
  0xad   : > { %770 = vrot.lane.b32.xlu0 %v6355_v45, %s5458_s23 }
  0xae   : > { %v6369_v5 = vpop.permute.xlu0 %626  ;;  %768 = vrot.lane.b32.xlu1 %v6362_v7, %s5458_s23 }
  0xaf   : > { %10655 = vst [vmem:[#allocation80_spill] sm:$0xff] %v6369_v5 }
  0xb0   : > { %v6378_v61 = vpop.permute.xlu1 %624 }
  0xb1   : > { %806 = vrot.lane.b32.xlu0 %v5741_v30, %s5459_s24 }
  0xb2   : > { %v6380_v15 = vpop.permute.xlu0 %630  ;;  %772 = vrot.lane.b32.xlu1 %v6374_v53, %s5458_s23 }
  0xb3   : > { %10657 = vst [vmem:[#allocation82_spill] sm:$0xff] %v6380_v15  ;;  %v10727_v15 = vld [vmem:[#allocation53_spill] sm:$0xff] }
  0xb4   : > { %v6386_v17 = vpop.permute.xlu1 %628 }
  0xb5   : > { %810 = vrot.lane.b32.xlu0 %v5745_v32, %s5459_s24  ;;  %10658 = vst [vmem:[#allocation83_spill] sm:$0xff] %v6386_v17 }
  0xb6   : > { %v6388_v45 = vpop.permute.xlu0 %634  ;;  %808 = vrot.lane.b32.xlu1 %v5743_v31, %s5459_s24 }
  0xb7   : > { %10659 = vst [vmem:[#allocation84_spill] sm:$0xff] %v6388_v45 }
  0xb8   : > { %v6394_v30 = vpop.permute.xlu1 %632 }
  0xb9   : > { %814 = vrot.lane.b32.xlu0 %v5763_v40, %s5459_s24  ;;  %10660 = vst [vmem:[#allocation85_spill] sm:$0xff] %v6394_v30  ;;  %v10723_v30 = vld [vmem:[#allocation51_spill] sm:$0xff] }
  0xba   : > { %812 = vrot.lane.b32.xlu1 %v5755_v35, %s5459_s24 }
  0xbb   : > { %v6396_v22 = vpop.permute.xlu0 %638 }
  0xbc   : > { %10661 = vst [vmem:[#allocation86_spill] sm:$0xff] %v6396_v22  ;;  %v6402_v19 = vpop.permute.xlu1 %636 }
  0xbd   : > { %818 = vrot.lane.b32.xlu0 %v5779_v47, %s5459_s24  ;;  %10662 = vst [vmem:[#allocation87_spill] sm:$0xff] %v6402_v19 }
  0xbe   : > { %816 = vrot.lane.b32.xlu1 %v5765_v41, %s5459_s24 }
  0xbf   : > { %v6404_v53 = vpop.permute.xlu0 %642 }
  0xc0   : > { %10663 = vst [vmem:[#allocation88_spill] sm:$0xff] %v6404_v53  ;;  %v6410_v31 = vpop.permute.xlu1 %640 }
  0xc1   : > { %822 = vrot.lane.b32.xlu0 %v5798_v55, %s5459_s24  ;;  %10664 = vst [vmem:[#allocation89_spill] sm:$0xff] %v6410_v31  ;;  %v10707_v31 = vld [vmem:[#allocation43_spill] sm:$0xff] }
  0xc2   : > { %820 = vrot.lane.b32.xlu1 %v5781_v48, %s5459_s24 }
  0xc3   : > { %v6412_v7 = vpop.permute.xlu0 %646 }
  0xc4   : > { %10665 = vst [vmem:[#allocation90_spill] sm:$0xff] %v6412_v7  ;;  %v6418_v22 = vpop.permute.xlu1 %644  ;;  %v10702_v7 = vld [vmem:[#allocation40_spill] sm:$0xff] }
  0xc5   : > { %826 = vrot.lane.b32.xlu0 %v5818_v10, %s5459_s24  ;;  %10666 = vst [vmem:[#allocation91_spill] sm:$0xff] %v6418_v22  ;;  %v10703_v22 = vld [vmem:[#allocation41_spill] sm:$0xff] }
  0xc6   : > { %824 = vrot.lane.b32.xlu1 %v5800_v56, %s5459_s24 }
  0xc7   : > { %v6420_v33 = vpop.permute.xlu0 %650 }
  0xc8   : > { %10667 = vst [vmem:[#allocation92_spill] sm:$0xff] %v6420_v33  ;;  %v6426_v55 = vpop.permute.xlu1 %648 }
  0xc9   : > { %830 = vrot.lane.b32.xlu0 %v5881_v39, %s5459_s24  ;;  %10668 = vst [vmem:[#allocation93_spill] sm:$0xff] %v6426_v55 }
  0xca   : > { %828 = vrot.lane.b32.xlu1 %v5820_v11, %s5459_s24 }
  0xcb   : > { %v6428_v53 = vpop.permute.xlu0 %654 }
  0xcc   : > { %10669 = vst [vmem:[#allocation94_spill] sm:$0xff] %v6428_v53  ;;  %v6434_v48 = vpop.permute.xlu1 %652  ;;  %v10699_v53 = vld [vmem:[#allocation39_spill] sm:$0xff] }
  0xcd   : > { %834 = vrot.lane.b32.xlu0 %v5900_v12, %s5459_s24  ;;  %10670 = vst [vmem:[#allocation95_spill] sm:$0xff] %v6434_v48 }
  0xce   : > { %832 = vrot.lane.b32.xlu1 %v5883_v38, %s5459_s24 }
  0xcf   : > { %v6436_v10 = vpop.permute.xlu0 %658 }
  0xd0   : > { %10671 = vst [vmem:[#allocation96_spill] sm:$0xff] %v6436_v10  ;;  %v6442_v56 = vpop.permute.xlu1 %656 }
  0xd1   : > { %838 = vrot.lane.b32.xlu0 %v5919_v25, %s5459_s24  ;;  %10672 = vst [vmem:[#allocation97_spill] sm:$0xff] %v6442_v56  ;;  %v10698_v56 = vld [vmem:[#allocation38_spill] sm:$0xff] }
  0xd2   : > { %836 = vrot.lane.b32.xlu1 %v5902_v54, %s5459_s24 }
  0xd3   : > { %v6444_v33 = vpop.permute.xlu0 %662 }
  0xd4   : > { %10673 = vst [vmem:[#allocation98_spill] sm:$0xff] %v6444_v33  ;;  %v6450_v11 = vpop.permute.xlu1 %660  ;;  %v10694_v33 = vld [vmem:[#allocation31_spill] sm:$0xff] }
  0xd5   : > { %842 = vrot.lane.b32.xlu0 %v5938_v20, %s5459_s24  ;;  %10674 = vst [vmem:[#allocation99_spill] sm:$0xff] %v6450_v11 }
  0xd6   : > { %840 = vrot.lane.b32.xlu1 %v5921_v63, %s5459_s24 }
  0xd7   : > { %v6452_v12 = vpop.permute.xlu0 %666 }
  0xd8   : > { %10675 = vst [vmem:[#allocation100_spill] sm:$0xff] %v6452_v12  ;;  %v6458_v25 = vpop.permute.xlu1 %664 }
  0xd9   : > { %846 = vrot.lane.b32.xlu0 %v5957_v14, %s5459_s24  ;;  %10676 = vst [vmem:[#allocation101_spill] sm:$0xff] %v6458_v25 }
  0xda   : > { %844 = vrot.lane.b32.xlu1 %v5940_v0, %s5459_s24 }
  0xdb   : > { %v6460_v38 = vpop.permute.xlu0 %670 }
  0xdc   : > { %10677 = vst [vmem:[#allocation102_spill] sm:$0xff] %v6460_v38  ;;  %v6466_v20 = vpop.permute.xlu1 %668  ;;  %v10690_v38 = vld [vmem:[#allocation25_spill] sm:$0xff] }
  0xdd   : > { %850 = vrot.lane.b32.xlu0 %v5976_v3, %s5459_s24  ;;  %10678 = vst [vmem:[#allocation103_spill] sm:$0xff] %v6466_v20  ;;  %v10691_v20 = vld [vmem:[#allocation27_spill] sm:$0xff] }
  0xde   : > { %848 = vrot.lane.b32.xlu1 %v5959_v24, %s5459_s24  ;;  %v6492_v24 = vld [vmem:[#allocation2 + $0x180] sm:$0xff] }
  0xdf   : > { %v6468_v54 = vpop.permute.xlu0 %674  ;;  %10682 = vst [vmem:[#allocation107_spill] sm:$0xff] %v6492_v24 }
  0xe0   : > { %10679 = vst [vmem:[#allocation104_spill] sm:$0xff] %v6468_v54  ;;  %v6474_v14 = vpop.permute.xlu1 %672 }
  0xe1   : > { %854 = vrot.lane.b32.xlu0 %v5995_v60, %s5459_s24  ;;  %10680 = vst [vmem:[#allocation105_spill] sm:$0xff] %v6474_v14 }
  0xe2   : > { %852 = vrot.lane.b32.xlu1 %v5978_v18, %s5459_s24 }
  0xe3   : > { %v6476_v63 = vpop.permute.xlu0 %710 }
  0xe4   : > { %v6482_v3 = vpop.permute.xlu1 %676 }
  0xe5   : > { %858 = vrot.lane.b32.xlu0 %v6014_v29, %s5459_s24  ;;  %10681 = vst [vmem:[#allocation106_spill] sm:$0xff] %v6482_v3 }
  0xe6   : > { %856 = vrot.lane.b32.xlu1 %v5997_v13, %s5459_s24  ;;  %v6506_v13 = vld [vmem:[#allocation2 + $0x188] sm:$0xff] }
  0xe7   : > { %v6484_v0 = vpop.permute.xlu0 %714  ;;  %10684 = vst [vmem:[#allocation109_spill] sm:$0xff] %v6506_v13 }
  0xe8   : > { %v6490_v60 = vpop.permute.xlu1 %712 }
  0xe9   : > { %862 = vrot.lane.b32.xlu0 %v6033_v4, %s5459_s24 }
  0xea   : > { %860 = vrot.lane.b32.xlu1 %v6016_v2, %s5459_s24 }
  0xeb   : > { %v6494_v54 = vpop.permute.xlu0 %718 }
  0xec   : > { %v6500_v29 = vpop.permute.xlu1 %716 }
  0xed   : > { %866 = vrot.lane.b32.xlu0 %v6492_v24, %s5459_s24 }
  0xee   : > { %864 = vrot.lane.b32.xlu1 %v6035_v6, %s5459_s24 }
  0xef   : > { %v6502_v18 = vpop.permute.xlu0 %722 }
  0xf0   : > { %10683 = vst [vmem:[#allocation108_spill] sm:$0xff] %v6502_v18  ;;  %v6510_v4 = vpop.permute.xlu1 %720  ;;  %v10734_v18 = vld [vmem:[#allocation60_spill] sm:$0xff] }
  0xf1   : > { %902 = vrot.lane.b32.xlu0 %v5770_v43, %s5460_s25 }
  0xf2   : > { %868 = vrot.lane.b32.xlu1 %v6506_v13, %s5459_s24 }
  0xf3   : > { %v6512_v3 = vpop.permute.xlu0 %726 }
  0xf4   : > { %10685 = vst [vmem:[#allocation110_spill] sm:$0xff] %v6512_v3  ;;  %v6518_v2 = vpop.permute.xlu1 %724 }
  0xf5   : > { %906 = vrot.lane.b32.xlu0 %v5777_v46, %s5460_s25  ;;  %10686 = vst [vmem:[#allocation111_spill] sm:$0xff] %v6518_v2 }
  0xf6   : > { %904 = vrot.lane.b32.xlu1 %v5784_v49, %s5460_s25  ;;  %v10695_v49 = vld [vmem:[#allocation37_spill] sm:$0xff] }
  0xf7   : > { %v6520_v14 = vpop.permute.xlu0 %730 }
  0xf8   : > { %10687 = vst [vmem:[#allocation112_spill] sm:$0xff] %v6520_v14  ;;  %v6526_v43 = vpop.permute.xlu1 %728  ;;  %v10715_v14 = vld [vmem:[#allocation47_spill] sm:$0xff] }
  0xf9   : > { %910 = vrot.lane.b32.xlu0 %v5792_v52, %s5460_s25  ;;  %10688 = vst [vmem:[#allocation113_spill] sm:$0xff] %v6526_v43 }
  0xfa   : > { %908 = vrot.lane.b32.xlu1 %v10690_v38, %s5460_s25 }
  0xfb   : > { %v6528_v6 = vpop.permute.xlu0 %734 }
  0xfc   : > { %10689 = vst [vmem:[#allocation114_spill] sm:$0xff] %v6528_v6  ;;  %v6534_v12 = vpop.permute.xlu1 %732 }
  0xfd   : > { %914 = vrot.lane.b32.xlu0 %v10691_v20, %s5460_s25  ;;  %10692 = vst [vmem:[#allocation25_spill] sm:$0xff] %v6534_v12  ;;  %v10711_v12 = vld [vmem:[#allocation45_spill] sm:$0xff] }
  0xfe   : > { %912 = vrot.lane.b32.xlu1 %v10694_v33, %s5460_s25 }
  0xff   : > { %v6536_v25 = vpop.permute.xlu0 %738 }
 0x100   : > { %10693 = vst [vmem:[#allocation27_spill] sm:$0xff] %v6536_v25  ;;  %v6542_v11 = vpop.permute.xlu1 %736 }
 0x101   : > { %918 = vrot.lane.b32.xlu0 %v10695_v49, %s5460_s25  ;;  %10696 = vst [vmem:[#allocation31_spill] sm:$0xff] %v6542_v11 }
 0x102   : > { %916 = vrot.lane.b32.xlu1 %v10698_v56, %s5460_s25 }
 0x103   : > { %v6544_v10 = vpop.permute.xlu0 %742 }
 0x104   : > { %10697 = vst [vmem:[#allocation37_spill] sm:$0xff] %v6544_v10  ;;  %v6550_v48 = vpop.permute.xlu1 %740  ;;  %v10706_v10 = vld [vmem:[#allocation42_spill] sm:$0xff] }
 0x105   : > { %922 = vrot.lane.b32.xlu0 %v10699_v53, %s5460_s25  ;;  %10700 = vst [vmem:[#allocation38_spill] sm:$0xff] %v6550_v48 }
 0x106   : > { %920 = vrot.lane.b32.xlu1 %v10702_v7, %s5460_s25 }
 0x107   : > { %v6552_v55 = vpop.permute.xlu0 %746 }
 0x108   : > { %10701 = vst [vmem:[#allocation39_spill] sm:$0xff] %v6552_v55  ;;  %v6558_v25 = vpop.permute.xlu1 %744  ;;  %v10710_v55 = vld [vmem:[#allocation44_spill] sm:$0xff] }
 0x109   : > { %926 = vrot.lane.b32.xlu0 %v10703_v22, %s5460_s25  ;;  %10704 = vst [vmem:[#allocation40_spill] sm:$0xff] %v6558_v25 }
 0x10a   : > { %924 = vrot.lane.b32.xlu1 %v10706_v10, %s5460_s25 }
 0x10b   : > { %v6560_v11 = vpop.permute.xlu0 %750 }
 0x10c   : > { %10705 = vst [vmem:[#allocation41_spill] sm:$0xff] %v6560_v11  ;;  %v6566_v6 = vpop.permute.xlu1 %748  ;;  %v10714_v11 = vld [vmem:[#allocation46_spill] sm:$0xff] }
 0x10d   : > { %930 = vrot.lane.b32.xlu0 %v10707_v31, %s5460_s25  ;;  %10708 = vst [vmem:[#allocation42_spill] sm:$0xff] %v6566_v6 }
 0x10e   : > { %928 = vrot.lane.b32.xlu1 %v10710_v55, %s5460_s25 }
 0x10f   : > { %v6568_v48 = vpop.permute.xlu0 %754 }
 0x110   : > { %10709 = vst [vmem:[#allocation43_spill] sm:$0xff] %v6568_v48  ;;  %v6574_v19 = vpop.permute.xlu1 %752  ;;  %v10718_v48 = vld [vmem:[#allocation48_spill] sm:$0xff] }
 0x111   : > { %934 = vrot.lane.b32.xlu0 %v10711_v12, %s5460_s25  ;;  %10712 = vst [vmem:[#allocation44_spill] sm:$0xff] %v6574_v19 }
 0x112   : > { %932 = vrot.lane.b32.xlu1 %v10714_v11, %s5460_s25 }
 0x113   : > { %v6576_v25 = vpop.permute.xlu0 %758 }
 0x114   : > { %10713 = vst [vmem:[#allocation45_spill] sm:$0xff] %v6576_v25  ;;  %v6582_v45 = vpop.permute.xlu1 %756  ;;  %v10722_v25 = vld [vmem:[#allocation50_spill] sm:$0xff] }
 0x115   : > { %938 = vrot.lane.b32.xlu0 %v10715_v14, %s5460_s25  ;;  %10716 = vst [vmem:[#allocation46_spill] sm:$0xff] %v6582_v45 }
 0x116   : > { %936 = vrot.lane.b32.xlu1 %v10718_v48, %s5460_s25 }
 0x117   : > { %v6584_v6 = vpop.permute.xlu0 %762 }
 0x118   : > { %10717 = vst [vmem:[#allocation47_spill] sm:$0xff] %v6584_v6  ;;  %v6590_v43 = vpop.permute.xlu1 %760  ;;  %v10726_v6 = vld [vmem:[#allocation52_spill] sm:$0xff] }
 0x119   : > { %942 = vrot.lane.b32.xlu0 %v10719_v34, %s5460_s25  ;;  %10720 = vst [vmem:[#allocation48_spill] sm:$0xff] %v6590_v43 }
 0x11a   : > { %940 = vrot.lane.b32.xlu1 %v10722_v25, %s5460_s25 }
 0x11b   : > { %v6592_v19 = vpop.permute.xlu0 %766 }
 0x11c   : > { %10721 = vst [vmem:[#allocation49_spill] sm:$0xff] %v6592_v19  ;;  %v6598_v3 = vpop.permute.xlu1 %764 }
 0x11d   : > { %946 = vrot.lane.b32.xlu0 %v10723_v30, %s5460_s25  ;;  %10724 = vst [vmem:[#allocation50_spill] sm:$0xff] %v6598_v3  ;;  %v592_v3 = vrot.slane %v6506_v13, 1 }
 0x11e   : > { %944 = vrot.lane.b32.xlu1 %v10726_v6, %s5460_s25 }
 0x11f   : > { %v6600_v45 = vpop.permute.xlu0 %770 }
 0x120   : > { %10725 = vst [vmem:[#allocation115_spill] sm:$0xff] %v6600_v45  ;;  %v6606_v2 = vpop.permute.xlu1 %768  ;;  %v591_v45 = vrot.slane %v6492_v24, 1  ;;  %v6632_v24 = vld [vmem:[#allocation2 + $0x190] sm:$0x3] }
 0x121   : > { %950 = vrot.lane.b32.xlu0 %v10727_v15, %s5460_s25  ;;  %10728 = vst [vmem:[#allocation52_spill] sm:$0xff] %v6606_v2  ;;  %v10730_v15 = vld [vmem:[#allocation57_spill] sm:$0xff]  ;;  %v373_v2 = vld [vmem:[%s10360_s1] sm:$0xff]  ;;  %10732 = vst [vmem:[#allocation117_spill] sm:$0xff] %v6632_v24  ;;  %v594_v5 = vrot.slane %v6632_v24, 1 }
 0x122   : > { %948 = vrot.lane.b32.xlu1 %v6110_v36, %s5460_s25  ;;  %v374_v36 = vld [vmem:[%s10360_s1 + $0x8] sm:$0xff]  ;;  %v6635_v30 = vsel %vm426_vm2, %v591_v45, %v592_v3 }
 0x123   : > { %v6608_v43 = vpop.permute.xlu0 %806  ;;  %v5330_v13 = vpack.c.bf16 %v374_v36, %v373_v2  ;;  %10733 = vst [vmem:[#allocation118_spill] sm:$0xff] %v6635_v30  ;;  %v376_v36 = vld [vmem:[%s10360_s1 + $0x18] sm:$0xff]  ;;  %v10735_v24 = vld [vmem:[#allocation61_spill] sm:$0xff]  ;;  %v6657_v50 = vsel %vm426_vm2, %v592_v3, %v594_v5 }
 0x124   : > { %v6614_v19 = vpop.permute.xlu1 %772  ;;  %10736 = vst [vmem:[#allocation119_spill] sm:$0xff] %v6657_v50 }
 0x125   : > { %954 = vrot.lane.b32.xlu0 %v6125_v62, %s5460_s25  ;;  %10729 = vst [vmem:[#allocation116_spill] sm:$0xff] %v6614_v19  ;;  %v10731_v62 = vld [vmem:[#allocation58_spill] sm:$0xff]  ;;  %5331 = vmatprep.subr.bf16.mxu0 %v5330_v13 }
 0x126   : > { %952 = vrot.lane.b32.xlu1 %v10730_v15, %s5460_s25  ;;  %5333 = vmatpush3.bf16.msra.mxu0 %v5330_v13 }
 0x127   : > { %v6618_v17 = vpop.permute.xlu0 %810  ;;  %5354 = vmatprep.subr.bf16.mxu1 %v5330_v13 }
 0x128   : > { %v6630_v19 = vpop.permute.xlu1 %808  ;;  %5357 = vmatpush3.bf16.msra.mxu1 %v5330_v13 }
 0x129   : > { %958 = vrot.lane.b32.xlu0 %v10731_v62, %s5460_s25  ;;  %v375_v62 = vld [vmem:[%s10360_s1 + $0x10] sm:$0xff] }
 0x12a   : > { %956 = vrot.lane.b32.xlu1 %v10734_v18, %s5460_s25  ;;  %v5334_v2 = vpack.c.bf16 %v376_v36, %v375_v62  ;;  %v377_v62 = vld [vmem:[%s10360_s1 + $0x20] sm:$0xf] }
 0x12b   : > { %v6637_v15 = vpop.permute.xlu0 %814 }
 0x12c   : > { %v6650_v45 = vpop.permute.xlu1 %812  ;;  %5335 = vmatprep.subr.bf16.mxu0 %v5334_v2  ;;  %5355 = vmatprep.subr.bf16.mxu1 %v5334_v2 }
 0x12d   : > { %962 = vrot.lane.b32.xlu0 %v6635_v30, %s5460_s25  ;;  %5337 = vmatpush3.bf16.msra.mxu0 %v5334_v2 }
 0x12e   : > { %960 = vrot.lane.b32.xlu1 %v10735_v24, %s5460_s25  ;;  %5358 = vmatpush3.bf16.msra.mxu1 %v5334_v2 }
 0x12f   : > { %v6652_v18 = vpop.permute.xlu0 %818  ;;  %5164 = vmatprep.subr.msk.mxu0 %vm1742_vm5, %v377_v62  ;;  %5356 = vmatprep.subr.msk.mxu1 %vm1742_vm5, %v377_v62 }
 0x130   : > { %v6661_v30 = vpop.permute.xlu1 %816 }
 0x131   : > { %998 = vrot.lane.b32.xlu0 %v6170_v27, %s5461_s8  ;;  %5165 = vmatpush3.msk.msra.mxu0 %vm1742_vm5, %v377_v62 }
 0x132   : > { %964 = vrot.lane.b32.xlu1 %v6657_v50, %s5460_s25  ;;  %5359 = vmatpush3.msk.msra.mxu1 %vm1742_vm5, %v377_v62 }
 0x133   : > { %v6666_v13 = vpop.permute.xlu0 %822 }
 0x134   : > { %v6675_v27 = vpop.permute.xlu1 %820 }
 0x135   : > { %1094 = vrot.lane.b32.xlu0 %v5745_v32, %s5462_s11 }
 0x136   : > { %1000 = vrot.lane.b32.xlu1 %v6187_v8, %s5461_s8 }
 0x137   : > { %v6678_v5 = vpop.permute.xlu0 %826 }
 0x138   : > { %v6684_v3 = vpop.permute.xlu1 %824 }
 0x139   : > { %1190 = vrot.lane.b32.xlu0 %v5777_v46, %s5463_s12 }
 0x13a   : > { %1096 = vrot.lane.b32.xlu1 %v5755_v35, %s5462_s11 }
 0x13b   : > { %v6686_v36 = vpop.permute.xlu0 %830 }
 0x13c   : > { %v6692_v32 = vpop.permute.xlu1 %828 }
 0x13d   : > { %1286 = vrot.lane.b32.xlu0 %v6181_v9, %s5464_s13 }
 0x13e   : > { %1192 = vrot.lane.b32.xlu1 %v10690_v38, %s5463_s12 }
 0x13f   : > { %v6694_v2 = vpop.permute.xlu0 %834 }
 0x140   : > { %10737 = vst [vmem:[#allocation120_spill] sm:$0xff] %v6694_v2  ;;  %v6700_v46 = vpop.permute.xlu1 %832 }
 0x141   : > { %1288 = vrot.lane.b32.xlu0 %v6200_v21, %s5464_s13  ;;  %10738 = vst [vmem:[#allocation121_spill] sm:$0xff] %v6700_v46 }
 0x142   : > { %1002 = vrot.lane.b32.xlu1 %v6181_v9, %s5461_s8  ;;  %v10744_v9 = vld [vmem:[#allocation62_spill] sm:$0xff] }
 0x143   : > { %v6702_v8 = vpop.permute.xlu0 %838 }
 0x144   : > { %10739 = vst [vmem:[#allocation122_spill] sm:$0xff] %v6702_v8  ;;  %v6708_v35 = vpop.permute.xlu1 %836 }
 0x145   : > { %1098 = vrot.lane.b32.xlu0 %v5763_v40, %s5462_s11  ;;  %10740 = vst [vmem:[#allocation123_spill] sm:$0xff] %v6708_v35  ;;  %v10760_v35 = vld [vmem:[#allocation65_spill] sm:$0xff] }
 0x146   : > { %1004 = vrot.lane.b32.xlu1 %v6200_v21, %s5461_s8 }
 0x147   : > { %v6710_v62 = vpop.permute.xlu0 %842 }
 0x148   : > { %10741 = vst [vmem:[#allocation124_spill] sm:$0xff] %v6710_v62  ;;  %v6716_v38 = vpop.permute.xlu1 %840 }
 0x149   : > { %1194 = vrot.lane.b32.xlu0 %v5792_v52, %s5463_s12  ;;  %10742 = vst [vmem:[#allocation125_spill] sm:$0xff] %v6716_v38 }
 0x14a   : > { %1100 = vrot.lane.b32.xlu1 %v5765_v41, %s5462_s11 }
 0x14b   : > { %v6718_v50 = vpop.permute.xlu0 %846 }
 0x14c   : > { %10743 = vst [vmem:[#allocation126_spill] sm:$0xff] %v6718_v50  ;;  %v6724_v40 = vpop.permute.xlu1 %844 }
 0x14d   : > { %1290 = vrot.lane.b32.xlu0 %v10744_v9, %s5464_s13  ;;  %10745 = vst [vmem:[#allocation62_spill] sm:$0xff] %v6724_v40 }
 0x14e   : > { %1196 = vrot.lane.b32.xlu1 %v10694_v33, %s5463_s12 }
 0x14f   : > { %v6726_v8 = vpop.permute.xlu0 %850 }
 0x150   : > { %10746 = vst [vmem:[#allocation127_spill] sm:$0xff] %v6726_v8  ;;  %v6732_v52 = vpop.permute.xlu1 %848 }
 0x151   : > { %1292 = vrot.lane.b32.xlu0 %v6213_v1, %s5464_s13  ;;  %10747 = vst [vmem:[#allocation128_spill] sm:$0xff] %v6732_v52  ;;  %v6808_v52 = vld [vmem:[#allocation2 + $0x90] sm:$0xff] }
 0x152   : > { %1006 = vrot.lane.b32.xlu1 %v10744_v9, %s5461_s8 }
 0x153   : > { %v6734_v21 = vpop.permute.xlu0 %854 }
 0x154   : > { %10748 = vst [vmem:[#allocation129_spill] sm:$0xff] %v6734_v21  ;;  %v6740_v41 = vpop.permute.xlu1 %852  ;;  %v6752_v21 = vld [vmem:[#allocation2 + $0x68] sm:$0xff] }
 0x155   : > { %1102 = vrot.lane.b32.xlu0 %v5779_v47, %s5462_s11  ;;  %10749 = vst [vmem:[#allocation130_spill] sm:$0xff] %v6740_v41  ;;  %v10753_v47 = vld [vmem:[#allocation63_spill] sm:$0xff] }
 0x156   : > { %1008 = vrot.lane.b32.xlu1 %v6213_v1, %s5461_s8 }
 0x157   : > { %v6742_v50 = vpop.permute.xlu0 %858 }
 0x158   : > { %10750 = vst [vmem:[#allocation131_spill] sm:$0xff] %v6742_v50  ;;  %v6748_v33 = vpop.permute.xlu1 %856 }
 0x159   : > { %1198 = vrot.lane.b32.xlu0 %v10691_v20, %s5463_s12  ;;  %10751 = vst [vmem:[#allocation132_spill] sm:$0xff] %v6748_v33  ;;  %v10758_v33 = vld [vmem:[#allocation64_spill] sm:$0xff] }
 0x15a   : > { %1104 = vrot.lane.b32.xlu1 %v6752_v21, %s5462_s11 }
 0x15b   : > { %v6750_v8 = vpop.permute.xlu0 %862 }
 0x15c   : > { %10752 = vst [vmem:[#allocation133_spill] sm:$0xff] %v6750_v8  ;;  %v6758_v9 = vpop.permute.xlu1 %860  ;;  %v6772_v8 = vld [vmem:[#allocation2 + $0x78] sm:$0xff] }
 0x15d   : > { %1294 = vrot.lane.b32.xlu0 %v10753_v47, %s5464_s13  ;;  %10754 = vst [vmem:[#allocation63_spill] sm:$0xff] %v6758_v9 }
 0x15e   : > { %1200 = vrot.lane.b32.xlu1 %v10698_v56, %s5463_s12 }
 0x15f   : > { %v6760_v50 = vpop.permute.xlu0 %866 }
 0x160   : > { %10755 = vst [vmem:[#allocation134_spill] sm:$0xff] %v6760_v50  ;;  %v6766_v1 = vpop.permute.xlu1 %864 }
 0x161   : > { %1296 = vrot.lane.b32.xlu0 %v6226_v37, %s5464_s13  ;;  %10756 = vst [vmem:[#allocation135_spill] sm:$0xff] %v6766_v1 }
 0x162   : > { %1010 = vrot.lane.b32.xlu1 %v10753_v47, %s5461_s8  ;;  %v6788_v47 = vld [vmem:[#allocation2 + $0x80] sm:$0xff] }
 0x163   : > { %v6768_v20 = vpop.permute.xlu0 %902 }
 0x164   : > { %v6776_v9 = vpop.permute.xlu1 %868 }
 0x165   : > { %1106 = vrot.lane.b32.xlu0 %v6772_v8, %s5462_s11  ;;  %10757 = vst [vmem:[#allocation136_spill] sm:$0xff] %v6776_v9 }
 0x166   : > { %1012 = vrot.lane.b32.xlu1 %v6226_v37, %s5461_s8 }
 0x167   : > { %v6778_v50 = vpop.permute.xlu0 %906 }
 0x168   : > { %v6784_v56 = vpop.permute.xlu1 %904 }
 0x169   : > { %1202 = vrot.lane.b32.xlu0 %v10695_v49, %s5463_s12 }
 0x16a   : > { %1108 = vrot.lane.b32.xlu1 %v6788_v47, %s5462_s11 }
 0x16b   : > { %v6786_v1 = vpop.permute.xlu0 %910 }
 0x16c   : > { %v6794_v9 = vpop.permute.xlu1 %908 }
 0x16d   : > { %1298 = vrot.lane.b32.xlu0 %v10758_v33, %s5464_s13 }
 0x16e   : > { %1204 = vrot.lane.b32.xlu1 %v10702_v7, %s5463_s12 }
 0x16f   : > { %v6796_v41 = vpop.permute.xlu0 %914 }
 0x170   : > { %v6802_v37 = vpop.permute.xlu1 %912 }
 0x171   : > { %1300 = vrot.lane.b32.xlu0 %v6239_v42, %s5464_s13 }
 0x172   : > { %1014 = vrot.lane.b32.xlu1 %v10758_v33, %s5461_s8  ;;  %v6824_v33 = vld [vmem:[#allocation2 + $0x98] sm:$0xff] }
 0x173   : > { %v6804_v49 = vpop.permute.xlu0 %918  ;;  %10759 = vst [vmem:[#allocation64_spill] sm:$0xff] %v6824_v33 }
 0x174   : > { %v6812_v40 = vpop.permute.xlu1 %916 }
 0x175   : > { %1110 = vrot.lane.b32.xlu0 %v6808_v52, %s5462_s11 }
 0x176   : > { %1016 = vrot.lane.b32.xlu1 %v6239_v42, %s5461_s8 }
 0x177   : > { %v6814_v62 = vpop.permute.xlu0 %922 }
 0x178   : > { %v6820_v7 = vpop.permute.xlu1 %920 }
 0x179   : > { %1206 = vrot.lane.b32.xlu0 %v10699_v53, %s5463_s12 }
 0x17a   : > { %1112 = vrot.lane.b32.xlu1 %v6824_v33, %s5462_s11 }
 0x17b   : > { %v6822_v38 = vpop.permute.xlu0 %926 }
 0x17c   : > { %v6830_v2 = vpop.permute.xlu1 %924 }
 0x17d   : > { %1302 = vrot.lane.b32.xlu0 %v10760_v35, %s5464_s13 }
 0x17e   : > { %1208 = vrot.lane.b32.xlu1 %v10706_v10, %s5463_s12 }
 0x17f   : > { %v6832_v24 = vpop.permute.xlu0 %930 }
 0x180   : > { %10761 = vst [vmem:[#allocation65_spill] sm:$0xff] %v6832_v24  ;;  %v6838_v42 = vpop.permute.xlu1 %928 }
 0x181   : > { %1304 = vrot.lane.b32.xlu0 %v6252_v51, %s5464_s13 }
 0x182   : > { %1018 = vrot.lane.b32.xlu1 %v10760_v35, %s5461_s8 }
 0x183   : > { %v6840_v53 = vpop.permute.xlu0 %934 }
 0x184   : > { %10762 = vst [vmem:[#allocation137_spill] sm:$0xff] %v6840_v53  ;;  %v6846_v46 = vpop.permute.xlu1 %932  ;;  %v6858_v53 = vld [vmem:[#allocation2 + $0xb0] sm:$0xff] }
 0x185   : > { %1114 = vrot.lane.b32.xlu0 %v5881_v39, %s5462_s11  ;;  %v10766_v39 = vld [vmem:[#allocation66_spill] sm:$0xff] }
 0x186   : > { %1020 = vrot.lane.b32.xlu1 %v6252_v51, %s5461_s8 }
 0x187   : > { %v6848_v33 = vpop.permute.xlu0 %938 }
 0x188   : > { %10763 = vst [vmem:[#allocation138_spill] sm:$0xff] %v6848_v33  ;;  %v6854_v10 = vpop.permute.xlu1 %936 }
 0x189   : > { %1210 = vrot.lane.b32.xlu0 %v10703_v22, %s5463_s12  ;;  %10764 = vst [vmem:[#allocation139_spill] sm:$0xff] %v6854_v10 }
 0x18a   : > { %1116 = vrot.lane.b32.xlu1 %v6858_v53, %s5462_s11 }
 0x18b   : > { %v6856_v24 = vpop.permute.xlu0 %942 }
 0x18c   : > { %10765 = vst [vmem:[#allocation140_spill] sm:$0xff] %v6856_v24  ;;  %v6864_v35 = vpop.permute.xlu1 %940  ;;  %v6878_v24 = vld [vmem:[#allocation2 + $0xc0] sm:$0xff] }
 0x18d   : > { %1306 = vrot.lane.b32.xlu0 %v10766_v39, %s5464_s13  ;;  %10767 = vst [vmem:[#allocation66_spill] sm:$0xff] %v6864_v35 }
 0x18e   : > { %1212 = vrot.lane.b32.xlu1 %v10710_v55, %s5463_s12 }
 0x18f   : > { %v6866_v33 = vpop.permute.xlu0 %946 }
 0x190   : > { %10768 = vst [vmem:[#allocation141_spill] sm:$0xff] %v6866_v33  ;;  %v6872_v51 = vpop.permute.xlu1 %944 }
 0x191   : > { %1308 = vrot.lane.b32.xlu0 %v6265_v59, %s5464_s13  ;;  %10769 = vst [vmem:[#allocation142_spill] sm:$0xff] %v6872_v51  ;;  %v10775_v51 = vld [vmem:[#allocation67_spill] sm:$0xff] }
 0x192   : > { %1022 = vrot.lane.b32.xlu1 %v10766_v39, %s5461_s8  ;;  %v6894_v39 = vld [vmem:[#allocation2 + $0xc8] sm:$0xff] }
 0x193   : > { %v6874_v22 = vpop.permute.xlu0 %950 }
 0x194   : > { %10770 = vst [vmem:[#allocation143_spill] sm:$0xff] %v6874_v22  ;;  %v6882_v35 = vpop.permute.xlu1 %948 }
 0x195   : > { %1118 = vrot.lane.b32.xlu0 %v6878_v24, %s5462_s11  ;;  %10771 = vst [vmem:[#allocation144_spill] sm:$0xff] %v6882_v35 }
 0x196   : > { %1024 = vrot.lane.b32.xlu1 %v6265_v59, %s5461_s8 }
 0x197   : > { %v6884_v33 = vpop.permute.xlu0 %954 }
 0x198   : > { %10772 = vst [vmem:[#allocation145_spill] sm:$0xff] %v6884_v33  ;;  %v6890_v55 = vpop.permute.xlu1 %952 }
 0x199   : > { %1214 = vrot.lane.b32.xlu0 %v10707_v31, %s5463_s12  ;;  %10773 = vst [vmem:[#allocation146_spill] sm:$0xff] %v6890_v55 }
 0x19a   : > { %1120 = vrot.lane.b32.xlu1 %v6894_v39, %s5462_s11 }
 0x19b   : > { %v6892_v22 = vpop.permute.xlu0 %958 }
 0x19c   : > { %10774 = vst [vmem:[#allocation147_spill] sm:$0xff] %v6892_v22  ;;  %v6900_v35 = vpop.permute.xlu1 %956  ;;  %v6912_v22 = vld [vmem:[#allocation2 + $0xd8] sm:$0xff] }
 0x19d   : > { %1310 = vrot.lane.b32.xlu0 %v10775_v51, %s5464_s13  ;;  %10776 = vst [vmem:[#allocation67_spill] sm:$0xff] %v6900_v35  ;;  %10779 = vst [vmem:[#allocation150_spill] sm:$0xff] %v6912_v22 }
 0x19e   : > { %1216 = vrot.lane.b32.xlu1 %v10714_v11, %s5463_s12  ;;  %v5396_v11 = vld [vmem:[#allocation2] sm:$0xff] }
 0x19f   : > { %v6902_v33 = vpop.permute.xlu0 %962 }
 0x1a0   : > { %10777 = vst [vmem:[#allocation148_spill] sm:$0xff] %v6902_v33  ;;  %v6908_v59 = vpop.permute.xlu1 %960 }
 0x1a1   : > { %1312 = vrot.lane.b32.xlu0 %v6278_v44, %s5464_s13  ;;  %10778 = vst [vmem:[#allocation149_spill] sm:$0xff] %v6908_v59  ;;  %v1382_v59 = vsel %vm230_vm0, %v5396_v11, %v6327_v28  ;;  %v5398_v28 = vld [vmem:[#allocation2 + $0x8] sm:$0xff] }
 0x1a2   : > { %1026 = vrot.lane.b32.xlu1 %v10775_v51, %s5461_s8  ;;  %v1415_v55 = vsel %vm1414_vm3, %v1382_v59, %v6476_v63  ;;  %v1383_v11 = vsel %vm230_vm0, %v5398_v28, %v6342_v58 }
 0x1a3   : > { %v999_v31 = vpop.permute.xlu0 %998  ;;  %v1416_v63 = vsel %vm1414_vm3, %v1383_v11, %v6490_v60 }
 0x1a4   : > { %v6916_v35 = vpop.permute.xlu1 %964 }
 0x1a5   : > { %1122 = vrot.lane.b32.xlu0 %v6912_v22, %s5462_s11  ;;  %10780 = vst [vmem:[#allocation151_spill] sm:$0xff] %v6916_v35  ;;  %v1448_v35 = vsel %vm1447_vm6, %v1415_v55, %v6608_v43  ;;  %v10782_v55 = vld [vmem:[#allocation68_spill] sm:$0xff] }
 0x1a6   : > { %1028 = vrot.lane.b32.xlu1 %v6278_v44, %s5461_s8  ;;  %v6928_v44 = vld [vmem:[#allocation2 + $0xe0] sm:$0xff] }
 0x1a7   : > { %v1095_v33 = vpop.permute.xlu0 %1094  ;;  %10781 = vst [vmem:[#allocation152_spill] sm:$0xff] %v6928_v44 }
 0x1a8   : > { %v1001_v51 = vpop.permute.xlu1 %1000 }
 0x1a9   : > { %1218 = vrot.lane.b32.xlu0 %v10711_v12, %s5463_s12  ;;  %v1481_v12 = vsel %vm1480_vm7, %v1448_v35, %v6768_v20 }
 0x1aa   : > { %1124 = vrot.lane.b32.xlu1 %v6928_v44, %s5462_s11  ;;  %v1514_v43 = vsel %vm1513_vm8, %v1481_v12, %v999_v31  ;;  %v1449_v44 = vsel %vm1447_vm6, %v1416_v63, %v6630_v19 }
 0x1ab   : > { %v1191_v22 = vpop.permute.xlu0 %1190  ;;  %v1547_v10 = vsel %vm1546_vm9, %v1514_v43, %v1095_v33  ;;  %v1482_v58 = vsel %vm1480_vm7, %v1449_v44, %v6784_v56 }
 0x1ac   : > { %v1097_v59 = vpop.permute.xlu1 %1096  ;;  %v1580_v20 = vsel %vm1579_vm10, %v1547_v10, %v1191_v22  ;;  %v1515_v60 = vsel %vm1513_vm8, %v1482_v58, %v1001_v51  ;;  %v6959_v10 = vld [vmem:[#allocation2 + $0xf0] sm:$0xff]  ;;  %v5400_v51 = vld [vmem:[#allocation2 + $0x18] sm:$0xff] }
 0x1ad   : > { %1314 = vrot.lane.b32.xlu0 %v10782_v55, %s5464_s13  ;;  %v1548_v28 = vsel %vm1546_vm9, %v1515_v60, %v1097_v59  ;;  %v1384_v44 = vsel %vm230_vm0, %v5400_v51, %v6352_v57  ;;  %v6977_v58 = vld [vmem:[#allocation2 + $0xf8] sm:$0xff]  ;;  %v5404_v51 = vld [vmem:[#allocation2 + $0x30] sm:$0xff] }
 0x1ae   : > { %1220 = vrot.lane.b32.xlu1 %v10718_v48, %s5463_s12  ;;  %v1417_v12 = vsel %vm1414_vm3, %v1384_v44, %v6484_v0  ;;  %v1386_v44 = vsel %vm230_vm0, %v5404_v51, %v6357_v16 }
 0x1af   : > { %v1287_v35 = vpop.permute.xlu0 %1286  ;;  %v1450_v63 = vsel %vm1447_vm6, %v1417_v12, %v6618_v17  ;;  %v1419_v12 = vsel %vm1414_vm3, %v1386_v44, %v6494_v54 }
 0x1b0   : > { %v1613_v31 = vsel %vm1612_vm11, %v1580_v20, %v1287_v35  ;;  %v1193_v19 = vpop.permute.xlu1 %1192 }
 0x1b1   : > { %1316 = vrot.lane.b32.xlu0 %v6291_v26, %s5464_s13  ;;  %5166 = vmatprep.mubr.msk.f32.mxu0 %vm1645_vm12, %v1613_v31  ;;  %v1581_v56 = vsel %vm1579_vm10, %v1548_v28, %v1193_v19 }
 0x1b2   : > { %1030 = vrot.lane.b32.xlu1 %v10782_v55, %s5461_s8  ;;  %v1483_v55 = vsel %vm1480_vm7, %v1450_v63, %v6778_v50  ;;  %v1452_v63 = vsel %vm1447_vm6, %v1419_v12, %v6637_v15 }
 0x1b3   : > { %v1289_v33 = vpop.permute.xlu0 %1288 }
 0x1b4   : > { %v1614_v48 = vsel %vm1612_vm11, %v1581_v56, %v1289_v33  ;;  %v1003_v22 = vpop.permute.xlu1 %1002  ;;  %v10784_v56 = vld [vmem:[#allocation71_spill] sm:$0xff] }
 0x1b5   : > { %1126 = vrot.lane.b32.xlu0 %v6959_v10, %s5462_s11  ;;  %5167 = vmatmul.mubr.msk.f32.vlgmr.msra.gmra.mrb[0].mxu0 %vm1645_vm12, %v1614_v48  ;;  %v1516_v59 = vsel %vm1513_vm8, %v1483_v55, %v1003_v22  ;;  %v7005_v48 = vld [vmem:[#allocation2 + $0x108] sm:$0xff]  ;;  %v1485_v55 = vsel %vm1480_vm7, %v1452_v63, %v6786_v1 }
 0x1b6   : > { %1032 = vrot.lane.b32.xlu1 %v6291_v26, %s5461_s8  ;;  %v5402_v26 = vld [vmem:[#allocation2 + $0x20] sm:$0xff]  ;;  %v7069_v63 = vld [vmem:[#allocation2 + $0x128] sm:$0xff] }
 0x1b7   : > { %v1099_v11 = vpop.permute.xlu0 %1098  ;;  %v1385_v0 = vsel %vm230_vm0, %v5402_v26, %v6367_v23  ;;  %v5406_v26 = vld [vmem:[#allocation2 + $0x38] sm:$0xff] }
 0x1b8   : > { %v1005_v43 = vpop.permute.xlu1 %1004  ;;  %v1418_v17 = vsel %vm1414_vm3, %v1385_v0, %v6500_v29  ;;  %v1549_v35 = vsel %vm1546_vm9, %v1516_v59, %v1099_v11  ;;  %v1387_v54 = vsel %vm230_vm0, %v5406_v26, %v6378_v61  ;;  %v10792_v26 = vld [vmem:[#allocation72_spill] sm:$0xff] }
 0x1b9   : > { %1222 = vrot.lane.b32.xlu0 %v10715_v14, %s5463_s12  ;;  %v10783_v14 = vld [vmem:[#allocation69_spill] sm:$0xff]  ;;  %v1451_v50 = vsel %vm1447_vm6, %v1418_v17, %v6650_v45  ;;  %v1420_v15 = vsel %vm1414_vm3, %v1387_v54, %v6510_v4 }
 0x1ba   : > { %1128 = vrot.lane.b32.xlu1 %v6977_v58, %s5462_s11  ;;  %v1484_v60 = vsel %vm1480_vm7, %v1451_v50, %v6794_v9  ;;  %v1453_v1 = vsel %vm1447_vm6, %v1420_v15, %v6661_v30 }
 0x1bb   : > { %v1195_v57 = vpop.permute.xlu0 %1194  ;;  %v1517_v23 = vsel %vm1513_vm8, %v1484_v60, %v1005_v43  ;;  %v10786_v60 = vld [vmem:[#allocation73_spill] sm:$0xff] }
 0x1bc   : > { %v1101_v20 = vpop.permute.xlu1 %1100  ;;  %v1582_v31 = vsel %vm1579_vm10, %v1549_v35, %v1195_v57  ;;  %v7023_v57 = vld [vmem:[#allocation2 + $0x110] sm:$0xff] }
 0x1bd   : > { %1318 = vrot.lane.b32.xlu0 %v10783_v14, %s5464_s13  ;;  %v1550_v19 = vsel %vm1546_vm9, %v1517_v23, %v1101_v20 }
 0x1be   : > { %1224 = vrot.lane.b32.xlu1 %v10722_v25, %s5463_s12 }
 0x1bf   : > { %v1291_v28 = vpop.permute.xlu0 %1290 }
 0x1c0   : > { %v1615_v29 = vsel %vm1612_vm11, %v1582_v31, %v1291_v28  ;;  %v1197_v45 = vpop.permute.xlu1 %1196  ;;  %v7051_v28 = vld [vmem:[#allocation2 + $0x120] sm:$0xff] }
 0x1c1   : > { %1320 = vrot.lane.b32.xlu0 %v10784_v56, %s5464_s13  ;;  %5169 = vmatprep.mubr.msk.f32.mxu0 %vm1645_vm12, %v1615_v29  ;;  %v1583_v9 = vsel %vm1579_vm10, %v1550_v19, %v1197_v45  ;;  %v5408_v29 = vld [vmem:[#allocation2 + $0x48] sm:$0xff]  ;;  %v10787_v19 = vld [vmem:[#allocation80_spill] sm:$0xff] }
 0x1c2   : > { %1034 = vrot.lane.b32.xlu1 %v10783_v14, %s5461_s8  ;;  %v1486_v14 = vsel %vm1480_vm7, %v1453_v1, %v6802_v37 }
 0x1c3   : > { %v1293_v33 = vpop.permute.xlu0 %1292 }
 0x1c4   : > { %v1616_v25 = vsel %vm1612_vm11, %v1583_v9, %v1293_v33  ;;  %v1007_v22 = vpop.permute.xlu1 %1006  ;;  %v10788_v9 = vld [vmem:[#allocation108_spill] sm:$0xff] }
 0x1c5   : > { %1130 = vrot.lane.b32.xlu0 %v7005_v48, %s5462_s11  ;;  %5170 = vmatmul.mubr.msk.f32.gmra.mrb[2].mxu0 %vm1645_vm12, %v1616_v25  ;;  %v1518_v59 = vsel %vm1513_vm8, %v1485_v55, %v1007_v22  ;;  %v10789_v22 = vld [vmem:[#allocation51_spill] sm:$0xff] }
 0x1c6   : > { %1036 = vrot.lane.b32.xlu1 %v10784_v56, %s5461_s8  ;;  %v1388_v56 = vsel %vm230_vm0, %v5408_v29, %v10787_v19  ;;  %v10790_v55 = vld [vmem:[#allocation83_spill] sm:$0xff]  ;;  %v10796_v29 = vld [vmem:[#allocation110_spill] sm:$0xff] }
 0x1c7   : > { %v1103_v11 = vpop.permute.xlu0 %1102  ;;  %v1421_v33 = vsel %vm1414_vm3, %v1388_v56, %v10788_v9 }
 0x1c8   : > { %v1009_v43 = vpop.permute.xlu1 %1008  ;;  %v1551_v17 = vsel %vm1546_vm9, %v1518_v59, %v1103_v11  ;;  %v1454_v25 = vsel %vm1447_vm6, %v1421_v33, %v6652_v18  ;;  %v10791_v18 = vld [vmem:[#allocation111_spill] sm:$0xff] }
 0x1c9   : > { %1226 = vrot.lane.b32.xlu0 %v10719_v34, %s5463_s12  ;;  %v10785_v34 = vld [vmem:[#allocation70_spill] sm:$0xff]  ;;  %v1519_v61 = vsel %vm1513_vm8, %v1486_v14, %v1009_v43  ;;  %v1487_v44 = vsel %vm1480_vm7, %v1454_v25, %v6796_v41 }
 0x1ca   : > { %1132 = vrot.lane.b32.xlu1 %v7023_v57, %s5462_s11  ;;  %v5410_v43 = vld [vmem:[#allocation2 + $0x50] sm:$0xff] }
 0x1cb   : > { %v1199_v16 = vpop.permute.xlu0 %1198  ;;  %v1389_v59 = vsel %vm230_vm0, %v5410_v43, %v10790_v55  ;;  %v10800_v43 = vld [vmem:[#allocation74_spill] sm:$0xff] }
 0x1cc   : > { %v1105_v0 = vpop.permute.xlu1 %1104  ;;  %v1584_v20 = vsel %vm1579_vm10, %v1551_v17, %v1199_v16  ;;  %v1422_v16 = vsel %vm1414_vm3, %v1389_v59, %v10791_v18  ;;  %v10793_v17 = vld [vmem:[#allocation54_spill] sm:$0xff] }
 0x1cd   : > { %1322 = vrot.lane.b32.xlu0 %v10785_v34, %s5464_s13  ;;  %v1552_v35 = vsel %vm1546_vm9, %v1519_v61, %v1105_v0  ;;  %v1455_v41 = vsel %vm1447_vm6, %v1422_v16, %v6675_v27  ;;  %v10794_v61 = vld [vmem:[#allocation75_spill] sm:$0xff] }
 0x1ce   : > { %1228 = vrot.lane.b32.xlu1 %v10726_v6, %s5463_s12 }
 0x1cf   : > { %v1295_v50 = vpop.permute.xlu0 %1294 }
 0x1d0   : > { %v1617_v4 = vsel %vm1612_vm11, %v1584_v20, %v1295_v50  ;;  %v1201_v30 = vpop.permute.xlu1 %1200 }
 0x1d1   : > { %1324 = vrot.lane.b32.xlu0 %v10786_v60, %s5464_s13  ;;  %5172 = vmatprep.mubr.msk.f32.mxu0 %vm1645_vm12, %v1617_v4  ;;  %v1585_v37 = vsel %vm1579_vm10, %v1552_v35, %v1201_v30 }
 0x1d2   : > { %1038 = vrot.lane.b32.xlu1 %v10785_v34, %s5461_s8  ;;  %v1488_v34 = vsel %vm1480_vm7, %v1455_v41, %v6812_v40 }
 0x1d3   : > { %v1297_v31 = vpop.permute.xlu0 %1296 }
 0x1d4   : > { %v1618_v6 = vsel %vm1612_vm11, %v1585_v37, %v1297_v31  ;;  %v1011_v23 = vpop.permute.xlu1 %1010  ;;  %v5412_v37 = vld [vmem:[#allocation2 + $0x60] sm:$0xff]  ;;  %v10795_v31 = vld [vmem:[#allocation82_spill] sm:$0xff] }
 0x1d5   : > { %1134 = vrot.lane.b32.xlu0 %v7051_v28, %s5462_s11  ;;  %5173 = vmatmul.mubr.msk.f32.gmra.mrb[4].mxu0 %vm1645_vm12, %v1618_v6  ;;  %v1520_v11 = vsel %vm1513_vm8, %v1487_v44, %v1011_v23  ;;  %v1390_v6 = vsel %vm230_vm0, %v5412_v37, %v10795_v31  ;;  %v10798_v44 = vld [vmem:[#allocation85_spill] sm:$0xff] }
 0x1d6   : > { %1040 = vrot.lane.b32.xlu1 %v10786_v60, %s5461_s8  ;;  %v7097_v60 = vld [vmem:[#allocation2 + $0x138] sm:$0xff]  ;;  %v1423_v19 = vsel %vm1414_vm3, %v1390_v6, %v10796_v29 }
 0x1d7   : > { %v1107_v45 = vpop.permute.xlu0 %1106  ;;  %v1456_v56 = vsel %vm1447_vm6, %v1423_v19, %v6666_v13  ;;  %v10799_v13 = vld [vmem:[#allocation113_spill] sm:$0xff]  ;;  %v7163_v6 = vld [vmem:[#allocation2 + $0x158] sm:$0xff] }
 0x1d8   : > { %v1013_v51 = vpop.permute.xlu1 %1012  ;;  %v1553_v15 = vsel %vm1546_vm9, %v1520_v11, %v1107_v45  ;;  %v10797_v45 = vld [vmem:[#allocation53_spill] sm:$0xff]  ;;  %v1489_v33 = vsel %vm1480_vm7, %v1456_v56, %v6804_v49  ;;  %v1391_v11 = vsel %vm230_vm0, %v6752_v21, %v10798_v44  ;;  %v10808_v56 = vld [vmem:[#allocation76_spill] sm:$0xff] }
 0x1d9   : > { %1230 = vrot.lane.b32.xlu0 %v10789_v22, %s5463_s12  ;;  %v1521_v14 = vsel %vm1513_vm8, %v1488_v34, %v1013_v51  ;;  %v7115_v51 = vld [vmem:[#allocation2 + $0x140] sm:$0xff]  ;;  %v10801_v21 = vld [vmem:[#allocation57_spill] sm:$0xff] }
 0x1da   : > { %1136 = vrot.lane.b32.xlu1 %v7069_v63, %s5462_s11  ;;  %v10802_v34 = vld [vmem:[#allocation77_spill] sm:$0xff] }
 0x1db   : > { %v1203_v12 = vpop.permute.xlu0 %1202 }
 0x1dc   : > { %v1109_v54 = vpop.permute.xlu1 %1108  ;;  %v1586_v0 = vsel %vm1579_vm10, %v1553_v15, %v1203_v12  ;;  %v1424_v12 = vsel %vm1414_vm3, %v1391_v11, %v10799_v13 }
 0x1dd   : > { %1326 = vrot.lane.b32.xlu0 %v10792_v26, %s5464_s13  ;;  %v1554_v50 = vsel %vm1546_vm9, %v1521_v14, %v1109_v54  ;;  %v1457_v49 = vsel %vm1447_vm6, %v1424_v12, %v6684_v3  ;;  %v10810_v12 = vld [vmem:[#allocation79_spill] sm:$0xff] }
 0x1de   : > { %1232 = vrot.lane.b32.xlu1 %v10793_v17, %s5463_s12  ;;  %v1490_v18 = vsel %vm1480_vm7, %v1457_v49, %v6820_v7  ;;  %v7144_v17 = vld [vmem:[#allocation2 + $0x150] sm:$0xff]  ;;  %v7192_v49 = vld [vmem:[#allocation2 + $0x168] sm:$0xff] }
 0x1df   : > { %v1299_v1 = vpop.permute.xlu0 %1298 }
 0x1e0   : > { %v1619_v20 = vsel %vm1612_vm11, %v1586_v0, %v1299_v1  ;;  %v1205_v27 = vpop.permute.xlu1 %1204 }
 0x1e1   : > { %1328 = vrot.lane.b32.xlu0 %v10794_v61, %s5464_s13  ;;  %5175 = vmatprep.mubr.msk.f32.mxu0 %vm1645_vm12, %v1619_v20  ;;  %v1587_v40 = vsel %vm1579_vm10, %v1554_v50, %v1205_v27  ;;  %v10803_v20 = vld [vmem:[#allocation84_spill] sm:$0xff] }
 0x1e2   : > { %1042 = vrot.lane.b32.xlu1 %v10792_v26, %s5461_s8  ;;  %v1392_v50 = vsel %vm230_vm0, %v6772_v8, %v10803_v20  ;;  %v10804_v27 = vld [vmem:[#allocation112_spill] sm:$0xff]  ;;  %v10816_v20 = vmov 0.0  }
 0x1e3   : > { %v1301_v4 = vpop.permute.xlu0 %1300  ;;  %2249 = vst.msk [vmem:[#allocation3 + $0x28] sm:$0x3] %vm2245_vm13, %v10816_v20  ;;  %2246 = vst.msk [vmem:[#allocation3 + $0x10] sm:$0x3] %vm2245_vm13, %v10816_v20 }
 0x1e4   : > { %v1620_v35 = vsel %vm1612_vm11, %v1587_v40, %v1301_v4  ;;  %v1015_v30 = vpop.permute.xlu1 %1014  ;;  %v1425_v40 = vsel %vm1414_vm3, %v1392_v50, %v10804_v27  ;;  %2252 = vst.msk [vmem:[#allocation3 + $0x40] sm:$0x3] %vm2245_vm13, %v10816_v20  ;;  %2255 = vst.msk [vmem:[#allocation3 + $0x58] sm:$0x3] %vm2245_vm13, %v10816_v20 }
 0x1e5   : > { %1138 = vrot.lane.b32.xlu0 %v7097_v60, %s5462_s11  ;;  %5176 = vmatmul.mubr.msk.f32.gmra.mrb[6].mxu0 %vm1645_vm12, %v1620_v35  ;;  %v1522_v25 = vsel %vm1513_vm8, %v1489_v33, %v1015_v30  ;;  %v1458_v4 = vsel %vm1447_vm6, %v1425_v40, %v6678_v5  ;;  %v10805_v35 = vld [vmem:[#allocation56_spill] sm:$0xff]  ;;  %v10807_v5 = vld [vmem:[#allocation25_spill] sm:$0xff]  ;;  %2258 = vst.msk [vmem:[#allocation3 + $0x70] sm:$0x3] %vm2245_vm13, %v10816_v20  ;;  %2261 = vst.msk [vmem:[#allocation3 + $0x88] sm:$0x3] %vm2245_vm13, %v10816_v20 }
 0x1e6   : > { %1044 = vrot.lane.b32.xlu1 %v10794_v61, %s5461_s8  ;;  %v1491_v37 = vsel %vm1480_vm7, %v1458_v4, %v6814_v62  ;;  %2264 = vst.msk [vmem:[#allocation3 + $0xa0] sm:$0x3] %vm2245_vm13, %v10816_v20  ;;  %2267 = vst.msk [vmem:[#allocation3 + $0xb8] sm:$0x3] %vm2245_vm13, %v10816_v20  ;;  %v10819_v40 = vld [vmem:[#allocation121_spill] sm:$0xff] }
 0x1e7   : > { %v1111_v23 = vpop.permute.xlu0 %1110  ;;  %2270 = vst.msk [vmem:[#allocation3 + $0xd0] sm:$0x3] %vm2245_vm13, %v10816_v20  ;;  %2273 = vst.msk [vmem:[#allocation3 + $0xe8] sm:$0x3] %vm2245_vm13, %v10816_v20 }
 0x1e8   : > { %v1017_v9 = vpop.permute.xlu1 %1016  ;;  %v1555_v59 = vsel %vm1546_vm9, %v1522_v25, %v1111_v23  ;;  %v10806_v23 = vld [vmem:[#allocation87_spill] sm:$0xff]  ;;  %2276 = vst.msk [vmem:[#allocation3 + $0x100] sm:$0x3] %vm2245_vm13, %v10816_v20  ;;  %2279 = vst.msk [vmem:[#allocation3 + $0x118] sm:$0x3] %vm2245_vm13, %v10816_v20 }
 0x1e9   : > { %1234 = vrot.lane.b32.xlu0 %v10797_v45, %s5463_s12  ;;  %v1523_v54 = vsel %vm1513_vm8, %v1490_v18, %v1017_v9  ;;  %v1393_v29 = vsel %vm230_vm0, %v6788_v47, %v10806_v23  ;;  %v10809_v47 = vld [vmem:[#allocation60_spill] sm:$0xff]  ;;  %v10811_v18 = vld [vmem:[#allocation86_spill] sm:$0xff]  ;;  %2282 = vst.msk [vmem:[#allocation3 + $0x130] sm:$0x3] %vm2245_vm13, %v10816_v20  ;;  %2285 = vst.msk [vmem:[#allocation3 + $0x148] sm:$0x3] %vm2245_vm13, %v10816_v20 }
 0x1ea   : > { %1140 = vrot.lane.b32.xlu1 %v7115_v51, %s5462_s11  ;;  %v1426_v19 = vsel %vm1414_vm3, %v1393_v29, %v10807_v5  ;;  %2288 = vst.msk [vmem:[#allocation3 + $0x160] sm:$0x3] %vm2245_vm13, %v10816_v20  ;;  %2291 = vst.msk [vmem:[#allocation3 + $0x178] sm:$0x3] %vm2245_vm13, %v10816_v20 }
 0x1eb   : > { %v1207_v22 = vpop.permute.xlu0 %1206  ;;  %v1459_v62 = vsel %vm1447_vm6, %v1426_v19, %v6692_v32  ;;  %2294 = vst.msk [vmem:[#allocation3 + $0x190] sm:$0x3] %vm2245_vm13, %v10816_v20  ;;  %2297 = vst.msk [vmem:[#allocation3 + $0x1a8] sm:$0x3] %vm2245_vm13, %v10816_v20  ;;  %v10821_v19 = vld [vmem:[#allocation81_spill] sm:$0xff] }
 0x1ec   : > { %v1113_v55 = vpop.permute.xlu1 %1112  ;;  %v1588_v16 = vsel %vm1579_vm10, %v1555_v59, %v1207_v22  ;;  %v1492_v33 = vsel %vm1480_vm7, %v1459_v62, %v6830_v2 }
 0x1ed   : > { %1330 = vrot.lane.b32.xlu0 %v10800_v43, %s5464_s13  ;;  %v1556_v15 = vsel %vm1546_vm9, %v1523_v54, %v1113_v55 }
 0x1ee   : > { %1236 = vrot.lane.b32.xlu1 %v10801_v21, %s5463_s12  ;;  %v10812_v21 = vld [vmem:[#allocation114_spill] sm:$0xff] }
 0x1ef   : > { %v1303_v26 = vpop.permute.xlu0 %1302 }
 0x1f0   : > { %v1621_v41 = vsel %vm1612_vm11, %v1588_v16, %v1303_v26  ;;  %v1209_v3 = vpop.permute.xlu1 %1208  ;;  %v1394_v16 = vsel %vm230_vm0, %v6808_v52, %v10811_v18 }
 0x1f1   : > { %1332 = vrot.lane.b32.xlu0 %v10802_v34, %s5464_s13  ;;  %5178 = vmatprep.mubr.msk.f32.mxu0 %vm1645_vm12, %v1621_v41  ;;  %v1589_v7 = vsel %vm1579_vm10, %v1556_v15, %v1209_v3  ;;  %v1427_v54 = vsel %vm1414_vm3, %v1394_v16, %v10812_v21  ;;  %v10813_v15 = vld [vmem:[#allocation58_spill] sm:$0xff]  ;;  %v10828_v16 = vld [vmem:[#allocation65_spill] sm:$0xff] }
 0x1f2   : > { %1046 = vrot.lane.b32.xlu1 %v10800_v43, %s5461_s8  ;;  %v1460_v41 = vsel %vm1447_vm6, %v1427_v54, %v6686_v36  ;;  %v10829_v54 = vld [vmem:[#allocation117_spill] sm:$0xff] }
 0x1f3   : > { %v1305_v0 = vpop.permute.xlu0 %1304  ;;  %v1493_v3 = vsel %vm1480_vm7, %v1460_v41, %v6822_v38  ;;  %v10817_v38 = vld [vmem:[#allocation31_spill] sm:$0xff]  ;;  %v599_v41 = vrot.slane %v10829_v54, 2 }
 0x1f4   : > { %v1622_v1 = vsel %vm1612_vm11, %v1589_v7, %v1305_v0  ;;  %v1019_v14 = vpop.permute.xlu1 %1018  ;;  %v7211_v0 = vld [vmem:[#allocation2 + $0x170] sm:$0xff] }
 0x1f5   : > { %1142 = vrot.lane.b32.xlu0 %v7144_v17, %s5462_s11  ;;  %5179 = vmatmul.mubr.msk.f32.gmra.mrb[8].mxu0 %vm1645_vm12, %v1622_v1  ;;  %v1524_v31 = vsel %vm1513_vm8, %v1491_v37, %v1019_v14  ;;  %v10814_v1 = vld [vmem:[#allocation89_spill] sm:$0xff]  ;;  %v10815_v14 = vld [vmem:[#allocation64_spill] sm:$0xff] }
 0x1f6   : > { %1048 = vrot.lane.b32.xlu1 %v10802_v34, %s5461_s8  ;;  %v1395_v36 = vsel %vm230_vm0, %v10815_v14, %v10814_v1 }
 0x1f7   : > { %v1115_v61 = vpop.permute.xlu0 %1114  ;;  %v1428_v50 = vsel %vm1414_vm3, %v1395_v36, %v10817_v38  ;;  %v10832_v36 = vld [vmem:[#allocation123_spill] sm:$0xff] }
 0x1f8   : > { %v1021_v30 = vpop.permute.xlu1 %1020  ;;  %v1557_v9 = vsel %vm1546_vm9, %v1524_v31, %v1115_v61  ;;  %v10818_v61 = vld [vmem:[#allocation78_spill] sm:$0xff]  ;;  %v1461_v4 = vsel %vm1447_vm6, %v1428_v50, %v10819_v40 }
 0x1f9   : > { %1238 = vrot.lane.b32.xlu0 %v10805_v35, %s5463_s12  ;;  %v1525_v44 = vsel %vm1513_vm8, %v1492_v33, %v1021_v30  ;;  %v1494_v30 = vsel %vm1480_vm7, %v1461_v4, %v6838_v42  ;;  %v370_v4 = vld [vmem:[#allocation2 + $0x198] sm:$0xff] }
 0x1fa   : > { %1144 = vrot.lane.b32.xlu1 %v7163_v6, %s5462_s11 }
 0x1fb   : > { %v1211_v8 = vpop.permute.xlu0 %1210 }
 0x1fc   : > { %v1117_v45 = vpop.permute.xlu1 %1116  ;;  %v1590_v25 = vsel %vm1579_vm10, %v1557_v9, %v1211_v8  ;;  %v10820_v8 = vld [vmem:[#allocation61_spill] sm:$0xff]  ;;  %v10822_v9 = vld [vmem:[#allocation107_spill] sm:$0xff] }
 0x1fd   : > { %1334 = vrot.lane.b32.xlu0 %v10808_v56, %s5464_s13  ;;  %v1558_v13 = vsel %vm1546_vm9, %v1525_v44, %v1117_v45  ;;  %v5418_v44 = vld [vmem:[#allocation2 + $0xa8] sm:$0xff] }
 0x1fe   : > { %1240 = vrot.lane.b32.xlu1 %v10809_v47, %s5463_s12 }
 0x1ff   : > { %v1307_v22 = vpop.permute.xlu0 %1306 }
 0x200   : > { %v1623_v11 = vsel %vm1612_vm11, %v1590_v25, %v1307_v22  ;;  %v1213_v32 = vpop.permute.xlu1 %1212  ;;  %v596_v25 = vrot.slane %v10822_v9, 2  ;;  %v10823_v22 = vld [vmem:[#allocation109_spill] sm:$0xff] }
 0x201   : > { %1336 = vrot.lane.b32.xlu0 %v10810_v12, %s5464_s13  ;;  %5181 = vmatprep.mubr.msk.f32.mxu0 %vm1645_vm12, %v1623_v11  ;;  %v1591_v2 = vsel %vm1579_vm10, %v1558_v13, %v1213_v32  ;;  %v597_v47 = vrot.slane %v10823_v22, 2  ;;  %v10824_v11 = vld [vmem:[#allocation88_spill] sm:$0xff]  ;;  %v10825_v32 = vld [vmem:[#allocation27_spill] sm:$0xff] }
 0x202   : > { %1050 = vrot.lane.b32.xlu1 %v10808_v56, %s5461_s8  ;;  %v1396_v13 = vsel %vm230_vm0, %v5418_v44, %v10824_v11  ;;  %v10836_v44 = vld [vmem:[#allocation37_spill] sm:$0xff] }
 0x203   : > { %v1309_v43 = vpop.permute.xlu0 %1308  ;;  %v598_v21 = vsel %vm507_vm4, %v596_v25, %v597_v47  ;;  %v600_v50 = vsel %vm507_vm4, %v597_v47, %v599_v41  ;;  %v10835_v25 = vld [vmem:[#allocation90_spill] sm:$0xff]  ;;  %v10840_v41 = vld [vmem:[#allocation40_spill] sm:$0xff] }
 0x204   : > { %v1624_v55 = vsel %vm1612_vm11, %v1591_v2, %v1309_v43  ;;  %v1023_v59 = vpop.permute.xlu1 %1022  ;;  %v1429_v2 = vsel %vm1414_vm3, %v1396_v13, %v10825_v32  ;;  %v10826_v43 = vld [vmem:[#allocation120_spill] sm:$0xff] }
 0x205   : > { %1146 = vrot.lane.b32.xlu0 %v7192_v49, %s5462_s11  ;;  %5182 = vmatmul.mubr.msk.f32.gmra.mrb[10].mxu0 %vm1645_vm12, %v1624_v55  ;;  %v1526_v7 = vsel %vm1513_vm8, %v1493_v3, %v1023_v59  ;;  %v1462_v55 = vsel %vm1447_vm6, %v1429_v2, %v10826_v43  ;;  %v10827_v59 = vld [vmem:[#allocation118_spill] sm:$0xff]  ;;  %v10830_v3 = vld [vmem:[#allocation91_spill] sm:$0xff]  ;;  %v10838_v43 = vld [vmem:[#allocation137_spill] sm:$0xff] }
 0x206   : > { %1052 = vrot.lane.b32.xlu1 %v10810_v12, %s5461_s8 }
 0x207   : > { %v1119_v26 = vpop.permute.xlu0 %1118 }
 0x208   : > { %v1025_v34 = vpop.permute.xlu1 %1024  ;;  %v1559_v35 = vsel %vm1546_vm9, %v1526_v7, %v1119_v26  ;;  %v1495_v26 = vsel %vm1480_vm7, %v1462_v55, %v10828_v16  ;;  %v1397_v7 = vsel %vm230_vm0, %v6858_v53, %v10830_v3  ;;  %v10833_v53 = vld [vmem:[#allocation119_spill] sm:$0xff]  ;;  %v10839_v16 = vld [vmem:[#allocation93_spill] sm:$0xff] }
 0x209   : > { %1242 = vrot.lane.b32.xlu0 %v10813_v15, %s5463_s12  ;;  %v1527_v23 = vsel %vm1513_vm8, %v1494_v30, %v1025_v34  ;;  %v10841_v3 = vld [vmem:[#allocation125_spill] sm:$0xff] }
 0x20a   : > { %1148 = vrot.lane.b32.xlu1 %v7211_v0, %s5462_s11 }
 0x20b   : > { %v1215_v52 = vpop.permute.xlu0 %1214 }
 0x20c   : > { %v1121_v27 = vpop.permute.xlu1 %1120  ;;  %v1592_v37 = vsel %vm1579_vm10, %v1559_v35, %v1215_v52  ;;  %v10831_v52 = vld [vmem:[#allocation38_spill] sm:$0xff]  ;;  %v371_v35 = vld [vmem:[#allocation2 + $0x1a0] sm:$0xff] }
 0x20d   : > { %1338 = vrot.lane.b32.xlu0 %v10818_v61, %s5464_s13  ;;  %v1560_v5 = vsel %vm1546_vm9, %v1527_v23, %v1121_v27  ;;  %v1430_v1 = vsel %vm1414_vm3, %v1397_v7, %v10831_v52  ;;  %v604_v23 = vrot.slane %v370_v4, 1 }
 0x20e   : > { %1244 = vrot.lane.b32.xlu1 %v10820_v8, %s5463_s12  ;;  %v1463_v20 = vsel %vm1447_vm6, %v1430_v1, %v10832_v36  ;;  %v10842_v1 = vld [vmem:[#allocation139_spill] sm:$0xff] }
 0x20f   : > { %v1311_v31 = vpop.permute.xlu0 %1310 }
 0x210   : > { %v1625_v29 = vsel %vm1612_vm11, %v1592_v37, %v1311_v31  ;;  %v1217_v56 = vpop.permute.xlu1 %1216 }
 0x211   : > { %1340 = vrot.lane.b32.xlu0 %v10821_v19, %s5464_s13  ;;  %5184 = vmatprep.mubr.msk.f32.mxu0 %vm1645_vm12, %v1625_v29  ;;  %v1593_v42 = vsel %vm1579_vm10, %v1560_v5, %v1217_v56  ;;  %v605_v29 = vrot.slane %v371_v35, 1 }
 0x212   : > { %1054 = vrot.lane.b32.xlu1 %v10818_v61, %s5461_s8  ;;  %v1496_v61 = vsel %vm1480_vm7, %v1463_v20, %v6846_v46 }
 0x213   : > { %v1313_v45 = vpop.permute.xlu0 %1312 }
 0x214   : > { %v1626_v62 = vsel %vm1612_vm11, %v1593_v42, %v1313_v45  ;;  %v1027_v33 = vpop.permute.xlu1 %1026  ;;  %v372_v42 = vld [vmem:[#allocation2 + $0x1a8] sm:$0x3]  ;;  %v609_v45 = vrot.slane %v370_v4, 2 }
 0x215   : > { %1150 = vrot.lane.b32.xlu0 %v10822_v9, %s5462_s11  ;;  %5185 = vmatmul.mubr.msk.f32.gmra.mrb[12].mxu0 %vm1645_vm12, %v1626_v62  ;;  %v1528_v15 = vsel %vm1513_vm8, %v1495_v26, %v1027_v33  ;;  %v606_v62 = vsel %vm426_vm2, %v604_v23, %v605_v29  ;;  %v610_v9 = vrot.slane %v371_v35, 2  ;;  %v10834_v33 = vld [vmem:[#allocation4_spill] sm:$0xff]  ;;  %v607_v13 = vrot.slane %v372_v42, 1 }
 0x216   : > { %1056 = vrot.lane.b32.xlu1 %v10821_v19, %s5461_s8  ;;  %v1399_v26 = vsel %vm230_vm0, %v6894_v39, %v10839_v16  ;;  %v612_v54 = vrot.slane %v372_v42, 2 }
 0x217   : > { %v1123_v12 = vpop.permute.xlu0 %1122 }
 0x218   : > { %v1029_v18 = vpop.permute.xlu1 %1028  ;;  %v1561_v38 = vsel %vm1546_vm9, %v1528_v15, %v1123_v12  ;;  %v10837_v12 = vld [vmem:[#allocation122_spill] sm:$0xff]  ;;  %v1432_v15 = vsel %vm1414_vm3, %v1399_v26, %v10840_v41 }
 0x219   : > { %1246 = vrot.lane.b32.xlu0 %v10827_v59, %s5463_s12  ;;  %v1529_v30 = vsel %vm1513_vm8, %v1496_v61, %v1029_v18  ;;  %v611_v59 = vsel %vm507_vm4, %v609_v45, %v610_v9  ;;  %v1465_v7 = vsel %vm1447_vm6, %v1432_v15, %v10841_v3  ;;  %v10853_v15 = vld [vmem:[#allocation94_spill] sm:$0xff] }
 0x21a   : > { %1152 = vrot.lane.b32.xlu1 %v10823_v22, %s5462_s11  ;;  %v1398_v22 = vsel %vm230_vm0, %v6878_v24, %v10835_v25 }
 0x21b   : > { %v1219_v34 = vpop.permute.xlu0 %1218  ;;  %v1431_v11 = vsel %vm1414_vm3, %v1398_v22, %v10836_v44  ;;  %v10850_v22 = vld [vmem:[#allocation42_spill] sm:$0xff] }
 0x21c   : > { %v1125_v14 = vpop.permute.xlu1 %1124  ;;  %v1594_v27 = vsel %vm1579_vm10, %v1561_v38, %v1219_v34  ;;  %v1464_v32 = vsel %vm1447_vm6, %v1431_v11, %v10837_v12  ;;  %v10851_v11 = vld [vmem:[#allocation62_spill] sm:$0xff] }
 0x21d   : > { %1342 = vrot.lane.b32.xlu0 %v598_v21, %s5464_s13  ;;  %v1562_v31 = vsel %vm1546_vm9, %v1529_v30, %v1125_v14  ;;  %v1497_v55 = vsel %vm1480_vm7, %v1464_v32, %v10838_v43  ;;  %v1498_v14 = vsel %vm1480_vm7, %v1465_v7, %v10842_v1  ;;  %v10843_v30 = vld [vmem:[#allocation92_spill] sm:$0xff]  ;;  %v10852_v32 = vld [vmem:[#allocation66_spill] sm:$0xff]  ;;  %v10854_v7 = vld [vmem:[#allocation41_spill] sm:$0xff] }
 0x21e   : > { %1248 = vrot.lane.b32.xlu1 %v10833_v53, %s5463_s12  ;;  %v10855_v1 = vld [vmem:[#allocation126_spill] sm:$0xff] }
 0x21f   : > { %v1315_v40 = vpop.permute.xlu0 %1314 }
 0x220   : > { %v1627_v37 = vsel %vm1612_vm11, %v1594_v27, %v1315_v40  ;;  %v1221_v8 = vpop.permute.xlu1 %1220 }
 0x221   : > { %1344 = vrot.lane.b32.xlu0 %v600_v50, %s5464_s13  ;;  %5187 = vmatprep.mubr.msk.f32.mxu0 %vm1645_vm12, %v1627_v37  ;;  %v1595_v46 = vsel %vm1579_vm10, %v1562_v31, %v1221_v8  ;;  %v10844_v37 = vld [vmem:[#allocation150_spill] sm:$0xff] }
 0x222   : > { %1058 = vrot.lane.b32.xlu1 %v598_v21, %s5461_s8  ;;  %v608_v21 = vsel %vm426_vm2, %v605_v29, %v607_v13  ;;  %v1400_v31 = vsel %vm230_vm0, %v10844_v37, %v10843_v30  ;;  %v10846_v29 = vld [vmem:[#allocation124_spill] sm:$0xff]  ;;  %v10860_v37 = vld [vmem:[#allocation142_spill] sm:$0xff] }
 0x223   : > { %v1317_v5 = vpop.permute.xlu0 %1316 }
 0x224   : > { %v1628_v19 = vsel %vm1612_vm11, %v1595_v46, %v1317_v5  ;;  %v1031_v56 = vpop.permute.xlu1 %1030  ;;  %v10845_v46 = vld [vmem:[#allocation39_spill] sm:$0xff] }
 0x225   : > { %1154 = vrot.lane.b32.xlu0 %v370_v4, %s5462_s11  ;;  %5188 = vmatmul.mubr.msk.f32.gmra.mrb[14].mxu0 %vm1645_vm12, %v1628_v19  ;;  %v1530_v24 = vsel %vm1513_vm8, %v1497_v55, %v1031_v56  ;;  %v1433_v23 = vsel %vm1414_vm3, %v1400_v31, %v10845_v46  ;;  %v10847_v56 = vld [vmem:[#allocation138_spill] sm:$0xff] }
 0x226   : > { %5282 = vmatprep.mubr.msk.f32.mxu0 %vm230_vm0, %v10834_v33  ;;  %1060 = vrot.lane.b32.xlu1 %v600_v50, %s5461_s8  ;;  %v613_v50 = vsel %vm507_vm4, %v610_v9, %v612_v54  ;;  %v1466_v5 = vsel %vm1447_vm6, %v1433_v23, %v10846_v29  ;;  %v10848_v9 = vld [vmem:[#allocation95_spill] sm:$0xff]  ;;  %v10849_v33 = vld [vmem:[#allocation152_spill] sm:$0xff] }
 0x227   : > { %v1127_v47 = vpop.permute.xlu0 %1126  ;;  %v1499_v42 = vsel %vm1480_vm7, %v1466_v5, %v10847_v56  ;;  %v1401_v25 = vsel %vm230_vm0, %v10849_v33, %v10848_v9 }
 0x228   : > { %v1033_v2 = vpop.permute.xlu1 %1032  ;;  %v1563_v52 = vsel %vm1546_vm9, %v1530_v24, %v1127_v47  ;;  %v1434_v47 = vsel %vm1414_vm3, %v1401_v25, %v10850_v22  ;;  %v10862_v25 = vld [vmem:[#allocation43_spill] sm:$0xff] }
 0x229   : > { %1250 = vrot.lane.b32.xlu0 %v606_v62, %s5463_s12  ;;  %v1531_v20 = vsel %vm1513_vm8, %v1498_v14, %v1033_v2  ;;  %v1467_v13 = vsel %vm1447_vm6, %v1434_v47, %v10851_v11  ;;  %v10863_v47 = vld [vmem:[#allocation127_spill] sm:$0xff] }
 0x22a   : > { %1156 = vrot.lane.b32.xlu1 %v371_v35, %s5462_s11  ;;  %v1500_v2 = vsel %vm1480_vm7, %v1467_v13, %v10852_v32  ;;  %v10864_v13 = vld [vmem:[#allocation141_spill] sm:$0xff] }
 0x22b   : > { %v1223_v18 = vpop.permute.xlu0 %1222 }
 0x22c   : > { %v1129_v34 = vpop.permute.xlu1 %1128  ;;  %v1596_v36 = vsel %vm1579_vm10, %v1563_v52, %v1223_v18 }
 0x22d   : > { %1346 = vrot.lane.b32.xlu0 %v611_v59, %s5464_s13  ;;  %v1564_v61 = vsel %vm1546_vm9, %v1531_v20, %v1129_v34  ;;  %v1402_v34 = vsel %vm230_vm0, %v6959_v10, %v10853_v15 }
 0x22e   : > { %1252 = vrot.lane.b32.xlu1 %v608_v21, %s5463_s12  ;;  %v1435_v52 = vsel %vm1414_vm3, %v1402_v34, %v10854_v7 }
 0x22f   : > { %v1319_v39 = vpop.permute.xlu0 %1318  ;;  %v1468_v14 = vsel %vm1447_vm6, %v1435_v52, %v10855_v1 }
 0x230   : > { %v1629_v38 = vsel %vm1612_vm11, %v1596_v36, %v1319_v39  ;;  %v1225_v27 = vpop.permute.xlu1 %1224  ;;  %v10856_v39 = vld [vmem:[#allocation140_spill] sm:$0xff] }
 0x231   : > { %5190 = vmatprep.mubr.msk.f32.mxu1 %vm1645_vm12, %v1629_v38  ;;  %v1597_v40 = vsel %vm1579_vm10, %v1564_v61, %v1225_v27  ;;  %v1501_v20 = vsel %vm1480_vm7, %v1468_v14, %v10856_v39  ;;  %v10857_v61 = vld [vmem:[#allocation97_spill] sm:$0xff]  ;;  %v10869_v39 = vld [vmem:[#allocation98_spill] sm:$0xff] }
 0x232   : > { %1348 = vrot.lane.b32.xlu1 %v613_v50, %s5464_s13  ;;  %v1403_v27 = vsel %vm230_vm0, %v6977_v58, %v10857_v61 }
 0x233   : > { %v1321_v53 = vpop.permute.xlu0 %1320 }
 0x234   : > { %v1630_v4 = vsel %vm1612_vm11, %v1597_v40, %v1321_v53  ;;  %v1035_v35 = vpop.permute.xlu1 %1034  ;;  %v10858_v40 = vld [vmem:[#allocation44_spill] sm:$0xff] }
 0x235   : > { %5191 = vmatmul.mubr.msk.f32.vlgmr.msra.gmra.mrb[0].mxu1 %vm1645_vm12, %v1630_v4  ;;  %v1532_v45 = vsel %vm1513_vm8, %v1499_v42, %v1035_v35  ;;  %v1436_v10 = vsel %vm1414_vm3, %v1403_v27, %v10858_v40  ;;  %v10859_v4 = vld [vmem:[#allocation128_spill] sm:$0xff]  ;;  %v10871_v27 = vld [vmem:[#allocation129_spill] sm:$0xff] }
 0x236   : > { %v1469_v35 = vsel %vm1447_vm6, %v1436_v10, %v10859_v4 }
 0x237   : > { %v1131_v8 = vpop.permute.xlu0 %1130  ;;  %v1502_v31 = vsel %vm1480_vm7, %v1469_v35, %v10860_v37  ;;  %v10873_v37 = vld [vmem:[#allocation101_spill] sm:$0xff] }
 0x238   : > { %v1037_v19 = vpop.permute.xlu1 %1036  ;;  %v1565_v12 = vsel %vm1546_vm9, %v1532_v45, %v1131_v8 }
 0x239   : > { %v1533_v59 = vsel %vm1513_vm8, %v1500_v2, %v1037_v19 }
 0x23b   : > { %v1227_v62 = vpop.permute.xlu0 %1226 }
 0x23c   : > { %v1133_v44 = vpop.permute.xlu1 %1132  ;;  %v1598_v43 = vsel %vm1579_vm10, %v1565_v12, %v1227_v62  ;;  %v10861_v62 = vld [vmem:[#allocation96_spill] sm:$0xff] }
 0x23d   : > { %v1566_v18 = vsel %vm1546_vm9, %v1533_v59, %v1133_v44  ;;  %v1404_v9 = vsel %vm230_vm0, %v7005_v48, %v10861_v62  ;;  %v10866_v59 = vld [vmem:[#allocation46_spill] sm:$0xff] }
 0x23e   : > { %v1437_v22 = vsel %vm1414_vm3, %v1404_v9, %v10862_v25 }
 0x23f   : > { %v1323_v55 = vpop.permute.xlu0 %1322  ;;  %v1470_v44 = vsel %vm1447_vm6, %v1437_v22, %v10863_v47 }
 0x240   : > { %v1631_v24 = vsel %vm1612_vm11, %v1598_v43, %v1323_v55  ;;  %v1229_v16 = vpop.permute.xlu1 %1228  ;;  %v1503_v12 = vsel %vm1480_vm7, %v1470_v44, %v10864_v13  ;;  %v10865_v43 = vld [vmem:[#allocation99_spill] sm:$0xff]  ;;  %v10877_v44 = vld [vmem:[#allocation100_spill] sm:$0xff] }
 0x241   : > { %5193 = vmatprep.mubr.msk.f32.mxu1 %vm1645_vm12, %v1631_v24  ;;  %v1599_v26 = vsel %vm1579_vm10, %v1566_v18, %v1229_v16  ;;  %v1405_v55 = vsel %vm230_vm0, %v7023_v57, %v10865_v43  ;;  %v10867_v18 = vld [vmem:[#allocation130_spill] sm:$0xff] }
 0x242   : > { %v1438_v48 = vsel %vm1414_vm3, %v1405_v55, %v10866_v59  ;;  %v10880_v59 = vld [vmem:[#allocation145_spill] sm:$0xff] }
 0x243   : > { %v1325_v21 = vpop.permute.xlu0 %1324  ;;  %v1471_v16 = vsel %vm1447_vm6, %v1438_v48, %v10867_v18 }
 0x244   : > { %v1632_v54 = vsel %vm1612_vm11, %v1599_v26, %v1325_v21  ;;  %v1039_v41 = vpop.permute.xlu1 %1038  ;;  %v10868_v21 = vld [vmem:[#allocation144_spill] sm:$0xff] }
 0x245   : > { %5194 = vmatmul.mubr.msk.f32.gmra.mrb[2].mxu1 %vm1645_vm12, %v1632_v54  ;;  %v1534_v38 = vsel %vm1513_vm8, %v1501_v20, %v1039_v41  ;;  %v1504_v54 = vsel %vm1480_vm7, %v1471_v16, %v10868_v21  ;;  %v1406_v20 = vsel %vm230_vm0, %v7051_v28, %v10869_v39  ;;  %v10881_v16 = vld [vmem:[#allocation103_spill] sm:$0xff]  ;;  %v10882_v21 = vld [vmem:[#allocation50_spill] sm:$0xff] }
 0x247   : > { %v1135_v3 = vpop.permute.xlu0 %1134 }
 0x248   : > { %v1041_v36 = vpop.permute.xlu1 %1040  ;;  %v1567_v30 = vsel %vm1546_vm9, %v1534_v38, %v1135_v3 }
 0x249   : > { %v1535_v23 = vsel %vm1513_vm8, %v1502_v31, %v1041_v36  ;;  %v1407_v31 = vsel %vm230_vm0, %v7069_v63, %v10873_v37 }
 0x24b   : > { %v1231_v50 = vpop.permute.xlu0 %1230 }
 0x24c   : > { %v1137_v53 = vpop.permute.xlu1 %1136  ;;  %v1600_v8 = vsel %vm1579_vm10, %v1567_v30, %v1231_v50  ;;  %v10870_v50 = vld [vmem:[#allocation45_spill] sm:$0xff] }
 0x24d   : > { %v1568_v58 = vsel %vm1546_vm9, %v1535_v23, %v1137_v53  ;;  %v1439_v61 = vsel %vm1414_vm3, %v1406_v20, %v10870_v50  ;;  %v10872_v53 = vld [vmem:[#allocation143_spill] sm:$0xff]  ;;  %v10875_v23 = vld [vmem:[#allocation132_spill] sm:$0xff] }
 0x24e   : > { %v1472_v40 = vsel %vm1447_vm6, %v1439_v61, %v10871_v27  ;;  %v10885_v61 = vld [vmem:[#allocation102_spill] sm:$0xff] }
 0x24f   : > { %v1327_v46 = vpop.permute.xlu0 %1326  ;;  %v1505_v4 = vsel %vm1480_vm7, %v1472_v40, %v10872_v53  ;;  %v1410_v27 = vsel %vm230_vm0, %v7144_v17, %v10885_v61 }
 0x250   : > { %v1633_v29 = vsel %vm1612_vm11, %v1600_v8, %v1327_v46  ;;  %v1233_v5 = vpop.permute.xlu1 %1232  ;;  %v10874_v8 = vld [vmem:[#allocation48_spill] sm:$0xff] }
 0x251   : > { %5196 = vmatprep.mubr.msk.f32.mxu1 %vm1645_vm12, %v1633_v29  ;;  %v1601_v19 = vsel %vm1579_vm10, %v1568_v58, %v1233_v5  ;;  %v1440_v28 = vsel %vm1414_vm3, %v1407_v31, %v10874_v8  ;;  %v10876_v5 = vld [vmem:[#allocation146_spill] sm:$0xff] }
 0x252   : > { %v1473_v29 = vsel %vm1447_vm6, %v1440_v28, %v10875_v23 }
 0x253   : > { %v1329_v56 = vpop.permute.xlu0 %1328 }
 0x254   : > { %v1634_v42 = vsel %vm1612_vm11, %v1601_v19, %v1329_v56  ;;  %v1043_v45 = vpop.permute.xlu1 %1042  ;;  %v1506_v19 = vsel %vm1480_vm7, %v1473_v29, %v10876_v5 }
 0x255   : > { %5197 = vmatmul.mubr.msk.f32.gmra.mrb[4].mxu1 %vm1645_vm12, %v1634_v42  ;;  %v1536_v32 = vsel %vm1513_vm8, %v1503_v12, %v1043_v45  ;;  %v10878_v12 = vld [vmem:[#allocation47_spill] sm:$0xff] }
 0x257   : > { %v1139_v33 = vpop.permute.xlu0 %1138 }
 0x258   : > { %v1045_v11 = vpop.permute.xlu1 %1044  ;;  %v1569_v26 = vsel %vm1546_vm9, %v1536_v32, %v1139_v33 }
 0x259   : > { %v1537_v34 = vsel %vm1513_vm8, %v1504_v54, %v1045_v11  ;;  %v1408_v11 = vsel %vm230_vm0, %v7097_v60, %v10877_v44 }
 0x25a   : > { %v1441_v32 = vsel %vm1414_vm3, %v1408_v11, %v10878_v12  ;;  %v10892_v11 = vld [vmem:[#allocation149_spill] sm:$0xff] }
 0x25b   : > { %v1235_v2 = vpop.permute.xlu0 %1234 }
 0x25c   : > { %v1141_v24 = vpop.permute.xlu1 %1140  ;;  %v1602_v41 = vsel %vm1579_vm10, %v1569_v26, %v1235_v2  ;;  %v10879_v2 = vld [vmem:[#allocation131_spill] sm:$0xff]  ;;  %v1409_v26 = vsel %vm230_vm0, %v7115_v51, %v10881_v16  ;;  %v10893_v16 = vld [vmem:[#allocation104_spill] sm:$0xff] }
 0x25d   : > { %v1570_v57 = vsel %vm1546_vm9, %v1537_v34, %v1141_v24  ;;  %v1474_v43 = vsel %vm1447_vm6, %v1441_v32, %v10879_v2  ;;  %v1442_v60 = vsel %vm1414_vm3, %v1409_v26, %v10882_v21  ;;  %v1412_v26 = vsel %vm230_vm0, %v7192_v49, %v10893_v16 }
 0x25e   : > { %v1507_v48 = vsel %vm1480_vm7, %v1474_v43, %v10880_v59 }
 0x25f   : > { %v1331_v15 = vpop.permute.xlu0 %1330 }
 0x260   : > { %v1635_v3 = vsel %vm1612_vm11, %v1602_v41, %v1331_v15  ;;  %v1237_v7 = vpop.permute.xlu1 %1236  ;;  %v10883_v41 = vld [vmem:[#allocation63_spill] sm:$0xff] }
 0x261   : > { %5199 = vmatprep.mubr.msk.f32.mxu1 %vm1645_vm12, %v1635_v3  ;;  %v1603_v52 = vsel %vm1579_vm10, %v1570_v57, %v1237_v7  ;;  %v1475_v15 = vsel %vm1447_vm6, %v1442_v60, %v10883_v41  ;;  %v10884_v3 = vld [vmem:[#allocation67_spill] sm:$0xff] }
 0x262   : > { %v1508_v57 = vsel %vm1480_vm7, %v1475_v15, %v10884_v3  ;;  %v10894_v60 = vld [vmem:[#allocation115_spill] sm:$0xff]  ;;  %v10895_v15 = vld [vmem:[#allocation134_spill] sm:$0xff] }
 0x263   : > { %v1333_v1 = vpop.permute.xlu0 %1332 }
 0x264   : > { %v1636_v14 = vsel %vm1612_vm11, %v1603_v52, %v1333_v1  ;;  %v1047_v36 = vpop.permute.xlu1 %1046 }
 0x265   : > { %5200 = vmatmul.mubr.msk.f32.gmra.mrb[6].mxu1 %vm1645_vm12, %v1636_v14  ;;  %v1538_v35 = vsel %vm1513_vm8, %v1505_v4, %v1047_v36 }
 0x267   : > { %v1143_v38 = vpop.permute.xlu0 %1142 }
 0x268   : > { %v1049_v10 = vpop.permute.xlu1 %1048  ;;  %v1571_v58 = vsel %vm1546_vm9, %v1538_v35, %v1143_v38  ;;  %v10887_v35 = vld [vmem:[#allocation133_spill] sm:$0xff] }
 0x269   : > { %v1539_v45 = vsel %vm1513_vm8, %v1506_v19, %v1049_v10  ;;  %v10886_v10 = vld [vmem:[#allocation49_spill] sm:$0xff] }
 0x26a   : > { %v1443_v53 = vsel %vm1414_vm3, %v1410_v27, %v10886_v10 }
 0x26b   : > { %v1239_v30 = vpop.permute.xlu0 %1238 }
 0x26c   : > { %v1145_v46 = vpop.permute.xlu1 %1144  ;;  %v1604_v56 = vsel %vm1579_vm10, %v1571_v58, %v1239_v30  ;;  %v1476_v30 = vsel %vm1447_vm6, %v1443_v53, %v10887_v35  ;;  %v10897_v53 = vld [vmem:[#allocation106_spill] sm:$0xff] }
 0x26d   : > { %v1572_v63 = vsel %vm1546_vm9, %v1539_v45, %v1145_v46  ;;  %v10888_v46 = vld [vmem:[#allocation147_spill] sm:$0xff]  ;;  %v1413_v35 = vsel %vm230_vm0, %v7211_v0, %v10897_v53 }
 0x26e   : > { %v1509_v17 = vsel %vm1480_vm7, %v1476_v30, %v10888_v46 }
 0x26f   : > { %v1335_v42 = vpop.permute.xlu0 %1334 }
 0x270   : > { %v1637_v62 = vsel %vm1612_vm11, %v1604_v56, %v1335_v42  ;;  %v1241_v9 = vpop.permute.xlu1 %1240  ;;  %v10889_v42 = vld [vmem:[#allocation105_spill] sm:$0xff] }
 0x271   : > { %5202 = vmatprep.mubr.msk.f32.mxu1 %vm1645_vm12, %v1637_v62  ;;  %v1605_v33 = vsel %vm1579_vm10, %v1572_v63, %v1241_v9  ;;  %v1411_v45 = vsel %vm230_vm0, %v7163_v6, %v10889_v42  ;;  %v10890_v63 = vld [vmem:[#allocation52_spill] sm:$0xff] }
 0x272   : > { %v1444_v9 = vsel %vm1414_vm3, %v1411_v45, %v10890_v63 }
 0x273   : > { %v1337_v25 = vpop.permute.xlu0 %1336 }
 0x274   : > { %v1638_v22 = vsel %vm1612_vm11, %v1605_v33, %v1337_v25  ;;  %v1051_v47 = vpop.permute.xlu1 %1050 }
 0x275   : > { %5203 = vmatmul.mubr.msk.f32.gmra.mrb[8].mxu1 %vm1645_vm12, %v1638_v22  ;;  %v1540_v24 = vsel %vm1513_vm8, %v1507_v48, %v1051_v47  ;;  %v10891_v22 = vld [vmem:[#allocation135_spill] sm:$0xff] }
 0x276   : > { %v1477_v47 = vsel %vm1447_vm6, %v1444_v9, %v10891_v22 }
 0x277   : > { %v1147_v13 = vpop.permute.xlu0 %1146 }
 0x278   : > { %v1053_v55 = vpop.permute.xlu1 %1052  ;;  %v1573_v34 = vsel %vm1546_vm9, %v1540_v24, %v1147_v13  ;;  %v1510_v13 = vsel %vm1480_vm7, %v1477_v47, %v10892_v11 }
 0x279   : > { %v1541_v1 = vsel %vm1513_vm8, %v1508_v57, %v1053_v55 }
 0x27b   : > { %v1243_v18 = vpop.permute.xlu0 %1242 }
 0x27c   : > { %v1149_v54 = vpop.permute.xlu1 %1148  ;;  %v1606_v7 = vsel %vm1579_vm10, %v1573_v34, %v1243_v18 }
 0x27d   : > { %v1574_v51 = vsel %vm1546_vm9, %v1541_v1, %v1149_v54  ;;  %v1445_v54 = vsel %vm1414_vm3, %v1412_v26, %v10894_v60 }
 0x27e   : > { %v1478_v34 = vsel %vm1447_vm6, %v1445_v54, %v10895_v15 }
 0x27f   : > { %v1339_v52 = vpop.permute.xlu0 %1338 }
 0x280   : > { %v1639_v14 = vsel %vm1612_vm11, %v1606_v7, %v1339_v52  ;;  %v1245_v36 = vpop.permute.xlu1 %1244  ;;  %v10896_v7 = vld [vmem:[#allocation148_spill] sm:$0xff] }
 0x281   : > { %5205 = vmatprep.mubr.msk.f32.mxu1 %vm1645_vm12, %v1639_v14  ;;  %v1607_v39 = vsel %vm1579_vm10, %v1574_v51, %v1245_v36  ;;  %v1511_v52 = vsel %vm1480_vm7, %v1478_v34, %v10896_v7 }
 0x283   : > { %v1341_v20 = vpop.permute.xlu0 %1340 }
 0x284   : > { %v1640_v38 = vsel %vm1612_vm11, %v1607_v39, %v1341_v20  ;;  %v1055_v50 = vpop.permute.xlu1 %1054 }
 0x285   : > { %5206 = vmatmul.mubr.msk.f32.gmra.mrb[10].mxu1 %vm1645_vm12, %v1640_v38  ;;  %v1542_v58 = vsel %vm1513_vm8, %v1509_v17, %v1055_v50 }
 0x287   : > { %v1151_v40 = vpop.permute.xlu0 %1150 }
 0x288   : > { %v7508_v4 = vpop.f32.mrb[0].mxu0  ;;  %v1057_v28 = vpop.permute.xlu1 %1056  ;;  %v1575_v44 = vsel %vm1546_vm9, %v1542_v58, %v1151_v40 }
 0x289   : > { %v1972_v37 = vsel %vm1414_vm3, %v7508_v4, 0.0  ;;  %v2041_v31 = vmul.f32 %v7508_v4, %v7508_v4  ;;  %v7516_v8 = vpop.f32.mrb[1].mxu0  ;;  %v1543_v6 = vsel %vm1513_vm8, %v1510_v13, %v1057_v28  ;;  %v10898_v28 = vld [vmem:[#allocation116_spill] sm:$0xff] }
 0x28a   : > { %v1971_v23 = vsel %vm1414_vm3, %v7516_v8, 0.0  ;;  %v2040_v29 = vmul.f32 %v7516_v8, %v7516_v8  ;;  %v1446_v46 = vsel %vm1414_vm3, %v1413_v35, %v10898_v28 }
 0x28b   : > { %v2073_v5 = vsel %vm1414_vm3, %v2041_v31, 0.0  ;;  %v1973_v19 = vadd.f32 %v1972_v37, %v1971_v23  ;;  %v1247_v56 = vpop.permute.xlu0 %1246  ;;  %v10899_v23 = vld [vmem:[#allocation136_spill] sm:$0xff] }
 0x28c   : > { %v2072_v62 = vsel %vm1414_vm3, %v2040_v29, 0.0  ;;  %v1153_v25 = vpop.permute.xlu1 %1152  ;;  %v1608_v12 = vsel %vm1579_vm10, %v1575_v44, %v1247_v56  ;;  %v1479_v29 = vsel %vm1447_vm6, %v1446_v46, %v10899_v23  ;;  %vm3623_vm6 = vcmask 523264  }
 0x28d   : > { %v2074_v33 = vadd.f32 %v2073_v5, %v2072_v62  ;;  %v1576_v43 = vsel %vm1546_vm9, %v1543_v6, %v1153_v25  ;;  %v10900_v5 = vld [vmem:[#allocation151_spill] sm:$0xff] }
 0x28f   : > { %v1343_v32 = vpop.permute.xlu0 %1342 }
 0x290   : > { %v1641_v2 = vsel %vm1612_vm11, %v1608_v12, %v1343_v32  ;;  %v1249_v55 = vpop.permute.xlu1 %1248 }
 0x291   : > { %5208 = vmatprep.mubr.msk.f32.mxu1 %vm1645_vm12, %v1641_v2  ;;  %v1609_v59 = vsel %vm1579_vm10, %v1576_v43, %v1249_v55 }
 0x293   : > { %v1345_v48 = vpop.permute.xlu0 %1344 }
 0x294   : > { %v1642_v24 = vsel %vm1612_vm11, %v1609_v59, %v1345_v48  ;;  %v1059_v18 = vpop.permute.xlu1 %1058 }
 0x295   : > { %5209 = vmatmul.mubr.msk.f32.gmra.mrb[12].mxu1 %vm1645_vm12, %v1642_v24  ;;  %v1544_v51 = vsel %vm1513_vm8, %v1511_v52, %v1059_v18 }
 0x297   : > { %v1155_v21 = vpop.permute.xlu0 %1154 }
 0x298   : > { %v7550_v41 = vpop.f32.mrb[2].mxu0  ;;  %v1061_v57 = vpop.permute.xlu1 %1060  ;;  %v1577_v40 = vsel %vm1546_vm9, %v1544_v51, %v1155_v21 }
 0x299   : > { %v7554_v3 = vpop.f32.mrb[3].mxu0  ;;  %v2043_v1 = vmul.f32 %v7550_v41, %v7550_v41  ;;  %v1976_v20 = vsel %vm1414_vm3, %v7550_v41, 0.0 }
 0x29a   : > { %v1974_v49 = vsel %vm1414_vm3, %v7554_v3, 0.0  ;;  %v2042_v14 = vmul.f32 %v7554_v3, %v7554_v3 }
 0x29b   : > { %v1975_v36 = vadd.f32 %v1974_v49, %v1973_v19  ;;  %v1251_v39 = vpop.permute.xlu0 %1250  ;;  %v2077_v10 = vsel %vm1414_vm3, %v2043_v1, 0.0  ;;  %v1512_v19 = vsel %vm1480_vm7, %v1479_v29, %v10900_v5 }
 0x29c   : > { %v2075_v38 = vsel %vm1414_vm3, %v2042_v14, 0.0  ;;  %v1157_v61 = vpop.permute.xlu1 %1156  ;;  %v1610_v30 = vsel %vm1579_vm10, %v1577_v40, %v1251_v39  ;;  %v1545_v0 = vsel %vm1513_vm8, %v1512_v19, %v1061_v57  ;;  %vm3656_vm8 = vcmask 588800  }
 0x29d   : > { %v2076_v50 = vadd.f32 %v2075_v38, %v2074_v33  ;;  %v1977_v27 = vadd.f32 %v1976_v20, %v1975_v36  ;;  %v1578_v56 = vsel %vm1546_vm9, %v1545_v0, %v1157_v61 }
 0x29f   : > { %v1347_v37 = vpop.permute.xlu0 %1346  ;;  %v2078_v31 = vadd.f32 %v2077_v10, %v2076_v50 }
 0x2a0   : > { %v1643_v17 = vsel %vm1612_vm11, %v1610_v30, %v1347_v37  ;;  %v1253_v58 = vpop.permute.xlu1 %1252 }
 0x2a1   : > { %5211 = vmatprep.mubr.msk.f32.mxu1 %vm1645_vm12, %v1643_v17  ;;  %v1611_v42 = vsel %vm1579_vm10, %v1578_v56, %v1253_v58 }
 0x2a4   : > { %v1349_v45 = vpop.permute.xlu1 %1348 }
 0x2a5   : > { %v1644_v62 = vsel %vm1612_vm11, %v1611_v42, %v1349_v45 }
 0x2a6   : > { %5212 = vmatmul.mubr.msk.f32.gmra.mrb[14].mxu1 %vm1645_vm12, %v1644_v62 }
 0x2a8   : > { %v7587_v63 = vpop.f32.mrb[4].mxu0 }
 0x2a9   : > { %v7589_v9 = vpop.f32.mrb[5].mxu0  ;;  %v2045_v33 = vmul.f32 %v7587_v63, %v7587_v63  ;;  %v1980_v44 = vsel %vm1414_vm3, %v7587_v63, 0.0 }
 0x2aa   : > { %v1978_v25 = vsel %vm1414_vm3, %v7589_v9, 0.0  ;;  %v2044_v22 = vmul.f32 %v7589_v9, %v7589_v9 }
 0x2ab   : > { %v1979_v47 = vadd.f32 %v1978_v25, %v1977_v27  ;;  %v2081_v32 = vsel %vm1414_vm3, %v2045_v33, 0.0 }
 0x2ac   : > { %v2079_v11 = vsel %vm1414_vm3, %v2044_v22, 0.0 }
 0x2ad   : > { %v2080_v13 = vadd.f32 %v2079_v11, %v2078_v31  ;;  %v1981_v12 = vadd.f32 %v1980_v44, %v1979_v47 }
 0x2af   : > { %v2082_v6 = vadd.f32 %v2081_v32, %v2080_v13 }
 0x2b8   : > { %v7601_v2 = vpop.f32.mrb[6].mxu0 }
 0x2b9   : > { %v7603_v43 = vpop.f32.mrb[7].mxu0  ;;  %v2047_v55 = vmul.f32 %v7601_v2, %v7601_v2  ;;  %v1984_v18 = vsel %vm1414_vm3, %v7601_v2, 0.0 }
 0x2ba   : > { %v1982_v59 = vsel %vm1414_vm3, %v7603_v43, 0.0  ;;  %v2046_v48 = vmul.f32 %v7603_v43, %v7603_v43 }
 0x2bb   : > { %v1983_v24 = vadd.f32 %v1982_v59, %v1981_v12  ;;  %v2085_v60 = vsel %vm1414_vm3, %v2047_v55, 0.0 }
 0x2bc   : > { %v2083_v16 = vsel %vm1414_vm3, %v2046_v48, 0.0 }
 0x2bd   : > { %v2084_v26 = vadd.f32 %v2083_v16, %v2082_v6  ;;  %v1985_v21 = vadd.f32 %v1984_v18, %v1983_v24 }
 0x2bf   : > { %v2086_v54 = vadd.f32 %v2085_v60, %v2084_v26 }
 0x2c8   : > { %v7615_v15 = vpop.f32.mrb[8].mxu0 }
 0x2c9   : > { %v7617_v34 = vpop.f32.mrb[9].mxu0  ;;  %v2049_v57 = vmul.f32 %v7615_v15, %v7615_v15  ;;  %v1988_v49 = vsel %vm1414_vm3, %v7615_v15, 0.0 }
 0x2ca   : > { %v1986_v7 = vsel %vm1414_vm3, %v7617_v34, 0.0  ;;  %v2048_v52 = vmul.f32 %v7617_v34, %v7617_v34 }
 0x2cb   : > { %v1987_v1 = vadd.f32 %v1986_v7, %v1985_v21  ;;  %v2089_v39 = vsel %vm1414_vm3, %v2049_v57, 0.0 }
 0x2cc   : > { %v2087_v14 = vsel %vm1414_vm3, %v2048_v52, 0.0 }
 0x2cd   : > { %v2088_v51 = vadd.f32 %v2087_v14, %v2086_v54  ;;  %v1989_v36 = vadd.f32 %v1988_v49, %v1987_v1 }
 0x2cf   : > { %v2090_v20 = vadd.f32 %v2089_v39, %v2088_v51 }
 0x2d8   : > { %v7629_v38 = vpop.f32.mrb[10].mxu0 }
 0x2d9   : > { %v7631_v50 = vpop.f32.mrb[11].mxu0  ;;  %v2051_v61 = vmul.f32 %v7629_v38, %v7629_v38  ;;  %v1992_v53 = vsel %vm1414_vm3, %v7629_v38, 0.0 }
 0x2da   : > { %v1990_v27 = vsel %vm1414_vm3, %v7631_v50, 0.0  ;;  %v2050_v40 = vmul.f32 %v7631_v50, %v7631_v50 }
 0x2db   : > { %v1991_v10 = vadd.f32 %v1990_v27, %v1989_v36  ;;  %v2093_v31 = vsel %vm1414_vm3, %v2051_v61, 0.0 }
 0x2dc   : > { %v2091_v35 = vsel %vm1414_vm3, %v2050_v40, 0.0 }
 0x2dd   : > { %v2092_v30 = vadd.f32 %v2091_v35, %v2090_v20  ;;  %v1993_v37 = vadd.f32 %v1992_v53, %v1991_v10 }
 0x2df   : > { %v2094_v28 = vadd.f32 %v2093_v31, %v2092_v30  ;;  %v7699_v30 = vld [vmem:[#allocation3] sm:$0xff] }
 0x2e0   : > { %v2442_v31 = vrot.slane %v7699_v30, 1 }
 0x2e8   : > { %v7643_v46 = vpop.f32.mrb[12].mxu0 }
 0x2e9   : > { %v7645_v17 = vpop.f32.mrb[13].mxu0  ;;  %v2053_v23 = vmul.f32 %v7643_v46, %v7643_v46  ;;  %v1996_v19 = vsel %vm1414_vm3, %v7643_v46, 0.0 }
 0x2ea   : > { %v1994_v29 = vsel %vm1414_vm3, %v7645_v17, 0.0  ;;  %v2052_v58 = vmul.f32 %v7645_v17, %v7645_v17 }
 0x2eb   : > { %v1995_v5 = vadd.f32 %v1994_v29, %v1993_v37  ;;  %v2097_v45 = vsel %vm1414_vm3, %v2053_v23, 0.0  ;;  %v7701_v37 = vld [vmem:[#allocation3 + $0x8] sm:$0xff] }
 0x2ec   : > { %v2095_v0 = vsel %vm1414_vm3, %v2052_v58, 0.0  ;;  %v7709_v58 = vld [vmem:[#allocation3 + $0x10] sm:$0x3] }
 0x2ed   : > { %v2096_v56 = vadd.f32 %v2095_v0, %v2094_v28  ;;  %v1997_v42 = vadd.f32 %v1996_v19, %v1995_v5  ;;  %v2443_v28 = vrot.slane %v7701_v37, 1  ;;  %v2445_v19 = vrot.slane %v7709_v58, 1 }
 0x2ef   : > { %v2098_v62 = vadd.f32 %v2097_v45, %v2096_v56  ;;  %v2444_v23 = vsel %vm426_vm2, %v2442_v31, %v2443_v28 }
 0x2f0   : > { %2628 = vrot.lane.b32.xlu0 %v2444_v23, %s5458_s23 }
 0x2f8   : > { %v7657_v33 = vpop.f32.mrb[14].mxu0 }
 0x2f9   : > { %v7659_v25 = vpop.f32.mrb[15].mxu0  ;;  %v2055_v22 = vmul.f32 %v7657_v33, %v7657_v33  ;;  %v2000_v13 = vsel %vm1414_vm3, %v7657_v33, 0.0 }
 0x2fa   : > { %v1998_v47 = vsel %vm1414_vm3, %v7659_v25, 0.0  ;;  %v2054_v44 = vmul.f32 %v7659_v25, %v7659_v25 }
 0x2fb   : > { %v1999_v11 = vadd.f32 %v1998_v47, %v1997_v42  ;;  %v2101_v55 = vsel %vm1414_vm3, %v2055_v22, 0.0 }
 0x2fc   : > { %v2099_v12 = vsel %vm1414_vm3, %v2054_v44, 0.0 }
 0x2fd   : > { %v2100_v32 = vadd.f32 %v2099_v12, %v2098_v62  ;;  %v2001_v6 = vadd.f32 %v2000_v13, %v1999_v11  ;;  %v2446_v62 = vsel %vm426_vm2, %v2443_v28, %v2445_v19 }
 0x2fe   : > { %2630 = vrot.lane.b32.xlu1 %v2446_v62, %s5458_s23 }
 0x2ff   : > { %v2102_v59 = vadd.f32 %v2101_v55, %v2100_v32 }
 0x308   : > { %v7671_v48 = vpop.f32.mrb[0].mxu1 }
 0x309   : > { %v7673_v24 = vpop.f32.mrb[1].mxu1  ;;  %v2057_v18 = vmul.f32 %v7671_v48, %v7671_v48  ;;  %v2004_v60 = vsel %vm1414_vm3, %v7671_v48, 0.0 }
 0x30a   : > { %v2002_v16 = vsel %vm1414_vm3, %v7673_v24, 0.0  ;;  %v2056_v26 = vmul.f32 %v7673_v24, %v7673_v24 }
 0x30b   : > { %v2003_v21 = vadd.f32 %v2002_v16, %v2001_v6  ;;  %v2105_v52 = vsel %vm1414_vm3, %v2057_v18, 0.0 }
 0x30c   : > { %v2103_v54 = vsel %vm1414_vm3, %v2056_v26, 0.0 }
 0x30d   : > { %v2104_v57 = vadd.f32 %v2103_v54, %v2102_v59  ;;  %v2005_v7 = vadd.f32 %v2004_v60, %v2003_v21 }
 0x30f   : > { %v2106_v1 = vadd.f32 %v2105_v52, %v2104_v57 }
 0x318   : > { %v7685_v49 = vpop.f32.mrb[2].mxu1 }
 0x319   : > { %v7687_v14 = vpop.f32.mrb[3].mxu1  ;;  %v2059_v51 = vmul.f32 %v7685_v49, %v7685_v49  ;;  %v2008_v61 = vsel %vm1414_vm3, %v7685_v49, 0.0 }
 0x31a   : > { %v2006_v36 = vsel %vm1414_vm3, %v7687_v14, 0.0  ;;  %v2058_v39 = vmul.f32 %v7687_v14, %v7687_v14 }
 0x31b   : > { %v2007_v20 = vadd.f32 %v2006_v36, %v2005_v7  ;;  %v2109_v53 = vsel %vm1414_vm3, %v2059_v51, 0.0 }
 0x31c   : > { %v2107_v27 = vsel %vm1414_vm3, %v2058_v39, 0.0 }
 0x31d   : > { %v2108_v40 = vadd.f32 %v2107_v27, %v2106_v1  ;;  %v2009_v10 = vadd.f32 %v2008_v61, %v2007_v20 }
 0x31f   : > { %v2110_v35 = vadd.f32 %v2109_v53, %v2108_v40 }
 0x328   : > { %v7706_v29 = vpop.f32.mrb[4].mxu1 }
 0x329   : > { %v7711_v5 = vpop.f32.mrb[5].mxu1  ;;  %v2061_v0 = vmul.f32 %v7706_v29, %v7706_v29  ;;  %v2012_v22 = vsel %vm1414_vm3, %v7706_v29, 0.0 }
 0x32a   : > { %v2010_v56 = vsel %vm1414_vm3, %v7711_v5, 0.0  ;;  %v2060_v42 = vmul.f32 %v7711_v5, %v7711_v5 }
 0x32b   : > { %v2011_v45 = vadd.f32 %v2010_v56, %v2009_v10  ;;  %v2113_v13 = vsel %vm1414_vm3, %v2061_v0, 0.0 }
 0x32c   : > { %v2111_v47 = vsel %vm1414_vm3, %v2060_v42, 0.0 }
 0x32d   : > { %v2112_v44 = vadd.f32 %v2111_v47, %v2110_v35  ;;  %v2013_v11 = vadd.f32 %v2012_v22, %v2011_v45 }
 0x32f   : > { %v2114_v12 = vadd.f32 %v2113_v13, %v2112_v44 }
 0x338   : > { %v7726_v32 = vpop.f32.mrb[6].mxu1 }
 0x339   : > { %v7728_v6 = vpop.f32.mrb[7].mxu1  ;;  %v2063_v55 = vmul.f32 %v7726_v32, %v7726_v32  ;;  %v2016_v26 = vsel %vm1414_vm3, %v7726_v32, 0.0 }
 0x33a   : > { %v2014_v59 = vsel %vm1414_vm3, %v7728_v6, 0.0  ;;  %v2062_v18 = vmul.f32 %v7728_v6, %v7728_v6 }
 0x33b   : > { %v2015_v16 = vadd.f32 %v2014_v59, %v2013_v11  ;;  %v2117_v57 = vsel %vm1414_vm3, %v2063_v55, 0.0 }
 0x33c   : > { %v2115_v21 = vsel %vm1414_vm3, %v2062_v18, 0.0 }
 0x33d   : > { %v2116_v60 = vadd.f32 %v2115_v21, %v2114_v12  ;;  %v2017_v54 = vadd.f32 %v2016_v26, %v2015_v16 }
 0x33f   : > { %v2118_v7 = vadd.f32 %v2117_v57, %v2116_v60 }
 0x348   : > { %v7740_v52 = vpop.f32.mrb[8].mxu1 }
 0x349   : > { %v7742_v1 = vpop.f32.mrb[9].mxu1  ;;  %v2065_v51 = vmul.f32 %v7740_v52, %v7740_v52  ;;  %v2020_v61 = vsel %vm1414_vm3, %v7740_v52, 0.0 }
 0x34a   : > { %v2018_v36 = vsel %vm1414_vm3, %v7742_v1, 0.0  ;;  %v2064_v39 = vmul.f32 %v7742_v1, %v7742_v1 }
 0x34b   : > { %v2019_v20 = vadd.f32 %v2018_v36, %v2017_v54  ;;  %v2121_v53 = vsel %vm1414_vm3, %v2065_v51, 0.0 }
 0x34c   : > { %v2119_v27 = vsel %vm1414_vm3, %v2064_v39, 0.0 }
 0x34d   : > { %v2120_v40 = vadd.f32 %v2119_v27, %v2118_v7  ;;  %v2021_v10 = vadd.f32 %v2020_v61, %v2019_v20 }
 0x34f   : > { %v2122_v35 = vadd.f32 %v2121_v53, %v2120_v40 }
 0x358   : > { %v7754_v31 = vpop.f32.mrb[10].mxu1 }
 0x359   : > { %v7756_v28 = vpop.f32.mrb[11].mxu1  ;;  %v2067_v23 = vmul.f32 %v7754_v31, %v7754_v31  ;;  %v2024_v42 = vsel %vm1414_vm3, %v7754_v31, 0.0 }
 0x35a   : > { %v2022_v19 = vsel %vm1414_vm3, %v7756_v28, 0.0  ;;  %v2066_v0 = vmul.f32 %v7756_v28, %v7756_v28 }
 0x35b   : > { %v2023_v56 = vadd.f32 %v2022_v19, %v2021_v10  ;;  %v2125_v47 = vsel %vm1414_vm3, %v2067_v23, 0.0 }
 0x35c   : > { %v2123_v45 = vsel %vm1414_vm3, %v2066_v0, 0.0 }
 0x35d   : > { %v2124_v62 = vadd.f32 %v2123_v45, %v2122_v35  ;;  %v2025_v22 = vadd.f32 %v2024_v42, %v2023_v56 }
 0x35f   : > { %v2126_v44 = vadd.f32 %v2125_v47, %v2124_v62 }
 0x368   : > { %v7768_v11 = vpop.f32.mrb[12].mxu1 }
 0x369   : > { %v7770_v13 = vpop.f32.mrb[13].mxu1  ;;  %v2069_v12 = vmul.f32 %v7768_v11, %v7768_v11  ;;  %v2028_v16 = vsel %vm1414_vm3, %v7768_v11, 0.0 }
 0x36a   : > { %v2026_v55 = vsel %vm1414_vm3, %v7770_v13, 0.0  ;;  %v2068_v59 = vmul.f32 %v7770_v13, %v7770_v13 }
 0x36b   : > { %v2027_v18 = vadd.f32 %v2026_v55, %v2025_v22  ;;  %v2129_v54 = vsel %vm1414_vm3, %v2069_v12, 0.0 }
 0x36c   : > { %v2127_v26 = vsel %vm1414_vm3, %v2068_v59, 0.0 }
 0x36d   : > { %v2128_v21 = vadd.f32 %v2127_v26, %v2126_v44  ;;  %v2029_v60 = vadd.f32 %v2028_v16, %v2027_v18 }
 0x36f   : > { %v2130_v57 = vadd.f32 %v2129_v54, %v2128_v21 }
 0x379   : > { %v7782_v7 = vpop.f32.mrb[14].mxu1 }
 0x37a   : > { %v7784_v51 = vpop.f32.mrb[15].mxu1  ;;  %v2071_v36 = vmul.f32 %v7782_v7, %v7782_v7  ;;  %v2032_v27 = vsel %vm1414_vm3, %v7782_v7, 0.0 }
 0x37b   : > { %v2030_v39 = vsel %vm1414_vm3, %v7784_v51, 0.0  ;;  %v2070_v20 = vmul.f32 %v7784_v51, %v7784_v51 }
 0x37c   : > { %v2031_v61 = vadd.f32 %v2030_v39, %v2029_v60  ;;  %v2133_v35 = vsel %vm1414_vm3, %v2071_v36, 0.0 }
 0x37d   : > { %v2131_v40 = vsel %vm1414_vm3, %v2070_v20, 0.0 }
 0x37e   : > { %v2033_v10 = vadd.f32 %v2032_v27, %v2031_v61  ;;  %v2132_v53 = vadd.f32 %v2131_v40, %v2130_v57 }
 0x380   : > { %v2034_v23 = vrot.slane %v2033_v10, 4  ;;  %v2134_v19 = vadd.f32 %v2133_v35, %v2132_v53 }
 0x382   : > { %v2035_v0 = vadd.f32 %v2034_v23, %v2033_v10  ;;  %v2135_v56 = vrot.slane %v2134_v19, 4 }
 0x384   : > { %v2036_v42 = vrot.slane %v2035_v0, 2  ;;  %v2136_v45 = vadd.f32 %v2135_v56, %v2134_v19 }
 0x386   : > { %v2037_v62 = vadd.f32 %v2036_v42, %v2035_v0  ;;  %v2137_v22 = vrot.slane %v2136_v45, 2 }
 0x388   : > { %v2038_v47 = vrot.slane %v2037_v62, 1  ;;  %v2138_v44 = vadd.f32 %v2137_v22, %v2136_v45 }
 0x38a   : > { %v2039_v12 = vadd.f32 %v2038_v47, %v2037_v62  ;;  %v2139_v55 = vrot.slane %v2138_v44, 1 }
 0x38c   : > { %v2140_v59 = vadd.f32 %v2139_v55, %v2138_v44  ;;  %v7796_v18 = vmul.f32 0.00390625, %v2039_v12 }
 0x38e   : > { %v2142_v16 = vmul.f32 0.00390625, %v2140_v59  ;;  %v2143_v26 = vmul.f32 %v7796_v18, %v7796_v18  ;;  %v2175_v21 = vsub.f32 %v7784_v51, %v7796_v18  ;;  %v2145_v60 = vsub.f32 %v7516_v8, %v7796_v18 }
 0x38f   : > { %v2146_v54 = vsub.f32 %v7508_v4, %v7796_v18  ;;  %v2147_v57 = vsub.f32 %v7554_v3, %v7796_v18  ;;  %v2148_v36 = vsub.f32 %v7550_v41, %v7796_v18  ;;  %v2149_v39 = vsub.f32 %v7589_v9, %v7796_v18 }
 0x390   : > { %v2144_v20 = vsub.f32 %v2142_v16, %v2143_v26  ;;  %v2150_v61 = vsub.f32 %v7587_v63, %v7796_v18  ;;  %v2151_v51 = vsub.f32 %v7603_v43, %v7796_v18  ;;  %v2152_v8 = vsub.f32 %v7601_v2, %v7796_v18 }
 0x391   : > { %v2153_v4 = vsub.f32 %v7617_v34, %v7796_v18  ;;  %v2154_v3 = vsub.f32 %v7615_v15, %v7796_v18  ;;  %v2155_v41 = vsub.f32 %v7631_v50, %v7796_v18  ;;  %v2156_v9 = vsub.f32 %v7629_v38, %v7796_v18 }
 0x392   : > { %v2177_v27 = vadd.f32 1e-05, %v2144_v20  ;;  %v2157_v63 = vsub.f32 %v7645_v17, %v7796_v18  ;;  %v2158_v43 = vsub.f32 %v7643_v46, %v7796_v18  ;;  %v2159_v2 = vsub.f32 %v7659_v25, %v7796_v18 }
 0x393   : > { %v2160_v34 = vsub.f32 %v7657_v33, %v7796_v18  ;;  %v2161_v15 = vsub.f32 %v7673_v24, %v7796_v18  ;;  %v2162_v50 = vsub.f32 %v7671_v48, %v7796_v18  ;;  %v2163_v38 = vsub.f32 %v7687_v14, %v7796_v18 }
 0x394   : > { %5381 = vrsqrt.f32 %v2177_v27  ;;  %v2164_v17 = vsub.f32 %v7685_v49, %v7796_v18  ;;  %v2165_v46 = vsub.f32 %v7711_v5, %v7796_v18  ;;  %v2166_v25 = vsub.f32 %v7706_v29, %v7796_v18 }
 0x395   : > { %v2167_v33 = vsub.f32 %v7728_v6, %v7796_v18  ;;  %v2168_v24 = vsub.f32 %v7726_v32, %v7796_v18  ;;  %v2169_v48 = vsub.f32 %v7742_v1, %v7796_v18  ;;  %v2170_v14 = vsub.f32 %v7740_v52, %v7796_v18 }
 0x396   : > { %v2171_v49 = vsub.f32 %v7756_v28, %v7796_v18  ;;  %v2172_v5 = vsub.f32 %v7754_v31, %v7796_v18  ;;  %v2173_v29 = vsub.f32 %v7770_v13, %v7796_v18  ;;  %v2174_v6 = vsub.f32 %v7768_v11, %v7796_v18 }
 0x397   : > { %v2176_v32 = vsub.f32 %v7782_v7, %v7796_v18 }
 0x39e   : > { %v5382_v40 = vpop.eup %5381 }
 0x39f   : > { %v2209_v1 = vmul.f32 %v5382_v40, %v2175_v21  ;;  %v2179_v10 = vmul.f32 %v5382_v40, %v2145_v60  ;;  %v2180_v53 = vmul.f32 %v5382_v40, %v2146_v54  ;;  %v2181_v52 = vmul.f32 %v5382_v40, %v2147_v57 }
 0x3a0   : > { %v2182_v35 = vmul.f32 %v5382_v40, %v2148_v36  ;;  %v2183_v23 = vmul.f32 %v5382_v40, %v2149_v39  ;;  %v2184_v28 = vmul.f32 %v5382_v40, %v2150_v61  ;;  %v2185_v19 = vmul.f32 %v5382_v40, %v2151_v51 }
 0x3a1   : > { %v2241_v0 = vmax.f32 %v2209_v1, 0.0  ;;  %v2186_v31 = vmul.f32 %v5382_v40, %v2152_v8  ;;  %v2187_v56 = vmul.f32 %v5382_v40, %v2153_v4  ;;  %v2188_v42 = vmul.f32 %v5382_v40, %v2154_v3 }
 0x3a2   : > { %v2189_v13 = vmul.f32 %v5382_v40, %v2155_v41  ;;  %v2190_v45 = vmul.f32 %v5382_v40, %v2156_v9  ;;  %v2191_v62 = vmul.f32 %v5382_v40, %v2157_v63  ;;  %v2192_v11 = vmul.f32 %v5382_v40, %v2158_v43 }
 0x3a3   : > { %2329 = vst.msk [vmem:[#allocation3 + $0x181] sm:$0xff] %vm1414_vm3, %v2241_v0  ;;  %v2193_v7 = vmul.f32 %v5382_v40, %v2159_v2  ;;  %v2194_v22 = vmul.f32 %v5382_v40, %v2160_v34  ;;  %v2195_v47 = vmul.f32 %v5382_v40, %v2161_v15  ;;  %v2196_v44 = vmul.f32 %v5382_v40, %v2162_v50 }
 0x3a4   : > { %v2197_v12 = vmul.f32 %v5382_v40, %v2163_v38  ;;  %v7865_v55 = vmul.f32 %v5382_v40, %v2164_v17  ;;  %v7867_v59 = vmul.f32 %v5382_v40, %v2165_v46  ;;  %v7869_v18 = vmul.f32 %v5382_v40, %v2166_v25 }
 0x3a5   : > { %v7871_v16 = vmul.f32 %v5382_v40, %v2167_v33  ;;  %v7873_v26 = vmul.f32 %v5382_v40, %v2168_v24  ;;  %v7875_v21 = vmul.f32 %v5382_v40, %v2169_v48  ;;  %v7877_v60 = vmul.f32 %v5382_v40, %v2170_v14 }
 0x3a6   : > { %v7879_v54 = vmul.f32 %v5382_v40, %v2171_v49  ;;  %v7881_v57 = vmul.f32 %v5382_v40, %v2172_v5  ;;  %v7883_v36 = vmul.f32 %v5382_v40, %v2173_v29  ;;  %v7885_v39 = vmul.f32 %v5382_v40, %v2174_v6 }
 0x3a7   : > { %v7887_v20 = vmul.f32 %v5382_v40, %v2176_v32  ;;  %v2211_v61 = vmax.f32 %v2179_v10, 0.0  ;;  %v2212_v51 = vmax.f32 %v2180_v53, 0.0  ;;  %v2213_v8 = vmax.f32 %v2181_v52, 0.0 }
 0x3a8   : > { %v2214_v4 = vmax.f32 %v2182_v35, 0.0  ;;  %v2215_v3 = vmax.f32 %v2183_v23, 0.0  ;;  %v2216_v41 = vmax.f32 %v2184_v28, 0.0  ;;  %v2217_v9 = vmax.f32 %v2185_v19, 0.0 }
 0x3a9   : > { %v2218_v27 = vmax.f32 %v2186_v31, 0.0  ;;  %v2219_v63 = vmax.f32 %v2187_v56, 0.0  ;;  %v2220_v43 = vmax.f32 %v2188_v42, 0.0  ;;  %v2221_v2 = vmax.f32 %v2189_v13, 0.0  ;;  %2299 = vst.msk [vmem:[#allocation3 + $0x19] sm:$0xff] %vm1414_vm3, %v2211_v61  ;;  %2300 = vst.msk [vmem:[#allocation3 + $0x21] sm:$0xff] %vm1414_vm3, %v2212_v51 }
 0x3aa   : > { %2301 = vst.msk [vmem:[#allocation3 + $0x31] sm:$0xff] %vm1414_vm3, %v2213_v8  ;;  %v2222_v34 = vmax.f32 %v2190_v45, 0.0  ;;  %v2223_v15 = vmax.f32 %v2191_v62, 0.0  ;;  %v2224_v50 = vmax.f32 %v2192_v11, 0.0  ;;  %v2225_v38 = vmax.f32 %v2193_v7, 0.0  ;;  %2302 = vst.msk [vmem:[#allocation3 + $0x39] sm:$0xff] %vm1414_vm3, %v2214_v4 }
 0x3ab   : > { %2303 = vst.msk [vmem:[#allocation3 + $0x49] sm:$0xff] %vm1414_vm3, %v2215_v3  ;;  %2304 = vst.msk [vmem:[#allocation3 + $0x51] sm:$0xff] %vm1414_vm3, %v2216_v41  ;;  %v2226_v17 = vmax.f32 %v2194_v22, 0.0  ;;  %v2227_v46 = vmax.f32 %v2195_v47, 0.0  ;;  %v2228_v25 = vmax.f32 %v2196_v44, 0.0  ;;  %v2229_v33 = vmax.f32 %v2197_v12, 0.0 }
 0x3ac   : > { %2305 = vst.msk [vmem:[#allocation3 + $0x61] sm:$0xff] %vm1414_vm3, %v2217_v9  ;;  %2306 = vst.msk [vmem:[#allocation3 + $0x69] sm:$0xff] %vm1414_vm3, %v2218_v27  ;;  %v2230_v24 = vmax.f32 %v7865_v55, 0.0  ;;  %v2231_v48 = vmax.f32 %v7867_v59, 0.0  ;;  %v2232_v14 = vmax.f32 %v7869_v18, 0.0  ;;  %v2233_v49 = vmax.f32 %v7871_v16, 0.0 }
 0x3ad   : > { %2307 = vst.msk [vmem:[#allocation3 + $0x79] sm:$0xff] %vm1414_vm3, %v2219_v63  ;;  %2308 = vst.msk [vmem:[#allocation3 + $0x81] sm:$0xff] %vm1414_vm3, %v2220_v43  ;;  %v2234_v5 = vmax.f32 %v7873_v26, 0.0  ;;  %v2235_v29 = vmax.f32 %v7875_v21, 0.0  ;;  %v2236_v6 = vmax.f32 %v7877_v60, 0.0  ;;  %v2237_v32 = vmax.f32 %v7879_v54, 0.0 }
 0x3ae   : > { %2309 = vst.msk [vmem:[#allocation3 + $0x91] sm:$0xff] %vm1414_vm3, %v2221_v2  ;;  %2310 = vst.msk [vmem:[#allocation3 + $0x99] sm:$0xff] %vm1414_vm3, %v2222_v34  ;;  %v2238_v40 = vmax.f32 %v7881_v57, 0.0  ;;  %v2239_v1 = vmax.f32 %v7883_v36, 0.0  ;;  %v2240_v10 = vmax.f32 %v7885_v39, 0.0  ;;  %v2242_v53 = vmax.f32 %v7887_v20, 0.0 }
 0x3af   : > { %2311 = vst.msk [vmem:[#allocation3 + $0xa9] sm:$0xff] %vm1414_vm3, %v2223_v15  ;;  %2312 = vst.msk [vmem:[#allocation3 + $0xb1] sm:$0xff] %vm1414_vm3, %v2224_v50 }
 0x3b0   : > { %2313 = vst.msk [vmem:[#allocation3 + $0xc1] sm:$0xff] %vm1414_vm3, %v2225_v38  ;;  %2314 = vst.msk [vmem:[#allocation3 + $0xc9] sm:$0xff] %vm1414_vm3, %v2226_v17  ;;  %v7928_v52 = vld [vmem:[#allocation3 + $0x20] sm:$0xff]  ;;  %v7930_v35 = vld [vmem:[#allocation3 + $0x28] sm:$0x3] }
 0x3b1   : > { %2315 = vst.msk [vmem:[#allocation3 + $0xd9] sm:$0xff] %vm1414_vm3, %v2227_v46  ;;  %2316 = vst.msk [vmem:[#allocation3 + $0xe1] sm:$0xff] %vm1414_vm3, %v2228_v25  ;;  %v7936_v23 = vld [vmem:[#allocation3 + $0x18] sm:$0xff]  ;;  %v2448_v28 = vrot.slane %v7928_v52, 1  ;;  %v2450_v19 = vrot.slane %v7930_v35, 1  ;;  %v7946_v13 = vld [vmem:[#allocation3 + $0x30] sm:$0xff] }
 0x3b2   : > { %2317 = vst.msk [vmem:[#allocation3 + $0xf1] sm:$0xff] %vm1414_vm3, %v2229_v33  ;;  %2318 = vst.msk [vmem:[#allocation3 + $0xf9] sm:$0xff] %vm1414_vm3, %v2230_v24  ;;  %v2447_v0 = vrot.slane %v7936_v23, 1  ;;  %v7941_v31 = vld [vmem:[#allocation3 + $0x38] sm:$0xff]  ;;  %v7943_v56 = vld [vmem:[#allocation3 + $0x40] sm:$0x3] }
 0x3b3   : > { %2319 = vst.msk [vmem:[#allocation3 + $0x109] sm:$0xff] %vm1414_vm3, %v2231_v48  ;;  %2320 = vst.msk [vmem:[#allocation3 + $0x111] sm:$0xff] %vm1414_vm3, %v2232_v14  ;;  %v2453_v42 = vrot.slane %v7941_v31, 1  ;;  %v7949_v45 = vsel %vm426_vm2, %v2448_v28, %v2450_v19  ;;  %v2455_v11 = vrot.slane %v7943_v56, 1  ;;  %v2452_v7 = vrot.slane %v7946_v13, 1  ;;  %v7956_v22 = vld [vmem:[#allocation3 + $0x50] sm:$0xff] }
 0x3b4   : > { %2321 = vst.msk [vmem:[#allocation3 + $0x121] sm:$0xff] %vm1414_vm3, %v2233_v49  ;;  %2322 = vst.msk [vmem:[#allocation3 + $0x129] sm:$0xff] %vm1414_vm3, %v2234_v5  ;;  %v7952_v62 = vsel %vm426_vm2, %v2447_v0, %v2448_v28  ;;  %2634 = vrot.lane.b32.xlu1 %v7949_v45, %s5458_s23  ;;  %v7962_v47 = vld [vmem:[#allocation3 + $0x58] sm:$0x3]  ;;  %v7964_v44 = vld [vmem:[#allocation3 + $0x48] sm:$0xff]  ;;  %v2458_v12 = vrot.slane %v7956_v22, 1 }
 0x3b5   : > { %2323 = vst.msk [vmem:[#allocation3 + $0x139] sm:$0xff] %vm1414_vm3, %v2235_v29  ;;  %2324 = vst.msk [vmem:[#allocation3 + $0x141] sm:$0xff] %vm1414_vm3, %v2236_v6  ;;  %2632 = vrot.lane.b32.xlu0 %v7952_v62, %s5458_s23  ;;  %v7968_v55 = vsel %vm426_vm2, %v2453_v42, %v2455_v11  ;;  %v7971_v59 = vsel %vm426_vm2, %v2452_v7, %v2453_v42  ;;  %v2460_v18 = vrot.slane %v7962_v47, 1  ;;  %v2457_v16 = vrot.slane %v7964_v44, 1  ;;  %v7975_v26 = vld [vmem:[#allocation3 + $0x68] sm:$0xff]  ;;  %v7983_v60 = vld [vmem:[#allocation3 + $0x60] sm:$0xff] }
 0x3b6   : > { %2325 = vst.msk [vmem:[#allocation3 + $0x151] sm:$0xff] %vm1414_vm3, %v2237_v32  ;;  %2326 = vst.msk [vmem:[#allocation3 + $0x159] sm:$0xff] %vm1414_vm3, %v2238_v40  ;;  %v7981_v21 = vld [vmem:[#allocation3 + $0x70] sm:$0x3]  ;;  %v2463_v54 = vrot.slane %v7975_v26, 1  ;;  %v2462_v20 = vrot.slane %v7983_v60, 1 }
 0x3b7   : > { %2327 = vst.msk [vmem:[#allocation3 + $0x169] sm:$0xff] %vm1414_vm3, %v2239_v1  ;;  %2328 = vst.msk [vmem:[#allocation3 + $0x171] sm:$0xff] %vm1414_vm3, %v2240_v10  ;;  %v7987_v57 = vsel %vm426_vm2, %v2458_v12, %v2460_v18  ;;  %v7990_v36 = vsel %vm426_vm2, %v2457_v16, %v2458_v12  ;;  %v2465_v39 = vrot.slane %v7981_v21, 1  ;;  %v7994_v61 = vld [vmem:[#allocation3 + $0x80] sm:$0xff]  ;;  %v8000_v51 = vld [vmem:[#allocation3 + $0x88] sm:$0x3] }
 0x3b8   : > { %2330 = vst.msk [vmem:[#allocation3 + $0x189] sm:$0xff] %vm1414_vm3, %v2242_v53  ;;  %2638 = vrot.lane.b32.xlu1 %v7968_v55, %s5458_s23  ;;  %10901 = vst [vmem:[#allocation68_spill] sm:$0xff] %v7987_v57  ;;  %v8002_v8 = vld [vmem:[#allocation3 + $0x78] sm:$0xff]  ;;  %v2468_v4 = vrot.slane %v7994_v61, 1  ;;  %v8009_v41 = vsel %vm426_vm2, %v2462_v20, %v2463_v54  ;;  %v2470_v9 = vrot.slane %v8000_v51, 1  ;;  %v8021_v2 = vld [vmem:[#allocation3 + $0x90] sm:$0xff] }
 0x3b9   : > { %2636 = vrot.lane.b32.xlu0 %v7971_v59, %s5458_s23  ;;  %v8006_v3 = vsel %vm426_vm2, %v2463_v54, %v2465_v39  ;;  %10903 = vst [vmem:[#allocation71_spill] sm:$0xff] %v8009_v41  ;;  %v2467_v27 = vrot.slane %v8002_v8, 1  ;;  %v8013_v63 = vld [vmem:[#allocation3 + $0x98] sm:$0xff]  ;;  %v8019_v43 = vld [vmem:[#allocation3 + $0xa0] sm:$0x3]  ;;  %v2472_v17 = vrot.slane %v8021_v2, 1 }
 0x3ba   : > { %10902 = vst [vmem:[#allocation69_spill] sm:$0xff] %v8006_v3  ;;  %v2473_v34 = vrot.slane %v8013_v63, 1  ;;  %v8025_v15 = vsel %vm426_vm2, %v2468_v4, %v2470_v9  ;;  %v2475_v38 = vrot.slane %v8019_v43, 1  ;;  %v8032_v46 = vld [vmem:[#allocation3 + $0xb0] sm:$0xff]  ;;  %v8038_v25 = vld [vmem:[#allocation3 + $0xb8] sm:$0x3] }
 0x3bb   : > { %10904 = vst [vmem:[#allocation70_spill] sm:$0xff] %v8025_v15  ;;  %v8028_v50 = vsel %vm426_vm2, %v2467_v27, %v2468_v4  ;;  %v8040_v33 = vld [vmem:[#allocation3 + $0xa8] sm:$0xff]  ;;  %v2478_v24 = vrot.slane %v8032_v46, 1  ;;  %v2480_v49 = vrot.slane %v8038_v25, 1  ;;  %v8057_v6 = vld [vmem:[#allocation3 + $0xd0] sm:$0x3] }
 0x3bc   : > { %2642 = vrot.lane.b32.xlu1 %v7987_v57, %s5458_s23  ;;  %10905 = vst [vmem:[#allocation73_spill] sm:$0xff] %v8028_v50  ;;  %v8044_v48 = vsel %vm426_vm2, %v2473_v34, %v2475_v38  ;;  %v8047_v14 = vsel %vm426_vm2, %v2472_v17, %v2473_v34  ;;  %v2477_v5 = vrot.slane %v8040_v33, 1  ;;  %v8051_v29 = vld [vmem:[#allocation3 + $0xc8] sm:$0xff]  ;;  %v8059_v32 = vld [vmem:[#allocation3 + $0xc0] sm:$0xff]  ;;  %v2485_v53 = vrot.slane %v8057_v6, 1  ;;  %v8078_v42 = vld [vmem:[#allocation3 + $0xd8] sm:$0xff] }
 0x3bd   : > { %2640 = vrot.lane.b32.xlu0 %v7990_v36, %s5458_s23  ;;  %10906 = vst [vmem:[#allocation80_spill] sm:$0xff] %v8044_v48  ;;  %10907 = vst [vmem:[#allocation108_spill] sm:$0xff] %v8047_v14  ;;  %v2483_v40 = vrot.slane %v8051_v29, 1  ;;  %v8063_v1 = vsel %vm426_vm2, %v2478_v24, %v2480_v49  ;;  %v2482_v28 = vrot.slane %v8059_v32, 1  ;;  %v8070_v19 = vld [vmem:[#allocation3 + $0xe0] sm:$0xff]  ;;  %v2487_v16 = vrot.slane %v8078_v42, 1 }
 0x3be   : > { %10908 = vst [vmem:[#allocation51_spill] sm:$0xff] %v8051_v29  ;;  %10909 = vst [vmem:[#allocation83_spill] sm:$0xff] %v8063_v1  ;;  %v8066_v10 = vsel %vm426_vm2, %v2477_v5, %v2478_v24  ;;  %v8076_v0 = vld [vmem:[#allocation3 + $0xe8] sm:$0x3]  ;;  %v2488_v11 = vrot.slane %v8070_v19, 1  ;;  %v8089_v54 = vld [vmem:[#allocation3 + $0xf8] sm:$0xff] }
 0x3bf   : > { %10910 = vst [vmem:[#allocation111_spill] sm:$0xff] %v8066_v10  ;;  %10911 = vst [vmem:[#allocation72_spill] sm:$0xff] %v8070_v19  ;;  %v8082_v7 = vsel %vm426_vm2, %v2483_v40, %v2485_v53  ;;  %v8085_v12 = vsel %vm426_vm2, %v2482_v28, %v2483_v40  ;;  %v2490_v18 = vrot.slane %v8076_v0, 1  ;;  %v8095_v39 = vld [vmem:[#allocation3 + $0x100] sm:$0x3]  ;;  %v8097_v20 = vld [vmem:[#allocation3 + $0xf0] sm:$0xff] }
 0x3c0   : > { %2646 = vrot.lane.b32.xlu1 %v8006_v3, %s5458_s23  ;;  %10912 = vst [vmem:[#allocation54_spill] sm:$0xff] %v8082_v7  ;;  %10913 = vst [vmem:[#allocation75_spill] sm:$0xff] %v8085_v12  ;;  %v2493_v4 = vrot.slane %v8089_v54, 1  ;;  %v8104_v27 = vsel %vm426_vm2, %v2487_v16, %v2488_v11  ;;  %v2495_v34 = vrot.slane %v8095_v39, 1  ;;  %v2492_v38 = vrot.slane %v8097_v20, 1  ;;  %v8108_v17 = vld [vmem:[#allocation3 + $0x110] sm:$0xff] }
 0x3c1   : > { %2644 = vrot.lane.b32.xlu0 %v8009_v41, %s5458_s23  ;;  %10914 = vst [vmem:[#allocation82_spill] sm:$0xff] %v8089_v54  ;;  %v8101_v9 = vsel %vm426_vm2, %v2488_v11, %v2490_v18  ;;  %10916 = vst [vmem:[#allocation53_spill] sm:$0xff] %v8104_v27  ;;  %v8114_v24 = vld [vmem:[#allocation3 + $0x118] sm:$0x3]  ;;  %v8116_v49 = vld [vmem:[#allocation3 + $0x108] sm:$0xff]  ;;  %v2498_v5 = vrot.slane %v8108_v17, 1 }
 0x3c2   : > { %10915 = vst [vmem:[#allocation110_spill] sm:$0xff] %v8101_v9  ;;  %v8120_v40 = vsel %vm426_vm2, %v2493_v4, %v2495_v34  ;;  %v8123_v53 = vsel %vm426_vm2, %v2492_v38, %v2493_v4  ;;  %v2500_v28 = vrot.slane %v8114_v24, 1  ;;  %v2497_v11 = vrot.slane %v8116_v49, 1  ;;  %v8127_v18 = vld [vmem:[#allocation3 + $0x128] sm:$0xff]  ;;  %v8133_v16 = vld [vmem:[#allocation3 + $0x130] sm:$0x3] }
 0x3c3   : > { %10917 = vst [vmem:[#allocation85_spill] sm:$0xff] %v8120_v40  ;;  %10918 = vst [vmem:[#allocation113_spill] sm:$0xff] %v8123_v53  ;;  %v2503_v34 = vrot.slane %v8127_v18, 1 }
 0x3c4   : > { %2650 = vrot.lane.b32.xlu1 %v8025_v15, %s5458_s23  ;;  %v8139_v4 = vsel %vm426_vm2, %v2498_v5, %v2500_v28  ;;  %v8142_v38 = vsel %vm426_vm2, %v2497_v11, %v2498_v5 }
 0x3c5   : > { %2648 = vrot.lane.b32.xlu0 %v8028_v50, %s5458_s23  ;;  %10919 = vst [vmem:[#allocation74_spill] sm:$0xff] %v8139_v4  ;;  %10920 = vst [vmem:[#allocation57_spill] sm:$0xff] %v8142_v38  ;;  %v8192_v50 = vld [vmem:[#allocation3 + $0x168] sm:$0xff] }
 0x3c6   : > { %v2517_v41 = vrot.slane %v8192_v50, 1 }
 0x3c8   : > { %2654 = vrot.lane.b32.xlu1 %v8044_v48, %s5458_s23  ;;  %v8173_v48 = vld [vmem:[#allocation3 + $0x150] sm:$0xff] }
 0x3c9   : > { %2652 = vrot.lane.b32.xlu0 %v8047_v14, %s5458_s23  ;;  %v2512_v15 = vrot.slane %v8173_v48, 1 }
 0x3cc   : > { %2658 = vrot.lane.b32.xlu1 %v8063_v1, %s5458_s23 }
 0x3cd   : > { %2656 = vrot.lane.b32.xlu0 %v8066_v10, %s5458_s23 }
 0x3d0   : > { %2662 = vrot.lane.b32.xlu1 %v8082_v7, %s5458_s23 }
 0x3d1   : > { %2660 = vrot.lane.b32.xlu0 %v8085_v12, %s5458_s23  ;;  %v8154_v12 = vld [vmem:[#allocation3 + $0x138] sm:$0xff] }
 0x3d2   : > { %v2507_v10 = vrot.slane %v8154_v12, 1 }
 0x3d4   : > { %2666 = vrot.lane.b32.xlu1 %v8101_v9, %s5458_s23  ;;  %v8135_v9 = vld [vmem:[#allocation3 + $0x120] sm:$0xff] }
 0x3d5   : > { %2664 = vrot.lane.b32.xlu0 %v8104_v27, %s5458_s23  ;;  %v2505_v27 = vrot.slane %v8133_v16, 1  ;;  %v2502_v7 = vrot.slane %v8135_v9, 1 }
 0x3d7   : > { %v8158_v5 = vsel %vm426_vm2, %v2503_v34, %v2505_v27  ;;  %v8161_v11 = vsel %vm426_vm2, %v2502_v7, %v2503_v34 }
 0x3d8   : > { %2670 = vrot.lane.b32.xlu1 %v8120_v40, %s5458_s23  ;;  %v8146_v40 = vld [vmem:[#allocation3 + $0x140] sm:$0xff]  ;;  %10921 = vst [vmem:[#allocation77_spill] sm:$0xff] %v8158_v5  ;;  %10922 = vst [vmem:[#allocation84_spill] sm:$0xff] %v8161_v11 }
 0x3d9   : > { %2668 = vrot.lane.b32.xlu0 %v8123_v53, %s5458_s23  ;;  %v8152_v53 = vld [vmem:[#allocation3 + $0x148] sm:$0x3]  ;;  %v2508_v28 = vrot.slane %v8146_v40, 1 }
 0x3da   : > { %v2510_v1 = vrot.slane %v8152_v53, 1 }
 0x3db   : > { %v8180_v34 = vsel %vm426_vm2, %v2507_v10, %v2508_v28 }
 0x3dc   : > { %2674 = vrot.lane.b32.xlu1 %v8139_v4, %s5458_s23  ;;  %v8165_v4 = vld [vmem:[#allocation3 + $0x158] sm:$0xff]  ;;  %v8177_v7 = vsel %vm426_vm2, %v2508_v28, %v2510_v1  ;;  %10924 = vst [vmem:[#allocation56_spill] sm:$0xff] %v8180_v34 }
 0x3dd   : > { %2672 = vrot.lane.b32.xlu0 %v8142_v38, %s5458_s23  ;;  %v8171_v38 = vld [vmem:[#allocation3 + $0x160] sm:$0x3]  ;;  %v2513_v27 = vrot.slane %v8165_v4, 1  ;;  %10923 = vst [vmem:[#allocation112_spill] sm:$0xff] %v8177_v7 }
 0x3de   : > { %v2515_v14 = vrot.slane %v8171_v38, 1 }
 0x3df   : > { %v8199_v28 = vsel %vm426_vm2, %v2512_v15, %v2513_v27 }
 0x3e0   : > { %2678 = vrot.lane.b32.xlu1 %v8158_v5, %s5458_s23  ;;  %v8184_v5 = vld [vmem:[#allocation3 + $0x170] sm:$0xff]  ;;  %v8196_v10 = vsel %vm426_vm2, %v2513_v27, %v2515_v14  ;;  %10926 = vst [vmem:[#allocation25_spill] sm:$0xff] %v8199_v28  ;;  %v2522_v14 = vrot.slane %v7699_v30, 2  ;;  %v2530_v30 = vrot.slane %v7930_v35, 2  ;;  %v2538_v35 = vrot.slane %v7956_v22, 2 }
 0x3e1   : > { %2676 = vrot.lane.b32.xlu0 %v8161_v11, %s5458_s23  ;;  %v8190_v11 = vld [vmem:[#allocation3 + $0x178] sm:$0x3]  ;;  %v2518_v1 = vrot.slane %v8184_v5, 1  ;;  %10925 = vst [vmem:[#allocation87_spill] sm:$0xff] %v8196_v10 }
 0x3e2   : > { %v2520_v3 = vrot.slane %v8190_v11, 1 }
 0x3e3   : > { %v8214_v15 = vsel %vm426_vm2, %v2517_v41, %v2518_v1  ;;  %v2533_v41 = vrot.slane %v7941_v31, 2 }
 0x3e4   : > { %2682 = vrot.lane.b32.xlu1 %v8177_v7, %s5458_s23  ;;  %v2523_v7 = vrot.slane %v7701_v37, 2  ;;  %v8211_v57 = vsel %vm426_vm2, %v2518_v1, %v2520_v3  ;;  %10928 = vst [vmem:[#allocation60_spill] sm:$0xff] %v8214_v15  ;;  %v2527_v3 = vrot.slane %v7936_v23, 2 }
 0x3e5   : > { %2680 = vrot.lane.b32.xlu0 %v8180_v34, %s5458_s23  ;;  %v2525_v34 = vrot.slane %v7709_v58, 2  ;;  %10927 = vst [vmem:[#allocation76_spill] sm:$0xff] %v8211_v57  ;;  %v2528_v58 = vrot.slane %v7928_v52, 2 }
 0x3e6   : > { %v2524_v37 = vsel %vm507_vm4, %v2522_v14, %v2523_v7 }
 0x3e7   : > { %v2526_v27 = vsel %vm507_vm4, %v2523_v7, %v2525_v34  ;;  %v8229_v1 = vsel %vm507_vm4, %v2528_v58, %v2530_v30  ;;  %v2535_v7 = vrot.slane %v7943_v56, 2  ;;  %v2532_v34 = vrot.slane %v7946_v13, 2 }
 0x3e8   : > { %2686 = vrot.lane.b32.xlu1 %v8196_v10, %s5458_s23  ;;  %v2537_v56 = vrot.slane %v7964_v44, 2 }
 0x3e9   : > { %2684 = vrot.lane.b32.xlu0 %v8199_v28, %s5458_s23  ;;  %v8242_v14 = vsel %vm507_vm4, %v2533_v41, %v2535_v7  ;;  %v2548_v7 = vrot.slane %v7994_v61, 2 }
 0x3ec   : > { %2690 = vrot.lane.b32.xlu1 %v8211_v57, %s5458_s23  ;;  %v8232_v57 = vsel %vm507_vm4, %v2527_v3, %v2528_v58  ;;  %v2543_v58 = vrot.slane %v7975_v26, 2  ;;  %v8258_v3 = vsel %vm507_vm4, %v2537_v56, %v2538_v35  ;;  %v2553_v56 = vrot.slane %v8013_v63, 2 }
 0x3ed   : > { %2688 = vrot.lane.b32.xlu0 %v8214_v15, %s5458_s23 }
 0x3f0   : > { %2726 = vrot.lane.b32.xlu1 %v2526_v27, %s5460_s25  ;;  %v8245_v27 = vsel %vm507_vm4, %v2532_v34, %v2533_v41  ;;  %v2545_v41 = vrot.slane %v7981_v21, 2  ;;  %v2547_v21 = vrot.slane %v8002_v8, 2 }
 0x3f1   : > { %2724 = vrot.lane.b32.xlu0 %v2524_v37, %s5460_s25  ;;  %v2540_v37 = vrot.slane %v7962_v47, 2  ;;  %v2542_v47 = vrot.slane %v7983_v60, 2 }
 0x3f2   : > { %v8268_v34 = vsel %vm507_vm4, %v2543_v58, %v2545_v41  ;;  %v8284_v41 = vsel %vm507_vm4, %v2547_v21, %v2548_v7  ;;  %v2563_v21 = vrot.slane %v8051_v29, 2 }
 0x3f3   : > { %v8255_v30 = vsel %vm507_vm4, %v2538_v35, %v2540_v37  ;;  %v8271_v37 = vsel %vm507_vm4, %v2542_v47, %v2543_v58  ;;  %v2550_v35 = vrot.slane %v8000_v51, 2  ;;  %v2555_v58 = vrot.slane %v8019_v43, 2 }
 0x3f4   : > { %2730 = vrot.lane.b32.xlu1 %v8229_v1, %s5460_s25  ;;  %v2552_v51 = vrot.slane %v8021_v2, 2  ;;  %v2558_v47 = vrot.slane %v8032_v46, 2  ;;  %v2557_v43 = vrot.slane %v8040_v33, 2 }
 0x3f5   : > { %2728 = vrot.lane.b32.xlu0 %v8232_v57, %s5460_s25  ;;  %v8281_v15 = vsel %vm507_vm4, %v2548_v7, %v2550_v35  ;;  %v8294_v10 = vsel %vm507_vm4, %v2553_v56, %v2555_v58  ;;  %v2560_v7 = vrot.slane %v8038_v25, 2  ;;  %v2562_v25 = vrot.slane %v8059_v32, 2 }
 0x3f6   : > { %v8297_v35 = vsel %vm507_vm4, %v2552_v51, %v2553_v56  ;;  %v8310_v58 = vsel %vm507_vm4, %v2557_v43, %v2558_v47  ;;  %v2565_v56 = vrot.slane %v8057_v6, 2  ;;  %v2568_v51 = vrot.slane %v8070_v19, 2 }
 0x3f7   : > { %v8307_v28 = vsel %vm507_vm4, %v2558_v47, %v2560_v7  ;;  %v8323_v7 = vsel %vm507_vm4, %v2562_v25, %v2563_v21  ;;  %v2570_v47 = vrot.slane %v8076_v0, 2  ;;  %v2567_v6 = vrot.slane %v8078_v42, 2 }
 0x3f8   : > { %2734 = vrot.lane.b32.xlu1 %v8242_v14, %s5460_s25  ;;  %v8320_v29 = vsel %vm507_vm4, %v2563_v21, %v2565_v56  ;;  %v2573_v43 = vrot.slane %v8089_v54, 2  ;;  %v2575_v21 = vrot.slane %v8095_v39, 2  ;;  %v2572_v0 = vrot.slane %v8097_v20, 2 }
 0x3f9   : > { %2732 = vrot.lane.b32.xlu0 %v8245_v27, %s5460_s25  ;;  %v8333_v19 = vsel %vm507_vm4, %v2568_v51, %v2570_v47  ;;  %v8336_v56 = vsel %vm507_vm4, %v2567_v6, %v2568_v51  ;;  %v2578_v25 = vrot.slane %v8108_v17, 2  ;;  %v2580_v51 = vrot.slane %v8114_v24, 2 }
 0x3fa   : > { %v8346_v54 = vsel %vm507_vm4, %v2573_v43, %v2575_v21  ;;  %v8349_v47 = vsel %vm507_vm4, %v2572_v0, %v2573_v43  ;;  %v2577_v39 = vrot.slane %v8116_v49, 2  ;;  %v2583_v6 = vrot.slane %v8127_v18, 2 }
 0x3fb   : > { %v8359_v17 = vsel %vm507_vm4, %v2578_v25, %v2580_v51  ;;  %v2585_v43 = vrot.slane %v8133_v16, 2  ;;  %v2582_v24 = vrot.slane %v8135_v9, 2  ;;  %v2588_v49 = vrot.slane %v8146_v40, 2  ;;  %v8383_v9 = vpop.permute.xlu0 %2628  ;;  %v8385_v51 = vpop.permute.xlu1 %2630 }
 0x3fc   : > { %2738 = vrot.lane.b32.xlu1 %v8255_v30, %s5460_s25  ;;  %v8362_v21 = vsel %vm507_vm4, %v2577_v39, %v2578_v25  ;;  %v2590_v25 = vrot.slane %v8152_v53, 2  ;;  %v2587_v16 = vrot.slane %v8154_v12, 2  ;;  %v2593_v40 = vrot.slane %v8165_v4, 2 }
 0x3fd   : > { %2736 = vrot.lane.b32.xlu0 %v8258_v3, %s5460_s25  ;;  %v8372_v18 = vsel %vm507_vm4, %v2583_v6, %v2585_v43  ;;  %v8375_v0 = vsel %vm507_vm4, %v2582_v24, %v2583_v6  ;;  %v2595_v12 = vrot.slane %v8171_v38, 2  ;;  %v2592_v53 = vrot.slane %v8173_v48, 2 }
 0x3fe   : > { %v8389_v39 = vsel %vm507_vm4, %v2588_v49, %v2590_v25  ;;  %v8392_v6 = vsel %vm507_vm4, %v2587_v16, %v2588_v49  ;;  %v2598_v4 = vrot.slane %v8184_v5, 2  ;;  %v2600_v48 = vrot.slane %v8190_v11, 2 }
 0x3ff   : > { %10929 = vst [vmem:[#allocation79_spill] sm:$0xff] %v8389_v39  ;;  %10930 = vst [vmem:[#allocation86_spill] sm:$0xff] %v8392_v6  ;;  %v8406_v25 = vsel %vm507_vm4, %v2593_v40, %v2595_v12  ;;  %v8409_v49 = vsel %vm507_vm4, %v2592_v53, %v2593_v40  ;;  %v2597_v38 = vrot.slane %v8192_v50, 2  ;;  %v2385_v12 = vld [vmem:[%s10361_s2] sm:$0xff]  ;;  %v2386_v53 = vld [vmem:[%s10361_s2 + $0x8] sm:$0xff] }
 0x400   : > { %2742 = vrot.lane.b32.xlu1 %v8268_v34, %s5460_s25  ;;  %10931 = vst [vmem:[#allocation114_spill] sm:$0xff] %v8406_v25  ;;  %10932 = vst [vmem:[#allocation58_spill] sm:$0xff] %v8409_v49  ;;  %v8422_v5 = vsel %vm507_vm4, %v2598_v4, %v2600_v48 }
 0x401   : > { %2740 = vrot.lane.b32.xlu0 %v8271_v37, %s5460_s25  ;;  %10933 = vst [vmem:[#allocation89_spill] sm:$0xff] %v8422_v5  ;;  %v8425_v40 = vsel %vm507_vm4, %v2597_v38, %v2598_v4  ;;  %v5338_v4 = vpack.c.bf16 %v2386_v53, %v2385_v12 }
 0x402   : > { %10934 = vst [vmem:[#allocation64_spill] sm:$0xff] %v8425_v40 }
 0x403   : > { %5339 = vmatprep.subr.bf16.mxu1 %v5338_v4 }
 0x404   : > { %2746 = vrot.lane.b32.xlu1 %v8281_v15, %s5460_s25  ;;  %5341 = vmatpush3.bf16.msra.mxu1 %v5338_v4 }
 0x405   : > { %2744 = vrot.lane.b32.xlu0 %v8284_v41, %s5460_s25 }
 0x408   : > { %2750 = vrot.lane.b32.xlu1 %v8294_v10, %s5460_s25 }
 0x409   : > { %2748 = vrot.lane.b32.xlu0 %v8297_v35, %s5460_s25 }
 0x40c   : > { %2754 = vrot.lane.b32.xlu1 %v8307_v28, %s5460_s25 }
 0x40d   : > { %2752 = vrot.lane.b32.xlu0 %v8310_v58, %s5460_s25 }
 0x410   : > { %2758 = vrot.lane.b32.xlu1 %v8320_v29, %s5460_s25 }
 0x411   : > { %2756 = vrot.lane.b32.xlu0 %v8323_v7, %s5460_s25 }
 0x414   : > { %2762 = vrot.lane.b32.xlu1 %v8333_v19, %s5460_s25 }
 0x415   : > { %2760 = vrot.lane.b32.xlu0 %v8336_v56, %s5460_s25 }
 0x418   : > { %2766 = vrot.lane.b32.xlu1 %v8346_v54, %s5460_s25 }
 0x419   : > { %2764 = vrot.lane.b32.xlu0 %v8349_v47, %s5460_s25 }
 0x41c   : > { %2770 = vrot.lane.b32.xlu1 %v8359_v17, %s5460_s25 }
 0x41d   : > { %2768 = vrot.lane.b32.xlu0 %v8362_v21, %s5460_s25 }
 0x420   : > { %2774 = vrot.lane.b32.xlu1 %v8372_v18, %s5460_s25 }
 0x421   : > { %2772 = vrot.lane.b32.xlu0 %v8375_v0, %s5460_s25 }
 0x424   : > { %2778 = vrot.lane.b32.xlu1 %v8389_v39, %s5460_s25 }
 0x425   : > { %2776 = vrot.lane.b32.xlu0 %v8392_v6, %s5460_s25 }
 0x426   : > { %v8402_v24 = vpop.permute.xlu1 %2634 }
 0x427   : > { %v8400_v43 = vpop.permute.xlu0 %2632 }
 0x428   : > { %2782 = vrot.lane.b32.xlu1 %v8406_v25, %s5460_s25 }
 0x429   : > { %2780 = vrot.lane.b32.xlu0 %v8409_v49, %s5460_s25 }
 0x42a   : > { %v8419_v39 = vpop.permute.xlu1 %2638 }
 0x42b   : > { %v8417_v16 = vpop.permute.xlu0 %2636 }
 0x42c   : > { %2786 = vrot.lane.b32.xlu1 %v8422_v5, %s5460_s25  ;;  %v2387_v5 = vld [vmem:[%s10361_s2 + $0x10] sm:$0xff] }
 0x42d   : > { %2784 = vrot.lane.b32.xlu0 %v8425_v40, %s5460_s25  ;;  %v2388_v40 = vld [vmem:[%s10361_s2 + $0x18] sm:$0xff]  ;;  %s5465_s25 = smov 40  }
 0x42e   : > { %v8433_v11 = vpop.permute.xlu1 %2642  ;;  %v5342_v12 = vpack.c.bf16 %v2388_v40, %v2387_v5  ;;  %v2390_v5 = vld [vmem:[%s10361_s2 + $0x28] sm:$0xff] }
 0x42f   : > { %v8431_v50 = vpop.permute.xlu0 %2640 }
 0x430   : > { %2822 = vrot.lane.b32.xlu1 %v7928_v52, %s5462_s11  ;;  %5343 = vmatprep.subr.bf16.mxu1 %v5342_v12 }
 0x431   : > { %2820 = vrot.lane.b32.xlu0 %v7936_v23, %s5462_s11  ;;  %5345 = vmatpush3.bf16.msra.mxu1 %v5342_v12 }
 0x432   : > { %v8447_v38 = vpop.permute.xlu1 %2646 }
 0x433   : > { %v8445_v48 = vpop.permute.xlu0 %2644 }
 0x434   : > { %2916 = vrot.lane.b32.xlu1 %v7952_v62, %s5464_s13  ;;  %v2389_v62 = vld [vmem:[%s10361_s2 + $0x20] sm:$0xff] }
 0x435   : > { %2824 = vrot.lane.b32.xlu0 %v7946_v13, %s5462_s11  ;;  %v5346_v40 = vpack.c.bf16 %v2390_v5, %v2389_v62 }
 0x436   : > { %v8461_v25 = vpop.permute.xlu1 %2650 }
 0x437   : > { %v8459_v53 = vpop.permute.xlu0 %2648  ;;  %5347 = vmatprep.subr.bf16.mxu1 %v5346_v40 }
 0x438   : > { %3012 = vrot.lane.b32.xlu1 %v8232_v57, %s5465_s25  ;;  %5349 = vmatpush3.bf16.msra.mxu1 %v5346_v40  ;;  %v2392_v57 = vld [vmem:[%s10361_s2 + $0x38] sm:$0xff] }
 0x439   : > { %2918 = vrot.lane.b32.xlu0 %v7949_v45, %s5464_s13  ;;  %v2391_v45 = vld [vmem:[%s10361_s2 + $0x30] sm:$0xff] }
 0x43a   : > { %v8475_v49 = vpop.permute.xlu1 %2654  ;;  %v5350_v5 = vpack.c.bf16 %v2392_v57, %v2391_v45 }
 0x43b   : > { %v8473_v4 = vpop.permute.xlu0 %2652 }
 0x43c   : > { %3108 = vrot.lane.b32.xlu1 %v7946_v13, %s5466_s30  ;;  %5351 = vmatprep.subr.bf16.mxu1 %v5350_v5 }
 0x43d   : > { %3014 = vrot.lane.b32.xlu0 %v8229_v1, %s5465_s25  ;;  %v2393_v1 = vld [vmem:[%s10361_s2 + $0x40] sm:$0xff]  ;;  %5353 = vmatpush3.bf16.msra.mxu1 %v5350_v5 }
 0x43e   : > { %v8489_v62 = vpop.permute.xlu1 %2658  ;;  %5230 = vmatprep.subr.mxu1 %v2393_v1 }
 0x43f   : > { %v8487_v12 = vpop.permute.xlu0 %2656  ;;  %10936 = vst [vmem:[#allocation78_spill] sm:$0xff] %v8489_v62 }
 0x440   : > { %10935 = vst [vmem:[#allocation31_spill] sm:$0xff] %v8487_v12  ;;  %3204 = vrot.lane.b32.xlu1 %v7971_v59, %s5467_s9 }
 0x441   : > { %3110 = vrot.lane.b32.xlu0 %v7941_v31, %s5466_s30  ;;  %5231 = vmatpush3.msra.mxu1 %v2393_v1 }
 0x442   : > { %v8500_v6 = vpop.permute.xlu1 %2662 }
 0x443   : > { %v8498_v40 = vpop.permute.xlu0 %2660  ;;  %10938 = vst [vmem:[#allocation61_spill] sm:$0xff] %v8500_v6 }
 0x444   : > { %10937 = vst [vmem:[#allocation121_spill] sm:$0xff] %v8498_v40  ;;  %2920 = vrot.lane.b32.xlu1 %v7971_v59, %s5464_s13 }
 0x445   : > { %2826 = vrot.lane.b32.xlu0 %v7941_v31, %s5462_s11 }
 0x446   : > { %v8508_v57 = vpop.permute.xlu1 %2666 }
 0x447   : > { %v8506_v45 = vpop.permute.xlu0 %2664  ;;  %10940 = vst [vmem:[#allocation107_spill] sm:$0xff] %v8508_v57 }
 0x448   : > { %10939 = vst [vmem:[#allocation81_spill] sm:$0xff] %v8506_v45  ;;  %3300 = vrot.lane.b32.xlu1 %v8245_v27, %s5468_s14 }
 0x449   : > { %3206 = vrot.lane.b32.xlu0 %v7968_v55, %s5467_s9 }
 0x44a   : > { %v8516_v6 = vpop.permute.xlu1 %2670 }
 0x44b   : > { %v8514_v5 = vpop.permute.xlu0 %2668  ;;  %10942 = vst [vmem:[#allocation88_spill] sm:$0xff] %v8516_v6  ;;  %v10955_v6 = vld [vmem:[#allocation69_spill] sm:$0xff] }
 0x44c   : > { %10941 = vst [vmem:[#allocation109_spill] sm:$0xff] %v8514_v5  ;;  %3016 = vrot.lane.b32.xlu1 %v8245_v27, %s5465_s25 }
 0x44d   : > { %2922 = vrot.lane.b32.xlu0 %v7968_v55, %s5464_s13 }
 0x44e   : > { %v8524_v59 = vpop.permute.xlu1 %2674 }
 0x44f   : > { %v8522_v31 = vpop.permute.xlu0 %2672  ;;  %10944 = vst [vmem:[#allocation120_spill] sm:$0xff] %v8524_v59 }
 0x450   : > { %10943 = vst [vmem:[#allocation27_spill] sm:$0xff] %v8522_v31  ;;  %3018 = vrot.lane.b32.xlu1 %v8242_v14, %s5465_s25 }
 0x451   : > { %3302 = vrot.lane.b32.xlu0 %v8242_v14, %s5468_s14 }
 0x452   : > { %v8532_v5 = vpop.permute.xlu1 %2678 }
 0x453   : > { %v8530_v1 = vpop.permute.xlu0 %2676  ;;  %10946 = vst [vmem:[#allocation65_spill] sm:$0xff] %v8532_v5 }
 0x454   : > { %10945 = vst [vmem:[#allocation118_spill] sm:$0xff] %v8530_v1  ;;  %2828 = vrot.lane.b32.xlu1 %v7964_v44, %s5462_s11 }
 0x455   : > { %3112 = vrot.lane.b32.xlu0 %v7964_v44, %s5466_s30 }
 0x456   : > { %v8540_v27 = vpop.permute.xlu1 %2682 }
 0x457   : > { %v8538_v55 = vpop.permute.xlu0 %2680  ;;  %10948 = vst [vmem:[#allocation91_spill] sm:$0xff] %v8540_v27  ;;  %v10953_v27 = vld [vmem:[#allocation68_spill] sm:$0xff] }
 0x458   : > { %10947 = vst [vmem:[#allocation117_spill] sm:$0xff] %v8538_v55  ;;  %3208 = vrot.lane.b32.xlu1 %v7990_v36, %s5467_s9 }
 0x459   : > { %3114 = vrot.lane.b32.xlu0 %v7956_v22, %s5466_s30 }
 0x45a   : > { %v8548_v1 = vpop.permute.xlu1 %2686 }
 0x45b   : > { %v8546_v14 = vpop.permute.xlu0 %2684  ;;  %10950 = vst [vmem:[#allocation123_spill] sm:$0xff] %v8548_v1  ;;  %v10954_v1 = vld [vmem:[#allocation71_spill] sm:$0xff] }
 0x45c   : > { %10949 = vst [vmem:[#allocation38_spill] sm:$0xff] %v8546_v14  ;;  %2924 = vrot.lane.b32.xlu1 %v7990_v36, %s5464_s13 }
 0x45d   : > { %2830 = vrot.lane.b32.xlu0 %v7956_v22, %s5462_s11 }
 0x45e   : > { %v8556_v55 = vpop.permute.xlu1 %2690 }
 0x45f   : > { %v8554_v44 = vpop.permute.xlu0 %2688  ;;  %10952 = vst [vmem:[#allocation4_spill] sm:$0xff] %v8556_v55 }
 0x460   : > { %10951 = vst [vmem:[#allocation119_spill] sm:$0xff] %v8554_v44  ;;  %3304 = vrot.lane.b32.xlu1 %v8258_v3, %s5468_s14 }
 0x461   : > { %3210 = vrot.lane.b32.xlu0 %v10953_v27, %s5467_s9 }
 0x462   : > { %v8564_v14 = vpop.permute.xlu1 %2726 }
 0x463   : > { %v8562_v5 = vpop.permute.xlu0 %2724 }
 0x464   : > { %3020 = vrot.lane.b32.xlu1 %v8258_v3, %s5465_s25 }
 0x465   : > { %2926 = vrot.lane.b32.xlu0 %v10953_v27, %s5464_s13 }
 0x466   : > { %v8572_v36 = vpop.permute.xlu1 %2730 }
 0x467   : > { %v8570_v22 = vpop.permute.xlu0 %2728 }
 0x468   : > { %3022 = vrot.lane.b32.xlu1 %v8255_v30, %s5465_s25 }
 0x469   : > { %3306 = vrot.lane.b32.xlu0 %v8255_v30, %s5468_s14 }
 0x46a   : > { %v8580_v44 = vpop.permute.xlu1 %2734 }
 0x46b   : > { %v8578_v55 = vpop.permute.xlu0 %2732 }
 0x46c   : > { %2832 = vrot.lane.b32.xlu1 %v7983_v60, %s5462_s11 }
 0x46d   : > { %3116 = vrot.lane.b32.xlu0 %v7983_v60, %s5466_s30 }
 0x46e   : > { %v8588_v27 = vpop.permute.xlu1 %2738 }
 0x46f   : > { %v8586_v3 = vpop.permute.xlu0 %2736 }
 0x470   : > { %3212 = vrot.lane.b32.xlu1 %v10954_v1, %s5467_s9 }
 0x471   : > { %3118 = vrot.lane.b32.xlu0 %v7975_v26, %s5466_s30 }
 0x472   : > { %v8596_v59 = vpop.permute.xlu1 %2742 }
 0x473   : > { %v8594_v30 = vpop.permute.xlu0 %2740 }
 0x474   : > { %2928 = vrot.lane.b32.xlu1 %v10954_v1, %s5464_s13 }
 0x475   : > { %2834 = vrot.lane.b32.xlu0 %v7975_v26, %s5462_s11 }
 0x476   : > { %v8604_v31 = vpop.permute.xlu1 %2746 }
 0x477   : > { %v8602_v60 = vpop.permute.xlu0 %2744 }
 0x478   : > { %3308 = vrot.lane.b32.xlu1 %v8271_v37, %s5468_s14 }
 0x479   : > { %3214 = vrot.lane.b32.xlu0 %v10955_v6, %s5467_s9 }
 0x47a   : > { %v8612_v45 = vpop.permute.xlu1 %2750 }
 0x47b   : > { %v8610_v57 = vpop.permute.xlu0 %2748  ;;  %10956 = vst [vmem:[#allocation90_spill] sm:$0xff] %v8612_v45 }
 0x47c   : > { %3024 = vrot.lane.b32.xlu1 %v8271_v37, %s5465_s25 }
 0x47d   : > { %2930 = vrot.lane.b32.xlu0 %v10955_v6, %s5464_s13 }
 0x47e   : > { %v8620_v1 = vpop.permute.xlu1 %2754 }
 0x47f   : > { %v8618_v26 = vpop.permute.xlu0 %2752  ;;  %10958 = vst [vmem:[#allocation122_spill] sm:$0xff] %v8620_v1  ;;  %v10963_v1 = vld [vmem:[#allocation73_spill] sm:$0xff] }
 0x480   : > { %10957 = vst [vmem:[#allocation37_spill] sm:$0xff] %v8618_v26  ;;  %3026 = vrot.lane.b32.xlu1 %v8268_v34, %s5465_s25 }
 0x481   : > { %3310 = vrot.lane.b32.xlu0 %v8268_v34, %s5468_s14 }
 0x482   : > { %v8628_v62 = vpop.permute.xlu1 %2758 }
 0x483   : > { %v8626_v40 = vpop.permute.xlu0 %2756  ;;  %10960 = vst [vmem:[#allocation93_spill] sm:$0xff] %v8628_v62 }
 0x484   : > { %10959 = vst [vmem:[#allocation137_spill] sm:$0xff] %v8626_v40  ;;  %2836 = vrot.lane.b32.xlu1 %v8002_v8, %s5462_s11 }
 0x485   : > { %3120 = vrot.lane.b32.xlu0 %v8002_v8, %s5466_s30 }
 0x486   : > { %v8636_v6 = vpop.permute.xlu1 %2762 }
 0x487   : > { %v8634_v37 = vpop.permute.xlu0 %2760  ;;  %10962 = vst [vmem:[#allocation125_spill] sm:$0xff] %v8636_v6  ;;  %v10968_v6 = vld [vmem:[#allocation70_spill] sm:$0xff] }
 0x488   : > { %10961 = vst [vmem:[#allocation40_spill] sm:$0xff] %v8634_v37  ;;  %3216 = vrot.lane.b32.xlu1 %v10963_v1, %s5467_s9 }
 0x489   : > { %3122 = vrot.lane.b32.xlu0 %v7994_v61, %s5466_s30 }
 0x48a   : > { %v8644_v40 = vpop.permute.xlu1 %2766 }
 0x48b   : > { %v8642_v34 = vpop.permute.xlu0 %2764  ;;  %10965 = vst [vmem:[#allocation92_spill] sm:$0xff] %v8644_v40  ;;  %v5419_v40 = vld [vmem:[#allocation3] sm:$0xff] }
 0x48c   : > { %10964 = vst [vmem:[#allocation139_spill] sm:$0xff] %v8642_v34  ;;  %2932 = vrot.lane.b32.xlu1 %v10963_v1, %s5464_s13  ;;  %v3396_v26 = vsel %vm1414_vm3, %v5419_v40, %v8383_v9 }
 0x48d   : > { %2838 = vrot.lane.b32.xlu0 %v7994_v61, %s5462_s11 }
 0x48e   : > { %v8652_v37 = vpop.permute.xlu1 %2770 }
 0x48f   : > { %v8650_v8 = vpop.permute.xlu0 %2768  ;;  %10967 = vst [vmem:[#allocation39_spill] sm:$0xff] %v8652_v37 }
 0x490   : > { %10966 = vst [vmem:[#allocation150_spill] sm:$0xff] %v8650_v8  ;;  %3312 = vrot.lane.b32.xlu1 %v8284_v41, %s5468_s14 }
 0x491   : > { %3218 = vrot.lane.b32.xlu0 %v10968_v6, %s5467_s9 }
 0x492   : > { %v8660_v34 = vpop.permute.xlu1 %2774 }
 0x493   : > { %v8658_v62 = vpop.permute.xlu0 %2772  ;;  %10970 = vst [vmem:[#allocation138_spill] sm:$0xff] %v8660_v34 }
 0x494   : > { %10969 = vst [vmem:[#allocation124_spill] sm:$0xff] %v8658_v62  ;;  %3028 = vrot.lane.b32.xlu1 %v8284_v41, %s5465_s25 }
 0x495   : > { %2934 = vrot.lane.b32.xlu0 %v10968_v6, %s5464_s13 }
 0x496   : > { %v8668_v1 = vpop.permute.xlu1 %2778 }
 0x497   : > { %v8666_v61 = vpop.permute.xlu0 %2776  ;;  %10972 = vst [vmem:[#allocation152_spill] sm:$0xff] %v8668_v1  ;;  %v10977_v1 = vld [vmem:[#allocation108_spill] sm:$0xff] }
 0x498   : > { %10971 = vst [vmem:[#allocation95_spill] sm:$0xff] %v8666_v61  ;;  %3030 = vrot.lane.b32.xlu1 %v8281_v15, %s5465_s25 }
 0x499   : > { %3314 = vrot.lane.b32.xlu0 %v8281_v15, %s5468_s14 }
 0x49a   : > { %v8676_v62 = vpop.permute.xlu1 %2782 }
 0x49b   : > { %v8674_v37 = vpop.permute.xlu0 %2780  ;;  %10974 = vst [vmem:[#allocation62_spill] sm:$0xff] %v8676_v62 }
 0x49c   : > { %10973 = vst [vmem:[#allocation42_spill] sm:$0xff] %v8674_v37  ;;  %2840 = vrot.lane.b32.xlu1 %v8021_v2, %s5462_s11 }
 0x49d   : > { %3124 = vrot.lane.b32.xlu0 %v8021_v2, %s5466_s30 }
 0x49e   : > { %v8684_v6 = vpop.permute.xlu1 %2786 }
 0x49f   : > { %v8682_v41 = vpop.permute.xlu0 %2784  ;;  %10976 = vst [vmem:[#allocation94_spill] sm:$0xff] %v8684_v6 }
 0x4a0   : > { %10975 = vst [vmem:[#allocation66_spill] sm:$0xff] %v8682_v41  ;;  %3220 = vrot.lane.b32.xlu1 %v10977_v1, %s5467_s9  ;;  %v10978_v41 = vld [vmem:[#allocation80_spill] sm:$0xff] }
 0x4a1   : > { %3126 = vrot.lane.b32.xlu0 %v8013_v63, %s5466_s30 }
 0x4a2   : > { %v2823_v37 = vpop.permute.xlu1 %2822 }
 0x4a3   : > { %v2821_v15 = vpop.permute.xlu0 %2820 }
 0x4a4   : > { %2936 = vrot.lane.b32.xlu1 %v10977_v1, %s5464_s13 }
 0x4a5   : > { %2842 = vrot.lane.b32.xlu0 %v8013_v63, %s5462_s11 }
 0x4a6   : > { %v2917_v2 = vpop.permute.xlu1 %2916 }
 0x4a7   : > { %v8694_v62 = vpop.permute.xlu0 %2824 }
 0x4a8   : > { %3316 = vrot.lane.b32.xlu1 %v8297_v35, %s5468_s14 }
 0x4a9   : > { %3222 = vrot.lane.b32.xlu0 %v10978_v41, %s5467_s9 }
 0x4aa   : > { %v3013_v61 = vpop.permute.xlu1 %3012 }
 0x4ab   : > { %v2919_v6 = vpop.permute.xlu0 %2918 }
 0x4ac   : > { %3032 = vrot.lane.b32.xlu1 %v8297_v35, %s5465_s25  ;;  %v3428_v35 = vsel %vm1480_vm7, %v3396_v26, %v8562_v5 }
 0x4ad   : > { %2938 = vrot.lane.b32.xlu0 %v10978_v41, %s5464_s13  ;;  %v3460_v41 = vsel %vm1546_vm9, %v3428_v35, %v2821_v15 }
 0x4ae   : > { %v3109_v34 = vpop.permute.xlu1 %3108  ;;  %v3492_v45 = vsel %vm1612_vm11, %v3460_v41, %v2917_v2  ;;  %v5420_v2 = vld [vmem:[#allocation3 + $0x8] sm:$0xff] }
 0x4af   : > { %v3015_v63 = vpop.permute.xlu0 %3014  ;;  %v3525_v9 = vsel %vm3524_vm14, %v3492_v45, %v3013_v61  ;;  %v3397_v45 = vsel %vm1414_vm3, %v5420_v2, %v8385_v51  ;;  %v10980_v51 = vld [vmem:[#allocation83_spill] sm:$0xff] }
 0x4b0   : > { %3034 = vrot.lane.b32.xlu1 %v8294_v10, %s5465_s25  ;;  %v3558_v40 = vsel %vm3557_vm15, %v3525_v9, %v3109_v34  ;;  %v3429_v34 = vsel %vm1480_vm7, %v3397_v45, %v8564_v14 }
 0x4b1   : > { %3318 = vrot.lane.b32.xlu0 %v8294_v10, %s5468_s14 }
 0x4b2   : > { %v3205_v8 = vpop.permute.xlu1 %3204 }
 0x4b3   : > { %v3111_v1 = vpop.permute.xlu0 %3110  ;;  %v3591_v5 = vsel %vm3590_vm1, %v3558_v40, %v3205_v8  ;;  %v3461_v8 = vsel %vm1546_vm9, %v3429_v34, %v2823_v37 }
 0x4b4   : > { %2844 = vrot.lane.b32.xlu1 %v8040_v33, %s5462_s11  ;;  %v3493_v9 = vsel %vm1612_vm11, %v3461_v8, %v2919_v6 }
 0x4b5   : > { %3128 = vrot.lane.b32.xlu0 %v8040_v33, %s5466_s30  ;;  %v10979_v33 = vld [vmem:[#allocation111_spill] sm:$0xff]  ;;  %v3526_v40 = vsel %vm3524_vm14, %v3493_v9, %v3015_v63 }
 0x4b6   : > { %v2921_v12 = vpop.permute.xlu1 %2920 }
 0x4b7   : > { %v8717_v10 = vpop.permute.xlu0 %2826 }
 0x4b8   : > { %3224 = vrot.lane.b32.xlu1 %v10979_v33, %s5467_s9 }
 0x4b9   : > { %3130 = vrot.lane.b32.xlu0 %v8032_v46, %s5466_s30 }
 0x4ba   : > { %v3301_v15 = vpop.permute.xlu1 %3300 }
 0x4bb   : > { %v3207_v26 = vpop.permute.xlu0 %3206  ;;  %v3624_v35 = vsel %vm3623_vm6, %v3591_v5, %v3301_v15  ;;  %v3398_v15 = vsel %vm1414_vm3, %v7936_v23, %v8400_v43  ;;  %v10981_v23 = vld [vmem:[#allocation51_spill] sm:$0xff] }
 0x4bc   : > { %2940 = vrot.lane.b32.xlu1 %v10979_v33, %s5464_s13  ;;  %5232 = vmatprep.mubr.msk.f32.mxu1 %vm3656_vm8, %v3624_v35  ;;  %v10982_v43 = vld [vmem:[#allocation75_spill] sm:$0xff] }
 0x4bd   : > { %2846 = vrot.lane.b32.xlu0 %v8032_v46, %s5462_s11  ;;  %v3559_v46 = vsel %vm3557_vm15, %v3526_v40, %v3111_v1 }
 0x4be   : > { %v3017_v41 = vpop.permute.xlu1 %3016  ;;  %v3592_v14 = vsel %vm3590_vm1, %v3559_v46, %v3207_v26 }
 0x4bf   : > { %v2923_v61 = vpop.permute.xlu0 %2922 }
 0x4c0   : > { %3320 = vrot.lane.b32.xlu1 %v8310_v58, %s5468_s14 }
 0x4c1   : > { %3226 = vrot.lane.b32.xlu0 %v10980_v51, %s5467_s9 }
 0x4c2   : > { %v3019_v5 = vpop.permute.xlu1 %3018 }
 0x4c3   : > { %v3303_v33 = vpop.permute.xlu0 %3302 }
 0x4c4   : > { %v3625_v37 = vsel %vm3623_vm6, %v3592_v14, %v3303_v33  ;;  %3036 = vrot.lane.b32.xlu1 %v8310_v58, %s5465_s25  ;;  %v3430_v58 = vsel %vm1480_vm7, %v3398_v15, %v8570_v22  ;;  %v3400_v15 = vsel %vm1414_vm3, %v7946_v13, %v8417_v16  ;;  %v10984_v13 = vld [vmem:[#allocation72_spill] sm:$0xff]  ;;  %v10985_v16 = vld [vmem:[#allocation53_spill] sm:$0xff] }
 0x4c5   : > { %2942 = vrot.lane.b32.xlu0 %v10980_v51, %s5464_s13  ;;  %5233 = vmatmul.mubr.msk.f32.vlgmr.msra.gmra.mrb[16].mxu1 %vm3656_vm8, %v3625_v37  ;;  %v3462_v35 = vsel %vm1546_vm9, %v3430_v58, %v8694_v62 }
 0x4c6   : > { %v2829_v63 = vpop.permute.xlu1 %2828  ;;  %v3494_v45 = vsel %vm1612_vm11, %v3462_v35, %v2921_v12  ;;  %v3399_v12 = vsel %vm1414_vm3, %v7928_v52, %v8402_v24  ;;  %v10983_v24 = vld [vmem:[#allocation54_spill] sm:$0xff] }
 0x4c7   : > { %v3113_v6 = vpop.permute.xlu0 %3112  ;;  %v3527_v34 = vsel %vm3524_vm14, %v3494_v45, %v3017_v41  ;;  %v3431_v41 = vsel %vm1480_vm7, %v3399_v12, %v8572_v36 }
 0x4c8   : > { %3038 = vrot.lane.b32.xlu1 %v8307_v28, %s5465_s25  ;;  %v3463_v40 = vsel %vm1546_vm9, %v3431_v41, %v8717_v10 }
 0x4c9   : > { %3322 = vrot.lane.b32.xlu0 %v8307_v28, %s5468_s14  ;;  %v3495_v14 = vsel %vm1612_vm11, %v3463_v40, %v2923_v61 }
 0x4ca   : > { %v3209_v26 = vpop.permute.xlu1 %3208  ;;  %v3528_v52 = vsel %vm3524_vm14, %v3495_v14, %v3019_v5 }
 0x4cb   : > { %v3115_v1 = vpop.permute.xlu0 %3114 }
 0x4cc   : > { %2848 = vrot.lane.b32.xlu1 %v8059_v32, %s5462_s11  ;;  %v3561_v33 = vsel %vm3557_vm15, %v3528_v52, %v3115_v1 }
 0x4cd   : > { %3132 = vrot.lane.b32.xlu0 %v8059_v32, %s5466_s30  ;;  %v3560_v32 = vsel %vm3557_vm15, %v3527_v34, %v3113_v6 }
 0x4ce   : > { %v2925_v28 = vpop.permute.xlu1 %2924  ;;  %v3593_v8 = vsel %vm3590_vm1, %v3560_v32, %v3209_v26  ;;  %v5421_v32 = vld [vmem:[#allocation3 + $0x38] sm:$0xff] }
 0x4cf   : > { %v2831_v2 = vpop.permute.xlu0 %2830 }
 0x4d0   : > { %3228 = vrot.lane.b32.xlu1 %v10982_v43, %s5467_s9 }
 0x4d1   : > { %3134 = vrot.lane.b32.xlu0 %v10981_v23, %s5466_s30 }
 0x4d2   : > { %v3305_v9 = vpop.permute.xlu1 %3304 }
 0x4d3   : > { %v3211_v22 = vpop.permute.xlu0 %3210  ;;  %v3626_v62 = vsel %vm3623_vm6, %v3593_v8, %v3305_v9 }
 0x4d4   : > { %2944 = vrot.lane.b32.xlu1 %v10982_v43, %s5464_s13  ;;  %5235 = vmatprep.mubr.msk.f32.mxu1 %vm3656_vm8, %v3626_v62  ;;  %v3594_v36 = vsel %vm3590_vm1, %v3561_v33, %v3211_v22 }
 0x4d5   : > { %2850 = vrot.lane.b32.xlu0 %v10981_v23, %s5462_s11 }
 0x4d6   : > { %v3021_v46 = vpop.permute.xlu1 %3020 }
 0x4d7   : > { %v2927_v51 = vpop.permute.xlu0 %2926 }
 0x4d8   : > { %3324 = vrot.lane.b32.xlu1 %v8323_v7, %s5468_s14 }
 0x4d9   : > { %3230 = vrot.lane.b32.xlu0 %v10983_v24, %s5467_s9 }
 0x4da   : > { %v3023_v6 = vpop.permute.xlu1 %3022 }
 0x4db   : > { %v3307_v37 = vpop.permute.xlu0 %3306 }
 0x4dc   : > { %v3627_v10 = vsel %vm3623_vm6, %v3594_v36, %v3307_v37  ;;  %3040 = vrot.lane.b32.xlu1 %v8323_v7, %s5465_s25  ;;  %v3432_v7 = vsel %vm1480_vm7, %v3400_v15, %v8578_v55  ;;  %v5422_v36 = vld [vmem:[#allocation3 + $0x48] sm:$0xff] }
 0x4dd   : > { %2946 = vrot.lane.b32.xlu0 %v10983_v24, %s5464_s13  ;;  %5236 = vmatmul.mubr.msk.f32.gmra.mrb[18].mxu1 %vm3656_vm8, %v3627_v10  ;;  %v3464_v58 = vsel %vm1546_vm9, %v3432_v7, %v2829_v63  ;;  %v3402_v37 = vsel %vm1414_vm3, %v5422_v36, %v8431_v50  ;;  %v10987_v50 = vld [vmem:[#allocation82_spill] sm:$0xff] }
 0x4de   : > { %v2833_v5 = vpop.permute.xlu1 %2832  ;;  %v3496_v45 = vsel %vm1612_vm11, %v3464_v58, %v2925_v28  ;;  %v3401_v28 = vsel %vm1414_vm3, %v5421_v32, %v8419_v39  ;;  %v10986_v39 = vld [vmem:[#allocation110_spill] sm:$0xff]  ;;  %v4218_v58 = vld [vmem:[%s10362_s3] sm:$0xf] }
 0x4df   : > { %v3117_v61 = vpop.permute.xlu0 %3116  ;;  %v3529_v34 = vsel %vm3524_vm14, %v3496_v45, %v3021_v46  ;;  %v3433_v8 = vsel %vm1480_vm7, %v3401_v28, %v8580_v44  ;;  %5280 = vmatprep.subr.msk.mxu0 %vm1742_vm5, %v4218_v58 }
 0x4e0   : > { %3042 = vrot.lane.b32.xlu1 %v8320_v29, %s5465_s25  ;;  %v3465_v22 = vsel %vm1546_vm9, %v3433_v8, %v2831_v2  ;;  %5281 = vmatpush3.msk.msra.mxu0 %vm1742_vm5, %v4218_v58 }
 0x4e1   : > { %3326 = vrot.lane.b32.xlu0 %v8320_v29, %s5468_s14  ;;  %v3497_v12 = vsel %vm1612_vm11, %v3465_v22, %v2927_v51  ;;  %v10992_v22 = vld [vmem:[#allocation7_spill] sm:$0xff] }
 0x4e2   : > { %v3213_v26 = vpop.permute.xlu1 %3212  ;;  %v3530_v41 = vsel %vm3524_vm14, %v3497_v12, %v3023_v6 }
 0x4e3   : > { %v3119_v1 = vpop.permute.xlu0 %3118 }
 0x4e4   : > { %2852 = vrot.lane.b32.xlu1 %v8078_v42, %s5462_s11  ;;  %v3563_v40 = vsel %vm3557_vm15, %v3530_v41, %v3119_v1  ;;  %v10994_v41 = vld [vmem:[#allocation9_spill] sm:$0xff] }
 0x4e5   : > { %3136 = vrot.lane.b32.xlu0 %v8078_v42, %s5466_s30  ;;  %v3562_v42 = vsel %vm3557_vm15, %v3529_v34, %v3117_v61 }
 0x4e6   : > { %v2929_v29 = vpop.permute.xlu1 %2928  ;;  %v3595_v23 = vsel %vm3590_vm1, %v3562_v42, %v3213_v26  ;;  %v10988_v26 = vld [vmem:[#allocation113_spill] sm:$0xff] }
 0x4e7   : > { %v8816_v35 = vpop.permute.xlu0 %2834 }
 0x4e8   : > { %3232 = vrot.lane.b32.xlu1 %v10985_v16, %s5467_s9 }
 0x4e9   : > { %3138 = vrot.lane.b32.xlu0 %v10984_v13, %s5466_s30 }
 0x4ea   : > { %v3309_v43 = vpop.permute.xlu1 %3308 }
 0x4eb   : > { %v3215_v55 = vpop.permute.xlu0 %3214  ;;  %v3628_v63 = vsel %vm3623_vm6, %v3595_v23, %v3309_v43  ;;  %v10989_v23 = vld [vmem:[#allocation5_spill] sm:$0xff] }
 0x4ec   : > { %2948 = vrot.lane.b32.xlu1 %v10985_v16, %s5464_s13  ;;  %5238 = vmatprep.mubr.msk.f32.mxu1 %vm3656_vm8, %v3628_v63  ;;  %v3596_v44 = vsel %vm3590_vm1, %v3563_v40, %v3215_v55 }
 0x4ed   : > { %2854 = vrot.lane.b32.xlu0 %v10984_v13, %s5462_s11  ;;  %5283 = vmatmul.mubr.msk.f32.vlgmr.msra.gmra.mrb[16].mxu0 %vm230_vm0, %v10989_v23 }
 0x4ee   : > { %v3025_v62 = vpop.permute.xlu1 %3024 }
 0x4ef   : > { %v2931_v9 = vpop.permute.xlu0 %2930 }
 0x4f0   : > { %3328 = vrot.lane.b32.xlu1 %v8336_v56, %s5468_s14 }
 0x4f1   : > { %3234 = vrot.lane.b32.xlu0 %v10986_v39, %s5467_s9 }
 0x4f2   : > { %v3027_v14 = vpop.permute.xlu1 %3026 }
 0x4f3   : > { %v3311_v46 = vpop.permute.xlu0 %3310 }
 0x4f4   : > { %v3629_v2 = vsel %vm3623_vm6, %v3596_v44, %v3311_v46  ;;  %3044 = vrot.lane.b32.xlu1 %v8336_v56, %s5465_s25  ;;  %v3434_v56 = vsel %vm1480_vm7, %v3402_v37, %v8586_v3  ;;  %v10996_v44 = vld [vmem:[#allocation11_spill] sm:$0xff]  ;;  %v5424_v46 = vld [vmem:[#allocation3 + $0x60] sm:$0xff]  ;;  %v10998_v37 = vld [vmem:[#allocation13_spill] sm:$0xff] }
 0x4f5   : > { %2950 = vrot.lane.b32.xlu0 %v10986_v39, %s5464_s13  ;;  %5239 = vmatmul.mubr.msk.f32.gmra.mrb[20].mxu1 %vm3656_vm8, %v3629_v2  ;;  %v3466_v6 = vsel %vm1546_vm9, %v3434_v56, %v2833_v5  ;;  %v10995_v39 = vld [vmem:[#allocation10_spill] sm:$0xff]  ;;  %v8929_v2 = vld [vmem:[#allocation3 + $0x108] sm:$0xff] }
 0x4f6   : > { %v8851_v52 = vpop.permute.xlu1 %2836  ;;  %v3498_v61 = vsel %vm1612_vm11, %v3466_v6, %v2929_v29  ;;  %v5423_v29 = vld [vmem:[#allocation3 + $0x50] sm:$0xff] }
 0x4f7   : > { %v3121_v51 = vpop.permute.xlu0 %3120  ;;  %v3531_v1 = vsel %vm3524_vm14, %v3498_v61, %v3025_v62  ;;  %v3403_v45 = vsel %vm1414_vm3, %v5423_v29, %v8433_v11  ;;  %v8947_v6 = vld [vmem:[#allocation3 + $0x110] sm:$0xff]  ;;  %v11000_v61 = vld [vmem:[#allocation14_spill] sm:$0xff] }
 0x4f8   : > { %3046 = vrot.lane.b32.xlu1 %v8333_v19, %s5465_s25  ;;  %v3435_v34 = vsel %vm1480_vm7, %v3403_v45, %v8588_v27  ;;  %v10990_v27 = vld [vmem:[#allocation85_spill] sm:$0xff] }
 0x4f9   : > { %3330 = vrot.lane.b32.xlu0 %v8333_v19, %s5468_s14  ;;  %v3467_v13 = vsel %vm1546_vm9, %v3435_v34, %v8816_v35  ;;  %v10991_v35 = vld [vmem:[#allocation6_spill] sm:$0xff]  ;;  %v11003_v34 = vld [vmem:[#allocation17_spill] sm:$0xff] }
 0x4fa   : > { %v3217_v33 = vpop.permute.xlu1 %3216  ;;  %v3499_v11 = vsel %vm1612_vm11, %v3467_v13, %v2931_v9  ;;  %5285 = vmatprep.mubr.msk.f32.mxu0 %vm230_vm0, %v10991_v35  ;;  %v10993_v9 = vld [vmem:[#allocation8_spill] sm:$0xff] }
 0x4fb   : > { %v3123_v24 = vpop.permute.xlu0 %3122  ;;  %v3532_v55 = vsel %vm3524_vm14, %v3499_v11, %v3027_v14  ;;  %5286 = vmatmul.mubr.msk.f32.gmra.mrb[18].mxu0 %vm230_vm0, %v10992_v22  ;;  %v3404_v14 = vsel %vm1414_vm3, %v5424_v46, %v8445_v48  ;;  %v11005_v11 = vld [vmem:[#allocation18_spill] sm:$0xff]  ;;  %v11010_v22 = vld [vmem:[#allocation23_spill] sm:$0xff] }
 0x4fc   : > { %2856 = vrot.lane.b32.xlu1 %v8097_v20, %s5462_s11  ;;  %v3565_v43 = vsel %vm3557_vm15, %v3532_v55, %v3123_v24  ;;  %5288 = vmatprep.mubr.msk.f32.mxu0 %vm230_vm0, %v10993_v9  ;;  %v5428_v9 = vld [vmem:[#allocation3 + $0x78] sm:$0xff]  ;;  %v11012_v46 = vld [vmem:[#allocation26_spill] sm:$0xff] }
 0x4fd   : > { %3140 = vrot.lane.b32.xlu0 %v8097_v20, %s5466_s30  ;;  %v3564_v20 = vsel %vm3557_vm15, %v3531_v1, %v3121_v51  ;;  %v10997_v51 = vld [vmem:[#allocation12_spill] sm:$0xff] }
 0x4fe   : > { %v2933_v19 = vpop.permute.xlu1 %2932  ;;  %v3597_v15 = vsel %vm3590_vm1, %v3564_v20, %v3217_v33  ;;  %v11001_v20 = vld [vmem:[#allocation15_spill] sm:$0xff] }
 0x4ff   : > { %v8866_v10 = vpop.permute.xlu0 %2838  ;;  %5289 = vmatmul.mubr.msk.f32.gmra.mrb[20].mxu0 %vm230_vm0, %v10994_v41  ;;  %v9009_v41 = vld [vmem:[#allocation3 + $0x120] sm:$0xff] }
 0x500   : > { %3236 = vrot.lane.b32.xlu1 %v10988_v26, %s5467_s9  ;;  %5291 = vmatprep.mubr.msk.f32.mxu0 %vm230_vm0, %v10995_v39  ;;  %v11011_v39 = vld [vmem:[#allocation24_spill] sm:$0xff] }
 0x501   : > { %3142 = vrot.lane.b32.xlu0 %v10987_v50, %s5466_s30 }
 0x502   : > { %v3313_v7 = vpop.permute.xlu1 %3312 }
 0x503   : > { %v3219_v3 = vpop.permute.xlu0 %3218  ;;  %v3630_v5 = vsel %vm3623_vm6, %v3597_v15, %v3313_v7  ;;  %5292 = vmatmul.mubr.msk.f32.gmra.mrb[22].mxu0 %vm230_vm0, %v10996_v44  ;;  %v5427_v15 = vld [vmem:[#allocation3 + $0x68] sm:$0xff] }
 0x504   : > { %2952 = vrot.lane.b32.xlu1 %v10988_v26, %s5464_s13  ;;  %5241 = vmatprep.mubr.msk.f32.mxu1 %vm3656_vm8, %v3630_v5  ;;  %v3598_v63 = vsel %vm3590_vm1, %v3565_v43, %v3219_v3  ;;  %v3405_v3 = vsel %vm1414_vm3, %v5427_v15, %v8447_v38  ;;  %v11002_v5 = vld [vmem:[#allocation16_spill] sm:$0xff] }
 0x505   : > { %2858 = vrot.lane.b32.xlu0 %v10987_v50, %s5462_s11  ;;  %5294 = vmatprep.mubr.msk.f32.mxu0 %vm230_vm0, %v10997_v51  ;;  %v3437_v7 = vsel %vm1480_vm7, %v3405_v3, %v8596_v59  ;;  %v11007_v43 = vld [vmem:[#allocation20_spill] sm:$0xff]  ;;  %v11018_v3 = vld [vmem:[#allocation77_spill] sm:$0xff] }
 0x506   : > { %v3029_v42 = vpop.permute.xlu1 %3028  ;;  %v3469_v58 = vsel %vm1546_vm9, %v3437_v7, %v8866_v10  ;;  %v11014_v51 = vld [vmem:[#allocation28_spill] sm:$0xff]  ;;  %v11019_v7 = vld [vmem:[#allocation33_spill] sm:$0xff] }
 0x507   : > { %v2935_v16 = vpop.permute.xlu0 %2934  ;;  %5295 = vmatmul.mubr.msk.f32.gmra.mrb[24].mxu0 %vm230_vm0, %v10998_v37 }
 0x508   : > { %3332 = vrot.lane.b32.xlu1 %v8349_v47, %s5468_s14  ;;  %5297 = vmatprep.mubr.msk.f32.mxu0 %vm230_vm0, %v11000_v61  ;;  %v3501_v38 = vsel %vm1612_vm11, %v3469_v58, %v2935_v16 }
 0x509   : > { %3238 = vrot.lane.b32.xlu0 %v10990_v27, %s5467_s9 }
 0x50a   : > { %v3031_v28 = vpop.permute.xlu1 %3030 }
 0x50b   : > { %v3315_v32 = vpop.permute.xlu0 %3314  ;;  %5298 = vmatmul.mubr.msk.f32.gmra.mrb[26].mxu0 %vm230_vm0, %v11001_v20  ;;  %v3534_v13 = vsel %vm3524_vm14, %v3501_v38, %v3031_v28  ;;  %v11009_v28 = vld [vmem:[#allocation22_spill] sm:$0xff]  ;;  %v11017_v20 = vld [vmem:[#allocation32_spill] sm:$0xff]  ;;  %v11021_v38 = vld [vmem:[#allocation35_spill] sm:$0xff] }
 0x50c   : > { %v3631_v8 = vsel %vm3623_vm6, %v3598_v63, %v3315_v32  ;;  %3048 = vrot.lane.b32.xlu1 %v8349_v47, %s5465_s25  ;;  %5300 = vmatprep.mubr.msk.f32.mxu0 %vm230_vm0, %v11002_v5  ;;  %v11008_v32 = vld [vmem:[#allocation21_spill] sm:$0xff] }
 0x50d   : > { %2954 = vrot.lane.b32.xlu0 %v10990_v27, %s5464_s13  ;;  %5242 = vmatmul.mubr.msk.f32.gmra.mrb[22].mxu1 %vm3656_vm8, %v3631_v8  ;;  %v11006_v27 = vld [vmem:[#allocation19_spill] sm:$0xff] }
 0x50e   : > { %v8915_v12 = vpop.permute.xlu1 %2840 }
 0x50f   : > { %v3125_v62 = vpop.permute.xlu0 %3124  ;;  %5301 = vmatmul.mubr.msk.f32.gmra.mrb[28].mxu0 %vm230_vm0, %v11003_v34 }
 0x510   : > { %3050 = vrot.lane.b32.xlu1 %v8346_v54, %s5465_s25  ;;  %5303 = vmatprep.mubr.msk.f32.mxu0 %vm230_vm0, %v11005_v11 }
 0x511   : > { %3334 = vrot.lane.b32.xlu0 %v8346_v54, %s5468_s14  ;;  %v3436_v54 = vsel %vm1480_vm7, %v3404_v14, %v8594_v30  ;;  %v10999_v30 = vld [vmem:[#allocation57_spill] sm:$0xff] }
 0x512   : > { %v3221_v40 = vpop.permute.xlu1 %3220  ;;  %v3468_v24 = vsel %vm1546_vm9, %v3436_v54, %v8851_v52  ;;  %v9027_v54 = vld [vmem:[#allocation3 + $0x128] sm:$0xff] }
 0x513   : > { %v3127_v47 = vpop.permute.xlu0 %3126  ;;  %v3500_v36 = vsel %vm1612_vm11, %v3468_v24, %v2933_v19  ;;  %5304 = vmatmul.mubr.msk.f32.gmra.mrb[30].mxu0 %vm230_vm0, %v11006_v27 }
 0x514   : > { %2860 = vrot.lane.b32.xlu1 %v8929_v2, %s5462_s11  ;;  %v3533_v56 = vsel %vm3524_vm14, %v3500_v36, %v3029_v42  ;;  %v11004_v42 = vld [vmem:[#allocation74_spill] sm:$0xff]  ;;  %v3567_v59 = vsel %vm3557_vm15, %v3534_v13, %v3127_v47  ;;  %5306 = vmatprep.mubr.msk.f32.mxu0 %vm230_vm0, %v11007_v43 }
 0x515   : > { %3144 = vrot.lane.b32.xlu0 %v8929_v2, %s5466_s30  ;;  %v3566_v52 = vsel %vm3557_vm15, %v3533_v56, %v3125_v62  ;;  %v3406_v62 = vsel %vm1414_vm3, %v5428_v9, %v8459_v53  ;;  %v11015_v56 = vld [vmem:[#allocation29_spill] sm:$0xff] }
 0x516   : > { %v2937_v48 = vpop.permute.xlu1 %2936  ;;  %v3599_v19 = vsel %vm3590_vm1, %v3566_v52, %v3221_v40 }
 0x517   : > { %v8941_v33 = vpop.permute.xlu0 %2842  ;;  %5307 = vmatmul.mubr.msk.f32.gmra.mrb[32].mxu0 %vm230_vm0, %v11008_v32 }
 0x518   : > { %3240 = vrot.lane.b32.xlu1 %v10999_v30, %s5467_s9  ;;  %5309 = vmatprep.mubr.msk.f32.mxu0 %vm230_vm0, %v11009_v28  ;;  %v9101_v28 = vld [vmem:[#allocation3 + $0x140] sm:$0xff] }
 0x519   : > { %3146 = vrot.lane.b32.xlu0 %v8947_v6, %s5466_s30 }
 0x51a   : > { %v3317_v50 = vpop.permute.xlu1 %3316 }
 0x51b   : > { %v3223_v1 = vpop.permute.xlu0 %3222  ;;  %v3632_v26 = vsel %vm3623_vm6, %v3599_v19, %v3317_v50  ;;  %5310 = vmatmul.mubr.msk.f32.gmra.mrb[34].mxu0 %vm230_vm0, %v11010_v22  ;;  %v11016_v19 = vld [vmem:[#allocation30_spill] sm:$0xff] }
 0x51c   : > { %2956 = vrot.lane.b32.xlu1 %v10999_v30, %s5464_s13  ;;  %5244 = vmatprep.mubr.msk.f32.mxu1 %vm3656_vm8, %v3632_v26  ;;  %v3600_v10 = vsel %vm3590_vm1, %v3567_v59, %v3223_v1  ;;  %v5431_v30 = vld [vmem:[#allocation3 + $0x80] sm:$0xff]  ;;  %v11023_v59 = vld [vmem:[#allocation55_spill] sm:$0xff] }
 0x51d   : > { %2862 = vrot.lane.b32.xlu0 %v8947_v6, %s5462_s11  ;;  %5312 = vmatprep.mubr.msk.f32.mxu0 %vm230_vm0, %v11011_v39  ;;  %v3407_v52 = vsel %vm1414_vm3, %v5431_v30, %v8461_v25  ;;  %v11026_v39 = vld [vmem:[#allocation90_spill] sm:$0xff]  ;;  %v11029_v30 = vld [vmem:[#allocation79_spill] sm:$0xff] }
 0x51e   : > { %v3033_v45 = vpop.permute.xlu1 %3032  ;;  %v3439_v61 = vsel %vm1480_vm7, %v3407_v52, %v8604_v31 }
 0x51f   : > { %v2939_v29 = vpop.permute.xlu0 %2938  ;;  %5313 = vmatmul.mubr.msk.f32.gmra.mrb[36].mxu0 %vm230_vm0, %v11012_v46  ;;  %v3471_v1 = vsel %vm1546_vm9, %v3439_v61, %v8941_v33 }
 0x520   : > { %3336 = vrot.lane.b32.xlu1 %v8362_v21, %s5468_s14  ;;  %5315 = vmatprep.mubr.msk.f32.mxu0 %vm230_vm0, %v11014_v51  ;;  %v3503_v25 = vsel %vm1612_vm11, %v3471_v1, %v2939_v29  ;;  %v11030_v1 = vld [vmem:[#allocation31_spill] sm:$0xff] }
 0x521   : > { %3242 = vrot.lane.b32.xlu0 %v11004_v42, %s5467_s9 }
 0x522   : > { %v3035_v16 = vpop.permute.xlu1 %3034 }
 0x523   : > { %v3319_v23 = vpop.permute.xlu0 %3318  ;;  %5316 = vmatmul.mubr.msk.f32.gmra.mrb[38].mxu0 %vm230_vm0, %v11015_v56  ;;  %v3536_v15 = vsel %vm3524_vm14, %v3503_v25, %v3035_v16  ;;  %v11031_v25 = vld [vmem:[#allocation37_spill] sm:$0xff] }
 0x524   : > { %v3633_v55 = vsel %vm3623_vm6, %v3600_v10, %v3319_v23  ;;  %3052 = vrot.lane.b32.xlu1 %v8362_v21, %s5465_s25  ;;  %5318 = vmatprep.mubr.msk.f32.mxu0 %vm230_vm0, %v11016_v19  ;;  %v11024_v10 = vld [vmem:[#allocation59_spill] sm:$0xff]  ;;  %v5432_v23 = vld [vmem:[#allocation3 + $0x90] sm:$0xff] }
 0x525   : > { %2958 = vrot.lane.b32.xlu0 %v11004_v42, %s5464_s13  ;;  %5245 = vmatmul.mubr.msk.f32.gmra.mrb[24].mxu1 %vm3656_vm8, %v3633_v55  ;;  %v11022_v42 = vld [vmem:[#allocation36_spill] sm:$0xff]  ;;  %v3408_v16 = vsel %vm1414_vm3, %v5432_v23, %v8473_v4  ;;  %v9087_v55 = vld [vmem:[#allocation3 + $0x138] sm:$0xff]  ;;  %v5436_v19 = vld [vmem:[#allocation3 + $0xa8] sm:$0xff] }
 0x526   : > { %v8995_v63 = vpop.permute.xlu1 %2844 }
 0x527   : > { %v3129_v35 = vpop.permute.xlu0 %3128  ;;  %5319 = vmatmul.mubr.msk.f32.gmra.mrb[40].mxu0 %vm230_vm0, %v11017_v20 }
 0x528   : > { %3054 = vrot.lane.b32.xlu1 %v8359_v17, %s5465_s25  ;;  %5321 = vmatprep.mubr.msk.f32.mxu0 %vm230_vm0, %v11019_v7 }
 0x529   : > { %3338 = vrot.lane.b32.xlu0 %v8359_v17, %s5468_s14  ;;  %v3438_v17 = vsel %vm1480_vm7, %v3406_v62, %v8602_v60  ;;  %v11013_v60 = vld [vmem:[#allocation84_spill] sm:$0xff]  ;;  %v5435_v62 = vld [vmem:[#allocation3 + $0x98] sm:$0xff] }
 0x52a   : > { %v3225_v8 = vpop.permute.xlu1 %3224  ;;  %v3470_v47 = vsel %vm1546_vm9, %v3438_v17, %v8915_v12  ;;  %v3409_v17 = vsel %vm1414_vm3, %v5435_v62, %v8475_v49  ;;  %v11037_v62 = vld [vmem:[#allocation114_spill] sm:$0xff] }
 0x52b   : > { %v3131_v21 = vpop.permute.xlu0 %3130  ;;  %v3502_v44 = vsel %vm1612_vm11, %v3470_v47, %v2937_v48  ;;  %v3441_v47 = vsel %vm1480_vm7, %v3409_v17, %v11026_v39 }
 0x52c   : > { %2864 = vrot.lane.b32.xlu1 %v9009_v41, %s5462_s11  ;;  %v3535_v14 = vsel %vm3524_vm14, %v3502_v44, %v3033_v45  ;;  %v3569_v31 = vsel %vm3557_vm15, %v3536_v15, %v3131_v21  ;;  %v11020_v45 = vld [vmem:[#allocation34_spill] sm:$0xff]  ;;  %v11025_v21 = vld [vmem:[#allocation56_spill] sm:$0xff] }
 0x52d   : > { %3148 = vrot.lane.b32.xlu0 %v9009_v41, %s5466_s30  ;;  %v3568_v12 = vsel %vm3557_vm15, %v3535_v14, %v3129_v35  ;;  %5322 = vmatmul.mubr.msk.f32.gmra.mrb[42].mxu0 %vm230_vm0, %v11020_v45 }
 0x52e   : > { %v2941_v53 = vpop.permute.xlu1 %2940  ;;  %v3601_v24 = vsel %vm3590_vm1, %v3568_v12, %v3225_v8  ;;  %5324 = vmatprep.mubr.msk.f32.mxu0 %vm230_vm0, %v11021_v38  ;;  %v11028_v12 = vld [vmem:[#allocation86_spill] sm:$0xff] }
 0x52f   : > { %v9021_v40 = vpop.permute.xlu0 %2846 }
 0x530   : > { %3244 = vrot.lane.b32.xlu1 %v11013_v60, %s5467_s9 }
 0x531   : > { %3150 = vrot.lane.b32.xlu0 %v9027_v54, %s5466_s30  ;;  %5325 = vmatmul.mubr.msk.f32.gmra.mrb[44].mxu0 %vm230_vm0, %v11022_v42  ;;  %v5439_v42 = vld [vmem:[#allocation3 + $0xb0] sm:$0xff] }
 0x532   : > { %v3321_v36 = vpop.permute.xlu1 %3320  ;;  %5327 = vmatprep.mubr.msk.f32.mxu0 %vm230_vm0, %v11023_v59  ;;  %v11033_v59 = vld [vmem:[#allocation78_spill] sm:$0xff] }
 0x533   : > { %v3227_v48 = vpop.permute.xlu0 %3226  ;;  %v3634_v37 = vsel %vm3623_vm6, %v3601_v24, %v3321_v36 }
 0x534   : > { %2960 = vrot.lane.b32.xlu1 %v11013_v60, %s5464_s13  ;;  %5247 = vmatprep.mubr.msk.f32.mxu1 %vm3656_vm8, %v3634_v37  ;;  %v3602_v33 = vsel %vm3590_vm1, %v3569_v31, %v3227_v48  ;;  %v11027_v60 = vld [vmem:[#allocation112_spill] sm:$0xff] }
 0x535   : > { %2866 = vrot.lane.b32.xlu0 %v9027_v54, %s5462_s11  ;;  %5328 = vmatmul.mubr.msk.f32.gmra.mrb[46].mxu0 %vm230_vm0, %v11024_v10 }
 0x536   : > { %v3037_v26 = vpop.permute.xlu1 %3036 }
 0x537   : > { %v2943_v50 = vpop.permute.xlu0 %2942 }
 0x538   : > { %3340 = vrot.lane.b32.xlu1 %v8375_v0, %s5468_s14 }
 0x539   : > { %3246 = vrot.lane.b32.xlu0 %v11018_v3, %s5467_s9 }
 0x53a   : > { %v3039_v58 = vpop.permute.xlu1 %3038 }
 0x53b   : > { %v3323_v5 = vpop.permute.xlu0 %3322 }
 0x53c   : > { %v3635_v29 = vsel %vm3623_vm6, %v3602_v33, %v3323_v5  ;;  %3056 = vrot.lane.b32.xlu1 %v8375_v0, %s5465_s25  ;;  %v9154_v5 = vld [vmem:[#allocation3 + $0x158] sm:$0xff] }
 0x53d   : > { %2962 = vrot.lane.b32.xlu0 %v11018_v3, %s5464_s13  ;;  %5248 = vmatmul.mubr.msk.f32.gmra.mrb[26].mxu1 %vm3656_vm8, %v3635_v29 }
 0x53e   : > { %v2849_v13 = vpop.permute.xlu1 %2848 }
 0x53f   : > { %v3133_v34 = vpop.permute.xlu0 %3132 }
 0x540   : > { %3058 = vrot.lane.b32.xlu1 %v8372_v18, %s5465_s25 }
 0x541   : > { %3342 = vrot.lane.b32.xlu0 %v8372_v18, %s5468_s14  ;;  %v3440_v18 = vsel %vm1480_vm7, %v3408_v16, %v8610_v57 }
 0x542   : > { %v3229_v11 = vpop.permute.xlu1 %3228  ;;  %v3472_v27 = vsel %vm1546_vm9, %v3440_v18, %v8995_v63 }
 0x543   : > { %v3135_v0 = vpop.permute.xlu0 %3134  ;;  %v3504_v32 = vsel %vm1612_vm11, %v3472_v27, %v2941_v53  ;;  %v3473_v53 = vsel %vm1546_vm9, %v3441_v47, %v9021_v40  ;;  %v5440_v47 = vld [vmem:[#allocation3 + $0xc0] sm:$0xff] }
 0x544   : > { %2868 = vrot.lane.b32.xlu1 %v9087_v55, %s5462_s11  ;;  %v3537_v4 = vsel %vm3524_vm14, %v3504_v32, %v3037_v26  ;;  %v3505_v14 = vsel %vm1612_vm11, %v3473_v53, %v2943_v50  ;;  %v3410_v50 = vsel %vm1414_vm3, %v5436_v19, %v11030_v1  ;;  %v9141_v26 = vld [vmem:[#allocation3 + $0x150] sm:$0xff]  ;;  %v11035_v32 = vld [vmem:[#allocation87_spill] sm:$0xff]  ;;  %v11038_v53 = vld [vmem:[#allocation121_spill] sm:$0xff] }
 0x545   : > { %3152 = vrot.lane.b32.xlu0 %v9087_v55, %s5466_s30  ;;  %v3570_v57 = vsel %vm3557_vm15, %v3537_v4, %v3133_v34  ;;  %v3538_v49 = vsel %vm3524_vm14, %v3505_v14, %v3039_v58  ;;  %v3442_v20 = vsel %vm1480_vm7, %v3410_v50, %v11031_v25  ;;  %v11032_v58 = vld [vmem:[#allocation25_spill] sm:$0xff]  ;;  %v11036_v4 = vld [vmem:[#allocation58_spill] sm:$0xff]  ;;  %v5443_v19 = vld [vmem:[#allocation3 + $0xc8] sm:$0xff] }
 0x546   : > { %v2945_v35 = vpop.permute.xlu1 %2944  ;;  %v3603_v8 = vsel %vm3590_vm1, %v3570_v57, %v3229_v11  ;;  %v3571_v51 = vsel %vm3557_vm15, %v3538_v49, %v3135_v0  ;;  %v3474_v15 = vsel %vm1546_vm9, %v3442_v20, %v2849_v13  ;;  %v3411_v0 = vsel %vm1414_vm3, %v5439_v42, %v11033_v59  ;;  %v11034_v11 = vld [vmem:[#allocation122_spill] sm:$0xff]  ;;  %v11039_v14 = vld [vmem:[#allocation137_spill] sm:$0xff] }
 0x547   : > { %v9097_v43 = vpop.permute.xlu0 %2850  ;;  %v3506_v7 = vsel %vm1612_vm11, %v3474_v15, %v2945_v35  ;;  %v3443_v10 = vsel %vm1480_vm7, %v3411_v0, %v11034_v11  ;;  %v11041_v1 = vld [vmem:[#allocation61_spill] sm:$0xff] }
 0x548   : > { %3248 = vrot.lane.b32.xlu1 %v11025_v21, %s5467_s9  ;;  %v3475_v23 = vsel %vm1546_vm9, %v3443_v10, %v9097_v43  ;;  %v3413_v50 = vsel %vm1414_vm3, %v5443_v19, %v11041_v1  ;;  %v11042_v25 = vld [vmem:[#allocation93_spill] sm:$0xff]  ;;  %v2379_v10 = vld [vmem:[#allocation3 + $0x180] sm:$0xff] }
 0x549   : > { %3154 = vrot.lane.b32.xlu0 %v9101_v28, %s5466_s30  ;;  %v3445_v20 = vsel %vm1480_vm7, %v3413_v50, %v11042_v25  ;;  %v11045_v11 = vld [vmem:[#allocation89_spill] sm:$0xff] }
 0x54a   : > { %v3325_v22 = vpop.permute.xlu1 %3324 }
 0x54b   : > { %v3231_v63 = vpop.permute.xlu0 %3230  ;;  %v3636_v9 = vsel %vm3623_vm6, %v3603_v8, %v3325_v22 }
 0x54c   : > { %2964 = vrot.lane.b32.xlu1 %v11025_v21, %s5464_s13  ;;  %5250 = vmatprep.mubr.msk.f32.mxu1 %vm3656_vm8, %v3636_v9  ;;  %v3604_v24 = vsel %vm3590_vm1, %v3571_v51, %v3231_v63 }
 0x54d   : > { %2870 = vrot.lane.b32.xlu0 %v9101_v28, %s5462_s11 }
 0x54e   : > { %v3041_v46 = vpop.permute.xlu1 %3040 }
 0x54f   : > { %v2947_v44 = vpop.permute.xlu0 %2946  ;;  %v3539_v33 = vsel %vm3524_vm14, %v3506_v7, %v3041_v46  ;;  %v9194_v46 = vld [vmem:[#allocation3 + $0x168] sm:$0xff] }
 0x550   : > { %3344 = vrot.lane.b32.xlu1 %v11028_v12, %s5468_s14  ;;  %v3507_v27 = vsel %vm1612_vm11, %v3475_v23, %v2947_v44  ;;  %v3412_v44 = vsel %vm1414_vm3, %v5440_v47, %v11038_v53  ;;  %v9247_v23 = vld [vmem:[#allocation3 + $0x188] sm:$0xff]  ;;  %v2381_v47 = vld [vmem:[#allocation3 + $0x190] sm:$0x3] }
 0x551   : > { %3250 = vrot.lane.b32.xlu0 %v11027_v60, %s5467_s9  ;;  %v3444_v49 = vsel %vm1480_vm7, %v3412_v44, %v11039_v14 }
 0x552   : > { %v3043_v36 = vpop.permute.xlu1 %3042 }
 0x553   : > { %v3327_v48 = vpop.permute.xlu0 %3326  ;;  %v3540_v35 = vsel %vm3524_vm14, %v3507_v27, %v3043_v36  ;;  %v9207_v36 = vld [vmem:[#allocation3 + $0x170] sm:$0xff]  ;;  %v2605_v27 = vrot.slane %v2379_v10, 1 }
 0x554   : > { %v3637_v40 = vsel %vm3623_vm6, %v3604_v24, %v3327_v48  ;;  %3060 = vrot.lane.b32.xlu1 %v11028_v12, %s5465_s25 }
 0x555   : > { %2966 = vrot.lane.b32.xlu0 %v11027_v60, %s5464_s13  ;;  %5251 = vmatmul.mubr.msk.f32.gmra.mrb[28].mxu1 %vm3656_vm8, %v3637_v40  ;;  %v11040_v40 = vld [vmem:[#allocation60_spill] sm:$0xff] }
 0x556   : > { %v2853_v56 = vpop.permute.xlu1 %2852 }
 0x557   : > { %v3137_v37 = vpop.permute.xlu0 %3136  ;;  %v3476_v60 = vsel %vm1546_vm9, %v3444_v49, %v2853_v56  ;;  %v2610_v49 = vrot.slane %v2379_v10, 2 }
 0x558   : > { %3062 = vrot.lane.b32.xlu1 %v11029_v30, %s5465_s25  ;;  %v3572_v29 = vsel %vm3557_vm15, %v3539_v33, %v3137_v37 }
 0x559   : > { %3346 = vrot.lane.b32.xlu0 %v11029_v30, %s5468_s14 }
 0x55a   : > { %v3233_v61 = vpop.permute.xlu1 %3232 }
 0x55b   : > { %v3139_v52 = vpop.permute.xlu0 %3138  ;;  %v3605_v45 = vsel %vm3590_vm1, %v3572_v29, %v3233_v61  ;;  %v11043_v29 = vld [vmem:[#allocation76_spill] sm:$0xff] }
 0x55c   : > { %2872 = vrot.lane.b32.xlu1 %v9141_v26, %s5462_s11  ;;  %v3573_v21 = vsel %vm3557_vm15, %v3540_v35, %v3139_v52  ;;  %v2606_v35 = vrot.slane %v9247_v23, 1 }
 0x55d   : > { %3156 = vrot.lane.b32.xlu0 %v9141_v26, %s5466_s30 }
 0x55e   : > { %v2949_v31 = vpop.permute.xlu1 %2948 }
 0x55f   : > { %v9150_v3 = vpop.permute.xlu0 %2854  ;;  %v3508_v24 = vsel %vm1612_vm11, %v3476_v60, %v2949_v31  ;;  %v2611_v60 = vrot.slane %v9247_v23, 2 }
 0x560   : > { %3252 = vrot.lane.b32.xlu1 %v11032_v58, %s5467_s9  ;;  %v3477_v15 = vsel %vm1546_vm9, %v3445_v20, %v9150_v3 }
 0x561   : > { %3158 = vrot.lane.b32.xlu0 %v9154_v5, %s5466_s30  ;;  %v2612_v25 = vsel %vm507_vm4, %v2610_v49, %v2611_v60 }
 0x562   : > { %v3329_v34 = vpop.permute.xlu1 %3328 }
 0x563   : > { %v3235_v38 = vpop.permute.xlu0 %3234  ;;  %v3638_v13 = vsel %vm3623_vm6, %v3605_v45, %v3329_v34  ;;  %v11044_v45 = vld [vmem:[#allocation64_spill] sm:$0xff] }
 0x564   : > { %2968 = vrot.lane.b32.xlu1 %v11032_v58, %s5464_s13  ;;  %5253 = vmatprep.mubr.msk.f32.mxu1 %vm3656_vm8, %v3638_v13  ;;  %v3606_v57 = vsel %vm3590_vm1, %v3573_v21, %v3235_v38 }
 0x565   : > { %2874 = vrot.lane.b32.xlu0 %v9154_v5, %s5462_s11 }
 0x566   : > { %v3045_v18 = vpop.permute.xlu1 %3044 }
 0x567   : > { %v2951_v16 = vpop.permute.xlu0 %2950  ;;  %v3541_v48 = vsel %vm3524_vm14, %v3508_v24, %v3045_v18  ;;  %v2608_v24 = vrot.slane %v2381_v47, 1 }
 0x568   : > { %3348 = vrot.lane.b32.xlu1 %v11036_v4, %s5468_s14  ;;  %v3509_v33 = vsel %vm1612_vm11, %v3477_v15, %v2951_v16 }
 0x569   : > { %3254 = vrot.lane.b32.xlu0 %v11035_v32, %s5467_s9  ;;  %v2609_v50 = vsel %vm426_vm2, %v2606_v35, %v2608_v24 }
 0x56a   : > { %v3047_v63 = vpop.permute.xlu1 %3046 }
 0x56b   : > { %v3331_v8 = vpop.permute.xlu0 %3330  ;;  %v3542_v58 = vsel %vm3524_vm14, %v3509_v33, %v3047_v63 }
 0x56c   : > { %v3639_v43 = vsel %vm3623_vm6, %v3606_v57, %v3331_v8  ;;  %3064 = vrot.lane.b32.xlu1 %v11036_v4, %s5465_s25  ;;  %v11046_v4 = vld [vmem:[#allocation81_spill] sm:$0xff]  ;;  %v11047_v57 = vld [vmem:[#allocation40_spill] sm:$0xff] }
 0x56d   : > { %2970 = vrot.lane.b32.xlu0 %v11035_v32, %s5464_s13  ;;  %5254 = vmatmul.mubr.msk.f32.gmra.mrb[30].mxu1 %vm3656_vm8, %v3639_v43  ;;  %v5444_v32 = vld [vmem:[#allocation3 + $0xd8] sm:$0xff] }
 0x56e   : > { %v2857_v9 = vpop.permute.xlu1 %2856  ;;  %v3414_v21 = vsel %vm1414_vm3, %v5444_v32, %v11046_v4 }
 0x56f   : > { %v3141_v22 = vpop.permute.xlu0 %3140  ;;  %v3446_v8 = vsel %vm1480_vm7, %v3414_v21, %v11047_v57 }
 0x570   : > { %3066 = vrot.lane.b32.xlu1 %v11037_v62, %s5465_s25  ;;  %v3574_v37 = vsel %vm3557_vm15, %v3541_v48, %v3141_v22  ;;  %v3478_v63 = vsel %vm1546_vm9, %v3446_v8, %v2857_v9  ;;  %v5445_v48 = vld [vmem:[#allocation3 + $0xe0] sm:$0xff] }
 0x571   : > { %3350 = vrot.lane.b32.xlu0 %v11037_v62, %s5468_s14 }
 0x572   : > { %v3237_v39 = vpop.permute.xlu1 %3236 }
 0x573   : > { %v3143_v17 = vpop.permute.xlu0 %3142  ;;  %v3607_v30 = vsel %vm3590_vm1, %v3574_v37, %v3237_v39 }
 0x574   : > { %2876 = vrot.lane.b32.xlu1 %v9194_v46, %s5462_s11  ;;  %v3575_v38 = vsel %vm3557_vm15, %v3542_v58, %v3143_v17  ;;  %v2607_v17 = vsel %vm426_vm2, %v2605_v27, %v2606_v35  ;;  %v2383_v27 = vld [vmem:[#allocation3 + $0x1a0] sm:$0xff]  ;;  %v2384_v35 = vld [vmem:[#allocation3 + $0x1a8] sm:$0x3] }
 0x575   : > { %3160 = vrot.lane.b32.xlu0 %v9194_v46, %s5466_s30  ;;  %v2619_v21 = vrot.slane %v2383_v27, 1  ;;  %v2621_v57 = vrot.slane %v2384_v35, 1 }
 0x576   : > { %v2953_v51 = vpop.permute.xlu1 %2952 }
 0x577   : > { %v9203_v12 = vpop.permute.xlu0 %2858  ;;  %v3510_v62 = vsel %vm1612_vm11, %v3478_v63, %v2953_v51  ;;  %v2622_v49 = vsel %vm426_vm2, %v2619_v21, %v2621_v57 }
 0x578   : > { %3256 = vrot.lane.b32.xlu1 %v11040_v40, %s5467_s9 }
 0x579   : > { %3162 = vrot.lane.b32.xlu0 %v9207_v36, %s5466_s30 }
 0x57a   : > { %v3333_v52 = vpop.permute.xlu1 %3332 }
 0x57b   : > { %v3239_v56 = vpop.permute.xlu0 %3238  ;;  %v3640_v61 = vsel %vm3623_vm6, %v3607_v30, %v3333_v52  ;;  %v11049_v30 = vld [vmem:[#allocation125_spill] sm:$0xff] }
 0x57c   : > { %2972 = vrot.lane.b32.xlu1 %v11040_v40, %s5464_s13  ;;  %5256 = vmatprep.mubr.msk.f32.mxu1 %vm3656_vm8, %v3640_v61  ;;  %v3608_v34 = vsel %vm3590_vm1, %v3575_v38, %v3239_v56  ;;  %v11048_v40 = vld [vmem:[#allocation107_spill] sm:$0xff] }
 0x57d   : > { %2878 = vrot.lane.b32.xlu0 %v9207_v36, %s5462_s11  ;;  %v3415_v37 = vsel %vm1414_vm3, %v5445_v48, %v11048_v40 }
 0x57e   : > { %v3049_v7 = vpop.permute.xlu1 %3048  ;;  %v3447_v56 = vsel %vm1480_vm7, %v3415_v37, %v11049_v30 }
 0x57f   : > { %v2955_v31 = vpop.permute.xlu0 %2954  ;;  %v3543_v39 = vsel %vm3524_vm14, %v3510_v62, %v3049_v7  ;;  %v3479_v52 = vsel %vm1546_vm9, %v3447_v56, %v9203_v12  ;;  %v5446_v62 = vld [vmem:[#allocation3 + $0xf0] sm:$0xff] }
 0x580   : > { %3352 = vrot.lane.b32.xlu1 %v11044_v45, %s5468_s14  ;;  %v3511_v1 = vsel %vm1612_vm11, %v3479_v52, %v2955_v31 }
 0x581   : > { %3258 = vrot.lane.b32.xlu0 %v11043_v29, %s5467_s9 }
 0x582   : > { %v3051_v42 = vpop.permute.xlu1 %3050 }
 0x583   : > { %v3335_v13 = vpop.permute.xlu0 %3334  ;;  %v3544_v20 = vsel %vm3524_vm14, %v3511_v1, %v3051_v42 }
 0x584   : > { %v3641_v3 = vsel %vm3623_vm6, %v3608_v34, %v3335_v13  ;;  %3068 = vrot.lane.b32.xlu1 %v11044_v45, %s5465_s25 }
 0x585   : > { %2974 = vrot.lane.b32.xlu0 %v11043_v29, %s5464_s13  ;;  %5257 = vmatmul.mubr.msk.f32.gmra.mrb[32].mxu1 %vm3656_vm8, %v3641_v3 }
 0x586   : > { %v9241_v0 = vpop.permute.xlu1 %2860 }
 0x587   : > { %v3145_v59 = vpop.permute.xlu0 %3144 }
 0x588   : > { %3070 = vrot.lane.b32.xlu1 %v11045_v11, %s5465_s25  ;;  %v3576_v53 = vsel %vm3557_vm15, %v3543_v39, %v3145_v59  ;;  %v2613_v59 = vrot.slane %v2381_v47, 2  ;;  %v11051_v47 = vld [vmem:[#allocation139_spill] sm:$0xff] }
 0x589   : > { %3354 = vrot.lane.b32.xlu0 %v11045_v11, %s5468_s14 }
 0x58a   : > { %v3241_v18 = vpop.permute.xlu1 %3240  ;;  %v2614_v32 = vsel %vm507_vm4, %v2611_v60, %v2613_v59  ;;  %v2626_v60 = vrot.slane %v2384_v35, 2 }
 0x58b   : > { %v3147_v16 = vpop.permute.xlu0 %3146  ;;  %v3609_v9 = vsel %vm3590_vm1, %v3576_v53, %v3241_v18  ;;  %v2382_v18 = vld [vmem:[#allocation3 + $0x198] sm:$0xff] }
 0x58c   : > { %2880 = vrot.lane.b32.xlu1 %v2379_v10, %s5462_s11  ;;  %v3577_v7 = vsel %vm3557_vm15, %v3544_v20, %v3147_v16  ;;  %v2618_v4 = vrot.slane %v2382_v18, 1  ;;  %v5447_v20 = vld [vmem:[#allocation3 + $0xf8] sm:$0xff] }
 0x58d   : > { %3164 = vrot.lane.b32.xlu0 %v2379_v10, %s5466_s30 }
 0x58e   : > { %v9259_v22 = vpop.permute.xlu1 %2956 }
 0x58f   : > { %v9257_v43 = vpop.permute.xlu0 %2862 }
 0x590   : > { %3260 = vrot.lane.b32.xlu1 %v2607_v17, %s5467_s9 }
 0x591   : > { %3166 = vrot.lane.b32.xlu0 %v9247_v23, %s5466_s30 }
 0x592   : > { %v3337_v14 = vpop.permute.xlu1 %3336 }
 0x593   : > { %v3243_v44 = vpop.permute.xlu0 %3242  ;;  %v3642_v51 = vsel %vm3623_vm6, %v3609_v9, %v3337_v14  ;;  %v2623_v9 = vrot.slane %v2382_v18, 2  ;;  %v2620_v14 = vsel %vm426_vm2, %v2618_v4, %v2619_v21 }
 0x594   : > { %2976 = vrot.lane.b32.xlu1 %v2607_v17, %s5464_s13  ;;  %5259 = vmatprep.mubr.msk.f32.mxu1 %vm3656_vm8, %v3642_v51  ;;  %v3610_v58 = vsel %vm3590_vm1, %v3577_v7, %v3243_v44  ;;  %v11050_v17 = vld [vmem:[#allocation109_spill] sm:$0xff]  ;;  %v2624_v44 = vrot.slane %v2383_v27, 2  ;;  %v11053_v7 = vld [vmem:[#allocation92_spill] sm:$0xff] }
 0x595   : > { %2882 = vrot.lane.b32.xlu0 %v9247_v23, %s5462_s11  ;;  %v3416_v39 = vsel %vm1414_vm3, %v5446_v62, %v11050_v17 }
 0x596   : > { %v3053_v19 = vpop.permute.xlu1 %3052  ;;  %v3448_v53 = vsel %vm1480_vm7, %v3416_v39, %v11051_v47  ;;  %v2625_v56 = vsel %vm507_vm4, %v2623_v9, %v2624_v44  ;;  %v2627_v52 = vsel %vm507_vm4, %v2624_v44, %v2626_v60  ;;  %v11057_v9 = vld [vmem:[#allocation150_spill] sm:$0xff] }
 0x597   : > { %v9281_v61 = vpop.permute.xlu0 %2958  ;;  %v3480_v51 = vsel %vm1546_vm9, %v3448_v53, %v9241_v0 }
 0x598   : > { %v9287_v15 = vpop.f32.mrb[16].mxu1  ;;  %3356 = vrot.lane.b32.xlu1 %v2612_v25, %s5468_s14  ;;  %v3512_v40 = vsel %vm1612_vm11, %v3480_v51, %v9259_v22  ;;  %v11052_v22 = vld [vmem:[#allocation88_spill] sm:$0xff] }
 0x599   : > { %3262 = vrot.lane.b32.xlu0 %v2609_v50, %s5467_s9  ;;  %v3979_v12 = vsel %vm1414_vm3, %v9287_v15, 0.0  ;;  %v4048_v31 = vmul.f32 %v9287_v15, %v9287_v15  ;;  %v9296_v33 = vpop.f32.mrb[17].mxu1  ;;  %v3545_v37 = vsel %vm3524_vm14, %v3512_v40, %v3053_v19  ;;  %v3417_v19 = vsel %vm1414_vm3, %v5447_v20, %v11052_v22 }
 0x59a   : > { %v3978_v29 = vsel %vm1414_vm3, %v9296_v33, 0.0  ;;  %v4047_v45 = vmul.f32 %v9296_v33, %v9296_v33  ;;  %v3055_v34 = vpop.permute.xlu1 %3054 }
 0x59b   : > { %v3339_v38 = vpop.permute.xlu0 %3338  ;;  %v4080_v13 = vsel %vm1414_vm3, %v4048_v31, 0.0  ;;  %v9304_v42 = vadd.f32 %v3979_v12, %v3978_v29  ;;  %v3449_v12 = vsel %vm1480_vm7, %v3417_v19, %v11053_v7 }
 0x59c   : > { %v3643_v3 = vsel %vm3623_vm6, %v3610_v58, %v3339_v38  ;;  %v4079_v11 = vsel %vm1414_vm3, %v4047_v45, 0.0  ;;  %3072 = vrot.lane.b32.xlu1 %v2612_v25, %s5465_s25  ;;  %v3481_v31 = vsel %vm1546_vm9, %v3449_v12, %v9257_v43 }
 0x59d   : > { %2978 = vrot.lane.b32.xlu0 %v2609_v50, %s5464_s13  ;;  %v9310_v10 = vadd.f32 %v4080_v13, %v4079_v11  ;;  %5260 = vmatmul.mubr.msk.f32.gmra.mrb[34].mxu1 %vm3656_vm8, %v3643_v3  ;;  %v3513_v45 = vsel %vm1612_vm11, %v3481_v31, %v9281_v61 }
 0x59e   : > { %v9313_v16 = vpop.permute.xlu1 %2864  ;;  %v3546_v38 = vsel %vm3524_vm14, %v3513_v45, %v3055_v34 }
 0x59f   : > { %v3149_v23 = vpop.permute.xlu0 %3148 }
 0x5a0   : > { %3074 = vrot.lane.b32.xlu1 %v2614_v32, %s5465_s25  ;;  %v3578_v30 = vsel %vm3557_vm15, %v3545_v37, %v3149_v23 }
 0x5a1   : > { %3358 = vrot.lane.b32.xlu0 %v2614_v32, %s5468_s14 }
 0x5a2   : > { %v3245_v63 = vpop.permute.xlu1 %3244 }
 0x5a3   : > { %v3151_v8 = vpop.permute.xlu0 %3150  ;;  %v3611_v1 = vsel %vm3590_vm1, %v3578_v30, %v3245_v63 }
 0x5a4   : > { %3170 = vrot.lane.b32.xlu1 %v2383_v27, %s5466_s30  ;;  %v3579_v3 = vsel %vm3557_vm15, %v3546_v38, %v3151_v8 }
 0x5a5   : > { %3168 = vrot.lane.b32.xlu0 %v2382_v18, %s5466_s30 }
 0x5a6   : > { %v2961_v48 = vpop.permute.xlu1 %2960 }
 0x5a7   : > { %v2867_v24 = vpop.permute.xlu0 %2866 }
 0x5a8   : > { %3266 = vrot.lane.b32.xlu1 %v2622_v49, %s5467_s9 }
 0x5a9   : > { %3264 = vrot.lane.b32.xlu0 %v2620_v14, %s5467_s9 }
 0x5aa   : > { %v3341_v50 = vpop.permute.xlu1 %3340 }
 0x5ab   : > { %v3247_v0 = vpop.permute.xlu0 %3246  ;;  %v3644_v25 = vsel %vm3623_vm6, %v3611_v1, %v3341_v50 }
 0x5ac   : > { %3362 = vrot.lane.b32.xlu1 %v2627_v52, %s5468_s14  ;;  %5262 = vmatprep.mubr.msk.f32.mxu1 %vm3656_vm8, %v3644_v25  ;;  %v3612_v11 = vsel %vm3590_vm1, %v3579_v3, %v3247_v0  ;;  %v11058_v52 = vld [vmem:[#allocation120_spill] sm:$0xff] }
 0x5ad   : > { %3360 = vrot.lane.b32.xlu0 %v2625_v56, %s5468_s14  ;;  %v3419_v1 = vsel %vm1414_vm3, %v8947_v6, %v11058_v52 }
 0x5ae   : > { %v3057_v29 = vpop.permute.xlu1 %3056 }
 0x5af   : > { %v2963_v58 = vpop.permute.xlu0 %2962 }
 0x5b0   : > { %v9350_v13 = vpop.f32.mrb[18].mxu1 }
 0x5b1   : > { %11054 = vst [vmem:[#allocation41_spill] sm:$0xff] %v9350_v13  ;;  %v9353_v59 = vpop.f32.mrb[19].mxu1  ;;  %v4050_v23 = vmul.f32 %v9350_v13, %v9350_v13  ;;  %v3983_v32 = vsel %vm1414_vm3, %v9350_v13, 0.0  ;;  %v11083_v13 = vld [vmem:[#allocation94_spill] sm:$0xff] }
 0x5b2   : > { %11055 = vst [vmem:[#allocation126_spill] sm:$0xff] %v9353_v59  ;;  %v3981_v43 = vsel %vm1414_vm3, %v9353_v59, 0.0  ;;  %v4049_v18 = vmul.f32 %v9353_v59, %v9353_v59  ;;  %v3059_v27 = vpop.permute.xlu1 %3058 }
 0x5b3   : > { %v3343_v61 = vpop.permute.xlu0 %3342  ;;  %v3982_v34 = vadd.f32 %v3981_v43, %v9304_v42  ;;  %v4084_v8 = vsel %vm1414_vm3, %v4050_v23, 0.0  ;;  %v11056_v42 = vld [vmem:[#allocation27_spill] sm:$0xff] }
 0x5b4   : > { %v3645_v35 = vsel %vm3623_vm6, %v3612_v11, %v3343_v61  ;;  %v4082_v4 = vsel %vm1414_vm3, %v4049_v18, 0.0  ;;  %v3418_v53 = vsel %vm1414_vm3, %v8929_v2, %v11056_v42 }
 0x5b5   : > { %5263 = vmatmul.mubr.msk.f32.gmra.mrb[36].mxu1 %vm3656_vm8, %v3645_v35  ;;  %v4083_v21 = vadd.f32 %v4082_v4, %v9310_v10  ;;  %v3984_v57 = vadd.f32 %v3983_v32, %v3982_v34  ;;  %v3450_v44 = vsel %vm1480_vm7, %v3418_v53, %v11057_v9 }
 0x5b6   : > { %v2869_v62 = vpop.permute.xlu1 %2868  ;;  %v3482_v14 = vsel %vm1546_vm9, %v3450_v44, %v9313_v16  ;;  %v11059_v16 = vld [vmem:[#allocation39_spill] sm:$0xff] }
 0x5b7   : > { %v3153_v63 = vpop.permute.xlu0 %3152  ;;  %v4085_v17 = vadd.f32 %v4084_v8, %v4083_v21  ;;  %v3514_v60 = vsel %vm1612_vm11, %v3482_v14, %v2961_v48  ;;  %v3451_v0 = vsel %vm1480_vm7, %v3419_v1, %v11059_v16  ;;  %v11062_v21 = vld [vmem:[#allocation118_spill] sm:$0xff]  ;;  %v11063_v8 = vld [vmem:[#allocation124_spill] sm:$0xff] }
 0x5b8   : > { %v3547_v51 = vsel %vm3524_vm14, %v3514_v60, %v3057_v29  ;;  %v3483_v48 = vsel %vm1546_vm9, %v3451_v0, %v2867_v24 }
 0x5b9   : > { %v3580_v40 = vsel %vm3557_vm15, %v3547_v51, %v3153_v63  ;;  %v3515_v20 = vsel %vm1612_vm11, %v3483_v48, %v2963_v58 }
 0x5ba   : > { %v3249_v47 = vpop.permute.xlu1 %3248  ;;  %v3548_v22 = vsel %vm3524_vm14, %v3515_v20, %v3059_v27 }
 0x5bb   : > { %v3155_v39 = vpop.permute.xlu0 %3154  ;;  %v3613_v37 = vsel %vm3590_vm1, %v3580_v40, %v3249_v47  ;;  %v11065_v40 = vld [vmem:[#allocation138_spill] sm:$0xff] }
 0x5bc   : > { %v3581_v7 = vsel %vm3557_vm15, %v3548_v22, %v3155_v39 }
 0x5be   : > { %v2965_v10 = vpop.permute.xlu1 %2964 }
 0x5bf   : > { %v2871_v49 = vpop.permute.xlu0 %2870 }
 0x5c2   : > { %v3345_v56 = vpop.permute.xlu1 %3344 }
 0x5c3   : > { %v3251_v30 = vpop.permute.xlu0 %3250  ;;  %v3646_v2 = vsel %vm3623_vm6, %v3613_v37, %v3345_v56 }
 0x5c4   : > { %5265 = vmatprep.mubr.msk.f32.mxu1 %vm3656_vm8, %v3646_v2  ;;  %v3614_v6 = vsel %vm3590_vm1, %v3581_v7, %v3251_v30  ;;  %v9433_v30 = vpop.f32.mrb[16].mxu0 }
 0x5c5   : > { %v4613_v1 = vmul.f32 %v9433_v30, %v9433_v30  ;;  %v9445_v0 = vpop.f32.mrb[17].mxu0 }
 0x5c6   : > { %v3061_v25 = vpop.permute.xlu1 %3060 }
 0x5c7   : > { %v2967_v50 = vpop.permute.xlu0 %2966 }
 0x5c8   : > { %v9391_v19 = vpop.f32.mrb[20].mxu1 }
 0x5c9   : > { %11060 = vst [vmem:[#allocation140_spill] sm:$0xff] %v9391_v19  ;;  %v9394_v12 = vpop.f32.mrb[21].mxu1  ;;  %v4052_v31 = vmul.f32 %v9391_v19, %v9391_v19  ;;  %v3987_v11 = vsel %vm1414_vm3, %v9391_v19, 0.0 }
 0x5ca   : > { %11061 = vst [vmem:[#allocation97_spill] sm:$0xff] %v9394_v12  ;;  %v3985_v24 = vsel %vm1414_vm3, %v9394_v12, 0.0  ;;  %v4051_v29 = vmul.f32 %v9394_v12, %v9394_v12  ;;  %v3063_v45 = vpop.permute.xlu1 %3062 }
 0x5cb   : > { %v3347_v58 = vpop.permute.xlu0 %3346  ;;  %v3986_v38 = vadd.f32 %v3985_v24, %v3984_v57  ;;  %v4088_v61 = vsel %vm1414_vm3, %v4052_v31, 0.0  ;;  %v3420_v57 = vsel %vm1414_vm3, %v9009_v41, %v11062_v21  ;;  %v11064_v41 = vld [vmem:[#allocation65_spill] sm:$0xff]  ;;  %v4645_v31 = vsel %vm1414_vm3, %v4613_v1, 0.0 }
 0x5cc   : > { %v3647_v3 = vsel %vm3623_vm6, %v3614_v6, %v3347_v58  ;;  %v4086_v23 = vsel %vm1414_vm3, %v4051_v29, 0.0  ;;  %v3452_v63 = vsel %vm1480_vm7, %v3420_v57, %v11063_v8  ;;  %v3421_v51 = vsel %vm1414_vm3, %v9027_v54, %v11064_v41 }
 0x5cd   : > { %5266 = vmatmul.mubr.msk.f32.gmra.mrb[38].mxu1 %vm3656_vm8, %v3647_v3  ;;  %v4087_v43 = vadd.f32 %v4086_v23, %v4085_v17  ;;  %v3988_v18 = vadd.f32 %v3987_v11, %v3986_v38  ;;  %v3484_v39 = vsel %vm1546_vm9, %v3452_v63, %v2869_v62  ;;  %v3453_v37 = vsel %vm1480_vm7, %v3421_v51, %v11065_v40 }
 0x5ce   : > { %v9409_v34 = vpop.permute.xlu1 %2872  ;;  %v3516_v42 = vsel %vm1612_vm11, %v3484_v39, %v2965_v10  ;;  %v3485_v10 = vsel %vm1546_vm9, %v3453_v37, %v2871_v49  ;;  %v4544_v54 = vsel %vm1414_vm3, %v9433_v30, 0.0  ;;  %v9454_v20 = vpop.f32.mrb[18].mxu0 }
 0x5cf   : > { %v3157_v27 = vpop.permute.xlu0 %3156  ;;  %v4089_v35 = vadd.f32 %v4088_v61, %v4087_v43  ;;  %v3549_v53 = vsel %vm3524_vm14, %v3516_v42, %v3061_v25  ;;  %v3517_v56 = vsel %vm1612_vm11, %v3485_v10, %v2967_v50  ;;  %v4543_v50 = vsel %vm1414_vm3, %v9445_v0, 0.0  ;;  %v9462_v29 = vpop.f32.mrb[19].mxu0 }
 0x5d0   : > { %v3582_v9 = vsel %vm3557_vm15, %v3549_v53, %v3157_v27  ;;  %v3550_v16 = vsel %vm3524_vm14, %v3517_v56, %v3063_v45  ;;  %v4612_v25 = vmul.f32 %v9445_v0, %v9445_v0  ;;  %v4545_v24 = vadd.f32 %v4544_v54, %v4543_v50 }
 0x5d1   : > { %v4615_v23 = vmul.f32 %v9454_v20, %v9454_v20  ;;  %v4548_v57 = vsel %vm1414_vm3, %v9454_v20, 0.0  ;;  %v4546_v8 = vsel %vm1414_vm3, %v9462_v29, 0.0  ;;  %v4614_v53 = vmul.f32 %v9462_v29, %v9462_v29 }
 0x5d2   : > { %v3253_v4 = vpop.permute.xlu1 %3252  ;;  %v4644_v11 = vsel %vm1414_vm3, %v4612_v25, 0.0 }
 0x5d3   : > { %v3159_v32 = vpop.permute.xlu0 %3158  ;;  %v3615_v44 = vsel %vm3590_vm1, %v3582_v9, %v3253_v4  ;;  %v4646_v21 = vadd.f32 %v4645_v31, %v4644_v11 }
 0x5d4   : > { %v3583_v49 = vsel %vm3557_vm15, %v3550_v16, %v3159_v32  ;;  %v9476_v32 = vpop.f32.mrb[20].mxu0 }
 0x5d5   : > { %v9484_v63 = vpop.f32.mrb[21].mxu0  ;;  %v4552_v1 = vsel %vm1414_vm3, %v9476_v32, 0.0 }
 0x5d6   : > { %v9419_v17 = vpop.permute.xlu1 %2968  ;;  %v4616_v41 = vmul.f32 %v9484_v63, %v9484_v63  ;;  %v4550_v40 = vsel %vm1414_vm3, %v9484_v63, 0.0  ;;  %v9503_v37 = vpop.f32.mrb[22].mxu0 }
 0x5d7   : > { %v9417_v47 = vpop.permute.xlu0 %2874  ;;  %v9505_v54 = vpop.f32.mrb[23].mxu0 }
 0x5d8   : > { %v4651_v16 = vsel %vm1414_vm3, %v4616_v41, 0.0 }
 0x5da   : > { %v3349_v60 = vpop.permute.xlu1 %3348 }
 0x5db   : > { %v3255_v14 = vpop.permute.xlu0 %3254  ;;  %v3648_v62 = vsel %vm3623_vm6, %v3615_v44, %v3349_v60  ;;  %v4649_v60 = vsel %vm1414_vm3, %v4615_v23, 0.0 }
 0x5dc   : > { %5268 = vmatprep.mubr.msk.f32.mxu1 %vm3656_vm8, %v3648_v62  ;;  %v3616_v22 = vsel %vm3590_vm1, %v3583_v49, %v3255_v14  ;;  %v4617_v62 = vmul.f32 %v9476_v32, %v9476_v32  ;;  %v4618_v49 = vmul.f32 %v9505_v54, %v9505_v54 }
 0x5de   : > { %v9438_v52 = vpop.permute.xlu1 %3064  ;;  %v4653_v31 = vsel %vm1414_vm3, %v4617_v62, 0.0 }
 0x5df   : > { %v9436_v2 = vpop.permute.xlu0 %2970 }
 0x5e0   : > { %v9448_v48 = vpop.f32.mrb[22].mxu1 }
 0x5e1   : > { %11066 = vst [vmem:[#allocation44_spill] sm:$0xff] %v9448_v48  ;;  %v4054_v7 = vmul.f32 %v9448_v48, %v9448_v48  ;;  %v9459_v6 = vpop.f32.mrb[23].mxu1  ;;  %v3991_v43 = vsel %vm1414_vm3, %v9448_v48, 0.0 }
 0x5e2   : > { %11067 = vst [vmem:[#allocation128_spill] sm:$0xff] %v9459_v6  ;;  %v3989_v58 = vsel %vm1414_vm3, %v9459_v6, 0.0  ;;  %v4053_v45 = vmul.f32 %v9459_v6, %v9459_v6  ;;  %v9468_v3 = vpop.permute.xlu1 %3066 }
 0x5e3   : > { %v3351_v38 = vpop.permute.xlu0 %3350  ;;  %v3990_v61 = vadd.f32 %v3989_v58, %v3988_v18  ;;  %v4547_v18 = vadd.f32 %v4546_v8, %v4545_v24  ;;  %v4092_v9 = vsel %vm1414_vm3, %v4054_v7, 0.0  ;;  %v4619_v24 = vmul.f32 %v9503_v37, %v9503_v37 }
 0x5e4   : > { %v3649_v27 = vsel %vm3623_vm6, %v3616_v22, %v3351_v38  ;;  %v4090_v4 = vsel %vm1414_vm3, %v4053_v45, 0.0  ;;  %v4554_v58 = vsel %vm1414_vm3, %v9505_v54, 0.0  ;;  %v9517_v45 = vpop.f32.mrb[24].mxu0  ;;  %v11068_v38 = vld [vmem:[#allocation117_spill] sm:$0xff] }
 0x5e5   : > { %5269 = vmatmul.mubr.msk.f32.gmra.mrb[40].mxu1 %vm3656_vm8, %v3649_v27  ;;  %v4091_v39 = vadd.f32 %v4090_v4, %v4089_v35  ;;  %v9486_v42 = vadd.f32 %v3991_v43, %v3990_v61  ;;  %v4647_v35 = vsel %vm1414_vm3, %v4614_v53, 0.0  ;;  %v4549_v56 = vadd.f32 %v4548_v57, %v4547_v18  ;;  %v9522_v61 = vpop.f32.mrb[25].mxu0  ;;  %v11069_v27 = vld [vmem:[#allocation95_spill] sm:$0xff] }
 0x5e6   : > { %v9491_v14 = vpop.permute.xlu1 %2876  ;;  %v4648_v10 = vadd.f32 %v4647_v35, %v4646_v21  ;;  %v3422_v11 = vsel %vm1414_vm3, %v9087_v55, %v11068_v38  ;;  %v4556_v21 = vsel %vm1414_vm3, %v9503_v37, 0.0  ;;  %v4655_v57 = vsel %vm1414_vm3, %v4618_v49, 0.0 }
 0x5e7   : > { %v3161_v44 = vpop.permute.xlu0 %3160  ;;  %v9496_v51 = vadd.f32 %v4092_v9, %v4091_v39  ;;  %v4551_v22 = vadd.f32 %v4550_v40, %v4549_v56  ;;  %v3454_v4 = vsel %vm1480_vm7, %v3422_v11, %v11069_v27  ;;  %v4620_v8 = vmul.f32 %v9522_v61, %v9522_v61  ;;  %v9544_v40 = vpop.f32.mrb[26].mxu0 }
 0x5e8   : > { %v4650_v7 = vadd.f32 %v4649_v60, %v4648_v10  ;;  %v3486_v39 = vsel %vm1546_vm9, %v3454_v4, %v9409_v34  ;;  %v4657_v41 = vsel %vm1414_vm3, %v4619_v24, 0.0  ;;  %v4621_v35 = vmul.f32 %v9517_v45, %v9517_v45  ;;  %v11070_v34 = vld [vmem:[#allocation91_spill] sm:$0xff]  ;;  %v11071_v24 = vld [vmem:[#allocation152_spill] sm:$0xff] }
 0x5e9   : > { %v4553_v43 = vadd.f32 %v4552_v1, %v4551_v22  ;;  %v3518_v60 = vsel %vm1612_vm11, %v3486_v39, %v9419_v17  ;;  %v4558_v62 = vsel %vm1414_vm3, %v9522_v61, 0.0  ;;  %v3423_v10 = vsel %vm1414_vm3, %v9101_v28, %v11070_v34  ;;  %v9551_v17 = vpop.f32.mrb[27].mxu0 }
 0x5ea   : > { %v3257_v25 = vpop.permute.xlu1 %3256  ;;  %v4652_v23 = vadd.f32 %v4651_v16, %v4650_v7  ;;  %v3551_v56 = vsel %vm3524_vm14, %v3518_v60, %v9438_v52  ;;  %v4560_v22 = vsel %vm1414_vm3, %v9517_v45, 0.0  ;;  %v4659_v7 = vsel %vm1414_vm3, %v4620_v8, 0.0 }
 0x5eb   : > { %v3163_v50 = vpop.permute.xlu0 %3162  ;;  %v4555_v53 = vadd.f32 %v4554_v58, %v4553_v43  ;;  %v3584_v49 = vsel %vm3557_vm15, %v3551_v56, %v3161_v44  ;;  %v3455_v28 = vsel %vm1480_vm7, %v3423_v10, %v11071_v24  ;;  %v4661_v44 = vsel %vm1414_vm3, %v4621_v35, 0.0 }
 0x5ec   : > { %v4654_v9 = vadd.f32 %v4653_v31, %v4652_v23  ;;  %v4622_v31 = vmul.f32 %v9551_v17, %v9551_v17  ;;  %v3617_v58 = vsel %vm3590_vm1, %v3584_v49, %v3257_v25  ;;  %v4623_v27 = vmul.f32 %v9544_v40, %v9544_v40 }
 0x5ed   : > { %v4557_v16 = vadd.f32 %v4556_v21, %v4555_v53  ;;  %v4562_v4 = vsel %vm1414_vm3, %v9551_v17, 0.0  ;;  %v3487_v21 = vsel %vm1546_vm9, %v3455_v28, %v9417_v47  ;;  %v4564_v39 = vsel %vm1414_vm3, %v9544_v40, 0.0 }
 0x5ee   : > { %v9535_v55 = vpop.permute.xlu1 %2972  ;;  %v4656_v1 = vadd.f32 %v4655_v57, %v4654_v9  ;;  %v3519_v8 = vsel %vm1612_vm11, %v3487_v21, %v9436_v2  ;;  %v4663_v53 = vsel %vm1414_vm3, %v4622_v31, 0.0  ;;  %v9576_v9 = vpop.f32.mrb[28].mxu0  ;;  %v4665_v10 = vsel %vm1414_vm3, %v4623_v27, 0.0 }
 0x5ef   : > { %v9533_v18 = vpop.permute.xlu0 %2878  ;;  %v4559_v11 = vadd.f32 %v4558_v62, %v4557_v16  ;;  %v3552_v60 = vsel %vm3524_vm14, %v3519_v8, %v9468_v3  ;;  %v4625_v34 = vmul.f32 %v9576_v9, %v9576_v9  ;;  %v9588_v56 = vpop.f32.mrb[29].mxu0 }
 0x5f0   : > { %v4658_v23 = vadd.f32 %v4657_v41, %v4656_v1  ;;  %v3585_v2 = vsel %vm3557_vm15, %v3552_v60, %v3163_v50  ;;  %v4568_v50 = vsel %vm1414_vm3, %v9576_v9, 0.0 }
 0x5f1   : > { %v4561_v57 = vadd.f32 %v4560_v22, %v4559_v11  ;;  %v4566_v22 = vsel %vm1414_vm3, %v9588_v56, 0.0  ;;  %v4669_v28 = vsel %vm1414_vm3, %v4625_v34, 0.0 }
 0x5f2   : > { %v3353_v38 = vpop.permute.xlu1 %3352  ;;  %v4660_v25 = vadd.f32 %v4659_v7, %v4658_v23  ;;  %v9595_v7 = vpop.f32.mrb[30].mxu0 }
 0x5f3   : > { %v3259_v52 = vpop.permute.xlu0 %3258  ;;  %v3650_v43 = vsel %vm3623_vm6, %v3617_v58, %v3353_v38  ;;  %v4563_v35 = vadd.f32 %v4562_v4, %v4561_v57  ;;  %v4624_v58 = vmul.f32 %v9588_v56, %v9588_v56  ;;  %v4572_v57 = vsel %vm1414_vm3, %v9595_v7, 0.0 }
 0x5f4   : > { %5271 = vmatprep.mubr.msk.f32.mxu1 %vm3656_vm8, %v3650_v43  ;;  %v4662_v62 = vadd.f32 %v4661_v44, %v4660_v25  ;;  %v3618_v1 = vsel %vm3590_vm1, %v3585_v2, %v3259_v52  ;;  %v9606_v52 = vpop.f32.mrb[31].mxu0  ;;  %v4627_v60 = vmul.f32 %v9595_v7, %v9595_v7 }
 0x5f5   : > { %v4565_v49 = vadd.f32 %v4564_v39, %v4563_v35  ;;  %v9620_v8 = vpop.f32.mrb[32].mxu0 }
 0x5f6   : > { %v9582_v47 = vpop.permute.xlu1 %3068  ;;  %v4664_v3 = vadd.f32 %v4663_v53, %v4662_v62  ;;  %v4667_v53 = vsel %vm1414_vm3, %v4624_v58, 0.0  ;;  %v9627_v62 = vpop.f32.mrb[33].mxu0  ;;  %v4626_v58 = vmul.f32 %v9606_v52, %v9606_v52 }
 0x5f7   : > { %v9580_v41 = vpop.permute.xlu0 %2974  ;;  %v4567_v44 = vadd.f32 %v4566_v22, %v4565_v49 }
 0x5f8   : > { %v9591_v16 = vpop.f32.mrb[24].mxu1  ;;  %v4666_v27 = vadd.f32 %v4665_v10, %v4664_v3  ;;  %v4570_v10 = vsel %vm1414_vm3, %v9606_v52, 0.0 }
 0x5f9   : > { %11072 = vst [vmem:[#allocation142_spill] sm:$0xff] %v9591_v16  ;;  %v4056_v31 = vmul.f32 %v9591_v16, %v9591_v16  ;;  %v9599_v24 = vpop.f32.mrb[25].mxu1  ;;  %v3995_v4 = vsel %vm1414_vm3, %v9591_v16, 0.0  ;;  %v4569_v35 = vadd.f32 %v4568_v50, %v4567_v44  ;;  %v4629_v44 = vmul.f32 %v9620_v8, %v9620_v8 }
 0x5fa   : > { %11073 = vst [vmem:[#allocation96_spill] sm:$0xff] %v9599_v24  ;;  %v3993_v38 = vsel %vm1414_vm3, %v9599_v24, 0.0  ;;  %v4055_v11 = vmul.f32 %v9599_v24, %v9599_v24  ;;  %v9612_v43 = vpop.permute.xlu1 %3070  ;;  %v4668_v2 = vadd.f32 %v4667_v53, %v4666_v27  ;;  %v4574_v27 = vsel %vm1414_vm3, %v9627_v62, 0.0 }
 0x5fb   : > { %v3355_v23 = vpop.permute.xlu0 %3354  ;;  %v3994_v21 = vadd.f32 %v3993_v38, %v9486_v42  ;;  %v4571_v22 = vadd.f32 %v4570_v10, %v4569_v35  ;;  %v4673_v38 = vsel %vm1414_vm3, %v4627_v60, 0.0 }
 0x5fc   : > { %v3651_v25 = vsel %vm3623_vm6, %v3618_v1, %v3355_v23  ;;  %v4094_v39 = vsel %vm1414_vm3, %v4055_v11, 0.0  ;;  %v4096_v1 = vsel %vm1414_vm3, %v4056_v31, 0.0  ;;  %v9642_v11 = vpop.f32.mrb[34].mxu0  ;;  %v4671_v23 = vsel %vm1414_vm3, %v4626_v58, 0.0 }
 0x5fd   : > { %5272 = vmatmul.mubr.msk.f32.gmra.mrb[42].mxu1 %vm3656_vm8, %v3651_v25  ;;  %v4095_v42 = vadd.f32 %v4094_v39, %v9496_v51  ;;  %v9630_v34 = vadd.f32 %v3995_v4, %v3994_v21  ;;  %v4670_v51 = vadd.f32 %v4669_v28, %v4668_v2  ;;  %v4573_v31 = vadd.f32 %v4572_v57, %v4571_v22  ;;  %v9649_v4 = vpop.f32.mrb[35].mxu0 }
 0x5fe   : > { %v9635_v49 = vpop.permute.xlu1 %2880  ;;  %v4576_v25 = vsel %vm1414_vm3, %v9620_v8, 0.0  ;;  %v4628_v28 = vmul.f32 %v9627_v62, %v9627_v62  ;;  %v4630_v35 = vmul.f32 %v9649_v4, %v9649_v4  ;;  %v4578_v2 = vsel %vm1414_vm3, %v9649_v4, 0.0  ;;  %v9662_v10 = vpop.f32.mrb[36].mxu0 }
 0x5ff   : > { %v3165_v3 = vpop.permute.xlu0 %3164  ;;  %v9639_v50 = vadd.f32 %v4096_v1, %v4095_v42  ;;  %v4672_v21 = vadd.f32 %v4671_v23, %v4670_v51  ;;  %v4575_v60 = vadd.f32 %v4574_v27, %v4573_v31  ;;  %v11074_v1 = vld [vmem:[#allocation38_spill] sm:$0xff]  ;;  %v4677_v58 = vsel %vm1414_vm3, %v4629_v44, 0.0  ;;  %v9670_v31 = vpop.f32.mrb[37].mxu0 }
 0x600   : > { %v4675_v42 = vsel %vm1414_vm3, %v4628_v28, 0.0  ;;  %v3424_v22 = vsel %vm1414_vm3, %v9141_v26, %v11074_v1  ;;  %v4631_v51 = vmul.f32 %v9642_v11, %v9642_v11  ;;  %v4580_v28 = vsel %vm1414_vm3, %v9642_v11, 0.0 }
 0x601   : > { %v4674_v57 = vadd.f32 %v4673_v38, %v4672_v21  ;;  %v4577_v23 = vadd.f32 %v4576_v25, %v4575_v60  ;;  %v11075_v38 = vld [vmem:[#allocation42_spill] sm:$0xff]  ;;  %v4679_v1 = vsel %vm1414_vm3, %v4630_v35, 0.0  ;;  %v4632_v25 = vmul.f32 %v9670_v31, %v9670_v31 }
 0x602   : > { %v3261_v53 = vpop.permute.xlu1 %3260  ;;  %v3456_v27 = vsel %vm1480_vm7, %v3424_v22, %v11075_v38  ;;  %v9689_v22 = vpop.f32.mrb[38].mxu0  ;;  %v4681_v38 = vsel %vm1414_vm3, %v4631_v51, 0.0  ;;  %v4633_v35 = vmul.f32 %v9662_v10, %v9662_v10 }
 0x603   : > { %v9655_v39 = vpop.permute.xlu0 %3166  ;;  %v4676_v21 = vadd.f32 %v4675_v42, %v4674_v57  ;;  %v3488_v16 = vsel %vm1546_vm9, %v3456_v27, %v9491_v14  ;;  %v4579_v44 = vadd.f32 %v4578_v2, %v4577_v23  ;;  %v4582_v42 = vsel %vm1414_vm3, %v9670_v31, 0.0  ;;  %v9696_v23 = vpop.f32.mrb[39].mxu0  ;;  %v11076_v27 = vld [vmem:[#allocation123_spill] sm:$0xff] }
 0x604   : > { %v3520_v60 = vsel %vm1612_vm11, %v3488_v16, %v9535_v55  ;;  %v3425_v55 = vsel %vm1414_vm3, %v9154_v5, %v11076_v27  ;;  %v4683_v6 = vsel %vm1414_vm3, %v4632_v25, 0.0  ;;  %v4635_v25 = vmul.f32 %v9689_v22, %v9689_v22 }
 0x605   : > { %v4678_v57 = vadd.f32 %v4677_v58, %v4676_v21  ;;  %v3553_v14 = vsel %vm3524_vm14, %v3520_v60, %v9582_v47  ;;  %v4581_v2 = vadd.f32 %v4580_v28, %v4579_v44  ;;  %v4584_v21 = vsel %vm1414_vm3, %v9662_v10, 0.0  ;;  %v11077_v44 = vld [vmem:[#allocation62_spill] sm:$0xff] }
 0x606   : > { %v9680_v26 = vpop.permute.xlu1 %2976  ;;  %v3586_v16 = vsel %vm3557_vm15, %v3553_v14, %v3165_v3  ;;  %v4634_v28 = vmul.f32 %v9696_v23, %v9696_v23  ;;  %v3457_v19 = vsel %vm1480_vm7, %v3425_v55, %v11077_v44  ;;  %v9719_v14 = vpop.f32.mrb[40].mxu0  ;;  %v4588_v27 = vsel %vm1414_vm3, %v9689_v22, 0.0 }
 0x607   : > { %v9678_v24 = vpop.permute.xlu0 %2882  ;;  %v4680_v58 = vadd.f32 %v4679_v1, %v4678_v57  ;;  %v3619_v47 = vsel %vm3590_vm1, %v3586_v16, %v3261_v53  ;;  %v4583_v48 = vadd.f32 %v4582_v42, %v4581_v2  ;;  %v4586_v1 = vsel %vm1414_vm3, %v9696_v23, 0.0 }
 0x608   : > { %v3489_v53 = vsel %vm1546_vm9, %v3457_v19, %v9533_v18  ;;  %v4685_v57 = vsel %vm1414_vm3, %v4633_v35, 0.0  ;;  %v4637_v19 = vmul.f32 %v9719_v14, %v9719_v14  ;;  %v9727_v18 = vpop.f32.mrb[41].mxu0 }
 0x609   : > { %v4682_v3 = vadd.f32 %v4681_v38, %v4680_v58  ;;  %v4585_v42 = vadd.f32 %v4584_v21, %v4583_v48  ;;  %v3521_v2 = vsel %vm1612_vm11, %v3489_v53, %v9580_v41  ;;  %v4687_v58 = vsel %vm1414_vm3, %v4634_v28, 0.0  ;;  %v11078_v41 = vld [vmem:[#allocation119_spill] sm:$0xff]  ;;  %v9745_v44 = vpop.f32.mrb[42].mxu0 }
 0x60a   : > { %v3357_v51 = vpop.permute.xlu1 %3356  ;;  %v3554_v35 = vsel %vm3524_vm14, %v3521_v2, %v9612_v43  ;;  %v3426_v21 = vsel %vm1414_vm3, %v9194_v46, %v11078_v41  ;;  %v4590_v43 = vsel %vm1414_vm3, %v9727_v18, 0.0  ;;  %v4689_v53 = vsel %vm1414_vm3, %v4635_v25, 0.0 }
 0x60b   : > { %v3263_v60 = vpop.permute.xlu0 %3262  ;;  %v3652_v5 = vsel %vm3623_vm6, %v3619_v47, %v3357_v51  ;;  %v4684_v38 = vadd.f32 %v4683_v6, %v4682_v3  ;;  %v4587_v16 = vadd.f32 %v4586_v1, %v4585_v42  ;;  %v4636_v6 = vmul.f32 %v9727_v18, %v9727_v18  ;;  %v9754_v42 = vpop.f32.mrb[43].mxu0 }
 0x60c   : > { %5274 = vmatprep.mubr.msk.f32.mxu1 %vm3656_vm8, %v3652_v5  ;;  %v3587_v47 = vsel %vm3557_vm15, %v3554_v35, %v9655_v39  ;;  %v11079_v5 = vld [vmem:[#allocation4_spill] sm:$0xff]  ;;  %v4592_v2 = vsel %vm1414_vm3, %v9719_v14, 0.0 }
 0x60d   : > { %v4686_v51 = vadd.f32 %v4685_v57, %v4684_v38  ;;  %v3427_v28 = vsel %vm1414_vm3, %v9207_v36, %v11079_v5  ;;  %v3620_v3 = vsel %vm3590_vm1, %v3587_v47, %v3263_v60  ;;  %v4589_v46 = vadd.f32 %v4588_v27, %v4587_v16 }
 0x60e   : > { %v9733_v48 = vpop.permute.xlu1 %3072  ;;  %v4693_v38 = vsel %vm1414_vm3, %v4637_v19, 0.0  ;;  %v4691_v35 = vsel %vm1414_vm3, %v4636_v6, 0.0  ;;  %v4594_v6 = vsel %vm1414_vm3, %v9754_v42, 0.0 }
 0x60f   : > { %v9731_v55 = vpop.permute.xlu0 %2978  ;;  %v4688_v57 = vadd.f32 %v4687_v58, %v4686_v51  ;;  %v4591_v41 = vadd.f32 %v4590_v43, %v4589_v46  ;;  %v9774_v51 = vpop.f32.mrb[44].mxu0  ;;  %v4638_v43 = vmul.f32 %v9754_v42, %v9754_v42 }
 0x610   : > { %v9751_v1 = vpop.f32.mrb[26].mxu1  ;;  %v9780_v46 = vpop.f32.mrb[45].mxu0 }
 0x611   : > { %11080 = vst [vmem:[#allocation43_spill] sm:$0xff] %v9751_v1  ;;  %v9756_v39 = vpop.f32.mrb[27].mxu1  ;;  %v4058_v36 = vmul.f32 %v9751_v1, %v9751_v1  ;;  %v3999_v58 = vsel %vm1414_vm3, %v9751_v1, 0.0  ;;  %v4593_v12 = vadd.f32 %v4592_v2, %v4591_v41  ;;  %v9799_v59 = vpop.f32.mrb[46].mxu0 }
 0x612   : > { %11081 = vst [vmem:[#allocation127_spill] sm:$0xff] %v9756_v39  ;;  %v3997_v60 = vsel %vm1414_vm3, %v9756_v39, 0.0  ;;  %v4057_v25 = vmul.f32 %v9756_v39, %v9756_v39  ;;  %v3075_v16 = vpop.permute.xlu1 %3074  ;;  %v4690_v39 = vadd.f32 %v4689_v53, %v4688_v57 }
 0x613   : > { %v3359_v27 = vpop.permute.xlu0 %3358  ;;  %v3998_v47 = vadd.f32 %v3997_v60, %v9630_v34  ;;  %v4100_v53 = vsel %vm1414_vm3, %v4058_v36, 0.0  ;;  %v4595_v1 = vadd.f32 %v4594_v6, %v4593_v12  ;;  %v4640_v12 = vmul.f32 %v9780_v46, %v9780_v46 }
 0x614   : > { %v3653_v19 = vsel %vm3623_vm6, %v3620_v3, %v3359_v27  ;;  %v4098_v5 = vsel %vm1414_vm3, %v4057_v25, 0.0  ;;  %v4596_v3 = vsel %vm1414_vm3, %v9745_v44, 0.0  ;;  %v4639_v27 = vmul.f32 %v9745_v44, %v9745_v44  ;;  %v11082_v25 = vld [vmem:[#allocation66_spill] sm:$0xff] }
 0x615   : > { %5275 = vmatmul.mubr.msk.f32.gmra.mrb[44].mxu1 %vm3656_vm8, %v3653_v19  ;;  %v4099_v34 = vadd.f32 %v4098_v5, %v9639_v50  ;;  %v9783_v60 = vadd.f32 %v3999_v58, %v3998_v47  ;;  %v3458_v19 = vsel %vm1480_vm7, %v3426_v21, %v11082_v25  ;;  %v4692_v41 = vadd.f32 %v4691_v35, %v4690_v39  ;;  %v9805_v39 = vpop.f32.mrb[47].mxu0 }
 0x616   : > { %v3171_v2 = vpop.permute.xlu1 %3170  ;;  %v3459_v50 = vsel %vm1480_vm7, %v3427_v28, %v11083_v13  ;;  %v4695_v47 = vsel %vm1414_vm3, %v4638_v43, 0.0  ;;  %v4598_v5 = vsel %vm1414_vm3, %v9780_v46, 0.0  ;;  %v3490_v21 = vsel %vm1546_vm9, %v3458_v19, %v9635_v49 }
 0x617   : > { %v3169_v57 = vpop.permute.xlu0 %3168  ;;  %v9794_v58 = vadd.f32 %v4100_v53, %v4099_v34  ;;  %v4694_v36 = vadd.f32 %v4693_v38, %v4692_v41  ;;  %v4597_v25 = vadd.f32 %v4596_v3, %v4595_v1  ;;  %v3491_v13 = vsel %vm1546_vm9, %v3459_v50, %v9678_v24 }
 0x618   : > { %v4697_v28 = vsel %vm1414_vm3, %v4639_v27, 0.0  ;;  %v4600_v35 = vsel %vm1414_vm3, %v9774_v51, 0.0  ;;  %v4641_v6 = vmul.f32 %v9774_v51, %v9774_v51  ;;  %v3522_v49 = vsel %vm1612_vm11, %v3490_v21, %v9680_v26 }
 0x619   : > { %v3523_v1 = vsel %vm1612_vm11, %v3491_v13, %v9731_v55  ;;  %v4696_v34 = vadd.f32 %v4695_v47, %v4694_v36  ;;  %v4599_v3 = vadd.f32 %v4598_v5, %v4597_v25  ;;  %v3555_v24 = vsel %vm3524_vm14, %v3522_v49, %v9733_v48 }
 0x61a   : > { %v3267_v43 = vpop.permute.xlu1 %3266  ;;  %v4699_v27 = vsel %vm1414_vm3, %v4640_v12, 0.0  ;;  %v4602_v19 = vsel %vm1414_vm3, %v9805_v39, 0.0  ;;  %v4642_v53 = vmul.f32 %v9805_v39, %v9805_v39  ;;  %v3556_v26 = vsel %vm3524_vm14, %v3523_v1, %v3075_v16 }
 0x61b   : > { %v3265_v38 = vpop.permute.xlu0 %3264  ;;  %v3588_v41 = vsel %vm3557_vm15, %v3555_v24, %v3169_v57  ;;  %v4698_v55 = vadd.f32 %v4697_v28, %v4696_v34  ;;  %v4601_v50 = vadd.f32 %v4600_v35, %v4599_v3  ;;  %v3589_v47 = vsel %vm3557_vm15, %v3556_v26, %v3171_v2 }
 0x61c   : > { %v4701_v5 = vsel %vm1414_vm3, %v4641_v6, 0.0  ;;  %v4604_v48 = vsel %vm1414_vm3, %v9799_v59, 0.0  ;;  %v4643_v21 = vmul.f32 %v9799_v59, %v9799_v59  ;;  %v3621_v36 = vsel %vm3590_vm1, %v3588_v41, %v3265_v38 }
 0x61d   : > { %v3622_v25 = vsel %vm3590_vm1, %v3589_v47, %v3267_v43  ;;  %v4700_v13 = vadd.f32 %v4699_v27, %v4698_v55  ;;  %v4603_v57 = vadd.f32 %v4602_v19, %v4601_v50  ;;  %v4703_v35 = vsel %vm1414_vm3, %v4642_v53, 0.0 }
 0x61e   : > { %v3363_v16 = vpop.permute.xlu1 %3362  ;;  %v4705_v1 = vsel %vm1414_vm3, %v4643_v21, 0.0 }
 0x61f   : > { %v3361_v12 = vpop.permute.xlu0 %3360  ;;  %v3655_v2 = vsel %vm3623_vm6, %v3622_v25, %v3363_v16  ;;  %v4605_v6 = vadd.f32 %v4604_v48, %v4603_v57  ;;  %v4702_v49 = vadd.f32 %v4701_v5, %v4700_v13 }
 0x620   : > { %v3654_v28 = vsel %vm3623_vm6, %v3621_v36, %v3361_v12 }
 0x621   : > { %5277 = vmatprep.mubr.msk.f32.mxu1 %vm3656_vm8, %v3654_v28  ;;  %v4606_v38 = vrot.slane %v4605_v6, 4  ;;  %v4704_v43 = vadd.f32 %v4703_v35, %v4702_v49 }
 0x622   : > { %5278 = vmatmul.mubr.msk.f32.gmra.mrb[46].mxu1 %vm3656_vm8, %v3655_v2 }
 0x623   : > { %v4607_v34 = vadd.f32 %v4606_v38, %v4605_v6  ;;  %v4706_v3 = vadd.f32 %v4705_v1, %v4704_v43 }
 0x625   : > { %v4608_v24 = vrot.slane %v4607_v34, 2  ;;  %v4707_v27 = vrot.slane %v4706_v3, 4 }
 0x627   : > { %v4609_v26 = vadd.f32 %v4608_v24, %v4607_v34  ;;  %v4708_v41 = vadd.f32 %v4707_v27, %v4706_v3 }
 0x628   : > { %v9841_v19 = vpop.f32.mrb[28].mxu1 }
 0x629   : > { %v4060_v53 = vmul.f32 %v9841_v19, %v9841_v19  ;;  %v9845_v55 = vpop.f32.mrb[29].mxu1  ;;  %v4610_v5 = vrot.slane %v4609_v26, 1  ;;  %v4709_v48 = vrot.slane %v4708_v41, 2  ;;  %v4003_v36 = vsel %vm1414_vm3, %v9841_v19, 0.0 }
 0x62a   : > { %v4001_v50 = vsel %vm1414_vm3, %v9845_v55, 0.0  ;;  %v4059_v47 = vmul.f32 %v9845_v55, %v9845_v55 }
 0x62b   : > { %v4002_v21 = vadd.f32 %v4001_v50, %v9783_v60  ;;  %v4611_v12 = vadd.f32 %v4610_v5, %v4609_v26  ;;  %v4710_v16 = vadd.f32 %v4709_v48, %v4708_v41  ;;  %v4104_v28 = vsel %vm1414_vm3, %v4060_v53, 0.0 }
 0x62c   : > { %v4102_v25 = vsel %vm1414_vm3, %v4059_v47, 0.0 }
 0x62d   : > { %v4103_v13 = vadd.f32 %v4102_v25, %v9794_v58  ;;  %v4004_v57 = vadd.f32 %v4003_v36, %v4002_v21  ;;  %v4711_v2 = vrot.slane %v4710_v16, 1  ;;  %v9857_v35 = vmul.f32 0.00390625, %v4611_v12 }
 0x62f   : > { %v4105_v6 = vadd.f32 %v4104_v28, %v4103_v13  ;;  %v4712_v49 = vadd.f32 %v4711_v2, %v4710_v16  ;;  %v4715_v60 = vmul.f32 %v9857_v35, %v9857_v35  ;;  %v4747_v1 = vsub.f32 %v9805_v39, %v9857_v35 }
 0x631   : > { %v4714_v38 = vmul.f32 0.00390625, %v4712_v49 }
 0x633   : > { %v4716_v43 = vsub.f32 %v4714_v38, %v4715_v60 }
 0x635   : > { %v4749_v34 = vadd.f32 1e-05, %v4716_v43  ;;  %v4717_v43 = vsub.f32 %v9445_v0, %v9857_v35 }
 0x637   : > { %5383 = vrsqrt.f32 %v4749_v34  ;;  %v4718_v34 = vsub.f32 %v9433_v30, %v9857_v35  ;;  %v4721_v30 = vsub.f32 %v9484_v63, %v9857_v35 }
 0x640   : > { %v9863_v3 = vpop.f32.mrb[30].mxu1 }
 0x641   : > { %v9865_v58 = vpop.f32.mrb[31].mxu1  ;;  %v9867_v24 = vpop.eup %5383  ;;  %v4062_v27 = vmul.f32 %v9863_v3, %v9863_v3  ;;  %v4007_v50 = vsel %vm1414_vm3, %v9863_v3, 0.0 }
 0x642   : > { %v4005_v26 = vsel %vm1414_vm3, %v9865_v58, 0.0  ;;  %v4061_v41 = vmul.f32 %v9865_v58, %v9865_v58  ;;  %v9876_v53 = vmul.f32 %v9867_v24, %v4747_v1 }
 0x643   : > { %v4006_v39 = vadd.f32 %v4005_v26, %v4004_v57  ;;  %v4108_v21 = vsel %vm1414_vm3, %v4062_v27, 0.0  ;;  %v9901_v27 = vmul.f32 %v9867_v24, %v4717_v43  ;;  %v9904_v26 = vmul.f32 %v9867_v24, %v4718_v34 }
 0x644   : > { %11084 = vst [vmem:[#allocation141_spill] sm:$0xff] %v9876_v53  ;;  %v4106_v47 = vsel %vm1414_vm3, %v4061_v41, 0.0  ;;  %v4719_v41 = vsub.f32 %v9462_v29, %v9857_v35 }
 0x645   : > { %v4107_v5 = vadd.f32 %v4106_v47, %v4105_v6  ;;  %v4008_v48 = vadd.f32 %v4007_v50, %v4006_v39  ;;  %v4720_v39 = vsub.f32 %v9454_v20, %v9857_v35  ;;  %v4722_v47 = vsub.f32 %v9476_v32, %v9857_v35 }
 0x646   : > { %v9911_v50 = vmul.f32 %v9867_v24, %v4719_v41  ;;  %v4723_v20 = vsub.f32 %v9505_v54, %v9857_v35  ;;  %v4725_v32 = vsub.f32 %v9522_v61, %v9857_v35 }
 0x647   : > { %v4109_v36 = vadd.f32 %v4108_v21, %v4107_v5  ;;  %v9914_v0 = vmul.f32 %v9867_v24, %v4720_v39  ;;  %v9921_v5 = vmul.f32 %v9867_v24, %v4721_v30  ;;  %v9924_v29 = vmul.f32 %v9867_v24, %v4722_v47 }
 0x648   : > { %v9931_v21 = vmul.f32 %v9867_v24, %v4723_v20  ;;  %v9945_v54 = vmul.f32 %v9867_v24, %v4725_v32  ;;  %v4731_v20 = vsub.f32 %v9606_v52, %v9857_v35 }
 0x64a   : > { %v9985_v32 = vmul.f32 %v9867_v24, %v4731_v20 }
 0x64c   : > { %11088 = vst [vmem:[#allocation144_spill] sm:$0xff] %v9985_v32 }
 0x658   : > { %v9882_v25 = vpop.f32.mrb[32].mxu1 }
 0x659   : > { %v9884_v12 = vpop.f32.mrb[33].mxu1  ;;  %v4064_v16 = vmul.f32 %v9882_v25, %v9882_v25  ;;  %v4011_v2 = vsel %vm1414_vm3, %v9882_v25, 0.0 }
 0x65a   : > { %v4009_v13 = vsel %vm1414_vm3, %v9884_v12, 0.0  ;;  %v4063_v57 = vmul.f32 %v9884_v12, %v9884_v12 }
 0x65b   : > { %v4010_v28 = vadd.f32 %v4009_v13, %v4008_v48  ;;  %v4112_v1 = vsel %vm1414_vm3, %v4064_v16, 0.0  ;;  %v4724_v48 = vsub.f32 %v9503_v37, %v9857_v35 }
 0x65c   : > { %v4110_v6 = vsel %vm1414_vm3, %v4063_v57, 0.0 }
 0x65d   : > { %v4111_v49 = vadd.f32 %v4110_v6, %v4109_v36  ;;  %v4012_v60 = vadd.f32 %v4011_v2, %v4010_v28  ;;  %v9934_v63 = vmul.f32 %v9867_v24, %v4724_v48  ;;  %v4726_v36 = vsub.f32 %v9517_v45, %v9857_v35 }
 0x65e   : > { %v4727_v2 = vsub.f32 %v9551_v17, %v9857_v35  ;;  %v4728_v6 = vsub.f32 %v9544_v40, %v9857_v35  ;;  %v4729_v17 = vsub.f32 %v9588_v56, %v9857_v35  ;;  %v4730_v40 = vsub.f32 %v9576_v9, %v9857_v35 }
 0x65f   : > { %v4113_v38 = vadd.f32 %v4112_v1, %v4111_v49  ;;  %v9948_v37 = vmul.f32 %v9867_v24, %v4726_v36  ;;  %v4732_v48 = vsub.f32 %v9595_v7, %v9857_v35  ;;  %v4733_v9 = vsub.f32 %v9627_v62, %v9857_v35 }
 0x660   : > { %v9964_v41 = vmul.f32 %v9867_v24, %v4727_v2  ;;  %v9967_v39 = vmul.f32 %v9867_v24, %v4728_v6  ;;  %v9975_v47 = vmul.f32 %v9867_v24, %v4729_v17  ;;  %v4734_v36 = vsub.f32 %v9620_v8, %v9857_v35 }
 0x661   : > { %v9988_v56 = vmul.f32 %v9867_v24, %v4732_v48  ;;  %v4735_v7 = vsub.f32 %v9649_v4, %v9857_v35  ;;  %v4737_v8 = vsub.f32 %v9670_v31, %v9857_v35  ;;  %v4738_v2 = vsub.f32 %v9662_v10, %v9857_v35 }
 0x662   : > { %11085 = vst [vmem:[#allocation99_spill] sm:$0xff] %v9967_v39  ;;  %11086 = vst [vmem:[#allocation46_spill] sm:$0xff] %v9975_v47  ;;  %v9998_v52 = vmul.f32 %v9867_v24, %v4734_v36  ;;  %v4739_v17 = vsub.f32 %v9696_v23, %v9857_v35  ;;  %v4742_v23 = vsub.f32 %v9719_v14, %v9857_v35 }
 0x663   : > { %11089 = vst [vmem:[#allocation98_spill] sm:$0xff] %v9988_v56  ;;  %v4745_v14 = vsub.f32 %v9780_v46, %v9857_v35 }
 0x664   : > { %11091 = vst [vmem:[#allocation129_spill] sm:$0xff] %v9998_v52  ;;  %v10039_v36 = vmul.f32 %v9867_v24, %v4739_v17 }
 0x666   : > { %11096 = vst [vmem:[#allocation146_spill] sm:$0xff] %v10039_v36 }
 0x670   : > { %v9940_v16 = vpop.f32.mrb[34].mxu1 }
 0x671   : > { %v9942_v13 = vpop.f32.mrb[35].mxu1  ;;  %v4066_v57 = vmul.f32 %v9940_v16, %v9940_v16  ;;  %v4015_v49 = vsel %vm1414_vm3, %v9940_v16, 0.0 }
 0x672   : > { %v4013_v28 = vsel %vm1414_vm3, %v9942_v13, 0.0  ;;  %v4065_v61 = vmul.f32 %v9942_v13, %v9942_v13 }
 0x673   : > { %v4014_v45 = vadd.f32 %v4013_v28, %v4012_v60  ;;  %v4116_v60 = vsel %vm1414_vm3, %v4066_v57, 0.0  ;;  %v9995_v57 = vmul.f32 %v9867_v24, %v4733_v9  ;;  %v4736_v28 = vsub.f32 %v9642_v11, %v9857_v35 }
 0x674   : > { %v4114_v1 = vsel %vm1414_vm3, %v4065_v61, 0.0  ;;  %v10005_v61 = vmul.f32 %v9867_v24, %v4735_v7 }
 0x675   : > { %v4115_v43 = vadd.f32 %v4114_v1, %v4113_v38  ;;  %v4016_v34 = vadd.f32 %v4015_v49, %v4014_v45  ;;  %v9978_v38 = vmul.f32 %v9867_v24, %v4730_v40  ;;  %11090 = vst [vmem:[#allocation45_spill] sm:$0xff] %v9995_v57  ;;  %v10008_v62 = vmul.f32 %v9867_v24, %v4736_v28 }
 0x676   : > { %11092 = vst [vmem:[#allocation143_spill] sm:$0xff] %v10005_v61  ;;  %v10025_v1 = vmul.f32 %v9867_v24, %v4737_v8  ;;  %v4740_v40 = vsub.f32 %v9689_v22, %v9857_v35  ;;  %v4741_v28 = vsub.f32 %v9727_v18, %v9857_v35  ;;  %v10052_v22 = vmul.f32 %v9867_v24, %v4742_v23 }
 0x677   : > { %v4117_v30 = vadd.f32 %v4116_v60, %v4115_v43  ;;  %11087 = vst [vmem:[#allocation130_spill] sm:$0xff] %v9978_v38  ;;  %11093 = vst [vmem:[#allocation101_spill] sm:$0xff] %v10008_v62  ;;  %v10028_v43 = vmul.f32 %v9867_v24, %v4738_v2  ;;  %v4744_v2 = vsub.f32 %v9745_v44, %v9857_v35 }
 0x678   : > { %11094 = vst [vmem:[#allocation48_spill] sm:$0xff] %v10025_v1  ;;  %v10049_v8 = vmul.f32 %v9867_v24, %v4741_v28  ;;  %11099 = vst [vmem:[#allocation131_spill] sm:$0xff] %v10052_v22  ;;  %v4748_v44 = vsub.f32 %v9799_v59, %v9857_v35 }
 0x679   : > { %11095 = vst [vmem:[#allocation132_spill] sm:$0xff] %v10028_v43  ;;  %v10062_v18 = vmul.f32 %v9867_v24, %v4744_v2 }
 0x67a   : > { %11098 = vst [vmem:[#allocation47_spill] sm:$0xff] %v10049_v8 }
 0x67b   : > { %11101 = vst [vmem:[#allocation103_spill] sm:$0xff] %v10062_v18 }
 0x688   : > { %v10010_v45 = vpop.f32.mrb[36].mxu1 }
 0x689   : > { %v4068_v4 = vmul.f32 %v10010_v45, %v10010_v45  ;;  %v10018_v6 = vpop.f32.mrb[37].mxu1  ;;  %v4019_v10 = vsel %vm1414_vm3, %v10010_v45, 0.0 }
 0x68a   : > { %v4017_v11 = vsel %vm1414_vm3, %v10018_v6, 0.0  ;;  %v4067_v49 = vmul.f32 %v10018_v6, %v10018_v6 }
 0x68b   : > { %v4018_v31 = vadd.f32 %v4017_v11, %v4016_v34  ;;  %v4120_v9 = vsel %vm1414_vm3, %v4068_v4, 0.0  ;;  %v10042_v34 = vmul.f32 %v9867_v24, %v4740_v40  ;;  %v4746_v11 = vsub.f32 %v9774_v51, %v9857_v35 }
 0x68c   : > { %v4118_v60 = vsel %vm1414_vm3, %v4067_v49, 0.0  ;;  %v10069_v49 = vmul.f32 %v9867_v24, %v4745_v14 }
 0x68d   : > { %v4119_v20 = vadd.f32 %v4118_v60, %v4117_v30  ;;  %v4020_v48 = vadd.f32 %v4019_v10, %v4018_v31  ;;  %11097 = vst [vmem:[#allocation100_spill] sm:$0xff] %v10042_v34  ;;  %v4743_v30 = vsub.f32 %v9754_v42, %v9857_v35  ;;  %v10072_v42 = vmul.f32 %v9867_v24, %v4746_v11 }
 0x68e   : > { %11102 = vst [vmem:[#allocation50_spill] sm:$0xff] %v10069_v49  ;;  %v10077_v31 = vmul.f32 %v9867_v24, %v4748_v44 }
 0x68f   : > { %v4121_v7 = vadd.f32 %v4120_v9, %v4119_v20  ;;  %v10059_v4 = vmul.f32 %v9867_v24, %v4743_v30  ;;  %11103 = vst [vmem:[#allocation63_spill] sm:$0xff] %v10072_v42 }
 0x690   : > { %11104 = vst [vmem:[#allocation67_spill] sm:$0xff] %v10077_v31 }
 0x691   : > { %11100 = vst [vmem:[#allocation145_spill] sm:$0xff] %v10059_v4 }
 0x6a0   : > { %v10079_v10 = vpop.f32.mrb[38].mxu1 }
 0x6a1   : > { %v10081_v60 = vpop.f32.mrb[39].mxu1  ;;  %v4070_v46 = vmul.f32 %v10079_v10, %v10079_v10  ;;  %v4023_v59 = vsel %vm1414_vm3, %v10079_v10, 0.0 }
 0x6a2   : > { %v4021_v51 = vsel %vm1414_vm3, %v10081_v60, 0.0  ;;  %v4069_v17 = vmul.f32 %v10081_v60, %v10081_v60 }
 0x6a3   : > { %v4022_v40 = vadd.f32 %v4021_v51, %v4020_v48  ;;  %v4124_v9 = vsel %vm1414_vm3, %v4070_v46, 0.0 }
 0x6a4   : > { %v4122_v35 = vsel %vm1414_vm3, %v4069_v17, 0.0 }
 0x6a5   : > { %v4123_v24 = vadd.f32 %v4122_v35, %v4121_v7  ;;  %v4024_v20 = vadd.f32 %v4023_v59, %v4022_v40 }
 0x6a7   : > { %v4125_v28 = vadd.f32 %v4124_v9, %v4123_v24 }
 0x6b8   : > { %v10093_v23 = vpop.f32.mrb[40].mxu1 }
 0x6b9   : > { %v10095_v30 = vpop.f32.mrb[41].mxu1  ;;  %v4072_v2 = vmul.f32 %v10093_v23, %v10093_v23  ;;  %v4027_v7 = vsel %vm1414_vm3, %v10093_v23, 0.0 }
 0x6ba   : > { %v4025_v48 = vsel %vm1414_vm3, %v10095_v30, 0.0  ;;  %v4071_v14 = vmul.f32 %v10095_v30, %v10095_v30 }
 0x6bb   : > { %v4026_v11 = vadd.f32 %v4025_v48, %v4024_v20  ;;  %v4128_v17 = vsel %vm1414_vm3, %v4072_v2, 0.0 }
 0x6bc   : > { %v4126_v44 = vsel %vm1414_vm3, %v4071_v14, 0.0 }
 0x6bd   : > { %v4127_v46 = vadd.f32 %v4126_v44, %v4125_v28  ;;  %v4028_v51 = vadd.f32 %v4027_v7, %v4026_v11 }
 0x6bf   : > { %v4129_v40 = vadd.f32 %v4128_v17, %v4127_v46 }
 0x6d0   : > { %v10107_v59 = vpop.f32.mrb[42].mxu1 }
 0x6d1   : > { %v10109_v35 = vpop.f32.mrb[43].mxu1  ;;  %v4074_v24 = vmul.f32 %v10107_v59, %v10107_v59  ;;  %v4031_v28 = vsel %vm1414_vm3, %v10107_v59, 0.0 }
 0x6d2   : > { %v4029_v20 = vsel %vm1414_vm3, %v10109_v35, 0.0  ;;  %v4073_v9 = vmul.f32 %v10109_v35, %v10109_v35 }
 0x6d3   : > { %v4030_v48 = vadd.f32 %v4029_v20, %v4028_v51  ;;  %v4132_v7 = vsel %vm1414_vm3, %v4074_v24, 0.0 }
 0x6d4   : > { %v4130_v2 = vsel %vm1414_vm3, %v4073_v9, 0.0 }
 0x6d5   : > { %v4131_v14 = vadd.f32 %v4130_v2, %v4129_v40  ;;  %v4032_v11 = vadd.f32 %v4031_v28, %v4030_v48 }
 0x6d7   : > { %v4133_v44 = vadd.f32 %v4132_v7, %v4131_v14 }
 0x6e8   : > { %v10121_v46 = vpop.f32.mrb[44].mxu1 }
 0x6e9   : > { %v10123_v17 = vpop.f32.mrb[45].mxu1  ;;  %v4076_v31 = vmul.f32 %v10121_v46, %v10121_v46  ;;  %v4035_v40 = vsel %vm1414_vm3, %v10121_v46, 0.0 }
 0x6ea   : > { %v4033_v51 = vsel %vm1414_vm3, %v10123_v17, 0.0  ;;  %v4075_v20 = vmul.f32 %v10123_v17, %v10123_v17 }
 0x6eb   : > { %v4034_v53 = vadd.f32 %v4033_v51, %v4032_v11  ;;  %v4136_v28 = vsel %vm1414_vm3, %v4076_v31, 0.0 }
 0x6ec   : > { %v4134_v24 = vsel %vm1414_vm3, %v4075_v20, 0.0 }
 0x6ed   : > { %v4135_v9 = vadd.f32 %v4134_v24, %v4133_v44  ;;  %v4036_v48 = vadd.f32 %v4035_v40, %v4034_v53 }
 0x6ef   : > { %v4137_v2 = vadd.f32 %v4136_v28, %v4135_v9 }
 0x6f5   : > { %v10135_v14 = vpop.f32.mrb[46].mxu1 }
 0x6f6   : > { %v10137_v7 = vpop.f32.mrb[47].mxu1  ;;  %v4078_v42 = vmul.f32 %v10135_v14, %v10135_v14  ;;  %v4039_v53 = vsel %vm1414_vm3, %v10135_v14, 0.0 }
 0x6f7   : > { %v4037_v11 = vsel %vm1414_vm3, %v10137_v7, 0.0  ;;  %v4077_v51 = vmul.f32 %v10137_v7, %v10137_v7 }
 0x6f8   : > { %v4038_v49 = vadd.f32 %v4037_v11, %v4036_v48  ;;  %v4140_v40 = vsel %vm1414_vm3, %v4078_v42, 0.0 }
 0x6f9   : > { %v4138_v31 = vsel %vm1414_vm3, %v4077_v51, 0.0 }
 0x6fa   : > { %v4040_v44 = vadd.f32 %v4039_v53, %v4038_v49  ;;  %v4139_v20 = vadd.f32 %v4138_v31, %v4137_v2  ;;  %v11109_v31 = vld [vmem:[#allocation128_spill] sm:$0xff] }
 0x6fc   : > { %v4041_v24 = vrot.slane %v4040_v44, 4  ;;  %v4141_v9 = vadd.f32 %v4140_v40, %v4139_v20 }
 0x6fe   : > { %v4042_v28 = vadd.f32 %v4041_v24, %v4040_v44  ;;  %v4142_v18 = vrot.slane %v4141_v9, 4  ;;  %v11112_v24 = vld [vmem:[#allocation142_spill] sm:$0xff] }
 0x700   : > { %v4043_v4 = vrot.slane %v4042_v28, 2  ;;  %v4143_v22 = vadd.f32 %v4142_v18, %v4141_v9 }
 0x702   : > { %v4044_v8 = vadd.f32 %v4043_v4, %v4042_v28  ;;  %v4144_v34 = vrot.slane %v4143_v22, 2  ;;  %v11105_v4 = vld [vmem:[#allocation126_spill] sm:$0xff]  ;;  %v11113_v28 = vld [vmem:[#allocation127_spill] sm:$0xff] }
 0x704   : > { %v4045_v36 = vrot.slane %v4044_v8, 1  ;;  %v4145_v43 = vadd.f32 %v4144_v34, %v4143_v22  ;;  %v11106_v34 = vld [vmem:[#allocation41_spill] sm:$0xff] }
 0x706   : > { %v4046_v48 = vadd.f32 %v4045_v36, %v4044_v8  ;;  %v4146_v11 = vrot.slane %v4145_v43, 1 }
 0x708   : > { %v4147_v1 = vadd.f32 %v4146_v11, %v4145_v43  ;;  %v10149_v62 = vmul.f32 0.00390625, %v4046_v48  ;;  %v11107_v43 = vld [vmem:[#allocation97_spill] sm:$0xff]  ;;  %v11114_v11 = vld [vmem:[#allocation43_spill] sm:$0xff] }
 0x70a   : > { %v4149_v51 = vmul.f32 0.00390625, %v4147_v1  ;;  %v4150_v49 = vmul.f32 %v10149_v62, %v10149_v62  ;;  %v4152_v42 = vsub.f32 %v9296_v33, %v10149_v62  ;;  %v4153_v2 = vsub.f32 %v9287_v15, %v10149_v62  ;;  %v11108_v1 = vld [vmem:[#allocation140_spill] sm:$0xff] }
 0x70b   : > { %v4154_v18 = vsub.f32 %v11105_v4, %v10149_v62  ;;  %v4155_v36 = vsub.f32 %v11106_v34, %v10149_v62  ;;  %v4156_v8 = vsub.f32 %v11107_v43, %v10149_v62  ;;  %v4157_v22 = vsub.f32 %v11108_v1, %v10149_v62  ;;  %v11110_v33 = vld [vmem:[#allocation44_spill] sm:$0xff] }
 0x70c   : > { %v4151_v53 = vsub.f32 %v4149_v51, %v4150_v49  ;;  %v4158_v44 = vsub.f32 %v11109_v31, %v10149_v62  ;;  %v4159_v20 = vsub.f32 %v11110_v33, %v10149_v62  ;;  %v11111_v15 = vld [vmem:[#allocation96_spill] sm:$0xff]  ;;  %v4161_v9 = vsub.f32 %v11112_v24, %v10149_v62 }
 0x70d   : > { %v4160_v40 = vsub.f32 %v11111_v15, %v10149_v62  ;;  %v4162_v48 = vsub.f32 %v11113_v28, %v10149_v62  ;;  %v4163_v4 = vsub.f32 %v11114_v11, %v10149_v62  ;;  %v4164_v51 = vsub.f32 %v9845_v55, %v10149_v62 }
 0x70e   : > { %v4165_v49 = vsub.f32 %v9841_v19, %v10149_v62  ;;  %v4166_v34 = vsub.f32 %v9865_v58, %v10149_v62  ;;  %v4167_v43 = vsub.f32 %v9863_v3, %v10149_v62  ;;  %v4168_v1 = vsub.f32 %v9884_v12, %v10149_v62 }
 0x70f   : > { %v4169_v31 = vsub.f32 %v9882_v25, %v10149_v62  ;;  %v4170_v33 = vsub.f32 %v9942_v13, %v10149_v62  ;;  %v4171_v55 = vsub.f32 %v9940_v16, %v10149_v62  ;;  %v4172_v19 = vsub.f32 %v10018_v6, %v10149_v62 }
 0x710   : > { %v4173_v58 = vsub.f32 %v10010_v45, %v10149_v62  ;;  %v4174_v3 = vsub.f32 %v10081_v60, %v10149_v62  ;;  %v4175_v12 = vsub.f32 %v10079_v10, %v10149_v62  ;;  %v4176_v25 = vsub.f32 %v10095_v30, %v10149_v62 }
 0x711   : > { %v4177_v13 = vsub.f32 %v10093_v23, %v10149_v62  ;;  %v4178_v16 = vsub.f32 %v10109_v35, %v10149_v62  ;;  %v4179_v6 = vsub.f32 %v10107_v59, %v10149_v62  ;;  %v4180_v45 = vsub.f32 %v10123_v17, %v10149_v62 }
 0x712   : > { %v4181_v60 = vsub.f32 %v10121_v46, %v10149_v62  ;;  %v4182_v10 = vsub.f32 %v10137_v7, %v10149_v62  ;;  %v4183_v30 = vsub.f32 %v10135_v14, %v10149_v62  ;;  %v4184_v15 = vadd.f32 1e-05, %v4151_v53 }
 0x714   : > { %5385 = vrsqrt.f32 %v4184_v15 }
 0x71e   : > { %v5386_v23 = vpop.eup %5385 }
 0x71f   : > { %v4186_v24 = vmul.f32 %v5386_v23, %v4152_v42  ;;  %v4187_v35 = vmul.f32 %v5386_v23, %v4153_v2  ;;  %v4188_v28 = vmul.f32 %v5386_v23, %v4154_v18  ;;  %v4189_v11 = vmul.f32 %v5386_v23, %v4155_v36 }
 0x720   : > { %v4190_v59 = vmul.f32 %v5386_v23, %v4156_v8  ;;  %v4191_v61 = vmul.f32 %v5386_v23, %v4157_v22  ;;  %v4192_v52 = vmul.f32 %v5386_v23, %v4158_v44  ;;  %v4193_v17 = vmul.f32 %v5386_v23, %v4159_v20 }
 0x721   : > { %v4194_v57 = vmul.f32 %v5386_v23, %v4160_v40  ;;  %v4195_v56 = vmul.f32 %v5386_v23, %v4161_v9  ;;  %v4196_v46 = vmul.f32 %v5386_v23, %v4162_v48  ;;  %v4197_v32 = vmul.f32 %v5386_v23, %v4163_v4 }
 0x722   : > { %v4198_v38 = vmul.f32 %v5386_v23, %v4164_v51  ;;  %v4199_v7 = vmul.f32 %v5386_v23, %v4165_v49  ;;  %v4200_v47 = vmul.f32 %v5386_v23, %v4166_v34  ;;  %v4201_v39 = vmul.f32 %v5386_v23, %v4167_v43 }
 0x723   : > { %v4202_v62 = vmul.f32 %v5386_v23, %v4168_v1  ;;  %v4203_v14 = vmul.f32 %v5386_v23, %v4169_v31  ;;  %v4204_v53 = vmul.f32 %v5386_v23, %v4170_v33  ;;  %v4205_v15 = vmul.f32 %v5386_v23, %v4171_v55 }
 0x724   : > { %v4206_v42 = vmul.f32 %v5386_v23, %v4172_v19  ;;  %v4207_v2 = vmul.f32 %v5386_v23, %v4173_v58  ;;  %v4208_v18 = vmul.f32 %v5386_v23, %v4174_v3  ;;  %v4209_v36 = vmul.f32 %v5386_v23, %v4175_v12  ;;  %v11115_v3 = vld [vmem:[#allocation99_spill] sm:$0xff]  ;;  %v11116_v12 = vld [vmem:[#allocation46_spill] sm:$0xff] }
 0x725   : > { %v4210_v8 = vmul.f32 %v5386_v23, %v4176_v25  ;;  %v4211_v22 = vmul.f32 %v5386_v23, %v4177_v13  ;;  %v4212_v44 = vmul.f32 %v5386_v23, %v4178_v16  ;;  %v4213_v20 = vmul.f32 %v5386_v23, %v4179_v6  ;;  %v11117_v25 = vld [vmem:[#allocation130_spill] sm:$0xff] }
 0x726   : > { %v4214_v40 = vmul.f32 %v5386_v23, %v4180_v45  ;;  %v4215_v9 = vmul.f32 %v5386_v23, %v4181_v60  ;;  %v4216_v48 = vmul.f32 %v5386_v23, %v4182_v10  ;;  %v4217_v4 = vmul.f32 %v5386_v23, %v4183_v30  ;;  %v11126_v45 = vld [vmem:[#allocation146_spill] sm:$0xff]  ;;  %v11129_v23 = vld [vmem:[#allocation131_spill] sm:$0xff] }
 0x727   : > { %v4783_v51 = vadd.f32 %v9901_v27, %v4186_v24  ;;  %v4784_v49 = vadd.f32 %v9904_v26, %v4187_v35  ;;  %v4785_v34 = vadd.f32 %v9911_v50, %v4188_v28  ;;  %v4786_v43 = vadd.f32 %v9914_v0, %v4189_v11  ;;  %v11130_v35 = vld [vmem:[#allocation145_spill] sm:$0xff]  ;;  %v11131_v11 = vld [vmem:[#allocation103_spill] sm:$0xff] }
 0x728   : > { %v4787_v1 = vadd.f32 %v9921_v5, %v4190_v59  ;;  %v4788_v31 = vadd.f32 %v9924_v29, %v4191_v61  ;;  %v4789_v33 = vadd.f32 %v9931_v21, %v4192_v52  ;;  %v4790_v55 = vadd.f32 %v9934_v63, %v4193_v17  ;;  %v11118_v5 = vld [vmem:[#allocation144_spill] sm:$0xff]  ;;  %v11119_v29 = vld [vmem:[#allocation98_spill] sm:$0xff]  ;;  %v11120_v21 = vld [vmem:[#allocation45_spill] sm:$0xff] }
 0x729   : > { %v4791_v19 = vadd.f32 %v9945_v54, %v4194_v57  ;;  %v4792_v58 = vadd.f32 %v9948_v37, %v4195_v56  ;;  %v4793_v27 = vadd.f32 %v9964_v41, %v4196_v46  ;;  %v4794_v26 = vadd.f32 %v11115_v3, %v4197_v32  ;;  %v11121_v63 = vld [vmem:[#allocation129_spill] sm:$0xff]  ;;  %v11122_v54 = vld [vmem:[#allocation143_spill] sm:$0xff]  ;;  %v11124_v41 = vld [vmem:[#allocation48_spill] sm:$0xff] }
 0x72a   : > { %v4795_v50 = vadd.f32 %v11116_v12, %v4198_v38  ;;  %v4796_v0 = vadd.f32 %v11117_v25, %v4199_v7  ;;  %v4797_v13 = vadd.f32 %v11118_v5, %v4200_v47  ;;  %v4798_v61 = vadd.f32 %v11119_v29, %v4201_v39  ;;  %v11123_v37 = vld [vmem:[#allocation101_spill] sm:$0xff]  ;;  %v11125_v32 = vld [vmem:[#allocation132_spill] sm:$0xff]  ;;  %v11128_v39 = vld [vmem:[#allocation47_spill] sm:$0xff] }
 0x72b   : > { %v4799_v52 = vadd.f32 %v11120_v21, %v4202_v62  ;;  %v4800_v16 = vadd.f32 %v11121_v63, %v4203_v14  ;;  %v4801_v57 = vadd.f32 %v11122_v54, %v4204_v53  ;;  %v4802_v56 = vadd.f32 %v11123_v37, %v4205_v15  ;;  %v11127_v47 = vld [vmem:[#allocation100_spill] sm:$0xff]  ;;  %v11132_v17 = vld [vmem:[#allocation50_spill] sm:$0xff]  ;;  %v11133_v7 = vld [vmem:[#allocation63_spill] sm:$0xff] }
 0x72c   : > { %v10238_v6 = vadd.f32 %v11124_v41, %v4206_v42  ;;  %v10241_v38 = vadd.f32 %v11125_v32, %v4207_v2  ;;  %v10244_v60 = vadd.f32 %v11126_v45, %v4208_v18  ;;  %v10247_v10 = vadd.f32 %v11127_v47, %v4209_v36  ;;  %v11134_v14 = vld [vmem:[#allocation141_spill] sm:$0xff]  ;;  %v11135_v15 = vld [vmem:[#allocation67_spill] sm:$0xff] }
 0x72d   : > { %v10250_v30 = vadd.f32 %v11128_v39, %v4210_v8  ;;  %v10253_v24 = vadd.f32 %v11129_v23, %v4211_v22  ;;  %v10256_v28 = vadd.f32 %v11130_v35, %v4212_v44  ;;  %v10259_v59 = vadd.f32 %v11131_v11, %v4213_v20 }
 0x72e   : > { %v10269_v46 = vadd.f32 %v11132_v17, %v4214_v40  ;;  %v10272_v62 = vadd.f32 %v11133_v7, %v4215_v9  ;;  %v10275_v53 = vadd.f32 %v11134_v14, %v4216_v48  ;;  %v10278_v42 = vadd.f32 %v11135_v15, %v4217_v4 }
 0x72f   : > { %v4815_v2 = vmax.f32 %v4783_v51, 0.0  ;;  %v4816_v18 = vmax.f32 %v4784_v49, 0.0  ;;  %v4817_v36 = vmax.f32 %v4785_v34, 0.0  ;;  %v4818_v8 = vmax.f32 %v4786_v43, 0.0 }
 0x730   : > { %v4819_v22 = vmax.f32 %v4787_v1, 0.0  ;;  %v4820_v44 = vmax.f32 %v4788_v31, 0.0  ;;  %v4821_v20 = vmax.f32 %v4789_v33, 0.0  ;;  %v4822_v40 = vmax.f32 %v4790_v55, 0.0 }
 0x731   : > { %v4823_v9 = vmax.f32 %v4791_v19, 0.0  ;;  %v4824_v48 = vmax.f32 %v4792_v58, 0.0  ;;  %v4825_v3 = vmax.f32 %v4793_v27, 0.0  ;;  %v4826_v12 = vmax.f32 %v4794_v26, 0.0  ;;  %4847 = vst.msk [vmem:[%s10266_s20] sm:$0xff] %vm1414_vm3, %v4815_v2  ;;  %4848 = vst.msk [vmem:[%s10266_s20 + $0x8] sm:$0xff] %vm1414_vm3, %v4816_v18 }
 0x732   : > { %4849 = vst.msk [vmem:[%s10266_s20 + $0x10] sm:$0xff] %vm1414_vm3, %v4817_v36  ;;  %4850 = vst.msk [vmem:[%s10266_s20 + $0x18] sm:$0xff] %vm1414_vm3, %v4818_v8  ;;  %v4827_v4 = vmax.f32 %v4795_v50, 0.0  ;;  %v4828_v51 = vmax.f32 %v4796_v0, 0.0  ;;  %v4829_v49 = vmax.f32 %v4797_v13, 0.0  ;;  %v4830_v34 = vmax.f32 %v4798_v61, 0.0 }
 0x733   : > { %4851 = vst.msk [vmem:[%s10266_s20 + $0x20] sm:$0xff] %vm1414_vm3, %v4819_v22  ;;  %4852 = vst.msk [vmem:[%s10266_s20 + $0x28] sm:$0xff] %vm1414_vm3, %v4820_v44  ;;  %v4831_v43 = vmax.f32 %v4799_v52, 0.0  ;;  %v4832_v1 = vmax.f32 %v4800_v16, 0.0  ;;  %v4833_v31 = vmax.f32 %v4801_v57, 0.0  ;;  %v4834_v33 = vmax.f32 %v4802_v56, 0.0 }
 0x734   : > { %4853 = vst.msk [vmem:[%s10266_s20 + $0x30] sm:$0xff] %vm1414_vm3, %v4821_v20  ;;  %4854 = vst.msk [vmem:[%s10266_s20 + $0x38] sm:$0xff] %vm1414_vm3, %v4822_v40  ;;  %v4835_v55 = vmax.f32 %v10238_v6, 0.0  ;;  %v4836_v19 = vmax.f32 %v10241_v38, 0.0  ;;  %v4837_v58 = vmax.f32 %v10244_v60, 0.0  ;;  %v4838_v27 = vmax.f32 %v10247_v10, 0.0 }
 0x735   : > { %4855 = vst.msk [vmem:[%s10266_s20 + $0x40] sm:$0xff] %vm1414_vm3, %v4823_v9  ;;  %4856 = vst.msk [vmem:[%s10266_s20 + $0x48] sm:$0xff] %vm1414_vm3, %v4824_v48  ;;  %v4839_v26 = vmax.f32 %v10250_v30, 0.0  ;;  %v4840_v50 = vmax.f32 %v10253_v24, 0.0  ;;  %v4841_v25 = vmax.f32 %v10256_v28, 0.0  ;;  %v4842_v0 = vmax.f32 %v10259_v59, 0.0 }
 0x736   : > { %4857 = vst.msk [vmem:[%s10266_s20 + $0x50] sm:$0xff] %vm1414_vm3, %v4825_v3  ;;  %4858 = vst.msk [vmem:[%s10266_s20 + $0x58] sm:$0xff] %vm1414_vm3, %v4826_v12  ;;  %v4843_v5 = vmax.f32 %v10269_v46, 0.0  ;;  %v4844_v13 = vmax.f32 %v10272_v62, 0.0  ;;  %v4845_v29 = vmax.f32 %v10275_v53, 0.0  ;;  %v4846_v61 = vmax.f32 %v10278_v42, 0.0 }
 0x737   : > { %4859 = vst.msk [vmem:[%s10266_s20 + $0x60] sm:$0xff] %vm1414_vm3, %v4827_v4  ;;  %4860 = vst.msk [vmem:[%s10266_s20 + $0x68] sm:$0xff] %vm1414_vm3, %v4828_v51 }
 0x738   : > { %4861 = vst.msk [vmem:[%s10266_s20 + $0x70] sm:$0xff] %vm1414_vm3, %v4829_v49  ;;  %4862 = vst.msk [vmem:[%s10266_s20 + $0x78] sm:$0xff] %vm1414_vm3, %v4830_v34 }
 0x739   : > { %4863 = vst.msk [vmem:[%s10266_s20 + $0x80] sm:$0xff] %vm1414_vm3, %v4831_v43  ;;  %4864 = vst.msk [vmem:[%s10266_s20 + $0x88] sm:$0xff] %vm1414_vm3, %v4832_v1 }
 0x73a   : > { %4865 = vst.msk [vmem:[%s10266_s20 + $0x90] sm:$0xff] %vm1414_vm3, %v4833_v31  ;;  %4866 = vst.msk [vmem:[%s10266_s20 + $0x98] sm:$0xff] %vm1414_vm3, %v4834_v33 }
 0x73b   : > { %4867 = vst.msk [vmem:[%s10266_s20 + $0xa0] sm:$0xff] %vm1414_vm3, %v4835_v55  ;;  %4868 = vst.msk [vmem:[%s10266_s20 + $0xa8] sm:$0xff] %vm1414_vm3, %v4836_v19 }
 0x73c   : > { %4869 = vst.msk [vmem:[%s10266_s20 + $0xb0] sm:$0xff] %vm1414_vm3, %v4837_v58  ;;  %4870 = vst.msk [vmem:[%s10266_s20 + $0xb8] sm:$0xff] %vm1414_vm3, %v4838_v27 }
 0x73d   : > { %4871 = vst.msk [vmem:[%s10266_s20 + $0xc0] sm:$0xff] %vm1414_vm3, %v4839_v26  ;;  %4872 = vst.msk [vmem:[%s10266_s20 + $0xc8] sm:$0xff] %vm1414_vm3, %v4840_v50 }
 0x73e   : > { %4873 = vst.msk [vmem:[%s10266_s20 + $0xd0] sm:$0xff] %vm1414_vm3, %v4841_v25  ;;  %4874 = vst.msk [vmem:[%s10266_s20 + $0xd8] sm:$0xff] %vm1414_vm3, %v4842_v0 }
 0x73f   : > { %4875 = vst.msk [vmem:[%s10266_s20 + $0xe0] sm:$0xff] %vm1414_vm3, %v4843_v5  ;;  %4876 = vst.msk [vmem:[%s10266_s20 + $0xe8] sm:$0xff] %vm1414_vm3, %v4844_v13 }
 0x740   : > { %4877 = vst.msk [vmem:[%s10266_s20 + $0xf0] sm:$0xff] %vm1414_vm3, %v4845_v29  ;;  %4878 = vst.msk [vmem:[%s10266_s20 + $0xf8] sm:$0xff] %vm1414_vm3, %v4846_v61 }
 0x741 PF: > { %s14_s15 = sadd.s32 1, %s5454_s15  }
 0x742   : > { %p11_p4 = scmp.ge.s32.totalorder %s14_s15, 4  }
 0x744   :  { %13 = sbr.rel (!%p11_p4) target bundleno = 1 (0x1), region = 68 }

</bundles_post_ra>
